<compile_context>
chip_gen: v7x
topology: tpu7x:2x2x1
jax: 0.10.0
libtpu: 0.0.40
codegen_flags: <defaults>
</compile_context>

<pallas_src>
import functools

import jax
import jax.numpy as jnp
from jax.experimental import pallas as pl
from jax.experimental.pallas import tpu as pltpu

CP = 128  # lane-dense channel padding (all channel dims padded to 128 lanes)


# ---------------------------------------------------------------------------
# Fused kernel: one batch element per grid step
# ---------------------------------------------------------------------------
def _residual_block_kernel(x_ref, w1_ref, w1c_ref, b1_ref, w2_ref, b2_ref,
                           bs_ref, o_ref, pad_ref, *,
                           K, dilation, H, W, shortcut_is_conv):
    """Fused ResidualBlock forward for one image.

    x_ref:   (1, Hp, Wp, CP) bf16  spatially padded, channel-padded input
    w1_ref:  (K*K*CP, CP)    bf16  conv1 weights, rows = (kh, kw, cin)
    w1c_ref: (CP, 2*CP)      bf16  [w1_center | ws]  (shortcut fused; unused
                                   second half if identity shortcut)
    b1_ref:  (1, CP)         f32
    w2_ref:  (K*K*CP, CP)    bf16  conv2 weights
    b2_ref:  (1, CP)         f32
    bs_ref:  (1, CP)         f32   shortcut bias (zeros if identity)
    o_ref:   (1, H, W, CP)   bf16  output (extra channels are exactly zero)
    pad_ref: (Hp, Wp, CP)    bf16  VMEM scratch: conv1 output with zero halo
    """
    d = dilation
    pad = (K // 2) * d
    HW = H * W
    ctr = (K // 2) * K + (K // 2)          # center tap index
    Hp_, Wp_ = pad_ref.shape[0], pad_ref.shape[1]

    # ---- conv1 (K*K accumulated matmuls) + fused 1x1 shortcut --------------
    y1 = None
    s = None
    for kh in range(K):
        for kw in range(K):
            tap = kh * K + kw
            win = x_ref[0, kh * d:kh * d + H, kw * d:kw * d + W, :]
            win = win.reshape(HW, CP)                        # bf16 (HW, 128)
            if shortcut_is_conv and tap == ctr:
                both = jnp.dot(win, w1c_ref[...],
                               preferred_element_type=jnp.float32)  # (HW, 256)
                contrib = both[:, :CP]
                s = both[:, CP:] + bs_ref[...]
            else:
                contrib = jnp.dot(win, w1_ref[tap * CP:(tap + 1) * CP, :],
                                  preferred_element_type=jnp.float32)
                if (not shortcut_is_conv) and tap == ctr:
                    s = win.astype(jnp.float32)              # identity shortcut
            y1 = contrib if y1 is None else y1 + contrib

    y1 = y1 + b1_ref[...]
    y1 = y1 * jax.nn.sigmoid(y1)                             # SiLU, f32

    # ---- stage conv1 output with a zero halo for conv2 taps ---------------
    if pad > 0:
        zrow = jnp.zeros((pad, Wp_, CP), pad_ref.dtype)
        zcol = jnp.zeros((H, pad, CP), pad_ref.dtype)
        pad_ref[0:pad, :, :] = zrow                          # top ring
        pad_ref[pad + H:Hp_, :, :] = zrow                    # bottom ring
        pad_ref[pad:pad + H, 0:pad, :] = zcol                # left ring
        pad_ref[pad:pad + H, pad + W:Wp_, :] = zcol          # right ring
    pad_ref[pad:pad + H, pad:pad + W, :] = (
        y1.reshape(H, W, CP).astype(pad_ref.dtype))

    # ---- conv2 (K*K accumulated matmuls on the VMEM-resident slab) ---------
    y2 = None
    for kh in range(K):
        for kw in range(K):
            tap = kh * K + kw
            win = pad_ref[kh * d:kh * d + H, kw * d:kw * d + W, :]
            win = win.reshape(HW, CP)
            contrib = jnp.dot(win, w2_ref[tap * CP:(tap + 1) * CP, :],
                              preferred_element_type=jnp.float32)
            y2 = contrib if y2 is None else y2 + contrib

    y2 = y2 + b2_ref[...]
    y2 = y2 * jax.nn.sigmoid(y2)                             # SiLU, f32

    # ---- residual add + store ----------------------------------------------
    o_ref[0] = (y2 + s).reshape(H, W, CP).astype(o_ref.dtype)


# ---------------------------------------------------------------------------
# Wrapper: layout prep + single pallas_call
# ---------------------------------------------------------------------------
def _im2col_weights(w_hwio):
    k, _, cin, cout = w_hwio.shape
    wp = jnp.pad(w_hwio, ((0, 0), (0, 0), (0, CP - cin), (0, CP - cout)))
    return wp.reshape(k * k * CP, CP).astype(jnp.bfloat16)


def _pad_bias(b):
    return jnp.pad(b, (0, CP - b.shape[0])).reshape(1, CP).astype(jnp.float32)


def residual_block_forward(params, x_nchw):
    x = jnp.transpose(x_nchw, (0, 2, 3, 1))                  # NHWC
    N, H, W, Cin = x.shape
    K = params["k"]
    d = params["dilation"]
    Cout = params["w1"].shape[-1]
    assert K % 2 == 1, "fused same-padding path supports odd kernel_size only"
    assert Cin <= CP and Cout <= CP
    pad = (K // 2) * d
    Hp, Wp = H + 2 * pad, W + 2 * pad
    ctr = K // 2

    # Pad once (spatial halo for the whole fused block + channels -> 128
    # lanes) and ship to the kernel as bf16 (MXU operand dtype).
    xp = jnp.pad(x, ((0, 0), (pad, pad), (pad, pad),
                     (0, CP - Cin))).astype(jnp.bfloat16)

    w1 = _im2col_weights(params["w1"])
    b1 = _pad_bias(params["b1"])
    w2 = _im2col_weights(params["w2"])
    b2 = _pad_bias(params["b2"])

    shortcut_is_conv = "ws" in params
    w1_ctr = jnp.pad(params["w1"][ctr, ctr],
                     ((0, CP - Cin), (0, CP - Cout)))
    if shortcut_is_conv:
        ws2d = params["ws"][0, 0]                            # (Cin, Cout)
        ws_p = jnp.pad(ws2d, ((0, CP - Cin), (0, CP - Cout)))
        bs = _pad_bias(params["bs"])
    else:
        ws_p = jnp.zeros((CP, CP), jnp.float32)
        bs = jnp.zeros((1, CP), jnp.float32)
    w1c = jnp.concatenate([w1_ctr, ws_p], axis=1).astype(jnp.bfloat16)

    kernel = functools.partial(
        _residual_block_kernel, K=K, dilation=d, H=H, W=W,
        shortcut_is_conv=shortcut_is_conv)

    # VMEM budget (explicit, so an oversized shape fails at compile time).
    vmem_need = (
        2 * Hp * Wp * CP * 2                                  # in block x2 buf
        + 2 * (w1.size + w1c.size + w2.size) * 2              # bf16 weights x2
        + 2 * (b1.size + b2.size + bs.size) * 4               # f32 biases x2
        + 2 * H * W * CP * 2                                  # out block x2 buf
        + Hp * Wp * CP * 2                                    # pad_ref scratch
        + 4 * H * W * CP * 4)                                 # f32 accumulators
    vmem_budget = int(min(max(2 * vmem_need, 8 << 20), 64 << 20))

    flops = int(N * (2 * 2 * H * W * K * K * CP * CP
                     + (2 * H * W * CP * CP if shortcut_is_conv else 0)))
    bytes_accessed = int(xp.size * 2
                         + (w1.size + w1c.size + w2.size) * 2
                         + (b1.size + b2.size + bs.size) * 4
                         + N * H * W * CP * 2)
    cost = pl.CostEstimate(flops=flops,
                           transcendentals=int(2 * N * H * W * CP),
                           bytes_accessed=bytes_accessed)

    out = pl.pallas_call(
        kernel,
        out_shape=jax.ShapeDtypeStruct((N, H, W, CP), jnp.bfloat16),
        grid_spec=pltpu.PrefetchScalarGridSpec(
            num_scalar_prefetch=0,
            grid=(N,),
            in_specs=[
                pl.BlockSpec((1, Hp, Wp, CP), lambda n: (n, 0, 0, 0)),
                pl.BlockSpec((K * K * CP, CP), lambda n: (0, 0)),
                pl.BlockSpec((CP, 2 * CP), lambda n: (0, 0)),
                pl.BlockSpec((1, CP), lambda n: (0, 0)),
                pl.BlockSpec((K * K * CP, CP), lambda n: (0, 0)),
                pl.BlockSpec((1, CP), lambda n: (0, 0)),
                pl.BlockSpec((1, CP), lambda n: (0, 0)),
            ],
            out_specs=pl.BlockSpec((1, H, W, CP), lambda n: (n, 0, 0, 0)),
            scratch_shapes=[
                pltpu.VMEM((Hp, Wp, CP), jnp.bfloat16),   # conv1 out + halo
            ],
        ),
        compiler_params=pltpu.CompilerParams(
            dimension_semantics=("parallel",),
            vmem_limit_bytes=vmem_budget),
        cost_estimate=cost,
    )(xp, w1, w1c, b1, w2, b2, bs)

    out = out[..., :Cout]                                     # drop channel pad
    return jnp.transpose(out, (0, 3, 1, 2)).astype(jnp.float32)  # back to NCHW


# ---------------------------------------------------------------------------
# Parameter construction (deterministic synthetic, matches nn.Module shapes)
# ---------------------------------------------------------------------------
def _init_conv(key, k, cin, cout):
    kw_key, kb_key = jax.random.split(key)
    scale = 1.0 / jnp.sqrt(jnp.float32(cin * k * k))
    w = jax.random.uniform(kw_key, (k, k, cin, cout), jnp.float32,
                           minval=-scale, maxval=scale)
    b = jax.random.uniform(kb_key, (cout,), jnp.float32,
                           minval=-scale, maxval=scale)
    return w, b


def init_residual_params(key, in_ch, out_ch, kernel_size, dilation=1):
    keys = jax.random.split(key, 3)
    w1, b1 = _init_conv(keys[0], kernel_size, in_ch, out_ch)
    w2, b2 = _init_conv(keys[1], kernel_size, out_ch, out_ch)
    params = {"k": kernel_size, "dilation": dilation,
              "w1": w1, "b1": b1, "w2": w2, "b2": b2}
    if in_ch != out_ch:
        ws, bs = _init_conv(keys[2], 1, in_ch, out_ch)
        params["ws"], params["bs"] = ws, bs
    return params


# ---------------------------------------------------------------------------
# Pure-JAX reference (for correctness check)
# ---------------------------------------------------------------------------
def residual_block_reference(params, x_nchw):
    x = jnp.transpose(x_nchw, (0, 2, 3, 1)).astype(jnp.float32)
    d = params["dilation"]
    dn = ("NHWC", "HWIO", "NHWC")

    def conv(inp, w, b, dil):
        y = jax.lax.conv_general_dilated(
            inp, w, window_strides=(1, 1), padding="SAME",
            rhs_dilation=(dil, dil), dimension_numbers=dn)
        return y + b[None, None, None, :]

    y = conv(x, params["w1"], params["b1"], d)
    y = y * jax.nn.sigmoid(y)
    y = conv(y, params["w2"], params["b2"], d)
    y = y * jax.nn.sigmoid(y)
    s = conv(x, params["ws"], params["bs"], 1) if "ws" in params else x
    return jnp.transpose(y + s, (0, 3, 1, 2))


if __name__ == "__main__":
    key = jax.random.PRNGKey(0)
    k_x, k_p = jax.random.split(key)

    # Small shapes consistent with the module: N=2, Cin=4, Cout=8, H=W=16, K=3.
    N, in_ch, out_ch, H, W = 2, 4, 8, 16, 16
    kernel_size, dilation = 3, 1

    x = jax.random.normal(k_x, (N, in_ch, H, W), jnp.float32)
    params = init_residual_params(k_p, in_ch, out_ch, kernel_size, dilation)

    y = residual_block_forward(params, x)
    jax.block_until_ready(y)
    assert y.shape == (N, out_ch, H, W), y.shape

    # Correctness vs pure-JAX reference (loose tol: bf16 MXU operands + bf16 I/O).
    y_ref = residual_block_reference(params, x)
    err = float(jnp.max(jnp.abs(y - y_ref)))
    assert err < 5e-2, f"max abs err = {err}"

    print("KERNEL_OK")
</pallas_src>

<mosaic_0001>
module attributes {stable_mosaic.version = 11 : i64} {
  func.func @_residual_block_kernel(%arg0: i32, %arg1: memref<1x18x18x128xbf16, #tpu.memory_space<vmem>>, %arg2: memref<1152x128xbf16, #tpu.memory_space<vmem>>, %arg3: memref<128x256xbf16, #tpu.memory_space<vmem>>, %arg4: memref<1x128xf32, #tpu.memory_space<vmem>>, %arg5: memref<1152x128xbf16, #tpu.memory_space<vmem>>, %arg6: memref<1x128xf32, #tpu.memory_space<vmem>>, %arg7: memref<1x128xf32, #tpu.memory_space<vmem>>, %arg8: memref<1x16x16x128xbf16, #tpu.memory_space<vmem>>, %arg9: memref<18x18x128xbf16, #tpu.memory_space<vmem>>) attributes {dimension_semantics = [#tpu.dimension_semantics<parallel>], iteration_bounds = array<i64: 2>, scalar_prefetch = 0 : i64, scratch_operands = 1 : i64, tpu.core_type = #tpu.core_type<tc>, window_params = [{transform_indices = @transform_0, window_bounds = array<i64: 1, 18, 18, 128>}, {pipeline_mode = #tpu.pipeline_mode<synchronous>, transform_indices = @transform_1, window_bounds = array<i64: 1152, 128>}, {pipeline_mode = #tpu.pipeline_mode<synchronous>, transform_indices = @transform_2, window_bounds = array<i64: 128, 256>}, {pipeline_mode = #tpu.pipeline_mode<synchronous>, transform_indices = @transform_3, window_bounds = array<i64: 1, 128>}, {pipeline_mode = #tpu.pipeline_mode<synchronous>, transform_indices = @transform_4, window_bounds = array<i64: 1152, 128>}, {pipeline_mode = #tpu.pipeline_mode<synchronous>, transform_indices = @transform_5, window_bounds = array<i64: 1, 128>}, {pipeline_mode = #tpu.pipeline_mode<synchronous>, transform_indices = @transform_6, window_bounds = array<i64: 1, 128>}, {transform_indices = @transform_7, window_bounds = array<i64: 1, 16, 16, 128>}]} {
    %c0 = arith.constant 0 : index
    %c0_0 = arith.constant 0 : index
    %c0_1 = arith.constant 0 : index
    %c0_2 = arith.constant 0 : index
    %0 = vector.load %arg1[%c0, %c0_0, %c0_1, %c0_2] : memref<1x18x18x128xbf16, #tpu.memory_space<vmem>>, vector<1x16x16x128xbf16>
    %1 = vector.shape_cast %0 : vector<1x16x16x128xbf16> to vector<16x16x128xbf16>
    %2 = vector.shape_cast %1 : vector<16x16x128xbf16> to vector<256x128xbf16>
    %c0_3 = arith.constant 0 : index
    %c0_4 = arith.constant 0 : index
    %3 = vector.load %arg2[%c0_3, %c0_4] : memref<1152x128xbf16, #tpu.memory_space<vmem>>, vector<128x128xbf16>
    %cst = arith.constant dense<0.000000e+00> : vector<256x128xf32>
    %4 = tpu.matmul %2, %3, %cst {dimension_numbers = #tpu.dot_dimension_numbers<[1], [0], [0], [1], [0, 0, 1, 1], [], []>} : vector<256x128xbf16>, vector<128x128xbf16>, vector<256x128xf32> -> vector<256x128xf32>
    %c0_5 = arith.constant 0 : index
    %c0_6 = arith.constant 0 : index
    %c1 = arith.constant 1 : index
    %c0_7 = arith.constant 0 : index
    %5 = vector.load %arg1[%c0_5, %c0_6, %c1, %c0_7] : memref<1x18x18x128xbf16, #tpu.memory_space<vmem>>, vector<1x16x16x128xbf16>
    %6 = vector.shape_cast %5 : vector<1x16x16x128xbf16> to vector<16x16x128xbf16>
    %7 = vector.shape_cast %6 : vector<16x16x128xbf16> to vector<256x128xbf16>
    %c128 = arith.constant 128 : index
    %c0_8 = arith.constant 0 : index
    %8 = vector.load %arg2[%c128, %c0_8] : memref<1152x128xbf16, #tpu.memory_space<vmem>>, vector<128x128xbf16>
    %cst_9 = arith.constant dense<0.000000e+00> : vector<256x128xf32>
    %9 = tpu.matmul %7, %8, %cst_9 {dimension_numbers = #tpu.dot_dimension_numbers<[1], [0], [0], [1], [0, 0, 1, 1], [], []>} : vector<256x128xbf16>, vector<128x128xbf16>, vector<256x128xf32> -> vector<256x128xf32>
    %10 = arith.addf %4, %9 : vector<256x128xf32>
    %c0_10 = arith.constant 0 : index
    %c0_11 = arith.constant 0 : index
    %c2 = arith.constant 2 : index
    %c0_12 = arith.constant 0 : index
    %11 = vector.load %arg1[%c0_10, %c0_11, %c2, %c0_12] : memref<1x18x18x128xbf16, #tpu.memory_space<vmem>>, vector<1x16x16x128xbf16>
    %12 = vector.shape_cast %11 : vector<1x16x16x128xbf16> to vector<16x16x128xbf16>
    %13 = vector.shape_cast %12 : vector<16x16x128xbf16> to vector<256x128xbf16>
    %c256 = arith.constant 256 : index
    %c0_13 = arith.constant 0 : index
    %14 = vector.load %arg2[%c256, %c0_13] : memref<1152x128xbf16, #tpu.memory_space<vmem>>, vector<128x128xbf16>
    %cst_14 = arith.constant dense<0.000000e+00> : vector<256x128xf32>
    %15 = tpu.matmul %13, %14, %cst_14 {dimension_numbers = #tpu.dot_dimension_numbers<[1], [0], [0], [1], [0, 0, 1, 1], [], []>} : vector<256x128xbf16>, vector<128x128xbf16>, vector<256x128xf32> -> vector<256x128xf32>
    %16 = arith.addf %10, %15 : vector<256x128xf32>
    %c0_15 = arith.constant 0 : index
    %c1_16 = arith.constant 1 : index
    %c0_17 = arith.constant 0 : index
    %c0_18 = arith.constant 0 : index
    %17 = vector.load %arg1[%c0_15, %c1_16, %c0_17, %c0_18] : memref<1x18x18x128xbf16, #tpu.memory_space<vmem>>, vector<1x16x16x128xbf16>
    %18 = vector.shape_cast %17 : vector<1x16x16x128xbf16> to vector<16x16x128xbf16>
    %19 = vector.shape_cast %18 : vector<16x16x128xbf16> to vector<256x128xbf16>
    %c384 = arith.constant 384 : index
    %c0_19 = arith.constant 0 : index
    %20 = vector.load %arg2[%c384, %c0_19] : memref<1152x128xbf16, #tpu.memory_space<vmem>>, vector<128x128xbf16>
    %cst_20 = arith.constant dense<0.000000e+00> : vector<256x128xf32>
    %21 = tpu.matmul %19, %20, %cst_20 {dimension_numbers = #tpu.dot_dimension_numbers<[1], [0], [0], [1], [0, 0, 1, 1], [], []>} : vector<256x128xbf16>, vector<128x128xbf16>, vector<256x128xf32> -> vector<256x128xf32>
    %22 = arith.addf %16, %21 : vector<256x128xf32>
    %c0_21 = arith.constant 0 : index
    %c1_22 = arith.constant 1 : index
    %c1_23 = arith.constant 1 : index
    %c0_24 = arith.constant 0 : index
    %23 = vector.load %arg1[%c0_21, %c1_22, %c1_23, %c0_24] : memref<1x18x18x128xbf16, #tpu.memory_space<vmem>>, vector<1x16x16x128xbf16>
    %24 = vector.shape_cast %23 : vector<1x16x16x128xbf16> to vector<16x16x128xbf16>
    %25 = vector.shape_cast %24 : vector<16x16x128xbf16> to vector<256x128xbf16>
    %c0_25 = arith.constant 0 : index
    %c0_26 = arith.constant 0 : index
    %26 = vector.load %arg3[%c0_25, %c0_26] : memref<128x256xbf16, #tpu.memory_space<vmem>>, vector<128x256xbf16>
    %cst_27 = arith.constant dense<0.000000e+00> : vector<256x256xf32>
    %27 = tpu.matmul %25, %26, %cst_27 {dimension_numbers = #tpu.dot_dimension_numbers<[1], [0], [0], [1], [0, 0, 1, 1], [], []>} : vector<256x128xbf16>, vector<128x256xbf16>, vector<256x256xf32> -> vector<256x256xf32>
    %28 = vector.extract_strided_slice %27 {offsets = [0, 0], sizes = [256, 128], strides = [1, 1]} : vector<256x256xf32> to vector<256x128xf32>
    %29 = vector.extract_strided_slice %27 {offsets = [0, 128], sizes = [256, 128], strides = [1, 1]} : vector<256x256xf32> to vector<256x128xf32>
    %c0_28 = arith.constant 0 : index
    %c0_29 = arith.constant 0 : index
    %30 = vector.load %arg7[%c0_28, %c0_29] : memref<1x128xf32, #tpu.memory_space<vmem>>, vector<1x128xf32>
    %31 = vector.broadcast %30 : vector<1x128xf32> to vector<256x128xf32>
    %32 = arith.addf %29, %31 : vector<256x128xf32>
    %33 = arith.addf %22, %28 : vector<256x128xf32>
    %c0_30 = arith.constant 0 : index
    %c1_31 = arith.constant 1 : index
    %c2_32 = arith.constant 2 : index
    %c0_33 = arith.constant 0 : index
    %34 = vector.load %arg1[%c0_30, %c1_31, %c2_32, %c0_33] : memref<1x18x18x128xbf16, #tpu.memory_space<vmem>>, vector<1x16x16x128xbf16>
    %35 = vector.shape_cast %34 : vector<1x16x16x128xbf16> to vector<16x16x128xbf16>
    %36 = vector.shape_cast %35 : vector<16x16x128xbf16> to vector<256x128xbf16>
    %c640 = arith.constant 640 : index
    %c0_34 = arith.constant 0 : index
    %37 = vector.load %arg2[%c640, %c0_34] : memref<1152x128xbf16, #tpu.memory_space<vmem>>, vector<128x128xbf16>
    %cst_35 = arith.constant dense<0.000000e+00> : vector<256x128xf32>
    %38 = tpu.matmul %36, %37, %cst_35 {dimension_numbers = #tpu.dot_dimension_numbers<[1], [0], [0], [1], [0, 0, 1, 1], [], []>} : vector<256x128xbf16>, vector<128x128xbf16>, vector<256x128xf32> -> vector<256x128xf32>
    %39 = arith.addf %33, %38 : vector<256x128xf32>
    %c0_36 = arith.constant 0 : index
    %c2_37 = arith.constant 2 : index
    %c0_38 = arith.constant 0 : index
    %c0_39 = arith.constant 0 : index
    %40 = vector.load %arg1[%c0_36, %c2_37, %c0_38, %c0_39] : memref<1x18x18x128xbf16, #tpu.memory_space<vmem>>, vector<1x16x16x128xbf16>
    %41 = vector.shape_cast %40 : vector<1x16x16x128xbf16> to vector<16x16x128xbf16>
    %42 = vector.shape_cast %41 : vector<16x16x128xbf16> to vector<256x128xbf16>
    %c768 = arith.constant 768 : index
    %c0_40 = arith.constant 0 : index
    %43 = vector.load %arg2[%c768, %c0_40] : memref<1152x128xbf16, #tpu.memory_space<vmem>>, vector<128x128xbf16>
    %cst_41 = arith.constant dense<0.000000e+00> : vector<256x128xf32>
    %44 = tpu.matmul %42, %43, %cst_41 {dimension_numbers = #tpu.dot_dimension_numbers<[1], [0], [0], [1], [0, 0, 1, 1], [], []>} : vector<256x128xbf16>, vector<128x128xbf16>, vector<256x128xf32> -> vector<256x128xf32>
    %45 = arith.addf %39, %44 : vector<256x128xf32>
    %c0_42 = arith.constant 0 : index
    %c2_43 = arith.constant 2 : index
    %c1_44 = arith.constant 1 : index
    %c0_45 = arith.constant 0 : index
    %46 = vector.load %arg1[%c0_42, %c2_43, %c1_44, %c0_45] : memref<1x18x18x128xbf16, #tpu.memory_space<vmem>>, vector<1x16x16x128xbf16>
    %47 = vector.shape_cast %46 : vector<1x16x16x128xbf16> to vector<16x16x128xbf16>
    %48 = vector.shape_cast %47 : vector<16x16x128xbf16> to vector<256x128xbf16>
    %c896 = arith.constant 896 : index
    %c0_46 = arith.constant 0 : index
    %49 = vector.load %arg2[%c896, %c0_46] : memref<1152x128xbf16, #tpu.memory_space<vmem>>, vector<128x128xbf16>
    %cst_47 = arith.constant dense<0.000000e+00> : vector<256x128xf32>
    %50 = tpu.matmul %48, %49, %cst_47 {dimension_numbers = #tpu.dot_dimension_numbers<[1], [0], [0], [1], [0, 0, 1, 1], [], []>} : vector<256x128xbf16>, vector<128x128xbf16>, vector<256x128xf32> -> vector<256x128xf32>
    %51 = arith.addf %45, %50 : vector<256x128xf32>
    %c0_48 = arith.constant 0 : index
    %c2_49 = arith.constant 2 : index
    %c2_50 = arith.constant 2 : index
    %c0_51 = arith.constant 0 : index
    %52 = vector.load %arg1[%c0_48, %c2_49, %c2_50, %c0_51] : memref<1x18x18x128xbf16, #tpu.memory_space<vmem>>, vector<1x16x16x128xbf16>
    %53 = vector.shape_cast %52 : vector<1x16x16x128xbf16> to vector<16x16x128xbf16>
    %54 = vector.shape_cast %53 : vector<16x16x128xbf16> to vector<256x128xbf16>
    %c1024 = arith.constant 1024 : index
    %c0_52 = arith.constant 0 : index
    %55 = vector.load %arg2[%c1024, %c0_52] : memref<1152x128xbf16, #tpu.memory_space<vmem>>, vector<128x128xbf16>
    %cst_53 = arith.constant dense<0.000000e+00> : vector<256x128xf32>
    %56 = tpu.matmul %54, %55, %cst_53 {dimension_numbers = #tpu.dot_dimension_numbers<[1], [0], [0], [1], [0, 0, 1, 1], [], []>} : vector<256x128xbf16>, vector<128x128xbf16>, vector<256x128xf32> -> vector<256x128xf32>
    %57 = arith.addf %51, %56 : vector<256x128xf32>
    %c0_54 = arith.constant 0 : index
    %c0_55 = arith.constant 0 : index
    %58 = vector.load %arg4[%c0_54, %c0_55] : memref<1x128xf32, #tpu.memory_space<vmem>>, vector<1x128xf32>
    %59 = vector.broadcast %58 : vector<1x128xf32> to vector<256x128xf32>
    %60 = arith.addf %57, %59 : vector<256x128xf32>
    %61 = arith.negf %60 : vector<256x128xf32>
    %62 = math.exp %61 : vector<256x128xf32>
    %cst_56 = arith.constant 1.000000e+00 : f32
    %63 = vector.broadcast %cst_56 : f32 to vector<256x128xf32>
    %64 = arith.addf %63, %62 : vector<256x128xf32>
    %65 = arith.divf %63, %64 : vector<256x128xf32>
    %66 = arith.mulf %60, %65 : vector<256x128xf32>
    %cst_57 = arith.constant 0.000000e+00 : bf16
    %67 = vector.broadcast %cst_57 : bf16 to vector<1x18x128xbf16>
    %cst_58 = arith.constant 0.000000e+00 : bf16
    %68 = vector.broadcast %cst_58 : bf16 to vector<16x1x128xbf16>
    %c0_59 = arith.constant 0 : index
    %c0_60 = arith.constant 0 : index
    %c0_61 = arith.constant 0 : index
    %69 = vector.load %arg9[%c0_59, %c0_60, %c0_61] : memref<18x18x128xbf16, #tpu.memory_space<vmem>>, vector<1x18x128xbf16>
    tpu.vector_store %arg9[%c0_59, %c0_60, %c0_61], %67 {strides = array<i32>} : memref<18x18x128xbf16, #tpu.memory_space<vmem>>, vector<1x18x128xbf16>,
    %c17 = arith.constant 17 : index
    %c0_62 = arith.constant 0 : index
    %c0_63 = arith.constant 0 : index
    %70 = vector.load %arg9[%c17, %c0_62, %c0_63] : memref<18x18x128xbf16, #tpu.memory_space<vmem>>, vector<1x18x128xbf16>
    tpu.vector_store %arg9[%c17, %c0_62, %c0_63], %67 {strides = array<i32>} : memref<18x18x128xbf16, #tpu.memory_space<vmem>>, vector<1x18x128xbf16>,
    %c1_64 = arith.constant 1 : index
    %c0_65 = arith.constant 0 : index
    %c0_66 = arith.constant 0 : index
    %71 = vector.load %arg9[%c1_64, %c0_65, %c0_66] : memref<18x18x128xbf16, #tpu.memory_space<vmem>>, vector<16x1x128xbf16>
    tpu.vector_store %arg9[%c1_64, %c0_65, %c0_66], %68 {strides = array<i32>} : memref<18x18x128xbf16, #tpu.memory_space<vmem>>, vector<16x1x128xbf16>,
    %c1_67 = arith.constant 1 : index
    %c17_68 = arith.constant 17 : index
    %c0_69 = arith.constant 0 : index
    %72 = vector.load %arg9[%c1_67, %c17_68, %c0_69] : memref<18x18x128xbf16, #tpu.memory_space<vmem>>, vector<16x1x128xbf16>
    tpu.vector_store %arg9[%c1_67, %c17_68, %c0_69], %68 {strides = array<i32>} : memref<18x18x128xbf16, #tpu.memory_space<vmem>>, vector<16x1x128xbf16>,
    %73 = vector.shape_cast %66 : vector<256x128xf32> to vector<16x16x128xf32>
    %74 = arith.truncf %73 : vector<16x16x128xf32> to vector<16x16x128xbf16>
    %c1_70 = arith.constant 1 : index
    %c1_71 = arith.constant 1 : index
    %c0_72 = arith.constant 0 : index
    %75 = vector.load %arg9[%c1_70, %c1_71, %c0_72] : memref<18x18x128xbf16, #tpu.memory_space<vmem>>, vector<16x16x128xbf16>
    tpu.vector_store %arg9[%c1_70, %c1_71, %c0_72], %74 {strides = array<i32>} : memref<18x18x128xbf16, #tpu.memory_space<vmem>>, vector<16x16x128xbf16>,
    %c0_73 = arith.constant 0 : index
    %c0_74 = arith.constant 0 : index
    %c0_75 = arith.constant 0 : index
    %76 = vector.load %arg9[%c0_73, %c0_74, %c0_75] : memref<18x18x128xbf16, #tpu.memory_space<vmem>>, vector<16x16x128xbf16>
    %77 = vector.shape_cast %76 : vector<16x16x128xbf16> to vector<256x128xbf16>
    %c0_76 = arith.constant 0 : index
    %c0_77 = arith.constant 0 : index
    %78 = vector.load %arg5[%c0_76, %c0_77] : memref<1152x128xbf16, #tpu.memory_space<vmem>>, vector<128x128xbf16>
    %cst_78 = arith.constant dense<0.000000e+00> : vector<256x128xf32>
    %79 = tpu.matmul %77, %78, %cst_78 {dimension_numbers = #tpu.dot_dimension_numbers<[1], [0], [0], [1], [0, 0, 1, 1], [], []>} : vector<256x128xbf16>, vector<128x128xbf16>, vector<256x128xf32> -> vector<256x128xf32>
    %c0_79 = arith.constant 0 : index
    %c1_80 = arith.constant 1 : index
    %c0_81 = arith.constant 0 : index
    %80 = vector.load %arg9[%c0_79, %c1_80, %c0_81] : memref<18x18x128xbf16, #tpu.memory_space<vmem>>, vector<16x16x128xbf16>
    %81 = vector.shape_cast %80 : vector<16x16x128xbf16> to vector<256x128xbf16>
    %c128_82 = arith.constant 128 : index
    %c0_83 = arith.constant 0 : index
    %82 = vector.load %arg5[%c128_82, %c0_83] : memref<1152x128xbf16, #tpu.memory_space<vmem>>, vector<128x128xbf16>
    %cst_84 = arith.constant dense<0.000000e+00> : vector<256x128xf32>
    %83 = tpu.matmul %81, %82, %cst_84 {dimension_numbers = #tpu.dot_dimension_numbers<[1], [0], [0], [1], [0, 0, 1, 1], [], []>} : vector<256x128xbf16>, vector<128x128xbf16>, vector<256x128xf32> -> vector<256x128xf32>
    %84 = arith.addf %79, %83 : vector<256x128xf32>
    %c0_85 = arith.constant 0 : index
    %c2_86 = arith.constant 2 : index
    %c0_87 = arith.constant 0 : index
    %85 = vector.load %arg9[%c0_85, %c2_86, %c0_87] : memref<18x18x128xbf16, #tpu.memory_space<vmem>>, vector<16x16x128xbf16>
    %86 = vector.shape_cast %85 : vector<16x16x128xbf16> to vector<256x128xbf16>
    %c256_88 = arith.constant 256 : index
    %c0_89 = arith.constant 0 : index
    %87 = vector.load %arg5[%c256_88, %c0_89] : memref<1152x128xbf16, #tpu.memory_space<vmem>>, vector<128x128xbf16>
    %cst_90 = arith.constant dense<0.000000e+00> : vector<256x128xf32>
    %88 = tpu.matmul %86, %87, %cst_90 {dimension_numbers = #tpu.dot_dimension_numbers<[1], [0], [0], [1], [0, 0, 1, 1], [], []>} : vector<256x128xbf16>, vector<128x128xbf16>, vector<256x128xf32> -> vector<256x128xf32>
    %89 = arith.addf %84, %88 : vector<256x128xf32>
    %c1_91 = arith.constant 1 : index
    %c0_92 = arith.constant 0 : index
    %c0_93 = arith.constant 0 : index
    %90 = vector.load %arg9[%c1_91, %c0_92, %c0_93] : memref<18x18x128xbf16, #tpu.memory_space<vmem>>, vector<16x16x128xbf16>
    %91 = vector.shape_cast %90 : vector<16x16x128xbf16> to vector<256x128xbf16>
    %c384_94 = arith.constant 384 : index
    %c0_95 = arith.constant 0 : index
    %92 = vector.load %arg5[%c384_94, %c0_95] : memref<1152x128xbf16, #tpu.memory_space<vmem>>, vector<128x128xbf16>
    %cst_96 = arith.constant dense<0.000000e+00> : vector<256x128xf32>
    %93 = tpu.matmul %91, %92, %cst_96 {dimension_numbers = #tpu.dot_dimension_numbers<[1], [0], [0], [1], [0, 0, 1, 1], [], []>} : vector<256x128xbf16>, vector<128x128xbf16>, vector<256x128xf32> -> vector<256x128xf32>
    %94 = arith.addf %89, %93 : vector<256x128xf32>
    %c1_97 = arith.constant 1 : index
    %c1_98 = arith.constant 1 : index
    %c0_99 = arith.constant 0 : index
    %95 = vector.load %arg9[%c1_97, %c1_98, %c0_99] : memref<18x18x128xbf16, #tpu.memory_space<vmem>>, vector<16x16x128xbf16>
    %96 = vector.shape_cast %95 : vector<16x16x128xbf16> to vector<256x128xbf16>
    %c512 = arith.constant 512 : index
    %c0_100 = arith.constant 0 : index
    %97 = vector.load %arg5[%c512, %c0_100] : memref<1152x128xbf16, #tpu.memory_space<vmem>>, vector<128x128xbf16>
    %cst_101 = arith.constant dense<0.000000e+00> : vector<256x128xf32>
    %98 = tpu.matmul %96, %97, %cst_101 {dimension_numbers = #tpu.dot_dimension_numbers<[1], [0], [0], [1], [0, 0, 1, 1], [], []>} : vector<256x128xbf16>, vector<128x128xbf16>, vector<256x128xf32> -> vector<256x128xf32>
    %99 = arith.addf %94, %98 : vector<256x128xf32>
    %c1_102 = arith.constant 1 : index
    %c2_103 = arith.constant 2 : index
    %c0_104 = arith.constant 0 : index
    %100 = vector.load %arg9[%c1_102, %c2_103, %c0_104] : memref<18x18x128xbf16, #tpu.memory_space<vmem>>, vector<16x16x128xbf16>
    %101 = vector.shape_cast %100 : vector<16x16x128xbf16> to vector<256x128xbf16>
    %c640_105 = arith.constant 640 : index
    %c0_106 = arith.constant 0 : index
    %102 = vector.load %arg5[%c640_105, %c0_106] : memref<1152x128xbf16, #tpu.memory_space<vmem>>, vector<128x128xbf16>
    %cst_107 = arith.constant dense<0.000000e+00> : vector<256x128xf32>
    %103 = tpu.matmul %101, %102, %cst_107 {dimension_numbers = #tpu.dot_dimension_numbers<[1], [0], [0], [1], [0, 0, 1, 1], [], []>} : vector<256x128xbf16>, vector<128x128xbf16>, vector<256x128xf32> -> vector<256x128xf32>
    %104 = arith.addf %99, %103 : vector<256x128xf32>
    %c2_108 = arith.constant 2 : index
    %c0_109 = arith.constant 0 : index
    %c0_110 = arith.constant 0 : index
    %105 = vector.load %arg9[%c2_108, %c0_109, %c0_110] : memref<18x18x128xbf16, #tpu.memory_space<vmem>>, vector<16x16x128xbf16>
    %106 = vector.shape_cast %105 : vector<16x16x128xbf16> to vector<256x128xbf16>
    %c768_111 = arith.constant 768 : index
    %c0_112 = arith.constant 0 : index
    %107 = vector.load %arg5[%c768_111, %c0_112] : memref<1152x128xbf16, #tpu.memory_space<vmem>>, vector<128x128xbf16>
    %cst_113 = arith.constant dense<0.000000e+00> : vector<256x128xf32>
    %108 = tpu.matmul %106, %107, %cst_113 {dimension_numbers = #tpu.dot_dimension_numbers<[1], [0], [0], [1], [0, 0, 1, 1], [], []>} : vector<256x128xbf16>, vector<128x128xbf16>, vector<256x128xf32> -> vector<256x128xf32>
    %109 = arith.addf %104, %108 : vector<256x128xf32>
    %c2_114 = arith.constant 2 : index
    %c1_115 = arith.constant 1 : index
    %c0_116 = arith.constant 0 : index
    %110 = vector.load %arg9[%c2_114, %c1_115, %c0_116] : memref<18x18x128xbf16, #tpu.memory_space<vmem>>, vector<16x16x128xbf16>
    %111 = vector.shape_cast %110 : vector<16x16x128xbf16> to vector<256x128xbf16>
    %c896_117 = arith.constant 896 : index
    %c0_118 = arith.constant 0 : index
    %112 = vector.load %arg5[%c896_117, %c0_118] : memref<1152x128xbf16, #tpu.memory_space<vmem>>, vector<128x128xbf16>
    %cst_119 = arith.constant dense<0.000000e+00> : vector<256x128xf32>
    %113 = tpu.matmul %111, %112, %cst_119 {dimension_numbers = #tpu.dot_dimension_numbers<[1], [0], [0], [1], [0, 0, 1, 1], [], []>} : vector<256x128xbf16>, vector<128x128xbf16>, vector<256x128xf32> -> vector<256x128xf32>
    %114 = arith.addf %109, %113 : vector<256x128xf32>
    %c2_120 = arith.constant 2 : index
    %c2_121 = arith.constant 2 : index
    %c0_122 = arith.constant 0 : index
    %115 = vector.load %arg9[%c2_120, %c2_121, %c0_122] : memref<18x18x128xbf16, #tpu.memory_space<vmem>>, vector<16x16x128xbf16>
    %116 = vector.shape_cast %115 : vector<16x16x128xbf16> to vector<256x128xbf16>
    %c1024_123 = arith.constant 1024 : index
    %c0_124 = arith.constant 0 : index
    %117 = vector.load %arg5[%c1024_123, %c0_124] : memref<1152x128xbf16, #tpu.memory_space<vmem>>, vector<128x128xbf16>
    %cst_125 = arith.constant dense<0.000000e+00> : vector<256x128xf32>
    %118 = tpu.matmul %116, %117, %cst_125 {dimension_numbers = #tpu.dot_dimension_numbers<[1], [0], [0], [1], [0, 0, 1, 1], [], []>} : vector<256x128xbf16>, vector<128x128xbf16>, vector<256x128xf32> -> vector<256x128xf32>
    %119 = arith.addf %114, %118 : vector<256x128xf32>
    %c0_126 = arith.constant 0 : index
    %c0_127 = arith.constant 0 : index
    %120 = vector.load %arg6[%c0_126, %c0_127] : memref<1x128xf32, #tpu.memory_space<vmem>>, vector<1x128xf32>
    %121 = vector.broadcast %120 : vector<1x128xf32> to vector<256x128xf32>
    %122 = arith.addf %119, %121 : vector<256x128xf32>
    %123 = arith.negf %122 : vector<256x128xf32>
    %124 = math.exp %123 : vector<256x128xf32>
    %cst_128 = arith.constant 1.000000e+00 : f32
    %125 = vector.broadcast %cst_128 : f32 to vector<256x128xf32>
    %126 = arith.addf %125, %124 : vector<256x128xf32>
    %127 = arith.divf %125, %126 : vector<256x128xf32>
    %128 = arith.mulf %122, %127 : vector<256x128xf32>
    %129 = arith.addf %128, %32 : vector<256x128xf32>
    %130 = vector.shape_cast %129 : vector<256x128xf32> to vector<16x16x128xf32>
    %131 = arith.truncf %130 : vector<16x16x128xf32> to vector<16x16x128xbf16>
    %c0_129 = arith.constant 0 : index
    %c0_130 = arith.constant 0 : index
    %c0_131 = arith.constant 0 : index
    %c0_132 = arith.constant 0 : index
    %132 = vector.load %arg8[%c0_129, %c0_130, %c0_131, %c0_132] : memref<1x16x16x128xbf16, #tpu.memory_space<vmem>>, vector<1x16x16x128xbf16>
    %133 = vector.shape_cast %132 : vector<1x16x16x128xbf16> to vector<16x16x128xbf16>
    %134 = vector.shape_cast %131 : vector<16x16x128xbf16> to vector<1x16x16x128xbf16>
    tpu.vector_store %arg8[%c0_129, %c0_130, %c0_131, %c0_132], %134 {strides = array<i32>} : memref<1x16x16x128xbf16, #tpu.memory_space<vmem>>, vector<1x16x16x128xbf16>,
    return
  }
  func.func @transform_0(%arg0: i32) -> (i32, i32, i32, i32) {
    %c0_i32 = arith.constant 0 : i32
    %c0_i32_0 = arith.constant 0 : i32
    %c0_i32_1 = arith.constant 0 : i32
    %c0_i32_2 = arith.constant 0 : i32
    return %arg0, %c0_i32, %c0_i32_0, %c0_i32_1 : i32, i32, i32, i32
  }
  func.func @transform_1(%arg0: i32) -> (i32, i32) {
    %c0_i32 = arith.constant 0 : i32
    %c0_i32_0 = arith.constant 0 : i32
    %c0_i32_1 = arith.constant 0 : i32
    return %c0_i32, %c0_i32_0 : i32, i32
  }
  func.func @transform_2(%arg0: i32) -> (i32, i32) {
    %c0_i32 = arith.constant 0 : i32
    %c0_i32_0 = arith.constant 0 : i32
    %c0_i32_1 = arith.constant 0 : i32
    return %c0_i32, %c0_i32_0 : i32, i32
  }
  func.func @transform_3(%arg0: i32) -> (i32, i32) {
    %c0_i32 = arith.constant 0 : i32
    %c0_i32_0 = arith.constant 0 : i32
    %c0_i32_1 = arith.constant 0 : i32
    return %c0_i32, %c0_i32_0 : i32, i32
  }
  func.func @transform_4(%arg0: i32) -> (i32, i32) {
    %c0_i32 = arith.constant 0 : i32
    %c0_i32_0 = arith.constant 0 : i32
    %c0_i32_1 = arith.constant 0 : i32
    return %c0_i32, %c0_i32_0 : i32, i32
  }
  func.func @transform_5(%arg0: i32) -> (i32, i32) {
    %c0_i32 = arith.constant 0 : i32
    %c0_i32_0 = arith.constant 0 : i32
    %c0_i32_1 = arith.constant 0 : i32
    return %c0_i32, %c0_i32_0 : i32, i32
  }
  func.func @transform_6(%arg0: i32) -> (i32, i32) {
    %c0_i32 = arith.constant 0 : i32
    %c0_i32_0 = arith.constant 0 : i32
    %c0_i32_1 = arith.constant 0 : i32
    return %c0_i32, %c0_i32_0 : i32, i32
  }
  func.func @transform_7(%arg0: i32) -> (i32, i32, i32, i32) {
    %c0_i32 = arith.constant 0 : i32
    %c0_i32_0 = arith.constant 0 : i32
    %c0_i32_1 = arith.constant 0 : i32
    %c0_i32_2 = arith.constant 0 : i32
    return %arg0, %c0_i32, %c0_i32_0, %c0_i32_1 : i32, i32, i32, i32
  }
}

</mosaic_0001>

<bundles_post_ra>
// kernel: tpu_custom_call.1
= control target key start
LH: loop header
LB: loop body
LE: loop exit
PB: predicated region body
PF: predicated region fallthrough
CT: control target
= control target key end

     0   :  { %12 = vsyncpa [#allocation4], 0  ;;  %s19320_s0 = inlined_call_operand.vmem [shape: bf16[2,18,18,128], index: 0, kind: input, shape index: {}]   ;;  %s19321_s1 = inlined_call_operand.vmem [shape: bf16[1152,128], index: 1, kind: input, shape index: {}]   ;;  %s19322_s2 = inlined_call_operand.vmem [shape: bf16[128,256], index: 2, kind: input, shape index: {}]   ;;  %s19323_s3 = inlined_call_operand.vmem [shape: f32[1,128], index: 3, kind: input, shape index: {}]   ;;  %s19324_s4 = inlined_call_operand.hbm [shape: bf16[1152,128], index: 4, kind: input, shape index: {}]   ;;  %s19325_s5 = inlined_call_operand.vmem [shape: f32[1,128], index: 5, kind: input, shape index: {}]   ;;  %s19326_s6 = inlined_call_operand.vmem [shape: f32[1,128], index: 6, kind: input, shape index: {}]   ;;  %s19327_s7 = inlined_call_operand.hbm [shape: bf16[2,16,16,128], index: 7, kind: output, shape index: {}]  }
   0x1   :  { %13 = vsyncpa [#allocation5], 0 }
   0x2   :  { %15 = vsyncpa [#allocation5 + $0x1], 0  ;;  %s14845_s24 = smov 0   ;;  %s14847_s25 = smov 0  }
   0x3   :  { %s14849_s26 = smov 0   ;;  %s14851_s27 = smov 0  }
   0x4 LB: > { %s14866_s28 = sadd.s32 4294967295, %s14796_s27   ;;  %s11438_s29 = sadd.s32 4294967294, %s14796_s27   ;;  %s14796_s27 = sphi %s14851_s27, %s19793_s27   ;;  %s14792_s26 = sphi %s14849_s26, %s19792_s26   ;;  %s14788_s25 = sphi %s14847_s25, %s19791_s25   ;;  %s14784_s24 = sphi %s14845_s24, %s19790_s24  }
   0x5   : > { %s14870_s30 = sadd.s32 1, %s14796_s27   ;;  %s180_s8 = sadd.s32 1, %s14792_s26 }
   0x6   : > { %s177_s9 = ssub.s32 %s14796_s27, %s14870_s30  ;;  %p190_p0 = scmp.ne.s32.totalorder %s14792_s26, %s14788_s25 }
   0x7   : > { %p178_p1 = scmp.eq.s32.totalorder %s177_s9, 0  ;;  %p191_p2 = scmp.eq.s32.totalorder %s14866_s28, 1 }
   0x8   : > { %p196_p3 = scmp.ne.s32.totalorder %s14788_s25, %s14784_s24  ;;  %p197_p4 = scmp.eq.s32.totalorder %s11438_s29, 1 }
   0x9   : > { %s14881_s10 = scalar_select %p178_p1, %s14792_s26, %s180_s8  }
   0xa   : > { %p14883_p5 = por %p191_p2, %p190_p0  ;;  %p14887_p6 = por %p197_p4, %p196_p3 }
   0xb   : > { %p11439_p7 = scmp.ge.s32.totalorder %s14796_s27, 1  ;;  %p204_p8 = scmp.lt.s32.totalorder %s14796_s27, 3 }
   0xc   : > { %s19426_s11 = scalar_select %p14883_p5, 1, 0 }
   0xd   : > { %s19427_s12 = scalar_select %p14887_p6, 1, 0 }
   0xe   : > { %p19328_p9 = scmp.eq.s32.totalorder %s14866_s28, 0  ;;  %p14894_p10 = pnand %p11439_p7, %p204_p8 }
   0xf   : > { %s14798_s14 = smov [#allocation3]   ;;  %s14702_s19 = scalar_lea.hbm %s19324_s4, 9216 }
  0x10   : > { %s19428_s13 = scalar_select %p14894_p10, 1, 0 }
  0x11   : > { %s225_s15 = sshll.u32 %s14798_s14, 4  ;;  %p14069_p11 = pneg %p14894_p10  ;;  %s226_s15 = int_to_ptr.vmem [resolvable:$true] %s225_s15 }
  0x12   : > { %p14703_p13 = scmp.ne.s32.totalorder %s19324_s4, %s14702_s19  ;;  %p14709_p3 = scmp.lt.u32.totalorder %s14702_s19, %s19324_s4 }
  0x13   : > { %p14902_p12 = pnand %p19328_p9, %p14069_p11 }
  0x15   : > { %p14704_p0 = pneg %p14902_p12 }
  0x17   : > { %p14705_p1 = pnand %p14704_p0, %p14703_p13 }
  0x19   : > { %p14706_p2 = pneg %p14705_p1 }
  0x1b   : > { %p14711_p4 = pnand %p14709_p3, %p14706_p2 }
  0x1d   : > { %14714 = shalt.err (!%p14711_p4)
}
  0x1e   : > { %s14715_s29 = scalar_lea.vmem %s226_s15, 9216  ;;  %p14723_p9 = scmp.lt.s32.totalorder %s226_s15, %s226_s15 }
  0x1f   : > { %p14716_p7 = scmp.ne.s32.totalorder %s226_s15, %s14715_s29  ;;  %p14724_p6 = scmp.lt.s32.totalorder %s14715_s29, %s14715_s29 }
  0x21   : > { %p14718_p8 = pnand %p14716_p7, %p14704_p0  ;;  %p14725_p5 = por %p14724_p6, %p14723_p9 }
  0x23   : > { %p14719_p11 = pneg %p14718_p8 }
  0x25   : > { %p14726_p10 = pnand %p14725_p5, %p14719_p11 }
  0x27   : > { %14729 = shalt.err (!%p14726_p10)
}
  0x28   : > { %s14799_s8 = smov 64   ;;  %s14800_s9 = smov 4  }
  0x29   : > { %14072 = dma.hbm_to_vmem [thread:$0]  (!%p14902_p12), %s19324_s4, 9216, %s226_s15, [#allocation4], %s14799_s8, %s14799_s8, %s14800_s9  }
  0x2a   : > { %p19430_p13 = scmp.ne.s32.totalorder %s19428_s13, 0 }
  0x2c   : > { %255 = sbr.rel (%p19430_p13) target bundleno = 1821 (0x71d), region = 48 }
  0x33   : > { %p19431_p1 = scmp.eq.s32.totalorder %s14866_s28, 0 }
  0x35   : > { %14775 = dma.done.wait (%p19431_p1), [#allocation4], 9216   ;;  %p19432_p0 = pmov %p19431_p1 }
  0x36   : > { %p287_p5 = scmp.lt.s32.totalorder %s14866_s28, 1  ;;  %v14118_v0 = vld [vmem:[%s19321_s1 + $0x40] sm:$0xff]   ;;  %v14119_v1 = vld [vmem:[%s19321_s1 + $0x48] sm:$0xff]   ;;  %v14120_v2 = vld [vmem:[%s19321_s1 + $0x50] sm:$0xff]   ;;  %vm357_vm0 = vsmask.f32 3328 }
  0x37   : > { %14777 = vsyncadd (%p19432_p0), [#allocation4], 4294958080  ;;  %12878 = vmatprep.subr.bf16.mxu1 %v14118_v0  ;;  %vm358_vm1 = vsmask.f32 7440  ;;  %v14121_v3 = vld [vmem:[%s19321_s1 + $0x58] sm:$0xff]   ;;  %v14122_v12 = vld [vmem:[%s19321_s1 + $0x60] sm:$0xff]  }
  0x38   : > { %s288_s18 = scalar_select %p287_p5, %s14866_s28, 1  ;;  %12879 = vmatpush3.bf16.msra.mxu1 %v14118_v0  ;;  %vm14977_vm2 = vmor %vm357_vm0, %vm358_vm1  ;;  %v19433_v29 = vmov 0  ;;  %v14123_v38 = vld [vmem:[%s19321_s1 + $0x68] sm:$0xff]   ;;  %v14124_v58 = vld [vmem:[%s19321_s1 + $0x70] sm:$0xff]   ;;  %vm1386_vm3 = vcmask 1042432   ;;  %vm1387_vm4 = vcmask 1046532  }
  0x39   : > { %12880 = vmatprep.subr.bf16.mxu1 %v14119_v1  ;;  %v19434_v29 = vsel %vm14977_vm2, 4294967295, %v19433_v29  ;;  %vm15307_vm5 = vmor %vm1386_vm3, %vm1387_vm4  ;;  %vm5468_vm6 = vcmask 1040384   ;;  %vm5469_vm7 = vsmask.f32 256  ;;  %vm5519_vm9 = vsmask.f32 7938 }
  0x3a   : > { %s14062_s13 = smul.u32 216, %s288_s18  ;;  %19435 = vst [vmem:[#allocation9_spill] sm:$0xff] %v19434_v29  ;;  %vm17002_vm8 = vmand %vm5468_vm6, %vm5469_vm7  ;;  %vm5987_vm11 = vcmask 1043456   ;;  %vm5665_vm12 = vsmask.f32 4368  ;;  %s284_s9 = sand.u32 1, %s14788_s25  }
  0x3b   : > { %vm17009_vm10 = vmand %vm5468_vm6, %vm5519_vm9  ;;  %s19099_s14 = sshll.u32 %s284_s9, 7  ;;  %s12374_s18 = sshll.u32 %s14866_s28, 11 }
  0x3c   : > { %s14942_s8 = scalar_lea.vmem %s19320_s0, %s14062_s13  ;;  %12881 = vmatpush3.bf16.msra.mxu1 %v14119_v1  ;;  %vm17344_vm13 = vmand %vm5987_vm11, %vm5519_vm9  ;;  %s19116_s17 = scalar_lea.vmem [#allocation6], %s19099_s14 }
  0x3d   : > { %12882 = vmatprep.subr.bf16.mxu1 %v14120_v2  ;;  %v14948_v4 = vld [vmem:[%s14942_s8] sm:$0xf]  ;;  %v14951_v5 = vld [vmem:[%s14942_s8 + $0x4] sm:$0xf]  ;;  %v341_v6 = vld [vmem:[%s14942_s8 + $0x8] sm:$0x1]  ;;  %s19271_s16 = scalar_lea.hbm %s19327_s7, %s12374_s18 }
  0x3e   : > { %v361_v7 = vshrl.u32 %v14948_v4, 16  ;;  %v364_v8 = vshll.u32 %v14948_v4, 16  ;;  %v370_v9 = vshll.u32 %v14951_v5, 16  ;;  %v374_v10 = vshrl.u32 %v14951_v5, 16  ;;  %v14959_v11 = vld [vmem:[%s14942_s8 + $0xc] sm:$0xf]  ;;  %vm17351_vm14 = vmor %vm5469_vm7, %vm5665_vm12 }
  0x3f   : > { %v380_v13 = vshll.u32 %v341_v6, 16  ;;  %v14965_v14 = vld [vmem:[%s14942_s8 + $0x10] sm:$0xf]  ;;  %v342_v15 = vld [vmem:[%s14942_s8 + $0x14] sm:$0x1]  ;;  %v385_v21 = vshrl.u32 %v14959_v11, 16 }
  0x40   : > { %12883 = vmatpush3.bf16.msra.mxu1 %v14120_v2  ;;  %v363_v16 = vrot.slane %v361_v7, 4  ;;  %v366_v17 = vrot.slane %v364_v8, 5  ;;  %v372_v18 = vrot.slane %v370_v9, 5  ;;  %v376_v19 = vrot.slane %v374_v10, 4  ;;  %v14973_v28 = vld [vmem:[%s14942_s8 + $0x18] sm:$0xf] }
  0x41   : > { %12884 = vmatprep.subr.bf16.mxu1 %v14121_v3  ;;  %v382_v20 = vrot.slane %v380_v13, 5  ;;  %v388_v22 = vshll.u32 %v14959_v11, 16  ;;  %v394_v23 = vshll.u32 %v14965_v14, 16  ;;  %v398_v26 = vshrl.u32 %v14965_v14, 16  ;;  %v14982_v33 = vld [vmem:[%s14942_s8 + $0x1c] sm:$0xf] }
  0x42   : > { %v367_v24 = vor.u32 %v366_v17, %v363_v16  ;;  %v377_v25 = vor.u32 %v376_v19, %v372_v18  ;;  %v404_v27 = vshll.u32 %v342_v15, 16  ;;  %v387_v30 = vrot.slane %v385_v21, 4  ;;  %v343_v40 = vld [vmem:[%s14942_s8 + $0x20] sm:$0x1]  ;;  %v14997_v48 = vld [vmem:[%s14942_s8 + $0x24] sm:$0xf] }
  0x43   : > { %v390_v31 = vrot.slane %v388_v22, 5  ;;  %v396_v32 = vrot.slane %v394_v23, 5  ;;  %v400_v36 = vrot.slane %v398_v26, 4  ;;  %v409_v41 = vshrl.u32 %v14973_v28, 16  ;;  %v15000_v49 = vld [vmem:[%s14942_s8 + $0x28] sm:$0xf] }
  0x44   : > { %12885 = vmatpush3.bf16.msra.mxu1 %v14121_v3  ;;  %v368_v34 = vrot.slane %v367_v24, 4  ;;  %v378_v35 = vrot.slane %v377_v25, 4  ;;  %v406_v37 = vrot.slane %v404_v27, 5  ;;  %v412_v42 = vshll.u32 %v14973_v28, 16  ;;  %v15008_v61 = vld [vmem:[%s14942_s8 + $0x2c] sm:$0x1] }
  0x45   : > { %12886 = vmatprep.subr.bf16.mxu1 %v14122_v12  ;;  %v391_v39 = vor.u32 %v390_v31, %v387_v30  ;;  %v418_v43 = vshll.u32 %v14982_v33, 16  ;;  %v401_v46 = vor.u32 %v400_v36, %v396_v32  ;;  %v422_v47 = vshrl.u32 %v14982_v33, 16  ;;  %v15016_v6 = vld [vmem:[%s14942_s8 + $0x30] sm:$0xf]  ;;  %v14125_v7 = vld [vmem:[%s19321_s1 + $0x78] sm:$0xff]   ;;  %s11364_s19 = sshll.u32 %s19116_s17, 4  ;;  %s19273_s19 = int_to_ptr.vmem [resolvable:$true] %s11364_s19 }
  0x46   : > { %v373_v44 = vsel %vm14977_vm2, %v368_v34, %v372_v18  ;;  %v383_v45 = vsel %vm14977_vm2, %v378_v35, %v382_v20  ;;  %v411_v52 = vrot.slane %v409_v41, 4  ;;  %v414_v53 = vrot.slane %v412_v42, 5  ;;  %v15024_v13 = vld [vmem:[%s14942_s8 + $0x34] sm:$0xf]  ;;  %v15029_v19 = vld [vmem:[%s14942_s8 + $0x38] sm:$0x1] }
  0x47   : > { %v11446_v50 = vcombine.low %v373_v44, %v383_v45  ;;  %v392_v51 = vrot.slane %v391_v39, 4  ;;  %v402_v54 = vrot.slane %v401_v46, 4  ;;  %v420_v55 = vrot.slane %v418_v43, 5  ;;  %v15039_v30 = vld [vmem:[%s14942_s8 + $0x3c] sm:$0xf]  ;;  %v14126_v41 = vld [vmem:[%s19321_s1] sm:$0xff]  }
  0x48   : > { %12887 = vmatpush3.bf16.msra.mxu1 %v14122_v12  ;;  %v424_v56 = vrot.slane %v422_v47, 4  ;;  %v428_v57 = vshll.u32 %v343_v40, 16  ;;  %v415_v60 = vor.u32 %v414_v53, %v411_v52  ;;  %v433_v62 = vshrl.u32 %v14997_v48, 16  ;;  %v15042_v36 = vld [vmem:[%s14942_s8 + $0x40] sm:$0xf]  ;;  %s19279_s21 = scalar_lea.sflag [#allocation5], %s284_s9 }
  0x49   : > { %12888 = vmatprep.subr.bf16.mxu1 %v14123_v38  ;;  %12894 = vmatprep.mubr.bf16.mxu1 %v11446_v50  ;;  %v397_v59 = vsel %vm14977_vm2, %v392_v51, %v396_v32  ;;  %v436_v63 = vshll.u32 %v14997_v48, 16  ;;  %v407_v0 = vsel %vm14977_vm2, %v402_v54, %v406_v37  ;;  %v442_v3 = vshll.u32 %v15000_v49, 16  ;;  %v15052_v44 = vld [vmem:[%s14942_s8 + $0x44] sm:$0x1]  ;;  %v15058_v53 = vld [vmem:[%s14942_s8 + $0x48] sm:$0xf] }
  0x4a   : > { %v425_v1 = vor.u32 %v424_v56, %v420_v55  ;;  %v430_v2 = vrot.slane %v428_v57, 5  ;;  %v15021_v8 = vcombine.low %v397_v59, %v407_v0  ;;  %v416_v9 = vrot.slane %v415_v60, 4  ;;  %s14730_s28 = scalar_lea.vmem %s19273_s19, 2048  ;;  %p19788_p9 = scmp.ne.s32.totalorder %s19426_s11, 0 }
  0x4b   : > { %v435_v10 = vrot.slane %v433_v62, 4  ;;  %v438_v12 = vrot.slane %v436_v63, 5  ;;  %v444_v16 = vrot.slane %v442_v3, 5  ;;  %v446_v17 = vshrl.u32 %v15000_v49, 16  ;;  %v15065_v63 = vld [vmem:[%s14942_s8 + $0x4c] sm:$0xf]  ;;  %p14731_p6 = scmp.ne.s32.totalorder %s19273_s19, %s14730_s28 }
  0x4c   : > { %12889 = vmatpush3.bf16.msra.mxu1 %v14123_v38  ;;  %v426_v15 = vrot.slane %v425_v1, 4  ;;  %v452_v18 = vshll.u32 %v15008_v61, 16  ;;  %v421_v20 = vsel %vm14977_vm2, %v416_v9, %v420_v55  ;;  %v457_v22 = vshrl.u32 %v15016_v6, 16  ;;  %v14127_v1 = vld [vmem:[%s19321_s1 + $0x8] sm:$0xff]   ;;  %v15073_v9 = vld [vmem:[%s14942_s8 + $0x50] sm:$0x1] }
  0x4d   : > { %12890 = vmatprep.subr.bf16.mxu1 %v14124_v58  ;;  %v439_v21 = vor.u32 %v438_v12, %v435_v10  ;;  %v460_v23 = vshll.u32 %v15016_v6, 16  ;;  %v448_v25 = vrot.slane %v446_v17, 4  ;;  %v466_v27 = vshll.u32 %v15024_v13, 16  ;;  %p14732_p10 = pnand %p14731_p6, %p19788_p9  ;;  %s14802_s13 = smov [#allocation6]  }
  0x4e   : > { %v431_v24 = vsel %vm14977_vm2, %v426_v15, %v430_v2  ;;  %v454_v26 = vrot.slane %v452_v18, 5  ;;  %v459_v34 = vrot.slane %v457_v22, 4  ;;  %v470_v39 = vshrl.u32 %v15024_v13, 16  ;;  %v15081_v22 = vld [vmem:[%s14942_s8 + $0x54] sm:$0xf]  ;;  %s14734_s15 = sshll.u32 %s14802_s13, 4  ;;  %s14735_s15 = int_to_ptr.vmem [resolvable:$false] %s14734_s15 }
  0x4f   : > { %v11448_v31 = vcombine.low %v421_v20, %v431_v24  ;;  %v440_v32 = vrot.slane %v439_v21, 4  ;;  %v462_v35 = vrot.slane %v460_v23, 5  ;;  %v449_v37 = vor.u32 %v448_v25, %v444_v16  ;;  %v14128_v24 = vld [vmem:[%s19321_s1 + $0x10] sm:$0xff]   ;;  %p14733_p12 = pneg %p14732_p10  ;;  %s14736_s22 = scalar_lea.vmem %s14735_s15, 4096 }
  0x50   : > { %12891 = vmatpush3.bf16.msra.mxu1 %v14124_v58  ;;  %v468_v38 = vrot.slane %v466_v27, 5  ;;  %v476_v40 = vshll.u32 %v15029_v19, 16  ;;  %v481_v45 = vshrl.u32 %v15039_v30, 16  ;;  %v484_v46 = vshll.u32 %v15039_v30, 16  ;;  %v15090_v27 = vld [vmem:[%s14942_s8 + $0x58] sm:$0xf]  ;;  %p14737_p2 = scmp.lt.s32.totalorder %s19273_s19, %s14735_s15  ;;  %p14738_p3 = scmp.lt.s32.totalorder %s14736_s22, %s14730_s28 }
  0x51   : > { %12892 = vmatprep.subr.bf16.mxu1 %v14125_v7  ;;  %v445_v42 = vsel %vm14977_vm2, %v440_v32, %v444_v16  ;;  %v463_v43 = vor.u32 %v462_v35, %v459_v34  ;;  %v450_v47 = vrot.slane %v449_v37, 4  ;;  %v472_v50 = vrot.slane %v470_v39, 4 }
  0x52   : > { %v478_v51 = vrot.slane %v476_v40, 5  ;;  %v490_v52 = vshll.u32 %v15042_v36, 16  ;;  %v483_v55 = vrot.slane %v481_v45, 4  ;;  %v486_v56 = vrot.slane %v484_v46, 5  ;;  %v15095_v40 = vld [vmem:[%s14942_s8 + $0x5c] sm:$0x1]  ;;  %p14739_p4 = por %p14738_p3, %p14737_p2 }
  0x53   : > { %v464_v54 = vrot.slane %v463_v43, 4  ;;  %v494_v57 = vshrl.u32 %v15042_v36, 16  ;;  %v455_v58 = vsel %vm14977_vm2, %v450_v47, %v454_v26  ;;  %v473_v59 = vor.u32 %v472_v50, %v468_v38  ;;  %v15104_v47 = vld [vmem:[%s14942_s8 + $0x60] sm:$0xf] }
  0x54   : > { %12893 = vmatpush3.bf16.msra.mxu1 %v14125_v7  ;;  %v492_v60 = vrot.slane %v490_v52, 5  ;;  %v500_v62 = vshll.u32 %v15052_v44, 16  ;;  %v11449_v0 = vcombine.low %v445_v42, %v455_v58  ;;  %v487_v3 = vor.u32 %v486_v56, %v483_v55  ;;  %v14129_v55 = vld [vmem:[%s19321_s1 + $0x18] sm:$0xff]   ;;  %v15110_v56 = vld [vmem:[%s14942_s8 + $0x64] sm:$0xf]  ;;  %p14740_p7 = pnand %p14739_p4, %p14733_p12 }
  0x55   : > { %12926 = vmatprep.subr.bf16.mxu1 %v14126_v41  ;;  %v469_v2 = vsel %vm14977_vm2, %v464_v54, %v468_v38  ;;  %v496_v7 = vrot.slane %v494_v57, 4  ;;  %v474_v10 = vrot.slane %v473_v59, 4  ;;  %v505_v15 = vshrl.u32 %v15058_v53, 16 }
  0x56   : > { %v502_v12 = vrot.slane %v500_v62, 5  ;;  %v508_v16 = vshll.u32 %v15058_v53, 16  ;;  %v488_v17 = vrot.slane %v487_v3, 4  ;;  %v514_v20 = vshll.u32 %v15065_v63, 16  ;;  %v15114_v62 = vld [vmem:[%s14942_s8 + $0x68] sm:$0x1] }
  0x57   : > { %12895 = vmatmul.mubr.bf16.vlgmr.msra.gmra.mrb[0].mxu1 %v15021_v8  ;;  %v497_v18 = vor.u32 %v496_v7, %v492_v60  ;;  %v518_v21 = vshrl.u32 %v15065_v63, 16  ;;  %v479_v23 = vsel %vm14977_vm2, %v474_v10, %v478_v51  ;;  %v507_v25 = vrot.slane %v505_v15, 4  ;;  %19436 = vst [vmem:[#allocation10_spill] sm:$0xff] %v15114_v62  ;;  %v15121_v10 = vld [vmem:[%s14942_s8 + $0x6c] sm:$0xf] }
  0x58   : > { %12927 = vmatpush3.bf16.msra.mxu1 %v14126_v41  ;;  %12898 = vmatprep.mubr.bf16.mxu1 %v11448_v31  ;;  %v510_v8 = vrot.slane %v508_v16, 5  ;;  %v524_v26 = vshll.u32 %v15073_v9, 16  ;;  %v11450_v32 = vcombine.low %v469_v2, %v479_v23  ;;  %v493_v34 = vsel %vm14977_vm2, %v488_v17, %v492_v60 }
  0x59   : > { %12928 = vmatprep.subr.bf16.mxu1 %v14127_v1  ;;  %v498_v31 = vrot.slane %v497_v18, 4  ;;  %v516_v35 = vrot.slane %v514_v20, 5  ;;  %v520_v38 = vrot.slane %v518_v21, 4  ;;  %v529_v41 = vshrl.u32 %v15081_v22, 16 }
  0x5a   : > { %v511_v37 = vor.u32 %v510_v8, %v507_v25  ;;  %v526_v39 = vrot.slane %v524_v26, 5  ;;  %v532_v43 = vshll.u32 %v15081_v22, 16  ;;  %v538_v45 = vshll.u32 %v15090_v27, 16  ;;  %v15128_v25 = vld [vmem:[%s14942_s8 + $0x70] sm:$0xf] }
  0x5b   : > { %v503_v42 = vsel %vm14977_vm2, %v498_v31, %v502_v12  ;;  %v542_v46 = vshrl.u32 %v15090_v27, 16  ;;  %v521_v52 = vor.u32 %v520_v38, %v516_v35  ;;  %v531_v54 = vrot.slane %v529_v41, 4  ;;  %v15140_v41 = vld [vmem:[%s14942_s8 + $0x74] sm:$0x1] }
  0x5c   : > { %12929 = vmatpush3.bf16.msra.mxu1 %v14127_v1  ;;  %v11451_v50 = vcombine.low %v493_v34, %v503_v42  ;;  %v512_v51 = vrot.slane %v511_v37, 4  ;;  %v534_v57 = vrot.slane %v532_v43, 5  ;;  %v540_v58 = vrot.slane %v538_v45, 5  ;;  %19437 = vst [vmem:[#allocation11_spill] sm:$0xff] %v15140_v41  ;;  %v15145_v45 = vld [vmem:[%s14942_s8 + $0x78] sm:$0xf] }
  0x5d   : > { %12930 = vmatprep.subr.bf16.mxu1 %v14128_v24  ;;  %v544_v59 = vrot.slane %v542_v46, 4  ;;  %v548_v60 = vshll.u32 %v15095_v40, 16  ;;  %v522_v2 = vrot.slane %v521_v52, 4  ;;  %v553_v3 = vshrl.u32 %v15104_v47, 16  ;;  %v14131_v46 = vld [vmem:[%s19321_s1 + $0x28] sm:$0xff]  }
  0x5e   : > { %v517_v1 = vsel %vm14977_vm2, %v512_v51, %v516_v35  ;;  %v556_v7 = vshll.u32 %v15104_v47, 16  ;;  %v535_v12 = vor.u32 %v534_v57, %v531_v54  ;;  %v562_v17 = vshll.u32 %v15110_v56, 16 }
  0x5f   : > { %12899 = vmatmul.mubr.bf16.gmra.mrb[4].mxu1 %v11449_v0  ;;  %v545_v15 = vor.u32 %v544_v59, %v540_v58  ;;  %v550_v16 = vrot.slane %v548_v60, 5  ;;  %v527_v18 = vsel %vm14977_vm2, %v522_v2, %v526_v39  ;;  %v555_v20 = vrot.slane %v553_v3, 4 }
  0x60   : > { %12902 = vmatprep.mubr.bf16.mxu1 %v11450_v32  ;;  %12931 = vmatpush3.bf16.msra.mxu1 %v14128_v24  ;;  %v558_v21 = vrot.slane %v556_v7, 5  ;;  %v566_v23 = vshrl.u32 %v15110_v56, 16  ;;  %v11452_v8 = vcombine.low %v517_v1, %v527_v18  ;;  %v536_v0 = vrot.slane %v535_v12, 4  ;;  %v14130_v24 = vld [vmem:[%s19321_s1 + $0x20] sm:$0xff]  }
  0x61   : > { %v546_v26 = vrot.slane %v545_v15, 4  ;;  %12932 = vmatprep.subr.bf16.mxu1 %v14129_v55  ;;  %v564_v34 = vrot.slane %v562_v17, 5  ;;  %v572_v35 = vshll.u32 %v15114_v62, 16  ;;  %v577_v37 = vshrl.u32 %v15121_v10, 16  ;;  %v15158_v15 = vld [vmem:[%s14942_s8 + $0x80] sm:$0x1] }
  0x62   : > { %v559_v32 = vor.u32 %v558_v21, %v555_v20  ;;  %v568_v31 = vrot.slane %v566_v23, 4  ;;  %v541_v38 = vsel %vm14977_vm2, %v536_v0, %v540_v58  ;;  %v580_v42 = vshll.u32 %v15121_v10, 16  ;;  %v15151_v58 = vld [vmem:[%s14942_s8 + $0x7c] sm:$0xf]  ;;  %19438 = vst [vmem:[#allocation12_spill] sm:$0xff] %v15158_v15 }
  0x63   : > { %v551_v39 = vsel %vm14977_vm2, %v546_v26, %v550_v16  ;;  %v586_v43 = vshll.u32 %v15128_v25, 16  ;;  %v574_v57 = vrot.slane %v572_v35, 5  ;;  %v579_v59 = vrot.slane %v577_v37, 4  ;;  %v15164_v21 = vld [vmem:[%s14942_s8 + $0x84] sm:$0xf] }
  0x64   : > { %v11453_v51 = vcombine.low %v541_v38, %v551_v39  ;;  %12933 = vmatpush3.bf16.msra.mxu1 %v14129_v55  ;;  %v560_v52 = vrot.slane %v559_v32, 4  ;;  %v569_v54 = vor.u32 %v568_v31, %v564_v34  ;;  %v582_v60 = vrot.slane %v580_v42, 5  ;;  %v15173_v38 = vld [vmem:[%s14942_s8 + $0x88] sm:$0xf] }
  0x65   : > { %v588_v1 = vrot.slane %v586_v43, 5  ;;  %v590_v2 = vshrl.u32 %v15128_v25, 16  ;;  %12934 = vmatprep.subr.bf16.mxu1 %v14130_v24  ;;  %v596_v12 = vshll.u32 %v15140_v41, 16  ;;  %v601_v55 = vshrl.u32 %v15145_v45, 16 }
  0x66   : > { %v565_v3 = vsel %vm14977_vm2, %v560_v52, %v564_v34  ;;  %v570_v7 = vrot.slane %v569_v54, 4  ;;  %v583_v16 = vor.u32 %v582_v60, %v579_v59  ;;  %v604_v18 = vshll.u32 %v15145_v45, 16  ;;  %v14132_v34 = vld [vmem:[%s19321_s1 + $0x30] sm:$0xff]  }
  0x67   : > { %12903 = vmatmul.mubr.bf16.gmra.mrb[8].mxu1 %v11451_v50  ;;  %v592_v17 = vrot.slane %v590_v2, 4  ;;  %v610_v20 = vshll.u32 %v15151_v58, 16  ;;  %v598_v0 = vrot.slane %v596_v12, 5  ;;  %v603_v26 = vrot.slane %v601_v55, 4  ;;  %v15181_v52 = vld [vmem:[%s14942_s8 + $0x90] sm:$0xf] }
  0x68   : > { %12906 = vmatprep.mubr.bf16.mxu1 %v11452_v8  ;;  %v575_v23 = vsel %vm14977_vm2, %v570_v7, %v574_v57  ;;  %12935 = vmatpush3.bf16.msra.mxu1 %v14130_v24  ;;  %v614_v50 = vshrl.u32 %v15151_v58, 16  ;;  %v584_v31 = vrot.slane %v583_v16, 4  ;;  %v606_v37 = vrot.slane %v604_v18, 5  ;;  %v15176_v8 = vld [vmem:[%s14942_s8 + $0x8c] sm:$0x1] }
  0x69   : > { %v11454_v32 = vcombine.low %v565_v3, %v575_v23  ;;  %v593_v35 = vor.u32 %v592_v17, %v588_v1  ;;  %19439 = vst [vmem:[#allocation13_spill] sm:$0xff] %v15176_v8  ;;  %12936 = vmatprep.subr.bf16.mxu1 %v14131_v46  ;;  %v612_v39 = vrot.slane %v610_v20, 5  ;;  %v620_v24 = vshll.u32 %v15158_v15, 16  ;;  %v15187_v2 = vld [vmem:[%s14942_s8 + $0x94] sm:$0xf]  ;;  %v14133_v3 = vld [vmem:[%s19321_s1 + $0x38] sm:$0xff]  }
  0x6a   : > { %v616_v42 = vrot.slane %v614_v50, 4  ;;  %v625_v43 = vshrl.u32 %v15164_v21, 16  ;;  %v589_v54 = vsel %vm14977_vm2, %v584_v31, %v588_v1  ;;  %v607_v59 = vor.u32 %v606_v37, %v603_v26  ;;  %v15197_v23 = vld [vmem:[%s14942_s8 + $0x98] sm:$0x1]  ;;  %v15201_v37 = vld [vmem:[%s14942_s8 + $0x9c] sm:$0xf] }
  0x6b   : > { %v594_v57 = vrot.slane %v593_v35, 4  ;;  %v628_v60 = vshll.u32 %v15164_v21, 16  ;;  %v622_v12 = vrot.slane %v620_v24, 5  ;;  %v634_v16 = vshll.u32 %v15173_v38, 16  ;;  %19440 = vst [vmem:[#allocation14_spill] sm:$0xff] %v15197_v23 }
  0x6c   : > { %v617_v7 = vor.u32 %v616_v42, %v612_v39  ;;  %v627_v55 = vrot.slane %v625_v43, 4  ;;  %12937 = vmatpush3.bf16.msra.mxu1 %v14131_v46  ;;  %v608_v17 = vrot.slane %v607_v59, 4  ;;  %v638_v20 = vshrl.u32 %v15173_v38, 16  ;;  %v15207_v43 = vld [vmem:[%s14942_s8 + $0xa0] sm:$0xf] }
  0x6d   : > { %v599_v1 = vsel %vm14977_vm2, %v594_v57, %v598_v0  ;;  %v630_v18 = vrot.slane %v628_v60, 5  ;;  %12938 = vmatprep.subr.bf16.mxu1 %v14132_v34  ;;  %v636_v31 = vrot.slane %v634_v16, 5  ;;  %v644_v35 = vshll.u32 %v15176_v8, 16 }
  0x6e   : > { %v11455_v26 = vcombine.low %v589_v54, %v599_v1  ;;  %v618_v50 = vrot.slane %v617_v7, 4  ;;  %v613_v46 = vsel %vm14977_vm2, %v608_v17, %v612_v39  ;;  %v640_v42 = vrot.slane %v638_v20, 4  ;;  %v15216_v39 = vld [vmem:[%s19321_s1 + $0x80] sm:$0xff]  }
  0x6f   : > { %12907 = vmatmul.mubr.bf16.gmra.mrb[12].mxu1 %v11453_v51  ;;  %v631_v0 = vor.u32 %v630_v18, %v627_v55  ;;  %v649_v24 = vshrl.u32 %v15181_v52, 16  ;;  %v646_v57 = vrot.slane %v644_v35, 5  ;;  %v652_v59 = vshll.u32 %v15181_v52, 16  ;;  %19441 = vst [vmem:[#allocation15_spill] sm:$0xff] %v15216_v39  ;;  %v15221_v18 = vld [vmem:[%s14942_s8 + $0xa4] sm:$0x1] }
  0x70   : > { %12910 = vmatprep.mubr.bf16.mxu1 %v11454_v32  ;;  %v623_v54 = vsel %vm14977_vm2, %v618_v50, %v622_v12  ;;  %v658_v51 = vshll.u32 %v15187_v2, 16  ;;  %12939 = vmatpush3.bf16.msra.mxu1 %v14132_v34  ;;  %v641_v32 = vor.u32 %v640_v42, %v636_v31  ;;  %v662_v1 = vshrl.u32 %v15187_v2, 16  ;;  %19442 = vst [vmem:[#allocation16_spill] sm:$0xff] %v15221_v18  ;;  %v15224_v34 = vld [vmem:[%s14942_s8 + $0xa8] sm:$0xf] }
  0x71   : > { %v11456_v60 = vcombine.low %v613_v46, %v623_v54  ;;  %v632_v7 = vrot.slane %v631_v0, 4  ;;  %v651_v55 = vrot.slane %v649_v24, 4  ;;  %12940 = vmatprep.subr.bf16.mxu1 %v14133_v3  ;;  %v654_v16 = vrot.slane %v652_v59, 5  ;;  %v15231_v0 = vld [vmem:[%s14942_s8 + $0xac] sm:$0xf] }
  0x72   : > { %v660_v12 = vrot.slane %v658_v51, 5  ;;  %v668_v17 = vshll.u32 %v15197_v23, 16  ;;  %v642_v50 = vrot.slane %v641_v32, 4  ;;  %v673_v35 = vshrl.u32 %v15201_v37, 16 }
  0x73   : > { %v637_v20 = vsel %vm14977_vm2, %v632_v7, %v636_v31  ;;  %v676_v46 = vshll.u32 %v15201_v37, 16  ;;  %v655_v42 = vor.u32 %v654_v16, %v651_v55  ;;  %v664_v24 = vrot.slane %v662_v1, 4  ;;  %v15239_v55 = vld [vmem:[%s14942_s8 + $0xb0] sm:$0x1] }
  0x74   : > { %v670_v54 = vrot.slane %v668_v17, 5  ;;  %v682_v59 = vshll.u32 %v15207_v43, 16  ;;  %12941 = vmatpush3.bf16.msra.mxu1 %v14133_v3  ;;  %v647_v51 = vsel %vm14977_vm2, %v642_v50, %v646_v57  ;;  %v675_v23 = vrot.slane %v673_v35, 4  ;;  %19443 = vst [vmem:[#allocation17_spill] sm:$0xff] %v15239_v55 }
  0x75   : > { %v678_v8 = vrot.slane %v676_v46, 5  ;;  %v686_v31 = vshrl.u32 %v15207_v43, 16  ;;  %12974 = vmatprep.subr.bf16.mxu1 %v15216_v39  ;;  %v11457_v7 = vcombine.low %v637_v20, %v647_v51  ;;  %v656_v32 = vrot.slane %v655_v42, 4 }
  0x76   : > { %v665_v15 = vor.u32 %v664_v24, %v660_v12  ;;  %v684_v41 = vrot.slane %v682_v59, 5  ;;  %v692_v3 = vshll.u32 %v15221_v18, 16  ;;  %v697_v57 = vshrl.u32 %v15224_v34, 16 }
  0x77   : > { %12911 = vmatmul.mubr.bf16.gmra.mrb[16].mxu1 %v11455_v26  ;;  %v679_v16 = vor.u32 %v678_v8, %v675_v23  ;;  %v688_v1 = vrot.slane %v686_v31, 4  ;;  %v661_v17 = vsel %vm14977_vm2, %v656_v32, %v660_v12  ;;  %v700_v20 = vshll.u32 %v15224_v34, 16  ;;  %v15248_v23 = vld [vmem:[%s14942_s8 + $0xb4] sm:$0xf]  ;;  %v15254_v12 = vld [vmem:[%s14942_s8 + $0xb8] sm:$0xf] }
  0x78   : > { %12914 = vmatprep.mubr.bf16.mxu1 %v11456_v60  ;;  %v666_v50 = vrot.slane %v665_v15, 4  ;;  %v706_v35 = vshll.u32 %v15231_v0, 16  ;;  %v694_v26 = vrot.slane %v692_v3, 5  ;;  %v699_v8 = vrot.slane %v697_v57, 4  ;;  %v15260_v57 = vld [vmem:[%s14942_s8 + $0xbc] sm:$0x1] }
  0x79   : > { %v680_v46 = vrot.slane %v679_v16, 4  ;;  %v689_v42 = vor.u32 %v688_v1, %v684_v41  ;;  %v702_v59 = vrot.slane %v700_v20, 5  ;;  %v710_v51 = vshrl.u32 %v15231_v0, 16  ;;  %v19455_v29 = vld [vmem:[#allocation16_spill] sm:$0xff] }
  0x7a   : > { %v671_v24 = vsel %vm14977_vm2, %v666_v50, %v670_v54  ;;  %v708_v60 = vrot.slane %v706_v35, 5  ;;  %v716_v16 = vshll.u32 %v15239_v55, 16  ;;  %v721_v18 = vshrl.u32 %v15248_v23, 16 }
  0x7b   : > { %v11458_v15 = vcombine.low %v661_v17, %v671_v24  ;;  %v685_v31 = vsel %vm14977_vm2, %v680_v46, %v684_v41  ;;  %v690_v32 = vrot.slane %v689_v42, 4  ;;  %v703_v1 = vor.u32 %v702_v59, %v699_v8 }
  0x7c   : > { %v712_v3 = vrot.slane %v710_v51, 4  ;;  %v724_v54 = vshll.u32 %v15248_v23, 16  ;;  %v718_v20 = vrot.slane %v716_v16, 5  ;;  %v730_v17 = vshll.u32 %v15254_v12, 16 }
  0x7d   : > { %v695_v50 = vsel %vm14977_vm2, %v690_v32, %v694_v26  ;;  %v734_v35 = vshrl.u32 %v15254_v12, 16  ;;  %v704_v41 = vrot.slane %v703_v1, 4  ;;  %v723_v42 = vrot.slane %v721_v18, 4  ;;  %v1353_v1 = vld [vmem:[%s14942_s8 + $0xb4] sm:$0xe] }
  0x7e   : > { %v713_v46 = vor.u32 %v712_v3, %v708_v60  ;;  %v726_v8 = vrot.slane %v724_v54, 5  ;;  %v732_v24 = vrot.slane %v730_v17, 5  ;;  %v740_v51 = vshll.u32 %v15260_v57, 16  ;;  %v1350_v17 = vld [vmem:[%s14942_s8 + $0x90] sm:$0xe] }
  0x7f   : > { %12915 = vmatmul.mubr.bf16.gmra.mrb[20].mxu1 %v11457_v7  ;;  %v736_v59 = vrot.slane %v734_v35, 4  ;;  %v11459_v55 = vcombine.low %v685_v31, %v695_v50  ;;  %v709_v39 = vsel %vm14977_vm2, %v704_v41, %v708_v60  ;;  %v11472_v41 = vcombine.low %v14973_v28, %v14982_v33  ;;  %v19448_v35 = vld [vmem:[#allocation11_spill] sm:$0xff]  ;;  %v1351_v60 = vld [vmem:[%s14942_s8 + $0x9c] sm:$0xe] }
  0x80   : > { %12918 = vmatprep.mubr.bf16.mxu1 %v11458_v15  ;;  %v714_v26 = vrot.slane %v713_v46, 4  ;;  %v727_v32 = vor.u32 %v726_v8, %v723_v42  ;;  %v742_v62 = vrot.slane %v740_v51, 5  ;;  %v1343_v42 = vld [vmem:[%s14942_s8 + $0x3c] sm:$0xe]  ;;  %v19444_v46 = vmov 0  ;;  %v19450_v15 = vld [vmem:[#allocation15_spill] sm:$0xff] }
  0x81   : > { %v737_v16 = vor.u32 %v736_v59, %v732_v24  ;;  %v1341_v59 = vld [vmem:[%s14942_s8 + $0x24] sm:$0xe]  ;;  %v19445_v46 = vsel %vm15307_vm5, 4294967295, %v19444_v46  ;;  %v1429_v28 = vrot.slane %v15052_v44, 5  ;;  %v1440_v44 = vrot.slane %v15090_v27, 5 }
  0x82   : > { %v719_v18 = vsel %vm14977_vm2, %v714_v26, %v718_v20  ;;  %v728_v3 = vrot.slane %v727_v32, 4  ;;  %v11497_v32 = vrot.slane %v1341_v59, 9  ;;  %19446 = vst [vmem:[#allocation18_spill] sm:$0xff] %v19445_v46  ;;  %v1345_v59 = vld [vmem:[%s14942_s8 + $0x54] sm:$0xe]  ;;  %v1457_v20 = vrot.slane %v19448_v35, 5 }
  0x83   : > { %v11460_v31 = vcombine.low %v709_v39, %v719_v18  ;;  %v738_v54 = vrot.slane %v737_v16, 4  ;;  %v1412_v16 = vrot.slane %v15000_v49, 5  ;;  %v1342_v18 = vld [vmem:[%s14942_s8 + $0x30] sm:$0xe]  ;;  %v11471_v39 = vcombine.low %v14959_v11, %v14965_v14 }
  0x84   : > { %v733_v51 = vsel %vm14977_vm2, %v728_v3, %v732_v24  ;;  %v1415_v3 = vrot.slane %v15008_v61, 5  ;;  %v19449_v35 = vld [vmem:[#allocation12_spill] sm:$0xff]  ;;  %v11506_v7 = vrot.slane %v1350_v17, 9 }
  0x85   : > { %v743_v26 = vsel %vm14977_vm2, %v738_v54, %v742_v62  ;;  %v1414_v24 = vrot.slane %v1412_v16, 4  ;;  %v11470_v62 = vcombine.low %v14948_v4, %v14951_v5  ;;  %v11498_v54 = vrot.slane %v1342_v18, 9  ;;  %v1347_v18 = vld [vmem:[%s14942_s8 + $0x6c] sm:$0xe] }
  0x86   : > { %v11461_v8 = vcombine.low %v733_v51, %v743_v26  ;;  %v1419_v26 = vrot.slane %v15024_v13, 5  ;;  %v1422_v4 = vrot.slane %v15029_v19, 5  ;;  %v11499_v5 = vrot.slane %v1343_v42, 9 }
  0x87   : > { %12919 = vmatmul.mubr.bf16.gmra.mrb[24].mxu1 %v11459_v55  ;;  %v1344_v55 = vld [vmem:[%s14942_s8 + $0x48] sm:$0xe]  ;;  %v15326_v51 = vsel %vm15307_vm5, %v1414_v24, %v1415_v3  ;;  %v1433_v42 = vrot.slane %v15065_v63, 5  ;;  %v1464_v50 = vrot.slane %v19449_v35, 5 }
  0x88   : > { %12922 = vmatprep.mubr.bf16.mxu1 %v11460_v31  ;;  %v15314_v31 = vsel %vm15307_vm5, %v11497_v32, %v1412_v16  ;;  %v1426_v32 = vrot.slane %v15042_v36, 5  ;;  %v1346_v16 = vld [vmem:[%s14942_s8 + $0x60] sm:$0xe]  ;;  %v15336_v11 = vsel %vm15307_vm5, %v11498_v54, %v1419_v26  ;;  %v1421_v14 = vrot.slane %v1419_v26, 4  ;;  %v1349_v26 = vld [vmem:[%s14942_s8 + $0x84] sm:$0xe] }
  0x89   : > { %v11500_v33 = vrot.slane %v1344_v55, 9  ;;  %v11501_v54 = vrot.slane %v1345_v59, 9  ;;  %v1443_v55 = vrot.slane %v15095_v40, 5  ;;  %v11503_v59 = vrot.slane %v1347_v18, 9 }
  0x8a   : > { %v15342_v24 = vsel %vm15307_vm5, %v11499_v5, %v1426_v32  ;;  %v1428_v19 = vrot.slane %v1426_v32, 4  ;;  %v15348_v3 = vsel %vm15307_vm5, %v1421_v14, %v1422_v4  ;;  %v1435_v4 = vrot.slane %v1433_v42, 4 }
  0x8b   : > { %v15367_v40 = vsel %vm15307_vm5, %v11501_v54, %v1440_v44  ;;  %v1442_v32 = vrot.slane %v1440_v44, 4  ;;  %v11502_v14 = vrot.slane %v1346_v16, 9  ;;  %v1454_v44 = vrot.slane %v15128_v25, 5 }
  0x8c   : > { %v15357_v5 = vsel %vm15307_vm5, %v1428_v19, %v1429_v28  ;;  %v14139_v28 = vld [vmem:[%s19321_s1 + $0x88] sm:$0xff]   ;;  %v1447_v19 = vrot.slane %v15110_v56, 5  ;;  %v1461_v54 = vrot.slane %v15151_v58, 5 }
  0x8d   : > { %v15383_v16 = vsel %vm15307_vm5, %v1442_v32, %v1443_v55  ;;  %v15396_v55 = vsel %vm15307_vm5, %v11503_v59, %v1454_v44  ;;  %v1456_v32 = vrot.slane %v1454_v44, 4  ;;  %v14142_v44 = vld [vmem:[%s19321_s1 + $0x90] sm:$0xff]  }
  0x8e   : > { %v1449_v18 = vrot.slane %v1447_v19, 4 }
  0x8f   : > { %12923 = vmatmul.mubr.bf16.gmra.mrb[28].mxu1 %v11461_v8  ;;  %v1436_v8 = vrot.slane %v15073_v9, 5  ;;  %v15361_v9 = vsel %vm15307_vm5, %v11500_v33, %v1433_v42  ;;  %v19447_v42 = vld [vmem:[#allocation10_spill] sm:$0xff] }
  0x90   : > { %12942 = vmatprep.mubr.bf16.mxu1 %v11470_v62  ;;  %v1348_v62 = vld [vmem:[%s14942_s8 + $0x78] sm:$0xe]  ;;  %v1450_v61 = vrot.slane %v19447_v42, 5 }
  0x91   : > { %v15375_v33 = vsel %vm15307_vm5, %v1435_v4, %v1436_v8  ;;  %v15392_v4 = vsel %vm15307_vm5, %v11502_v14, %v1447_v19  ;;  %v11504_v42 = vrot.slane %v1348_v62, 9  ;;  %v11505_v62 = vrot.slane %v1349_v26, 9  ;;  %v19451_v19 = vld [vmem:[#allocation13_spill] sm:$0xff]  ;;  %v1352_v8 = vld [vmem:[%s14942_s8 + $0xa8] sm:$0xe] }
  0x92   : > { %v15404_v14 = vsel %vm15307_vm5, %v1449_v18, %v1450_v61  ;;  %v1471_v59 = vrot.slane %v19451_v19, 5  ;;  %v1463_v26 = vrot.slane %v1461_v54, 4  ;;  %v11507_v18 = vrot.slane %v1351_v60, 9 }
  0x93   : > { %v15420_v61 = vsel %vm15307_vm5, %v11504_v42, %v1461_v54  ;;  %v1475_v54 = vrot.slane %v15187_v2, 5  ;;  %v19454_v42 = vld [vmem:[#allocation14_spill] sm:$0xff] }
  0x95   : > { %v1477_v60 = vrot.slane %v1475_v54, 4 }
  0x97   : > { %12943 = vmatmul.mubr.bf16.vlgmr.msra.gmra.mrb[0].mxu1 %v11471_v39  ;;  %v1468_v39 = vrot.slane %v15173_v38, 5 }
  0x98   : > { %12975 = vmatpush3.bf16.msra.mxu1 %v19450_v15  ;;  %12946 = vmatprep.mubr.bf16.mxu1 %v11472_v41  ;;  %v15416_v41 = vsel %vm15307_vm5, %v1456_v32, %v1457_v20  ;;  %v14145_v20 = vld [vmem:[%s19321_s1 + $0x98] sm:$0xff]   ;;  %v15434_v32 = vsel %vm15307_vm5, %v1463_v26, %v1464_v50  ;;  %v1478_v15 = vrot.slane %v19454_v42, 5  ;;  %v15450_v26 = vsel %vm15307_vm5, %v11506_v7, %v1475_v54 }
  0x99   : > { %12976 = vmatprep.subr.bf16.mxu1 %v14139_v28  ;;  %19452 = vst [vmem:[#allocation10_spill] sm:$0xff] %v15416_v41  ;;  %v15426_v35 = vsel %vm15307_vm5, %v11505_v62, %v1468_v39  ;;  %v1470_v19 = vrot.slane %v1468_v39, 4  ;;  %19453 = vst [vmem:[#allocation11_spill] sm:$0xff] %v15434_v32  ;;  %v1482_v39 = vrot.slane %v15207_v43, 5  ;;  %v1485_v41 = vrot.slane %v19455_v29, 5  ;;  %v19456_v62 = vld [vmem:[#allocation17_spill] sm:$0xff] }
  0x9a   : > { %v1492_v32 = vrot.slane %v19456_v62, 5  ;;  %v19457_v29 = vcombine.low %v14997_v48, %v15000_v49  ;;  %v15463_v50 = vsel %vm15307_vm5, %v1477_v60, %v1478_v15  ;;  %v11509_v7 = vrot.slane %v1353_v1, 9 }
  0x9b   : > { %v15442_v17 = vsel %vm15307_vm5, %v1470_v19, %v1471_v59  ;;  %v15454_v42 = vsel %vm15307_vm5, %v11507_v18, %v1482_v39  ;;  %v1484_v59 = vrot.slane %v1482_v39, 4  ;;  %v1489_v19 = vrot.slane %v15231_v0, 5 }
  0x9c   : > { %12977 = vmatpush3.bf16.msra.mxu1 %v14139_v28  ;;  %v11508_v28 = vrot.slane %v1352_v8, 9  ;;  %v1496_v8 = vrot.slane %v15254_v12, 5  ;;  %v1499_v54 = vrot.slane %v15260_v57, 5  ;;  %v19458_v18 = vcombine.low %v15016_v6, %v15024_v13  ;;  %v14148_v57 = vld [vmem:[%s19321_s1 + $0xa0] sm:$0xff]  }
  0x9d   : > { %12978 = vmatprep.subr.bf16.mxu1 %v14142_v44  ;;  %v11522_v62 = vcombine.low %v15450_v26, %v15463_v50  ;;  %v15474_v48 = vsel %vm15307_vm5, %v1484_v59, %v1485_v41  ;;  %v1491_v1 = vrot.slane %v1489_v19, 4  ;;  %v14151_v41 = vld [vmem:[%s19321_s1 + $0xa8] sm:$0xff]   ;;  %v19460_v59 = vcombine.low %v15058_v53, %v15065_v63  ;;  %v14158_v53 = vld [vmem:[%s19321_s1 + $0xc0] sm:$0xff]   ;;  %v14173_v50 = vld [vmem:[%s19322_s2 + $0x10] ss:$8 sps:$4 sm:$0xff]  }
  0x9e   : > { %v15478_v49 = vsel %vm15307_vm5, %v11508_v28, %v1489_v19  ;;  %v11523_v6 = vcombine.low %v15454_v42, %v15474_v48  ;;  %v15487_v13 = vsel %vm15307_vm5, %v11509_v7, %v1496_v8  ;;  %v14154_v19 = vld [vmem:[%s19321_s1 + $0xb0] sm:$0xff]   ;;  %v19463_v63 = vcombine.low %v15121_v10, %v15128_v25  ;;  %v14180_v26 = vld [vmem:[%s19322_s2 + $0x24] ss:$8 sps:$4 sm:$0xff]   ;;  %v14178_v48 = vld [vmem:[%s19322_s2 + $0x20] ss:$8 sps:$4 sm:$0xff]  }
  0x9f   : > { %12947 = vmatmul.mubr.bf16.gmra.mrb[4].mxu1 %v19457_v29  ;;  %v15491_v15 = vsel %vm15307_vm5, %v1491_v1, %v1492_v32  ;;  %v19459_v32 = vcombine.low %v15039_v30, %v15042_v36  ;;  %v19461_v30 = vcombine.low %v15081_v22, %v15090_v27  ;;  %v19462_v36 = vcombine.low %v15104_v47, %v15110_v56  ;;  %v14630_v27 = vld [vmem:[%s14942_s8 + $0x4] sm:$0xf]  ;;  %v1338_v56 = vld [vmem:[%s14942_s8] sm:$0xe]  ;;  %v14631_v29 = vld [vmem:[%s14942_s8 + $0x8] sm:$0x1] }
  0xa0   : > { %12950 = vmatprep.mubr.bf16.mxu1 %v19458_v18  ;;  %12979 = vmatpush3.bf16.msra.mxu1 %v14142_v44  ;;  %v1498_v44 = vrot.slane %v1496_v8, 4  ;;  %v11524_v39 = vcombine.low %v15478_v49, %v15491_v15  ;;  %v19464_v22 = vcombine.low %v15145_v45, %v15151_v58  ;;  %v1391_v47 = vrot.slane %v14630_v27, 5  ;;  %v1339_v58 = vld [vmem:[%s14942_s8 + $0xc] sm:$0xe]  ;;  %v1340_v18 = vld [vmem:[%s14942_s8 + $0x18] sm:$0xe] }
  0xa1   : > { %12980 = vmatprep.subr.bf16.mxu1 %v14145_v20  ;;  %v1394_v7 = vrot.slane %v14631_v29, 5  ;;  %v19465_v8 = vcombine.low %v15164_v21, %v15173_v38  ;;  %v19466_v10 = vcombine.low %v15181_v52, %v15187_v2  ;;  %v11494_v25 = vrot.slane %v1338_v56, 9  ;;  %v14633_v38 = vld [vmem:[%s14942_s8 + $0x1c] sm:$0xf]  ;;  %v14159_v56 = vld [vmem:[%s19321_s1 + $0xc8] sm:$0xff]   ;;  %v14160_v29 = vld [vmem:[%s19321_s1 + $0xd0] sm:$0xff]  }
  0xa2   : > { %v15500_v60 = vsel %vm15307_vm5, %v1498_v44, %v1499_v54  ;;  %v1393_v54 = vrot.slane %v1391_v47, 4  ;;  %v19467_v45 = vcombine.low %v15201_v37, %v15207_v43  ;;  %v19468_v1 = vcombine.low %v15224_v34, %v15231_v0  ;;  %v14172_v42 = vld [vmem:[%s14942_s8 + $0x30] sm:$0xff]   ;;  %v14177_v15 = vld [vmem:[%s14942_s8 + $0x48] sm:$0xff]  }
  0xa3   : > { %v11525_v28 = vcombine.low %v15487_v13, %v15500_v60  ;;  %v1405_v44 = vrot.slane %v14633_v38, 5  ;;  %v1392_v52 = vsel %vm15307_vm5, %v11494_v25, %v1391_v47  ;;  %v11495_v43 = vrot.slane %v1339_v58, 9  ;;  %v14163_v25 = vld [vmem:[%s19321_s1 + $0xe8] sm:$0xff]   ;;  %v14185_v49 = vld [vmem:[%s19322_s2 + $0x34] ss:$8 sps:$4 sm:$0xff]  }
  0xa4   : > { %12981 = vmatpush3.bf16.msra.mxu1 %v14145_v20  ;;  %v14157_v20 = vld [vmem:[%s19321_s1 + $0xb8] sm:$0xff]   ;;  %v1395_v2 = vsel %vm15307_vm5, %v1393_v54, %v1394_v7  ;;  %v19469_v0 = vcombine.low %v15248_v23, %v15254_v12  ;;  %v14190_v13 = vld [vmem:[%s19322_s2 + $0x44] ss:$8 sps:$4 sm:$0xff]   ;;  %v14188_v60 = vld [vmem:[%s19322_s2 + $0x40] ss:$8 sps:$4 sm:$0xff]  }
  0xa5   : > { %12982 = vmatprep.subr.bf16.mxu1 %v14148_v57  ;;  %v14161_v7 = vld [vmem:[%s19321_s1 + $0xd8] sm:$0xff]   ;;  %v14200_v58 = vld [vmem:[%s19322_s2 + $0x64] ss:$8 sps:$4 sm:$0xff]  }
  0xa6   : > { %v14203_v38 = vld [vmem:[%s19322_s2 + $0x70] ss:$8 sps:$4 sm:$0xff]  }
  0xa7   : > { %12951 = vmatmul.mubr.bf16.gmra.mrb[8].mxu1 %v19459_v32  ;;  %v11496_v32 = vrot.slane %v1340_v18, 9  ;;  %v14182_v18 = vld [vmem:[%s14942_s8 + $0x60] sm:$0xff]  }
  0xa8   : > { %12954 = vmatprep.mubr.bf16.mxu1 %v19460_v59  ;;  %12983 = vmatpush3.bf16.msra.mxu1 %v14148_v57  ;;  %v14632_v57 = vld [vmem:[%s14942_s8 + $0x10] sm:$0xf]  ;;  %v11510_v59 = vcombine.low %v1392_v52, %v1395_v2  ;;  %v14187_v52 = vld [vmem:[%s14942_s8 + $0x78] sm:$0xff]   ;;  %v14191_v2 = vld [vmem:[%s14942_s8 + $0x84] sm:$0xff]  }
  0xa9   : > { %12984 = vmatprep.subr.bf16.mxu1 %v14151_v41  ;;  %v1398_v21 = vrot.slane %v14632_v57, 5  ;;  %v1406_v23 = vsel %vm15307_vm5, %v11496_v32, %v1405_v44  ;;  %v14198_v57 = vld [vmem:[%s19322_s2 + $0x60] ss:$8 sps:$4 sm:$0xff]  }
  0xaa   : > { %v14196_v32 = vld [vmem:[%s14942_s8 + $0x9c] sm:$0xff]  }
  0xac   : > { %12985 = vmatpush3.bf16.msra.mxu1 %v14151_v41  ;;  %v14634_v41 = vld [vmem:[%s14942_s8 + $0x14] sm:$0x1] }
  0xad   : > { %12986 = vmatprep.subr.bf16.mxu1 %v14154_v19  ;;  %v1401_v37 = vrot.slane %v14634_v41, 5  ;;  %v14192_v41 = vld [vmem:[%s14942_s8 + $0x90] sm:$0xff]  }
  0xaf   : > { %12955 = vmatmul.mubr.bf16.gmra.mrb[12].mxu1 %v19461_v30  ;;  %v14635_v30 = vld [vmem:[%s14942_s8 + $0x20] sm:$0x1] }
  0xb0   : > { %12958 = vmatprep.mubr.bf16.mxu1 %v19462_v36  ;;  %12987 = vmatpush3.bf16.msra.mxu1 %v14154_v19  ;;  %v1400_v19 = vrot.slane %v1398_v21, 4  ;;  %v1408_v34 = vrot.slane %v14635_v30, 5  ;;  %v1399_v36 = vsel %vm15307_vm5, %v11495_v43, %v1398_v21  ;;  %v14205_v21 = vld [vmem:[%s19322_s2 + $0x74] ss:$8 sps:$4 sm:$0xff]   ;;  %v11591_v43 = vld [vmem:[%s14942_s8 + $0x10] sm:$0xf] }
  0xb1   : > { %12988 = vmatprep.subr.bf16.mxu1 %v14157_v20  ;;  %v2270_v30 = vshrl.u32 %v11591_v43, 16 }
  0xb4   : > { %12989 = vmatpush3.bf16.msra.mxu1 %v14157_v20  ;;  %v1407_v20 = vrot.slane %v1405_v44, 4  ;;  %v15693_v44 = vld [vmem:[%s19321_s1 + $0x140] sm:$0xff]  }
  0xb5   : > { %13022 = vmatprep.subr.bf16.mxu1 %v14158_v53 }
  0xb6   : > { %v1409_v12 = vsel %vm15307_vm5, %v1407_v20, %v1408_v34  ;;  %v2266_v20 = vshll.u32 %v11591_v43, 16 }
  0xb7   : > { %12959 = vmatmul.mubr.bf16.gmra.mrb[16].mxu1 %v19463_v63  ;;  %v1402_v63 = vsel %vm15307_vm5, %v1400_v19, %v1401_v37  ;;  %v11512_v47 = vcombine.low %v1406_v23, %v1409_v12  ;;  %v11590_v37 = vld [vmem:[%s14942_s8 + $0xc] sm:$0xf]  ;;  %v11592_v12 = vld [vmem:[%s14942_s8 + $0x14] sm:$0x1] }
  0xb8   : > { %12962 = vmatprep.mubr.bf16.mxu1 %v19464_v22  ;;  %v19343_v22 = vmov 0   ;;  %v11511_v27 = vcombine.low %v1399_v36, %v1402_v63  ;;  %v2260_v19 = vshll.u32 %v11590_v37, 16  ;;  %v2268_v36 = vrot.slane %v2266_v20, 5  ;;  %v14197_v23 = vld [vmem:[%s14942_s8 + $0xa8] sm:$0xff]  }
  0xb9   : > { %5460 = vst [vmem:[#allocation2] sm:$0xf] %v19343_v22  ;;  %5461 = vst [vmem:[#allocation2 + $0x4] sm:$0xf] %v19343_v22  ;;  %v2272_v63 = vrot.slane %v2270_v30, 4  ;;  %v14207_v20 = vld [vmem:[%s19321_s1 + $0x148] sm:$0xff]  }
  0xba   : > { %5462 = vst [vmem:[#allocation2 + $0x8] sm:$0x1] %v19343_v22  ;;  %5464 = vst [vmem:[#allocation2 + $0xcc] sm:$0xf] %v19343_v22 }
  0xbb   : > { %5465 = vst [vmem:[#allocation2 + $0xd0] sm:$0xf] %v19343_v22  ;;  %5466 = vst [vmem:[#allocation2 + $0xd4] sm:$0x1] %v19343_v22 }
  0xbf   : > { %12963 = vmatmul.mubr.bf16.gmra.mrb[20].mxu1 %v19465_v8  ;;  %v19470_v8 = vcombine.low %v15314_v31, %v15326_v51  ;;  %v19472_v31 = vcombine.low %v15342_v24, %v15357_v5  ;;  %v19473_v51 = vcombine.low %v15361_v9, %v15375_v33  ;;  %v19474_v24 = vcombine.low %v15367_v40, %v15383_v16  ;;  %v14170_v9 = vld [vmem:[%s19322_s2 + $0x4] ss:$8 sps:$4 sm:$0xff]  }
  0xc0   : > { %12966 = vmatprep.mubr.bf16.mxu1 %v19466_v10  ;;  %v19471_v10 = vcombine.low %v15336_v11, %v15348_v3  ;;  %v14164_v11 = vld [vmem:[%s19321_s1 + $0xf0] sm:$0xff]   ;;  %v14165_v3 = vld [vmem:[%s19321_s1 + $0xf8] sm:$0xff]   ;;  %v19475_v5 = vcombine.low %v15392_v4, %v15404_v14  ;;  %v19476_v33 = vld [vmem:[#allocation10_spill] sm:$0xff]  ;;  %v19480_v4 = vcombine.low %v15426_v35, %v15442_v17 }
  0xc1   : > { %v19477_v54 = vcombine.low %v15396_v55, %v19476_v33  ;;  %v19478_v40 = vld [vmem:[#allocation11_spill] sm:$0xff]  ;;  %v14167_v14 = vld [vmem:[%s14942_s8 + $0x18] sm:$0xff]  }
  0xc2   : > { %v19479_v16 = vcombine.low %v15420_v61, %v19478_v40  ;;  %v14166_v55 = vld [vmem:[%s14942_s8 + $0xc] sm:$0xff]   ;;  %v14168_v61 = vld [vmem:[%s19322_s2] ss:$8 sps:$4 sm:$0xff]   ;;  %v14175_v17 = vld [vmem:[%s19322_s2 + $0x14] ss:$8 sps:$4 sm:$0xff]  }
  0xc3   : > { %v14171_v35 = vld [vmem:[%s14942_s8 + $0x24] sm:$0xff]  }
  0xc4   : > { %v11597_v33 = vld [vmem:[%s14942_s8 + $0x28] sm:$0xf] }
  0xc7   : > { %12967 = vmatmul.mubr.bf16.gmra.mrb[24].mxu1 %v19467_v45  ;;  %v14193_v45 = vld [vmem:[%s19322_s2 + $0x50] ss:$8 sps:$4 sm:$0xff]  }
  0xc8   : > { %12970 = vmatprep.mubr.bf16.mxu1 %v19468_v1  ;;  %v14186_v1 = vld [vmem:[%s14942_s8 + $0x6c] sm:$0xff]  }
  0xcf   : > { %12971 = vmatmul.mubr.bf16.gmra.mrb[28].mxu1 %v19469_v0  ;;  %v2262_v0 = vrot.slane %v2260_v19, 5 }
  0xd0   : > { %12990 = vmatprep.mubr.bf16.mxu1 %v11510_v59  ;;  %v2257_v59 = vshrl.u32 %v11590_v37, 16 }
  0xd2   : > { %v2259_v34 = vrot.slane %v2257_v59, 4 }
  0xd7   : > { %12991 = vmatmul.mubr.bf16.vlgmr.msra.gmra.mrb[0].mxu1 %v11511_v27  ;;  %v14201_v27 = vld [vmem:[%s14942_s8 + $0xb4] sm:$0xff]  }
  0xd8   : > { %13023 = vmatpush3.bf16.msra.mxu1 %v14158_v53  ;;  %12994 = vmatprep.mubr.bf16.mxu1 %v11512_v47  ;;  %v14162_v53 = vld [vmem:[%s19321_s1 + $0xe0] sm:$0xff]   ;;  %v11593_v47 = vld [vmem:[%s14942_s8 + $0x18] sm:$0xf] }
  0xd9   : > { %13024 = vmatprep.subr.bf16.mxu1 %v14159_v56 }
  0xdc   : > { %13025 = vmatpush3.bf16.msra.mxu1 %v14159_v56  ;;  %v11594_v56 = vld [vmem:[%s14942_s8 + $0x1c] sm:$0xf] }
  0xdd   : > { %13026 = vmatprep.subr.bf16.mxu1 %v14160_v29 }
  0xdf   : > { %12995 = vmatmul.mubr.bf16.gmra.mrb[4].mxu1 %v19470_v8  ;;  %v2276_v8 = vshll.u32 %v11592_v12, 16 }
  0xe0   : > { %12998 = vmatprep.mubr.bf16.mxu1 %v19471_v10  ;;  %13027 = vmatpush3.bf16.msra.mxu1 %v14160_v29  ;;  %v2263_v29 = vor.u32 %v2262_v0, %v2259_v34  ;;  %v2281_v10 = vshrl.u32 %v11593_v47, 16 }
  0xe1   : > { %13028 = vmatprep.subr.bf16.mxu1 %v14161_v7 }
  0xe2   : > { %v2283_v40 = vrot.slane %v2281_v10, 4 }
  0xe4   : > { %13029 = vmatpush3.bf16.msra.mxu1 %v14161_v7  ;;  %v2273_v7 = vor.u32 %v2272_v63, %v2268_v36 }
  0xe5   : > { %13030 = vmatprep.subr.bf16.mxu1 %v14162_v53 }
  0xe7   : > { %12999 = vmatmul.mubr.bf16.gmra.mrb[8].mxu1 %v19472_v31  ;;  %v2294_v31 = vshrl.u32 %v11594_v56, 16 }
  0xe8   : > { %13002 = vmatprep.mubr.bf16.mxu1 %v19473_v51  ;;  %13031 = vmatpush3.bf16.msra.mxu1 %v14162_v53  ;;  %v2284_v53 = vshll.u32 %v11593_v47, 16  ;;  %v3137_v51 = vrot.slane %v11594_v56, 5 }
  0xe9   : > { %13032 = vmatprep.subr.bf16.mxu1 %v14163_v25 }
  0xec   : > { %13033 = vmatpush3.bf16.msra.mxu1 %v14163_v25  ;;  %v2290_v25 = vshll.u32 %v11594_v56, 16 }
  0xed   : > { %13034 = vmatprep.subr.bf16.mxu1 %v14164_v11 }
  0xef   : > { %13003 = vmatmul.mubr.bf16.gmra.mrb[12].mxu1 %v19474_v24  ;;  %v2264_v24 = vrot.slane %v2263_v29, 4 }
  0xf0   : > { %13006 = vmatprep.mubr.bf16.mxu1 %v19475_v5  ;;  %13035 = vmatpush3.bf16.msra.mxu1 %v14164_v11  ;;  %v11596_v11 = vld [vmem:[%s14942_s8 + $0x24] sm:$0xf]  ;;  %v2274_v5 = vrot.slane %v2273_v7, 4 }
  0xf1   : > { %13036 = vmatprep.subr.bf16.mxu1 %v14165_v3 }
  0xf4   : > { %13037 = vmatpush3.bf16.msra.mxu1 %v14165_v3  ;;  %v14202_v3 = vld [vmem:[%s14942_s8 + $0xc0] sm:$0xff]  }
  0xf5   : > { %2800 = vmatprep.subr.bf16.mxu1 %v14170_v9  ;;  %v2278_v9 = vrot.slane %v2276_v8, 5 }
  0xf7   : > { %13007 = vmatmul.mubr.bf16.gmra.mrb[16].mxu1 %v19477_v54  ;;  %v11595_v54 = vld [vmem:[%s14942_s8 + $0x20] sm:$0x1] }
  0xf8   : > { %13010 = vmatprep.mubr.bf16.mxu1 %v19479_v16  ;;  %v2286_v16 = vrot.slane %v2284_v53, 5  ;;  %v11601_v53 = vld [vmem:[%s14942_s8 + $0x38] sm:$0x1] }
  0xff   : > { %13011 = vmatmul.mubr.bf16.gmra.mrb[20].mxu1 %v19480_v4  ;;  %v2292_v4 = vrot.slane %v2290_v25, 5  ;;  %v11602_v25 = vld [vmem:[%s14942_s8 + $0x3c] sm:$0xf] }
 0x100   : > { %13014 = vmatprep.mubr.bf16.mxu1 %v11522_v62  ;;  %v14176_v62 = vld [vmem:[%s14942_s8 + $0x3c] sm:$0xff]  }
 0x107   : > { %13015 = vmatmul.mubr.bf16.gmra.mrb[24].mxu1 %v11523_v6  ;;  %v14183_v6 = vld [vmem:[%s19322_s2 + $0x30] ss:$8 sps:$4 sm:$0xff]  }
 0x108   : > { %13018 = vmatprep.mubr.bf16.mxu1 %v11524_v39  ;;  %v14181_v39 = vld [vmem:[%s14942_s8 + $0x54] sm:$0xff]  }
 0x10f   : > { %13019 = vmatmul.mubr.bf16.gmra.mrb[28].mxu1 %v11525_v28  ;;  %v14195_v28 = vld [vmem:[%s19322_s2 + $0x54] ss:$8 sps:$4 sm:$0xff]  }
 0x110   : > { %13038 = vmatprep.mubr.bf16.mxu1 %v14166_v55  ;;  %v2296_v55 = vrot.slane %v2294_v31, 4  ;;  %v15747_v31 = vld [vmem:[%s14942_s8 + $0x40] sm:$0xf] }
 0x117   : > { %13039 = vmatmul.mubr.bf16.vlgmr.msra.gmra.mrb[0].mxu1 %v14167_v14  ;;  %v3139_v14 = vrot.slane %v3137_v51, 4 }
 0x118   : > { %2801 = vmatpush1.bf16.msra.mxu1 %v14168_v61  ;;  %13042 = vmatprep.mubr.bf16.mxu1 %v14171_v35  ;;  %v3140_v61 = vrot.slane %v11595_v54, 5  ;;  %v2305_v35 = vshrl.u32 %v11596_v11, 16 }
 0x119   : > { %2802 = vmatprep.subr.bf16.mxu1 %v14175_v17  ;;  %v2308_v17 = vshll.u32 %v11596_v11, 16 }
 0x11c   : > { %2803 = vmatpush1.bf16.msra.mxu1 %v14173_v50  ;;  %v2314_v50 = vshll.u32 %v11597_v33, 16 }
 0x11d   : > { %2804 = vmatprep.subr.bf16.mxu1 %v14180_v26  ;;  %v2318_v26 = vshrl.u32 %v11597_v33, 16  ;;  %v2348_v33 = vshll.u32 %v11601_v53, 16 }
 0x11f   : > { %13043 = vmatmul.mubr.bf16.gmra.mrb[4].mxu1 %v14172_v42 }
 0x120   : > { %13046 = vmatprep.mubr.bf16.mxu1 %v14176_v62  ;;  %2805 = vmatpush1.bf16.msra.mxu1 %v14178_v48  ;;  %v2269_v62 = vsel %vm14977_vm2, %v2264_v24, %v2268_v36  ;;  %v2279_v48 = vsel %vm14977_vm2, %v2274_v5, %v2278_v9  ;;  %v11605_v24 = vld [vmem:[%s14942_s8 + $0x48] sm:$0xf]  ;;  %v14209_v5 = vld [vmem:[%s19321_s1 + $0x158] sm:$0xff]  }
 0x121   : > { %2806 = vmatprep.subr.bf16.mxu1 %v14185_v49  ;;  %v2287_v49 = vor.u32 %v2286_v16, %v2283_v40  ;;  %v2356_v40 = vshll.u32 %v11602_v25, 16  ;;  %v11606_v16 = vld [vmem:[%s14942_s8 + $0x4c] sm:$0xf] }
 0x124   : > { %2807 = vmatpush1.bf16.msra.mxu1 %v14183_v6  ;;  %v2300_v6 = vshll.u32 %v11595_v54, 16  ;;  %v2353_v54 = vshrl.u32 %v11602_v25, 16 }
 0x125   : > { %2808 = vmatprep.subr.bf16.mxu1 %v14190_v13  ;;  %v2297_v13 = vor.u32 %v2296_v55, %v2292_v4  ;;  %v2366_v55 = vshrl.u32 %v15747_v31, 16 }
 0x126   : > { %v2302_v37 = vrot.slane %v2300_v6, 5 }
 0x127   : > { %13047 = vmatmul.mubr.bf16.gmra.mrb[8].mxu1 %v14177_v15  ;;  %v2307_v15 = vrot.slane %v2305_v35, 4  ;;  %v11608_v35 = vld [vmem:[%s14942_s8 + $0x54] sm:$0xf] }
 0x128   : > { %13050 = vmatprep.mubr.bf16.mxu1 %v14181_v39  ;;  %2809 = vmatpush1.bf16.msra.mxu1 %v14188_v60  ;;  %v2310_v39 = vrot.slane %v2308_v17, 5  ;;  %v11672_v60 = vld [vmem:[%s14942_s8 + $0x18] sm:$0xe] }
 0x129   : > { %2810 = vmatprep.subr.bf16.mxu1 %v14195_v28  ;;  %v15719_v28 = vsel %vm15307_vm5, %v3139_v14, %v3140_v61  ;;  %v2377_v14 = vshrl.u32 %v11605_v24, 16  ;;  %v2380_v61 = vshll.u32 %v11605_v24, 16  ;;  %v15764_v17 = vld [vmem:[%s14942_s8 + $0x58] sm:$0xf] }
 0x12a   : > { %v2311_v43 = vor.u32 %v2310_v39, %v2307_v15  ;;  %v2355_v15 = vrot.slane %v2353_v54, 4  ;;  %v2358_v39 = vrot.slane %v2356_v40, 5 }
 0x12c   : > { %2811 = vmatpush1.bf16.msra.mxu1 %v14193_v45  ;;  %v2316_v45 = vrot.slane %v2314_v50, 5  ;;  %v2312_v12 = vrot.slane %v2311_v43, 4  ;;  %v14211_v43 = vld [vmem:[%s19321_s1 + $0x168] sm:$0xff]  }
 0x12d   : > { %2812 = vmatprep.subr.bf16.mxu1 %v14200_v58  ;;  %v2320_v58 = vrot.slane %v2318_v26, 4 }
 0x12f   : > { %13051 = vmatmul.mubr.bf16.gmra.mrb[12].mxu1 %v14182_v18  ;;  %v11688_v18 = vrot.slane %v11672_v60, 9  ;;  %v2321_v59 = vor.u32 %v2320_v58, %v2316_v45  ;;  %v2401_v60 = vshrl.u32 %v11608_v35, 16  ;;  %v2410_v58 = vshll.u32 %v15764_v17, 16 }
 0x130   : > { %13054 = vmatprep.mubr.bf16.mxu1 %v14186_v1  ;;  %2813 = vmatpush1.bf16.msra.mxu1 %v14198_v57  ;;  %v11598_v1 = vld [vmem:[%s14942_s8 + $0x2c] sm:$0x1]  ;;  %v11599_v57 = vld [vmem:[%s14942_s8 + $0x30] sm:$0xf] }
 0x131   : > { %2814 = vmatprep.subr.bf16.mxu1 %v14205_v21  ;;  %v11638_v21 = vcombine.low %v2269_v62, %v2279_v48  ;;  %v2324_v19 = vshll.u32 %v11598_v1, 16  ;;  %v2329_v30 = vshrl.u32 %v11599_v57, 16  ;;  %v2332_v34 = vshll.u32 %v11599_v57, 16 }
 0x132   : > { %v2386_v62 = vshll.u32 %v11606_v16, 16  ;;  %v2390_v48 = vshrl.u32 %v11606_v16, 16  ;;  %v2368_v57 = vrot.slane %v2366_v55, 4  ;;  %v14213_v55 = vld [vmem:[%s19321_s1 + $0x178] sm:$0xff]  }
 0x133   : > { %v2326_v47 = vrot.slane %v2324_v19, 5  ;;  %v2331_v56 = vrot.slane %v2329_v30, 4  ;;  %v2334_v29 = vrot.slane %v2332_v34, 5  ;;  %v11611_v30 = vld [vmem:[%s14942_s8 + $0x60] sm:$0xf]  ;;  %v2403_v34 = vrot.slane %v2401_v60, 4 }
 0x134   : > { %2815 = vmatpush1.bf16.msra.mxu1 %v14203_v38  ;;  %v2288_v38 = vrot.slane %v2287_v49, 4  ;;  %v14210_v49 = vld [vmem:[%s19321_s1 + $0x160] sm:$0xff]   ;;  %v15829_v60 = vld [vmem:[%s14942_s8 + $0x70] sm:$0xf] }
 0x135   : > { %13070 = vmatprep.subr.bf16.mxu1 %v15693_v44 }
 0x136   : > { %v2293_v63 = vsel %vm14977_vm2, %v2288_v38, %v2292_v4  ;;  %v2362_v4 = vshll.u32 %v15747_v31, 16  ;;  %v2382_v38 = vrot.slane %v2380_v61, 5 }
 0x137   : > { %13055 = vmatmul.mubr.bf16.gmra.mrb[16].mxu1 %v14187_v52  ;;  %v11600_v52 = vld [vmem:[%s14942_s8 + $0x34] sm:$0xf] }
 0x138   : > { %13058 = vmatprep.mubr.bf16.mxu1 %v14191_v2  ;;  %v15726_v2 = vsel %vm15307_vm5, %v11688_v18, %v3137_v51  ;;  %v2338_v0 = vshll.u32 %v11600_v52, 16  ;;  %v2342_v36 = vshrl.u32 %v11600_v52, 16  ;;  %v2317_v51 = vsel %vm14977_vm2, %v2312_v12, %v2316_v45  ;;  %v15774_v52 = vld [vmem:[%s14942_s8 + $0x44] sm:$0x1] }
 0x139   : > { %v2404_v45 = vshll.u32 %v11608_v35, 16  ;;  %v2414_v18 = vshrl.u32 %v15764_v17, 16  ;;  %v15771_v1 = vrot.slane %v2362_v4, 5  ;;  %v11614_v35 = vld [vmem:[%s14942_s8 + $0x6c] sm:$0xf] }
 0x13a   : > { %v15742_v7 = vrot.slane %v2338_v0, 5  ;;  %v2344_v8 = vrot.slane %v2342_v36, 4  ;;  %v15790_v36 = vrot.slane %v2410_v58, 5  ;;  %v15834_v58 = vld [vmem:[%s19321_s1 + $0x180] sm:$0xff]  }
 0x13b   : > { %v2406_v0 = vrot.slane %v2404_v45, 5  ;;  %v2369_v12 = vor.u32 %v2368_v57, %v15771_v1  ;;  %v2449_v45 = vshrl.u32 %v11614_v35, 16  ;;  %v11617_v57 = vld [vmem:[%s14942_s8 + $0x78] sm:$0xf] }
 0x13c   : > { %v2345_v9 = vor.u32 %v2344_v8, %v15742_v7  ;;  %v2428_v8 = vshll.u32 %v11611_v30, 16 }
 0x13d   : > { %v2407_v25 = vor.u32 %v2406_v0, %v2403_v34  ;;  %v11620_v34 = vld [vmem:[%s14942_s8 + $0x84] sm:$0xf] }
 0x13e   : > { %v2346_v6 = vrot.slane %v2345_v9, 4  ;;  %v2430_v4 = vrot.slane %v2428_v8, 5  ;;  %v15868_v8 = vld [vmem:[%s14942_s8 + $0x94] sm:$0xf] }
 0x13f   : > { %13059 = vmatmul.mubr.bf16.gmra.mrb[20].mxu1 %v14192_v41  ;;  %v2298_v41 = vrot.slane %v2297_v13, 4  ;;  %v2350_v13 = vrot.slane %v2348_v33, 5 }
 0x140   : > { %13062 = vmatprep.mubr.bf16.mxu1 %v14196_v32 }
 0x141   : > { %v2351_v19 = vsel %vm14977_vm2, %v2346_v6, %v2350_v13 }
 0x147   : > { %13063 = vmatmul.mubr.bf16.gmra.mrb[24].mxu1 %v14197_v23  ;;  %v2303_v23 = vsel %vm14977_vm2, %v2298_v41, %v2302_v37  ;;  %v15776_v41 = vrot.slane %v2386_v62, 5  ;;  %v2392_v37 = vrot.slane %v2390_v48, 4 }
 0x148   : > { %13066 = vmatprep.mubr.bf16.mxu1 %v14201_v27  ;;  %v2322_v27 = vrot.slane %v2321_v59, 4  ;;  %v11639_v10 = vcombine.low %v2293_v63, %v2303_v23  ;;  %v2416_v63 = vrot.slane %v2414_v18, 4  ;;  %v2359_v23 = vor.u32 %v2358_v39, %v2355_v15  ;;  %v15826_v15 = vld [vmem:[%s14942_s8 + $0x68] sm:$0x1] }
 0x14a   : > { %v2327_v11 = vsel %vm14977_vm2, %v2322_v27, %v2326_v47  ;;  %v2372_v27 = vshll.u32 %v15774_v52, 16  ;;  %v2360_v24 = vrot.slane %v2359_v23, 4  ;;  %v2473_v23 = vshrl.u32 %v11617_v57, 16 }
 0x14b   : > { %v11640_v50 = vcombine.low %v2317_v51, %v2327_v11  ;;  %v2417_v51 = vor.u32 %v2416_v63, %v15790_v36  ;;  %v15854_v63 = vrot.slane %v2449_v45, 4 }
 0x14c   : > { %v2374_v9 = vrot.slane %v2372_v27, 5  ;;  %v2365_v48 = vsel %vm14977_vm2, %v2360_v24, %v15771_v1 }
 0x14f   : > { %13067 = vmatmul.mubr.bf16.gmra.mrb[28].mxu1 %v14202_v3  ;;  %v2335_v3 = vor.u32 %v2334_v29, %v2331_v56  ;;  %v15796_v56 = vld [vmem:[%s14942_s8 + $0x5c] sm:$0x1]  ;;  %v2393_v29 = vor.u32 %v2392_v37, %v15776_v41  ;;  %v2452_v37 = vshll.u32 %v11614_v35, 16  ;;  %v2475_v35 = vrot.slane %v2473_v23, 4 }
 0x150   : > { %2832 = vmatprep.mubr.bf16.mxu1 %v19343_v22  ;;  %v2420_v11 = vshll.u32 %v15796_v56, 16 }
 0x151   : > { %v2336_v26 = vrot.slane %v2335_v3, 4  ;;  %v15806_v3 = vld [vmem:[%s14942_s8 + $0x64] sm:$0xf]  ;;  %v2394_v54 = vrot.slane %v2393_v29, 4  ;;  %v2476_v29 = vshll.u32 %v11617_v57, 16 }
 0x152   : > { %v2438_v61 = vshrl.u32 %v15806_v3, 16  ;;  %v2422_v62 = vrot.slane %v2420_v11, 5  ;;  %v15874_v11 = vld [vmem:[%s19321_s1 + $0x1c0] sm:$0xff]  }
 0x153   : > { %v2341_v59 = vsel %vm14977_vm2, %v2336_v26, %v15742_v7  ;;  %v2425_v7 = vshrl.u32 %v11611_v30, 16  ;;  %v2418_v26 = vrot.slane %v2417_v51, 4  ;;  %v2458_v30 = vshll.u32 %v15829_v60, 16  ;;  %19482 = vst [vmem:[#allocation12_spill] sm:$0xff] %v15874_v11  ;;  %13166 = vmatprep.subr.bf16.mxu0 %v15874_v11  ;;  %v15903_v57 = vld [vmem:[%s14942_s8 + $0xa0] sm:$0xf] }
 0x154   : > { %v11641_v53 = vcombine.low %v2341_v59, %v2351_v19  ;;  %v15838_v1 = vrot.slane %v2438_v61, 4  ;;  %v2444_v19 = vshll.u32 %v15826_v15, 16  ;;  %v2500_v51 = vshll.u32 %v11620_v34, 16  ;;  %13167 = vmatpush3.bf16.msra.mxu0 %v15874_v11 }
 0x155   : > { %v2427_v16 = vrot.slane %v2425_v7, 4  ;;  %v11623_v7 = vld [vmem:[%s14942_s8 + $0x90] sm:$0xf] }
 0x156   : > { %v15877_v24 = vrot.slane %v2444_v19, 5 }
 0x157   : > { %2833 = vmatmul.mubr.bf16.vlgmr.msra.gmra.mrb[32].mxu1 %v11638_v21  ;;  %v2379_v21 = vrot.slane %v2377_v14, 4  ;;  %v2434_v14 = vshll.u32 %v15806_v3, 16  ;;  %v2431_v39 = vor.u32 %v2430_v4, %v2427_v16  ;;  %v2530_v16 = vshll.u32 %v15868_v8, 16 }
 0x158   : > { %13071 = vmatpush3.bf16.msra.mxu1 %v15693_v44  ;;  %2842 = vmatprep.mubr.bf16.mxu1 %v19343_v22  ;;  %v14208_v44 = vld [vmem:[%s19321_s1 + $0x150] sm:$0xff]   ;;  %v2534_v4 = vshrl.u32 %v15868_v8, 16 }
 0x159   : > { %13072 = vmatprep.subr.bf16.mxu1 %v14207_v20  ;;  %v2383_v47 = vor.u32 %v2382_v38, %v2379_v21  ;;  %v15836_v18 = vrot.slane %v2434_v14, 5  ;;  %v15852_v0 = vrot.slane %v2431_v39, 4  ;;  %v15888_v14 = vld [vmem:[%s14942_s8 + $0x74] sm:$0x1]  ;;  %v14220_v39 = vld [vmem:[%s19321_s1 + $0x1c8] sm:$0xff]  }
 0x15a   : > { %13168 = vmatprep.subr.bf16.mxu0 %v14220_v39 }
 0x15b   : > { %v2384_v33 = vrot.slane %v2383_v47, 4  ;;  %v2441_v47 = vor.u32 %v15838_v1, %v15836_v18  ;;  %13169 = vmatpush3.bf16.msra.mxu0 %v14220_v39 }
 0x15c   : > { %13073 = vmatpush3.bf16.msra.mxu1 %v14207_v20  ;;  %v15787_v20 = vld [vmem:[%s14942_s8 + $0x50] sm:$0x1] }
 0x15d   : > { %13074 = vmatprep.subr.bf16.mxu1 %v14208_v44  ;;  %v2389_v6 = vsel %vm14977_vm2, %v2384_v33, %v15776_v41  ;;  %v2423_v41 = vsel %vm14977_vm2, %v2418_v26, %v2422_v62 }
 0x15f   : > { %2843 = vmatmul.mubr.bf16.gmra.mrb[36].mxu1 %v11639_v10  ;;  %v14212_v10 = vld [vmem:[%s19321_s1 + $0x170] sm:$0xff]  }
 0x160   : > { %2852 = vmatprep.mubr.bf16.mxu1 %v19343_v22  ;;  %13075 = vmatpush3.bf16.msra.mxu1 %v14208_v44  ;;  %v2396_v44 = vshll.u32 %v15787_v20, 16 }
 0x161   : > { %13076 = vmatprep.subr.bf16.mxu1 %v14209_v5 }
 0x162   : > { %v2398_v40 = vrot.slane %v2396_v44, 5 }
 0x164   : > { %13077 = vmatpush3.bf16.msra.mxu1 %v14209_v5  ;;  %v2370_v5 = vrot.slane %v2369_v12, 4  ;;  %v2399_v13 = vsel %vm14977_vm2, %v2394_v54, %v2398_v40  ;;  %v15858_v12 = vld [vmem:[%s14942_s8 + $0x88] sm:$0xf]  ;;  %v2521_v54 = vshrl.u32 %v11623_v7, 16  ;;  %v2524_v40 = vshll.u32 %v11623_v7, 16 }
 0x165   : > { %13078 = vmatprep.subr.bf16.mxu1 %v14210_v49  ;;  %v11643_v59 = vcombine.low %v2389_v6, %v2399_v13  ;;  %v2510_v33 = vshrl.u32 %v15858_v12, 16  ;;  %v2502_v13 = vrot.slane %v2500_v51, 5  ;;  %v14222_v51 = vld [vmem:[%s19321_s1 + $0x1d0] sm:$0xff]  }
 0x166   : > { %v2526_v19 = vrot.slane %v2524_v40, 5  ;;  %13170 = vmatprep.subr.bf16.mxu0 %v14222_v51 }
 0x167   : > { %2853 = vmatmul.mubr.bf16.gmra.mrb[40].mxu1 %v11640_v50  ;;  %v2408_v50 = vrot.slane %v2407_v25, 4  ;;  %v2497_v25 = vshrl.u32 %v11620_v34, 16  ;;  %v2512_v1 = vrot.slane %v2510_v33, 4  ;;  %v2536_v34 = vrot.slane %v2534_v4, 4  ;;  %13171 = vmatpush3.bf16.msra.mxu0 %v14222_v51 }
 0x168   : > { %2862 = vmatprep.mubr.bf16.mxu1 %v19343_v22  ;;  %13079 = vmatpush3.bf16.msra.mxu1 %v14210_v49  ;;  %v2375_v49 = vsel %vm14977_vm2, %v2370_v5, %v2374_v9  ;;  %v15879_v5 = vrot.slane %v2458_v30, 5  ;;  %v2506_v9 = vshll.u32 %v15858_v12, 16  ;;  %v15908_v30 = vrot.slane %v2530_v16, 5 }
 0x169   : > { %13080 = vmatprep.subr.bf16.mxu1 %v14211_v43  ;;  %v11642_v21 = vcombine.low %v2365_v48, %v2375_v49  ;;  %v2413_v38 = vsel %vm14977_vm2, %v2408_v50, %v15790_v36  ;;  %v2462_v36 = vshrl.u32 %v15829_v60, 16  ;;  %v2478_v50 = vrot.slane %v2476_v29, 5  ;;  %v15895_v48 = vld [vmem:[%s14942_s8 + $0x80] sm:$0x1] }
 0x16a   : > { %v15861_v27 = vcombine.low %v2413_v38, %v2423_v41  ;;  %v2499_v6 = vrot.slane %v2497_v25, 4  ;;  %v15900_v45 = vrot.slane %v2506_v9, 5  ;;  %v15906_v41 = vld [vmem:[%s14942_s8 + $0x8c] sm:$0x1]  ;;  %v2492_v29 = vshll.u32 %v15895_v48, 16 }
 0x16b   : > { %v2464_v61 = vrot.slane %v2462_v36, 4  ;;  %v2468_v36 = vshll.u32 %v15888_v14, 16  ;;  %v2479_v23 = vor.u32 %v2478_v50, %v2475_v35  ;;  %v2558_v25 = vshrl.u32 %v15903_v57, 16 }
 0x16c   : > { %13081 = vmatpush3.bf16.msra.mxu1 %v14211_v43  ;;  %v15847_v43 = vld [vmem:[%s14942_s8 + $0x7c] sm:$0xf]  ;;  %v2513_v9 = vor.u32 %v2512_v1, %v15900_v45  ;;  %v2516_v33 = vshll.u32 %v15906_v41, 16  ;;  %v2537_v4 = vor.u32 %v2536_v34, %v15908_v30 }
 0x16d   : > { %13082 = vmatprep.subr.bf16.mxu1 %v14212_v10  ;;  %v2482_v44 = vshll.u32 %v15847_v43, 16  ;;  %v2470_v50 = vrot.slane %v2468_v36, 5  ;;  %v2560_v1 = vrot.slane %v2558_v25, 4 }
 0x16f   : > { %2863 = vmatmul.mubr.bf16.gmra.mrb[44].mxu1 %v11641_v53  ;;  %v2486_v53 = vshrl.u32 %v15847_v43, 16  ;;  %v15890_v26 = vrot.slane %v2482_v44, 5  ;;  %v15914_v44 = vld [vmem:[%s14942_s8 + $0x98] sm:$0x1] }
 0x170   : > { %2872 = vmatprep.mubr.bf16.mxu1 %v19343_v22  ;;  %13083 = vmatpush3.bf16.msra.mxu1 %v14212_v10  ;;  %v2454_v10 = vrot.slane %v2452_v37, 5  ;;  %v2523_v37 = vrot.slane %v2521_v54, 4 }
 0x171   : > { %13084 = vmatprep.subr.bf16.mxu1 %v14213_v55  ;;  %v2488_v49 = vrot.slane %v2486_v53, 4  ;;  %v2554_v53 = vshll.u32 %v15903_v57, 16 }
 0x172   : > { %v2455_v62 = vor.u32 %v2454_v10, %v15854_v63  ;;  %v2465_v63 = vor.u32 %v2464_v61, %v15879_v5  ;;  %v2503_v10 = vor.u32 %v2502_v13, %v2499_v6  ;;  %v2527_v16 = vor.u32 %v2526_v19, %v2523_v37  ;;  %v15935_v19 = vld [vmem:[%s14942_s8 + $0xa4] sm:$0x1] }
 0x173   : > { %v2489_v7 = vor.u32 %v2488_v49, %v15890_v26  ;;  %v2480_v49 = vrot.slane %v2479_v23, 4  ;;  %v2494_v13 = vrot.slane %v2492_v29, 5  ;;  %v15927_v39 = vrot.slane %v2554_v53, 5  ;;  %v11629_v53 = vld [vmem:[%s14942_s8 + $0xa8] sm:$0xf] }
 0x174   : > { %13085 = vmatpush3.bf16.msra.mxu1 %v14213_v55  ;;  %v11626_v55 = vld [vmem:[%s14942_s8 + $0x9c] sm:$0xf]  ;;  %v2456_v61 = vrot.slane %v2455_v62, 4  ;;  %v2466_v35 = vrot.slane %v2465_v63, 4  ;;  %v2518_v37 = vrot.slane %v2516_v33, 5  ;;  %v2528_v34 = vrot.slane %v2527_v16, 4 }
 0x175   : > { %13118 = vmatprep.subr.bf16.mxu1 %v15834_v58  ;;  %v2548_v38 = vshll.u32 %v11626_v55, 16  ;;  %v2490_v6 = vrot.slane %v2489_v7, 4  ;;  %v2538_v63 = vrot.slane %v2537_v4, 4  ;;  %v2437_v23 = vsel %vm14977_vm2, %v15852_v0, %v15836_v18 }
 0x176   : > { %v2461_v7 = vsel %vm14977_vm2, %v2456_v61, %v15879_v5  ;;  %v2485_v18 = vsel %vm14977_vm2, %v2480_v49, %v15890_v26  ;;  %v2561_v0 = vor.u32 %v2560_v1, %v15927_v39  ;;  %v15961_v5 = vld [vmem:[%s19321_s1 + $0x1e0] sm:$0xff]   ;;  %v15996_v61 = vld [vmem:[%s19321_s1 + $0x1e8] sm:$0xff]   ;;  %v2572_v49 = vshll.u32 %v11629_v53, 16  ;;  %v11784_v1 = vld [vmem:[%s14942_s8 + $0x1c] sm:$0xf] }
 0x177   : > { %2873 = vmatmul.mubr.bf16.gmra.mrb[48].mxu1 %v11642_v21  ;;  %v2545_v21 = vshrl.u32 %v11626_v55, 16  ;;  %v2550_v40 = vrot.slane %v2548_v38, 5  ;;  %v2540_v55 = vshll.u32 %v15914_v44, 16  ;;  %v2514_v38 = vrot.slane %v2513_v9, 4  ;;  %19484 = vst [vmem:[#allocation13_spill] sm:$0xff] %v15961_v5  ;;  %19486 = vst [vmem:[#allocation16_spill] sm:$0xff] %v15996_v61 }
 0x178   : > { %2882 = vmatprep.mubr.bf16.mxu1 %v19343_v22  ;;  %v2533_v9 = vsel %vm14977_vm2, %v2528_v34, %v15908_v30  ;;  %v15989_v30 = vrot.slane %v2561_v0, 4  ;;  %v11786_v34 = vld [vmem:[%s14942_s8 + $0x24] sm:$0xf] }
 0x179   : > { %v2547_v54 = vrot.slane %v2545_v21, 4  ;;  %v2504_v21 = vrot.slane %v2503_v10, 4  ;;  %v2542_v36 = vrot.slane %v2540_v55, 5  ;;  %v2471_v10 = vsel %vm14977_vm2, %v2466_v35, %v2470_v50 }
 0x17a   : > { %v2519_v26 = vsel %vm14977_vm2, %v2514_v38, %v2518_v37 }
 0x17b   : > { %v2551_v62 = vor.u32 %v2550_v40, %v2547_v54  ;;  %v2509_v25 = vsel %vm14977_vm2, %v2504_v21, %v15900_v45  ;;  %v2543_v33 = vsel %vm14977_vm2, %v2538_v63, %v2542_v36  ;;  %v15979_v54 = vld [vmem:[%s14942_s8 + $0xac] sm:$0xf]  ;;  %v15982_v45 = vcombine.low %v2461_v7, %v2471_v10  ;;  %v16019_v10 = vld [vmem:[%s19321_s1 + $0x1f0] sm:$0xff]  }
 0x17c   : > { %19485 = vst [vmem:[#allocation14_spill] sm:$0xff] %v15979_v54  ;;  %v15987_v4 = vcombine.low %v2509_v25, %v2519_v26  ;;  %v15998_v35 = vcombine.low %v2533_v9, %v2543_v33  ;;  %v2582_v21 = vshrl.u32 %v15979_v54, 16  ;;  %v4009_v36 = vshrl.u32 %v11784_v1, 16  ;;  %19487 = vst [vmem:[#allocation17_spill] sm:$0xff] %v16019_v10 }
 0x17d   : > { %v15971_v51 = vrot.slane %v2551_v62, 4  ;;  %v4005_v62 = vshll.u32 %v11784_v1, 16  ;;  %v4023_v7 = vshll.u32 %v11786_v34, 16  ;;  %v16029_v1 = vld [vmem:[%s14942_s8 + $0x2c] sm:$0x1] }
 0x17e   : > { %v4011_v25 = vrot.slane %v4009_v36, 4  ;;  %v4039_v36 = vshll.u32 %v16029_v1, 16 }
 0x17f   : > { %2883 = vmatmul.mubr.bf16.gmra.mrb[52].mxu1 %v11643_v59  ;;  %v2442_v59 = vrot.slane %v2441_v47, 4  ;;  %v15932_v47 = vld [vmem:[%s19321_s1 + $0x1d8] sm:$0xff]   ;;  %v4025_v9 = vrot.slane %v4023_v7, 5 }
 0x180   : > { %2892 = vmatprep.mubr.bf16.mxu1 %v19343_v22  ;;  %19483 = vst [vmem:[#allocation15_spill] sm:$0xff] %v15932_v47  ;;  %13172 = vmatprep.subr.bf16.mxu0 %v15932_v47  ;;  %v16040_v7 = vld [vmem:[%s19321_s1 + $0x1f8] sm:$0xff]  }
 0x181   : > { %v2447_v29 = vsel %vm14977_vm2, %v2442_v59, %v15877_v24  ;;  %13173 = vmatpush3.bf16.msra.mxu0 %v15932_v47  ;;  %v2564_v24 = vshll.u32 %v15935_v19, 16  ;;  %v2569_v59 = vshrl.u32 %v11629_v53, 16  ;;  %19488 = vst [vmem:[#allocation10_spill] sm:$0xff] %v16040_v7 }
 0x182   : > { %13174 = vmatprep.subr.bf16.mxu0 %v15961_v5  ;;  %v11645_v40 = vcombine.low %v2437_v23, %v2447_v29  ;;  %v16014_v23 = vld [vmem:[%s14942_s8 + $0x28] sm:$0xf]  ;;  %v4020_v29 = vshrl.u32 %v11786_v34, 16 }
 0x183   : > { %v15991_v55 = vrot.slane %v2564_v24, 5  ;;  %v16010_v63 = vrot.slane %v2569_v59, 4  ;;  %v4007_v24 = vrot.slane %v4005_v62, 5  ;;  %v4029_v53 = vshll.u32 %v16014_v23, 16 }
 0x184   : > { %v4022_v26 = vrot.slane %v4020_v29, 4  ;;  %v4033_v33 = vshrl.u32 %v16014_v23, 16 }
 0x185   : > { %13175 = vmatpush3.bf16.msra.mxu0 %v15961_v5 }
 0x186   : > { %13176 = vmatprep.subr.bf16.mxu0 %v15996_v61  ;;  %v4026_v62 = vor.u32 %v4025_v9, %v4022_v26  ;;  %v4035_v34 = vrot.slane %v4033_v33, 4  ;;  %v4041_v26 = vrot.slane %v4039_v36, 5  ;;  %v11789_v9 = vld [vmem:[%s14942_s8 + $0x30] sm:$0xf] }
 0x187   : > { %2893 = vmatmul.mubr.bf16.gmra.mrb[56].mxu1 %v15861_v27  ;;  %v2495_v27 = vsel %vm14977_vm2, %v2490_v6, %v2494_v13  ;;  %v2578_v6 = vshll.u32 %v15979_v54, 16  ;;  %v11783_v13 = vld [vmem:[%s14942_s8 + $0x18] sm:$0xf] }
 0x188   : > { %2902 = vmatprep.mubr.bf16.mxu1 %v19343_v22  ;;  %v15985_v16 = vcombine.low %v2485_v18, %v2495_v27  ;;  %v3996_v38 = vshrl.u32 %v11783_v13, 16  ;;  %v3999_v37 = vshll.u32 %v11783_v13, 16  ;;  %v11785_v27 = vld [vmem:[%s14942_s8 + $0x20] sm:$0x1] }
 0x189   : > { %13177 = vmatpush3.bf16.msra.mxu0 %v15996_v61  ;;  %v4015_v13 = vshll.u32 %v11785_v27, 16  ;;  %v16033_v29 = vrot.slane %v2578_v6, 5  ;;  %v4027_v27 = vrot.slane %v4026_v62, 4  ;;  %v16055_v62 = vld [vmem:[%s14942_s8 + $0xb4] sm:$0xf] }
 0x18a   : > { %v3998_v18 = vrot.slane %v3996_v38, 4  ;;  %v4001_v0 = vrot.slane %v3999_v37, 5  ;;  %13178 = vmatprep.subr.bf16.mxu0 %v16019_v10  ;;  %v4031_v38 = vrot.slane %v4029_v53, 5  ;;  %v4012_v37 = vor.u32 %v4011_v25, %v4007_v24 }
 0x18c   : > { %v4002_v59 = vor.u32 %v4001_v0, %v3998_v18  ;;  %v4017_v0 = vrot.slane %v4015_v13, 5  ;;  %v4013_v53 = vrot.slane %v4012_v37, 4  ;;  %v4036_v25 = vor.u32 %v4035_v34, %v4031_v38 }
 0x18d   : > { %13179 = vmatpush3.bf16.msra.mxu0 %v16019_v10  ;;  %v4044_v13 = vshrl.u32 %v11789_v9, 16  ;;  %v4047_v37 = vshll.u32 %v11789_v9, 16  ;;  %v4032_v36 = vsel %vm14977_vm2, %v4027_v27, %v4031_v38  ;;  %v19489_v10 = vmov 0   ;;  %v11793_v27 = vld [vmem:[%s14942_s8 + $0x40] sm:$0xf] }
 0x18e   : > { %v4003_v18 = vrot.slane %v4002_v59, 4  ;;  %13180 = vmatprep.subr.bf16.mxu0 %v16040_v7  ;;  %v11790_v59 = vld [vmem:[%s14942_s8 + $0x34] sm:$0xf]  ;;  %v4018_v34 = vsel %vm14977_vm2, %v4013_v53, %v4017_v0  ;;  %v4037_v32 = vrot.slane %v4036_v25, 4  ;;  %v4077_v47 = vshll.u32 %v11793_v27, 16 }
 0x18f   : > { %2903 = vmatmul.mubr.bf16.gmra.mrb[60].mxu1 %v11645_v40  ;;  %v16025_v40 = vrot.slane %v2572_v49, 5  ;;  %v16035_v49 = vrot.slane %v2582_v21, 4  ;;  %v16048_v21 = vld [vmem:[%s14942_s8 + $0xb0] sm:$0x1]  ;;  %v4053_v50 = vshll.u32 %v11790_v59, 16  ;;  %v4049_v9 = vrot.slane %v4047_v37, 5 }
 0x190   : > { %2912 = vmatprep.mubr.bf16.mxu1 %v19343_v22  ;;  %v4008_v33 = vsel %vm14977_vm2, %v4003_v18, %v4007_v24  ;;  %v4046_v18 = vrot.slane %v4044_v13, 4  ;;  %v4057_v6 = vshrl.u32 %v11790_v59, 16  ;;  %v11792_v22 = vld [vmem:[%s14942_s8 + $0x3c] sm:$0xf]  ;;  %v4042_v53 = vsel %vm14977_vm2, %v4037_v32, %v4041_v26  ;;  %v11794_v37 = vld [vmem:[%s14942_s8 + $0x44] sm:$0x1] }
 0x191   : > { %13181 = vmatpush3.bf16.msra.mxu0 %v16040_v7  ;;  %v11831_v24 = vcombine.low %v4008_v33, %v4018_v34  ;;  %v11832_v25 = vcombine.low %v4032_v36, %v4042_v53  ;;  %v4055_v59 = vrot.slane %v4053_v50, 5  ;;  %v4068_v7 = vshrl.u32 %v11792_v22, 16  ;;  %v11795_v53 = vld [vmem:[%s14942_s8 + $0x48] sm:$0xf] }
 0x192   : > { %v4050_v33 = vor.u32 %v4049_v9, %v4046_v18  ;;  %v4059_v13 = vrot.slane %v4057_v6, 4  ;;  %v4071_v5 = vshll.u32 %v11792_v22, 16  ;;  %v4081_v32 = vshrl.u32 %v11793_v27, 16 }
 0x193   : > { %13182 = vmatprep.mubr.bf16.mxu0 %v11831_v24  ;;  %v4070_v54 = vrot.slane %v4068_v7, 4  ;;  %v4087_v36 = vshll.u32 %v11794_v37, 16  ;;  %v4079_v18 = vrot.slane %v4077_v47, 5 }
 0x194   : > { %13183 = vmatmul.mubr.bf16.vlgmr.msra.gmra.mrb[0].mxu0 %v11832_v25  ;;  %v4051_v0 = vrot.slane %v4050_v33, 4  ;;  %v4060_v38 = vor.u32 %v4059_v13, %v4055_v59  ;;  %v4073_v24 = vrot.slane %v4071_v5, 5  ;;  %v4083_v9 = vrot.slane %v4081_v32, 4  ;;  %v11796_v25 = vld [vmem:[%s14942_s8 + $0x4c] sm:$0xf] }
 0x195   : > { %v4092_v33 = vshrl.u32 %v11795_v53, 16  ;;  %v4095_v13 = vshll.u32 %v11795_v53, 16  ;;  %v4101_v7 = vshll.u32 %v11796_v25, 16  ;;  %v4105_v27 = vshrl.u32 %v11796_v25, 16 }
 0x196   : > { %v4056_v50 = vsel %vm14977_vm2, %v4051_v0, %v4055_v59  ;;  %v4061_v6 = vrot.slane %v4060_v38, 4  ;;  %v4074_v22 = vor.u32 %v4073_v24, %v4070_v54  ;;  %v11798_v0 = vld [vmem:[%s14942_s8 + $0x54] sm:$0xf]  ;;  %v11799_v38 = vld [vmem:[%s14942_s8 + $0x58] sm:$0xf] }
 0x197   : > { %2913 = vmatmul.mubr.bf16.gmra.mrb[64].mxu1 %v15982_v45  ;;  %v11791_v45 = vld [vmem:[%s14942_s8 + $0x38] sm:$0x1]  ;;  %v11797_v54 = vld [vmem:[%s14942_s8 + $0x50] sm:$0x1]  ;;  %v4094_v37 = vrot.slane %v4092_v33, 4  ;;  %v4097_v32 = vrot.slane %v4095_v13, 5 }
 0x198   : > { %2922 = vmatprep.mubr.bf16.mxu1 %v19489_v10  ;;  %v4063_v61 = vshll.u32 %v11791_v45, 16  ;;  %v4089_v45 = vrot.slane %v4087_v36, 5  ;;  %v4075_v59 = vrot.slane %v4074_v22, 4  ;;  %v4103_v36 = vrot.slane %v4101_v7, 5 }
 0x199   : > { %v4107_v53 = vrot.slane %v4105_v27, 4  ;;  %v4116_v25 = vshrl.u32 %v11798_v0, 16  ;;  %v4119_v34 = vshll.u32 %v11798_v0, 16  ;;  %v4125_v13 = vshll.u32 %v11799_v38, 16 }
 0x19a   : > { %v4065_v26 = vrot.slane %v4063_v61, 5  ;;  %v4084_v61 = vor.u32 %v4083_v9, %v4079_v18  ;;  %v11800_v9 = vld [vmem:[%s14942_s8 + $0x5c] sm:$0x1] }
 0x19b   : > { %v4108_v22 = vor.u32 %v4107_v53, %v4103_v36  ;;  %v4118_v7 = vrot.slane %v4116_v25, 4  ;;  %v4121_v27 = vrot.slane %v4119_v34, 5 }
 0x19c   : > { %v4066_v5 = vsel %vm14977_vm2, %v4061_v6, %v4065_v26  ;;  %v4085_v24 = vrot.slane %v4084_v61, 4  ;;  %v4080_v26 = vsel %vm14977_vm2, %v4075_v59, %v4079_v18  ;;  %v4098_v6 = vor.u32 %v4097_v32, %v4094_v37  ;;  %v11802_v32 = vld [vmem:[%s14942_s8 + $0x64] sm:$0xf] }
 0x19d   : > { %v11833_v47 = vcombine.low %v4056_v50, %v4066_v5  ;;  %v4127_v18 = vrot.slane %v4125_v13, 5  ;;  %v4129_v59 = vshrl.u32 %v11799_v38, 16  ;;  %v4135_v37 = vshll.u32 %v11800_v9, 16  ;;  %v11805_v9 = vld [vmem:[%s14942_s8 + $0x70] sm:$0xf] }
 0x19e   : > { %v4090_v50 = vsel %vm14977_vm2, %v4085_v24, %v4089_v45  ;;  %v4099_v61 = vrot.slane %v4098_v6, 4  ;;  %v4122_v0 = vor.u32 %v4121_v27, %v4118_v7  ;;  %v4149_v38 = vshll.u32 %v11802_v32, 16 }
 0x19f   : > { %2923 = vmatmul.mubr.bf16.gmra.mrb[68].mxu1 %v15985_v16  ;;  %v4111_v16 = vshll.u32 %v11797_v54, 16  ;;  %13186 = vmatprep.mubr.bf16.mxu0 %v11833_v47  ;;  %v11834_v5 = vcombine.low %v4080_v26, %v4090_v50  ;;  %v11801_v47 = vld [vmem:[%s14942_s8 + $0x60] sm:$0xf]  ;;  %v4109_v54 = vrot.slane %v4108_v22, 4  ;;  %v4131_v26 = vrot.slane %v4129_v59, 4 }
 0x1a0   : > { %2932 = vmatprep.mubr.bf16.mxu1 %v19489_v10  ;;  %v4104_v45 = vsel %vm14977_vm2, %v4099_v61, %v4103_v36  ;;  %v4140_v24 = vshrl.u32 %v11801_v47, 16  ;;  %v4143_v53 = vshll.u32 %v11801_v47, 16  ;;  %v4137_v6 = vrot.slane %v4135_v37, 5  ;;  %v11803_v36 = vld [vmem:[%s14942_s8 + $0x68] sm:$0x1] }
 0x1a1   : > { %v4113_v33 = vrot.slane %v4111_v16, 5  ;;  %13187 = vmatmul.mubr.bf16.gmra.mrb[4].mxu0 %v11834_v5  ;;  %v11804_v16 = vld [vmem:[%s14942_s8 + $0x6c] sm:$0xf]  ;;  %v4123_v50 = vrot.slane %v4122_v0, 4  ;;  %v4132_v5 = vor.u32 %v4131_v26, %v4127_v18  ;;  %v4151_v61 = vrot.slane %v4149_v38, 5 }
 0x1a2   : > { %v4142_v22 = vrot.slane %v4140_v24, 4  ;;  %v4145_v13 = vrot.slane %v4143_v53, 5  ;;  %v4153_v7 = vshrl.u32 %v11802_v32, 16  ;;  %v11806_v47 = vld [vmem:[%s14942_s8 + $0x74] sm:$0x1]  ;;  %v4167_v59 = vshll.u32 %v11804_v16, 16 }
 0x1a3   : > { %v4114_v34 = vsel %vm14977_vm2, %v4109_v54, %v4113_v33  ;;  %v4128_v33 = vsel %vm14977_vm2, %v4123_v50, %v4127_v18  ;;  %v4164_v54 = vshrl.u32 %v11804_v16, 16  ;;  %v4133_v37 = vrot.slane %v4132_v5, 4 }
 0x1a4   : > { %v11835_v25 = vcombine.low %v4104_v45, %v4114_v34  ;;  %v4146_v27 = vor.u32 %v4145_v13, %v4142_v22  ;;  %v4155_v11 = vrot.slane %v4153_v7, 4  ;;  %v4173_v0 = vshll.u32 %v11805_v9, 16  ;;  %v16107_v34 = vld [vmem:[%s14942_s8 + $0xb8] sm:$0xf] }
 0x1a5   : > { %v4166_v53 = vrot.slane %v4164_v54, 4  ;;  %v4169_v26 = vrot.slane %v4167_v59, 5  ;;  %v4177_v38 = vshrl.u32 %v11805_v9, 16  ;;  %v4138_v32 = vsel %vm14977_vm2, %v4133_v37, %v4137_v6 }
 0x1a6   : > { %13190 = vmatprep.mubr.bf16.mxu0 %v11835_v25  ;;  %v4147_v24 = vrot.slane %v4146_v27, 4  ;;  %v4156_v25 = vor.u32 %v4155_v11, %v4151_v61  ;;  %v4183_v18 = vshll.u32 %v11806_v47, 16  ;;  %v2596_v50 = vshll.u32 %v16055_v62, 16 }
 0x1a7   : > { %2933 = vmatmul.mubr.bf16.gmra.mrb[72].mxu1 %v15987_v4  ;;  %v4159_v4 = vshll.u32 %v11803_v36, 16  ;;  %v4175_v36 = vrot.slane %v4173_v0, 5  ;;  %v11836_v22 = vcombine.low %v4128_v33, %v4138_v32  ;;  %v4170_v16 = vor.u32 %v4169_v26, %v4166_v53  ;;  %v16143_v32 = vld [vmem:[%s14942_s8 + $0xbc] sm:$0x1] }
 0x1a8   : > { %2942 = vmatprep.mubr.bf16.mxu1 %v19489_v10  ;;  %v4179_v13 = vrot.slane %v4177_v38, 4  ;;  %v2602_v5 = vshll.u32 %v16107_v34, 16  ;;  %v2606_v7 = vshrl.u32 %v16107_v34, 16  ;;  %v4152_v9 = vsel %vm14977_vm2, %v4147_v24, %v4151_v61 }
 0x1a9   : > { %v4161_v45 = vrot.slane %v4159_v4, 5  ;;  %v4157_v4 = vrot.slane %v4156_v25, 4  ;;  %13191 = vmatmul.mubr.bf16.gmra.mrb[8].mxu0 %v11836_v22  ;;  %v4171_v11 = vrot.slane %v4170_v16, 4  ;;  %v4185_v27 = vrot.slane %v4183_v18, 5  ;;  %v11635_v25 = vld [vmem:[%s14942_s8 + $0xc0] sm:$0xf] }
 0x1aa   : > { %v4180_v6 = vor.u32 %v4179_v13, %v4175_v36  ;;  %v19491_v33 = vsel %vm14977_vm2, %v15971_v51, %v15927_v39  ;;  %v19492_v47 = vor.u32 %v16025_v40, %v16010_v63  ;;  %v19493_v59 = vshll.u32 %v16048_v21, 16 }
 0x1ab   : > { %v4162_v0 = vsel %vm14977_vm2, %v4157_v4, %v4161_v45  ;;  %v4176_v39 = vsel %vm14977_vm2, %v4171_v11, %v4175_v36  ;;  %v19495_v53 = vshrl.u32 %v16055_v62, 16  ;;  %v2598_v40 = vrot.slane %v2596_v50, 5 }
 0x1ac   : > { %v2576_v54 = vrot.slane %v19492_v47, 4  ;;  %v2590_v37 = vrot.slane %v19493_v59, 5  ;;  %v11837_v24 = vcombine.low %v4152_v9, %v4162_v0  ;;  %v4181_v51 = vrot.slane %v4180_v6, 4  ;;  %v16161_v47 = vld [vmem:[%s14942_s8 + $0xc8] sm:$0x1] }
 0x1ad   : > { %v2595_v63 = vrot.slane %v19495_v53, 4  ;;  %v2604_v26 = vrot.slane %v2602_v5, 5  ;;  %v2608_v38 = vrot.slane %v2606_v7, 4  ;;  %v2612_v16 = vshll.u32 %v16143_v32, 16 }
 0x1ae   : > { %13194 = vmatprep.mubr.bf16.mxu0 %v11837_v24  ;;  %v4186_v45 = vsel %vm14977_vm2, %v4181_v51, %v4185_v27  ;;  %v2581_v36 = vsel %vm14977_vm2, %v2576_v54, %v16033_v29  ;;  %v2617_v13 = vshrl.u32 %v11635_v25, 16  ;;  %v2620_v5 = vshll.u32 %v11635_v25, 16 }
 0x1af   : > { %2943 = vmatmul.mubr.bf16.gmra.mrb[76].mxu1 %v15998_v35  ;;  %v19490_v35 = vsel %vm14977_vm2, %v15989_v30, %v15991_v55  ;;  %v19494_v30 = vor.u32 %v16035_v49, %v16033_v29  ;;  %v16149_v49 = vld [vmem:[%s14942_s8 + $0xc4] sm:$0xf]  ;;  %v11838_v18 = vcombine.low %v4176_v39, %v4186_v45  ;;  %v2599_v50 = vor.u32 %v2598_v40, %v2595_v63  ;;  %v11671_v39 = vld [vmem:[%s14942_s8 + $0xc] sm:$0xe]  ;;  %v14637_v45 = vld [vmem:[%s14942_s8 + $0x14] sm:$0x1] }
 0x1b0   : > { %2952 = vmatprep.mubr.bf16.mxu1 %v19489_v10  ;;  %v11650_v61 = vcombine.low %v19491_v33, %v19490_v35  ;;  %v2609_v22 = vor.u32 %v2608_v38, %v2604_v26  ;;  %v2626_v7 = vshll.u32 %v16149_v49, 16  ;;  %v2630_v9 = vshrl.u32 %v16149_v49, 16 }
 0x1b1   : > { %v2586_v55 = vrot.slane %v19494_v30, 4  ;;  %13195 = vmatmul.mubr.bf16.gmra.mrb[12].mxu0 %v11838_v18  ;;  %v2600_v29 = vrot.slane %v2599_v50, 4  ;;  %v2614_v6 = vrot.slane %v2612_v16, 5  ;;  %v2619_v27 = vrot.slane %v2617_v13, 4  ;;  %v11673_v13 = vld [vmem:[%s14942_s8 + $0x24] sm:$0xe] }
 0x1b2   : > { %v2610_v11 = vrot.slane %v2609_v22, 4  ;;  %v2622_v35 = vrot.slane %v2620_v5, 5  ;;  %v2628_v33 = vrot.slane %v2626_v7, 5  ;;  %v2636_v30 = vshll.u32 %v16161_v47, 16  ;;  %v14638_v22 = vld [vmem:[%s14942_s8 + $0x28] sm:$0xf] }
 0x1b3   : > { %v2591_v62 = vsel %vm14977_vm2, %v2586_v55, %v2590_v37  ;;  %v2605_v54 = vsel %vm14977_vm2, %v2600_v29, %v2604_v26  ;;  %v14636_v55 = vld [vmem:[%s14942_s8 + $0x10] sm:$0xf]  ;;  %v11687_v38 = vrot.slane %v11671_v39, 9  ;;  %v3133_v25 = vrot.slane %v14637_v45, 5 }
 0x1b4   : > { %v11651_v4 = vcombine.low %v2581_v36, %v2591_v62  ;;  %v2615_v59 = vsel %vm14977_vm2, %v2610_v11, %v2614_v6  ;;  %v2623_v37 = vor.u32 %v2622_v35, %v2619_v27  ;;  %v3130_v24 = vrot.slane %v14636_v55, 5  ;;  %v14640_v11 = vld [vmem:[%s14942_s8 + $0x34] sm:$0xf] }
 0x1b5   : > { %v11652_v51 = vcombine.low %v2605_v54, %v2615_v59  ;;  %v2638_v40 = vrot.slane %v2636_v30, 5  ;;  %v3144_v16 = vrot.slane %v14638_v22, 5  ;;  %v11689_v7 = vrot.slane %v11673_v13, 9  ;;  %v11675_v54 = vld [vmem:[%s14942_s8 + $0x3c] sm:$0xe] }
 0x1b6   : > { %v2624_v53 = vrot.slane %v2623_v37, 4  ;;  %v3132_v26 = vrot.slane %v3130_v24, 4  ;;  %v3131_v62 = vsel %vm15307_vm5, %v11687_v38, %v3130_v24  ;;  %v3151_v6 = vrot.slane %v14640_v11, 5  ;;  %v14641_v30 = vld [vmem:[%s14942_s8 + $0x38] sm:$0x1]  ;;  %v14215_v24 = vld [vmem:[%s19321_s1 + $0x188] sm:$0xff]  }
 0x1b7   : > { %2953 = vmatmul.mubr.bf16.gmra.mrb[80].mxu1 %v11650_v61  ;;  %v2632_v61 = vrot.slane %v2630_v9, 4  ;;  %v3146_v9 = vrot.slane %v3144_v16, 4  ;;  %v3145_v27 = vsel %vm15307_vm5, %v11689_v7, %v3144_v16  ;;  %v3154_v55 = vrot.slane %v14641_v30, 5  ;;  %v14642_v38 = vld [vmem:[%s14942_s8 + $0x4c] sm:$0xf]  ;;  %v14218_v11 = vld [vmem:[%s19321_s1 + $0x1a0] sm:$0xff]  }
 0x1b8   : > { %2962 = vmatprep.mubr.bf16.mxu1 %v19489_v10  ;;  %v2629_v18 = vsel %vm14977_vm2, %v2624_v53, %v2628_v33  ;;  %v3134_v50 = vsel %vm15307_vm5, %v3132_v26, %v3133_v25  ;;  %v11691_v39 = vrot.slane %v11675_v54, 9  ;;  %v3161_v53 = vrot.slane %v15774_v52, 5  ;;  %v11677_v25 = vld [vmem:[%s14942_s8 + $0x54] sm:$0xe] }
 0x1b9   : > { %v2633_v0 = vor.u32 %v2632_v61, %v2628_v33  ;;  %v11674_v33 = vld [vmem:[%s14942_s8 + $0x30] sm:$0xe]  ;;  %v3158_v61 = vrot.slane %v15747_v31, 5  ;;  %v19496_v31 = vcombine.low %v15726_v2, %v15719_v28  ;;  %v3165_v26 = vrot.slane %v14642_v38, 5  ;;  %v11676_v28 = vld [vmem:[%s14942_s8 + $0x48] sm:$0xe] }
 0x1ba   : > { %v11690_v37 = vrot.slane %v11674_v33, 9  ;;  %v14216_v2 = vld [vmem:[%s19321_s1 + $0x190] sm:$0xff]   ;;  %v3168_v22 = vrot.slane %v15787_v20, 5  ;;  %v11693_v16 = vrot.slane %v11677_v25, 9  ;;  %v3179_v20 = vrot.slane %v15806_v3, 5 }
 0x1bb   : > { %v2634_v63 = vrot.slane %v2633_v0, 4  ;;  %v3153_v0 = vrot.slane %v3151_v6, 4  ;;  %v3159_v45 = vsel %vm15307_vm5, %v11691_v39, %v3158_v61  ;;  %v3200_v39 = vrot.slane %v15858_v12, 5 }
 0x1bc   : > { %v3181_v3 = vrot.slane %v3179_v20, 4  ;;  %v4773_v12 = vrot.slane %v16014_v23, 5  ;;  %v3203_v25 = vrot.slane %v15906_v41, 5 }
 0x1bd   : > { %v2639_v36 = vsel %vm14977_vm2, %v2634_v63, %v2638_v40  ;;  %v3152_v63 = vsel %vm15307_vm5, %v11690_v37, %v3151_v6  ;;  %v3155_v40 = vsel %vm15307_vm5, %v3153_v0, %v3154_v55  ;;  %v11679_v6 = vld [vmem:[%s14942_s8 + $0x6c] sm:$0xe]  ;;  %v3189_v37 = vrot.slane %v15888_v14, 5 }
 0x1be   : > { %v11653_v5 = vcombine.low %v2629_v18, %v2639_v36  ;;  %v11706_v18 = vcombine.low %v3152_v63, %v3155_v40  ;;  %v11695_v54 = vrot.slane %v11679_v6, 9  ;;  %v3193_v55 = vrot.slane %v15847_v43, 5 }
 0x1bf   : > { %2963 = vmatmul.mubr.bf16.gmra.mrb[84].mxu1 %v11651_v4  ;;  %v14639_v4 = vld [vmem:[%s14942_s8 + $0x2c] sm:$0x1]  ;;  %v4775_v41 = vrot.slane %v4773_v12, 4 }
 0x1c0   : > { %2972 = vmatprep.mubr.bf16.mxu1 %v19489_v10  ;;  %v3147_v29 = vrot.slane %v14639_v4, 5  ;;  %v11678_v4 = vld [vmem:[%s14942_s8 + $0x60] sm:$0xe] }
 0x1c1   : > { %v11694_v33 = vrot.slane %v11678_v4, 9 }
 0x1c2   : > { %v3148_v35 = vsel %vm15307_vm5, %v3146_v9, %v3147_v29  ;;  %v3186_v29 = vrot.slane %v15829_v60, 5  ;;  %v14221_v60 = vld [vmem:[%s19321_s1 + $0x1a8] sm:$0xff]  }
 0x1c3   : > { %v11705_v59 = vcombine.low %v3145_v27, %v3148_v35  ;;  %v3180_v0 = vsel %vm15307_vm5, %v11694_v33, %v3179_v20  ;;  %v3217_v33 = vrot.slane %v15935_v19, 5 }
 0x1c4   : > { %v3187_v14 = vsel %vm15307_vm5, %v11695_v54, %v3186_v29 }
 0x1c7   : > { %2973 = vmatmul.mubr.bf16.gmra.mrb[88].mxu1 %v11652_v51  ;;  %v3160_v51 = vrot.slane %v3158_v61, 4  ;;  %v3182_v61 = vrot.slane %v15826_v15, 5  ;;  %v11680_v15 = vld [vmem:[%s14942_s8 + $0x78] sm:$0xe] }
 0x1c8   : > { %2982 = vmatprep.mubr.bf16.mxu1 %v19489_v10  ;;  %v11703_v10 = vcombine.low %v3131_v62, %v3134_v50  ;;  %v11692_v62 = vrot.slane %v11676_v28, 9  ;;  %v3167_v50 = vrot.slane %v3165_v26, 4  ;;  %v11696_v40 = vrot.slane %v11680_v15, 9 }
 0x1c9   : > { %v3162_v52 = vsel %vm15307_vm5, %v3160_v51, %v3161_v53  ;;  %v3183_v30 = vsel %vm15307_vm5, %v3181_v3, %v3182_v61  ;;  %v14224_v51 = vld [vmem:[%s19321_s1 + $0x1b0] sm:$0xff]  }
 0x1ca   : > { %v11707_v36 = vcombine.low %v3159_v45, %v3162_v52  ;;  %v3169_v7 = vsel %vm15307_vm5, %v3167_v50, %v3168_v22  ;;  %v11710_v43 = vcombine.low %v3180_v0, %v3183_v30  ;;  %v3195_v45 = vrot.slane %v3193_v55, 4  ;;  %v19497_v3 = vld [vmem:[#allocation12_spill] sm:$0xff]  ;;  %v11684_v0 = vld [vmem:[%s14942_s8 + $0xa8] sm:$0xe] }
 0x1cb   : > { %v3196_v52 = vrot.slane %v15895_v48, 5  ;;  %v3194_v48 = vsel %vm15307_vm5, %v11696_v40, %v3193_v55  ;;  %v4776_v50 = vrot.slane %v16029_v1, 5  ;;  %v3228_v30 = vrot.slane %v16107_v34, 5  ;;  %v11685_v55 = vld [vmem:[%s14942_s8 + $0xb4] sm:$0xe] }
 0x1cc   : > { %v3224_v40 = vrot.slane %v16048_v21, 5  ;;  %v3231_v34 = vrot.slane %v16143_v32, 5 }
 0x1cd   : > { %v3197_v23 = vsel %vm15307_vm5, %v3195_v45, %v3196_v52  ;;  %v11701_v45 = vrot.slane %v11685_v55, 9  ;;  %v3230_v52 = vrot.slane %v3228_v30, 4  ;;  %v16389_v55 = vld [vmem:[%s14942_s8 + $0xb8] sm:$0xf] }
 0x1ce   : > { %v11712_v20 = vcombine.low %v3194_v48, %v3197_v23 }
 0x1cf   : > { %2983 = vmatmul.mubr.bf16.gmra.mrb[92].mxu1 %v11653_v5  ;;  %v3175_v5 = vrot.slane %v15796_v56, 5  ;;  %v3232_v21 = vsel %vm15307_vm5, %v3230_v52, %v3231_v34 }
 0x1d0   : > { %13086 = vmatprep.mubr.bf16.mxu1 %v11703_v10  ;;  %v14217_v10 = vld [vmem:[%s19321_s1 + $0x198] sm:$0xff]  }
 0x1d7   : > { %13087 = vmatmul.mubr.bf16.vlgmr.msra.gmra.mrb[96].mxu1 %v19496_v31  ;;  %v11681_v31 = vld [vmem:[%s14942_s8 + $0x84] sm:$0xe] }
 0x1d8   : > { %13119 = vmatpush3.bf16.msra.mxu1 %v15834_v58  ;;  %13090 = vmatprep.mubr.bf16.mxu1 %v11705_v59  ;;  %v3172_v58 = vrot.slane %v15764_v17, 5  ;;  %v3166_v17 = vsel %vm15307_vm5, %v11692_v62, %v3165_v26  ;;  %v3188_v59 = vrot.slane %v3186_v29, 4  ;;  %v11682_v62 = vld [vmem:[%s14942_s8 + $0x90] sm:$0xe]  ;;  %v3210_v29 = vrot.slane %v15914_v44, 5 }
 0x1d9   : > { %13120 = vmatprep.subr.bf16.mxu1 %v14215_v24  ;;  %v11708_v27 = vcombine.low %v3166_v17, %v3169_v7  ;;  %v16486_v44 = vld [vmem:[%s14942_s8 + $0x88] sm:$0xf] }
 0x1da   : > { %v3174_v13 = vrot.slane %v3172_v58, 4  ;;  %v3173_v9 = vsel %vm15307_vm5, %v11693_v16, %v3172_v58  ;;  %v3202_v58 = vrot.slane %v3200_v39, 4 }
 0x1dc   : > { %13121 = vmatpush3.bf16.msra.mxu1 %v14215_v24  ;;  %v3176_v56 = vsel %vm15307_vm5, %v3174_v13, %v3175_v5  ;;  %v3190_v24 = vsel %vm15307_vm5, %v3188_v59, %v3189_v37  ;;  %v3204_v16 = vsel %vm15307_vm5, %v3202_v58, %v3203_v25  ;;  %v11856_v13 = vld [vmem:[%s14942_s8 + $0x24] sm:$0xe]  ;;  %v3235_v58 = vrot.slane %v16149_v49, 5 }
 0x1dd   : > { %13122 = vmatprep.subr.bf16.mxu1 %v14216_v2  ;;  %v11709_v35 = vcombine.low %v3173_v9, %v3176_v56  ;;  %v11711_v26 = vcombine.low %v3187_v14, %v3190_v24  ;;  %v11872_v17 = vrot.slane %v11856_v13, 9  ;;  %v11698_v9 = vrot.slane %v11682_v62, 9  ;;  %v19498_v59 = vld [vmem:[#allocation14_spill] sm:$0xff] }
 0x1de   : > { %v3221_v37 = vrot.slane %v19498_v59, 5  ;;  %v3229_v25 = vsel %vm15307_vm5, %v11701_v45, %v3228_v30  ;;  %v3238_v49 = vrot.slane %v16161_v47, 5  ;;  %v14230_v47 = vld [vmem:[%s14942_s8 + $0x18] sm:$0xff]   ;;  %v14645_v30 = vld [vmem:[%s19321_s1 + $0x1d0] sm:$0xff]  }
 0x1df   : > { %13091 = vmatmul.mubr.bf16.gmra.mrb[100].mxu1 %v11706_v18  ;;  %v14227_v18 = vld [vmem:[%s19321_s1 + $0x1b8] sm:$0xff]   ;;  %v11717_v62 = vcombine.low %v3229_v25, %v3232_v21  ;;  %v14236_v25 = vld [vmem:[%s14942_s8 + $0x60] sm:$0xff]  }
 0x1e0   : > { %13094 = vmatprep.mubr.bf16.mxu1 %v11707_v36  ;;  %13123 = vmatpush3.bf16.msra.mxu1 %v14216_v2  ;;  %v11697_v2 = vrot.slane %v11681_v31, 9  ;;  %v3207_v36 = vrot.slane %v15868_v8, 5  ;;  %v3214_v8 = vrot.slane %v15903_v57, 5  ;;  %v16293_v57 = vsel %vm15307_vm5, %v11872_v17, %v4773_v12  ;;  %v14646_v21 = vld [vmem:[%s19321_s1 + $0x1d8] sm:$0xff]  }
 0x1e1   : > { %13124 = vmatprep.subr.bf16.mxu1 %v14217_v10  ;;  %v11700_v31 = vrot.slane %v11684_v0, 9 }
 0x1e2   : > { %v3201_v22 = vsel %vm15307_vm5, %v11697_v2, %v3200_v39  ;;  %v3209_v56 = vrot.slane %v3207_v36, 4  ;;  %v3208_v61 = vsel %vm15307_vm5, %v11698_v9, %v3207_v36 }
 0x1e3   : > { %v11713_v4 = vcombine.low %v3201_v22, %v3204_v16  ;;  %v3222_v12 = vsel %vm15307_vm5, %v11700_v31, %v3221_v37  ;;  %v16394_v31 = vld [vmem:[%s14942_s8 + $0xbc] sm:$0x1] }
 0x1e4   : > { %13125 = vmatpush3.bf16.msra.mxu1 %v14217_v10  ;;  %v11683_v10 = vld [vmem:[%s14942_s8 + $0x9c] sm:$0xe]  ;;  %v3211_v54 = vsel %vm15307_vm5, %v3209_v56, %v3210_v29  ;;  %v14231_v29 = vld [vmem:[%s14942_s8 + $0x24] sm:$0xff]   ;;  %v4860_v34 = vrot.slane %v16394_v31, 5 }
 0x1e5   : > { %13126 = vmatprep.subr.bf16.mxu1 %v14218_v11  ;;  %v11714_v24 = vcombine.low %v3208_v61, %v3211_v54  ;;  %v14644_v61 = vld [vmem:[%s19321_s1 + $0x1c8] sm:$0xff]  }
 0x1e7   : > { %13095 = vmatmul.mubr.bf16.gmra.mrb[104].mxu1 %v11708_v27  ;;  %v11699_v27 = vrot.slane %v11683_v10, 9 }
 0x1e8   : > { %13098 = vmatprep.mubr.bf16.mxu1 %v11709_v35  ;;  %13127 = vmatpush3.bf16.msra.mxu1 %v14218_v11  ;;  %v16297_v11 = vsel %vm15307_vm5, %v4775_v41, %v4776_v50  ;;  %v3216_v35 = vrot.slane %v3214_v8, 4  ;;  %v3237_v50 = vrot.slane %v3235_v58, 4 }
 0x1e9   : > { %13128 = vmatprep.subr.bf16.mxu1 %v14221_v60 }
 0x1ea   : > { %v16255_v53 = vpop.f32.mrb[0].mxu1  ;;  %v3218_v19 = vsel %vm15307_vm5, %v3216_v35, %v3217_v33  ;;  %v14232_v35 = vld [vmem:[%s14942_s8 + $0x30] sm:$0xff]  }
 0x1eb   : > { %v16258_v63 = vpop.f32.mrb[1].mxu1 }
 0x1ec   : > { %v16260_v38 = vpop.f32.mrb[2].mxu1  ;;  %13129 = vmatpush3.bf16.msra.mxu1 %v14221_v60  ;;  %v3215_v60 = vsel %vm15307_vm5, %v11699_v27, %v3214_v8  ;;  %v3239_v8 = vsel %vm15307_vm5, %v3237_v50, %v3238_v49  ;;  %v16423_v49 = vld [vmem:[%s14942_s8 + $0xd0] sm:$0xf] }
 0x1ed   : > { %v16264_v28 = vpop.f32.mrb[3].mxu1  ;;  %13130 = vmatprep.subr.bf16.mxu1 %v14224_v51 }
 0x1ef   : > { %13099 = vmatmul.mubr.bf16.gmra.mrb[108].mxu1 %v11710_v43  ;;  %v3223_v43 = vrot.slane %v3221_v37, 4  ;;  %v14233_v37 = vld [vmem:[%s14942_s8 + $0x3c] sm:$0xff]  }
 0x1f0   : > { %13102 = vmatprep.mubr.bf16.mxu1 %v11711_v26  ;;  %13131 = vmatpush3.bf16.msra.mxu1 %v14224_v51  ;;  %v11715_v51 = vcombine.low %v3215_v60, %v3218_v19  ;;  %v14234_v19 = vld [vmem:[%s14942_s8 + $0x48] sm:$0xff]  }
 0x1f1   : > { %13132 = vmatprep.subr.bf16.mxu1 %v14227_v18  ;;  %v3225_v2 = vsel %vm15307_vm5, %v3223_v43, %v3224_v40  ;;  %v11868_v43 = vld [vmem:[%s14942_s8 + $0xb4] sm:$0xe] }
 0x1f2   : > { %v16283_v5 = vpop.f32.mrb[4].mxu1  ;;  %v11716_v48 = vcombine.low %v3222_v12, %v3225_v2  ;;  %v11884_v45 = vrot.slane %v11868_v43, 9  ;;  %v14235_v2 = vld [vmem:[%s14942_s8 + $0x54] sm:$0xff]  }
 0x1f3   : > { %v16286_v7 = vpop.f32.mrb[5].mxu1 }
 0x1f4   : > { %v16288_v1 = vpop.f32.mrb[6].mxu1  ;;  %13133 = vmatpush3.bf16.msra.mxu1 %v14227_v18  ;;  %v11686_v18 = vld [vmem:[%s14942_s8 + $0xc0] sm:$0xe] }
 0x1f5   : > { %v16299_v6 = vpop.f32.mrb[7].mxu1  ;;  %13694 = vmatprep.subr.bf16.mxu1 %v19497_v3  ;;  %v11702_v41 = vrot.slane %v11686_v18, 9  ;;  %v14643_v3 = vld [vmem:[%s19321_s1 + $0x1c0] sm:$0xff]  }
 0x1f7   : > { %13103 = vmatmul.mubr.bf16.gmra.mrb[112].mxu1 %v11712_v20  ;;  %v3236_v16 = vsel %vm15307_vm5, %v11702_v41, %v3235_v58  ;;  %v19509_v41 = vld [vmem:[#allocation13_spill] sm:$0xff] }
 0x1f8   : > { %13106 = vmatprep.mubr.bf16.mxu1 %v11713_v4  ;;  %v11718_v17 = vcombine.low %v3236_v16, %v3239_v8  ;;  %v4871_v16 = vrot.slane %v16423_v49, 5  ;;  %v19510_v8 = vld [vmem:[#allocation16_spill] sm:$0xff] }
 0x1fa   : > { %v16316_v15 = vpop.f32.mrb[8].mxu1 }
 0x1fb   : > { %v16319_v14 = vpop.f32.mrb[9].mxu1 }
 0x1fc   : > { %v16321_v39 = vpop.f32.mrb[10].mxu1 }
 0x1fd   : > { %v16324_v26 = vpop.f32.mrb[11].mxu1 }
 0x1ff   : > { %13107 = vmatmul.mubr.bf16.gmra.mrb[116].mxu1 %v11714_v24  ;;  %v4857_v24 = vrot.slane %v16389_v55, 5 }
 0x200   : > { %13110 = vmatprep.mubr.bf16.mxu1 %v11715_v51  ;;  %v19502_v51 = vld [vmem:[#allocation15_spill] sm:$0xff] }
 0x201   : > { %v4859_v52 = vrot.slane %v4857_v24, 4  ;;  %v16411_v18 = vsel %vm15307_vm5, %v11884_v45, %v4857_v24 }
 0x202   : > { %v16337_v36 = vpop.f32.mrb[12].mxu1  ;;  %19506 = vst [vmem:[#allocation21_spill] sm:$0xff] %v16411_v18 }
 0x203   : > { %v16339_v32 = vpop.f32.mrb[13].mxu1 }
 0x204   : > { %v16341_v23 = vpop.f32.mrb[14].mxu1 }
 0x205   : > { %v16344_v22 = vpop.f32.mrb[15].mxu1 }
 0x207   : > { %13111 = vmatmul.mubr.bf16.gmra.mrb[120].mxu1 %v11716_v48  ;;  %v16415_v48 = vsel %vm15307_vm5, %v4859_v52, %v4860_v34  ;;  %v19517_v34 = vld [vmem:[#allocation17_spill] sm:$0xff] }
 0x208   : > { %13114 = vmatprep.mubr.bf16.mxu1 %v11717_v62  ;;  %19507 = vst [vmem:[#allocation22_spill] sm:$0xff] %v16415_v48 }
 0x20a   : > { %v16350_v13 = vpop.f32.mrb[16].mxu1 }
 0x20b   : > { %v16352_v10 = vpop.f32.mrb[17].mxu1 }
 0x20c   : > { %v16354_v20 = vpop.f32.mrb[18].mxu1 }
 0x20d   : > { %v16357_v9 = vpop.f32.mrb[19].mxu1 }
 0x20f   : > { %13115 = vmatmul.mubr.bf16.gmra.mrb[124].mxu1 %v11718_v17  ;;  %v16429_v17 = vld [vmem:[%s14942_s8 + $0xd4] sm:$0x1] }
 0x210   : > { %13134 = vmatprep.mubr.bf16.mxu1 %v14230_v47  ;;  %v11870_v47 = vld [vmem:[%s14942_s8 + $0xcc] sm:$0xe] }
 0x212   : > { %v16359_v56 = vpop.f32.mrb[20].mxu1 }
 0x213   : > { %v16361_v4 = vpop.f32.mrb[21].mxu1 }
 0x214   : > { %v16364_v27 = vpop.f32.mrb[22].mxu1 }
 0x215   : > { %v16367_v33 = vpop.f32.mrb[23].mxu1 }
 0x217   : > { %13135 = vmatmul.mubr.bf16.vlgmr.msra.gmra.mrb[128].mxu1 %v14231_v29 }
 0x218   : > { %13702 = vmatpush3.bf16.msra.mxu1 %v14643_v3  ;;  %13138 = vmatprep.mubr.bf16.mxu1 %v14232_v35  ;;  %v11886_v35 = vrot.slane %v11870_v47, 9  ;;  %v4873_v3 = vrot.slane %v4871_v16, 4 }
 0x219   : > { %13695 = vmatprep.subr.bf16.mxu1 %v14644_v61 }
 0x21a   : > { %v16375_v54 = vpop.f32.mrb[24].mxu1  ;;  %v16443_v43 = vsel %vm15307_vm5, %v11886_v35, %v4871_v16  ;;  %v16466_v16 = vld [vmem:[%s14942_s8 + $0x7c] sm:$0xf]  ;;  %v11810_v35 = vld [vmem:[%s14942_s8 + $0x84] sm:$0xf] }
 0x21b   : > { %19499 = vst [vmem:[#allocation11_spill] sm:$0xff] %v16375_v54  ;;  %v16377_v59 = vpop.f32.mrb[25].mxu1  ;;  %19513 = vst [vmem:[#allocation24_spill] sm:$0xff] %v16443_v43  ;;  %v4215_v50 = vshll.u32 %v11810_v35, 16  ;;  %v14241_v43 = vld [vmem:[%s14942_s8 + $0x9c] sm:$0xff]  }
 0x21c   : > { %v16380_v60 = vpop.f32.mrb[26].mxu1  ;;  %13703 = vmatpush3.bf16.msra.mxu1 %v14644_v61  ;;  %v4874_v61 = vrot.slane %v16429_v17, 5  ;;  %v16537_v54 = vld [vmem:[%s14942_s8 + $0xac] sm:$0xf] }
 0x21d   : > { %19500 = vst [vmem:[#allocation12_spill] sm:$0xff] %v16380_v60  ;;  %v16383_v0 = vpop.f32.mrb[27].mxu1  ;;  %13696 = vmatprep.subr.bf16.mxu1 %v14645_v30  ;;  %19530 = vst [vmem:[#allocation37_spill] sm:$0xff] %v16537_v54 }
 0x21e   : > { %19501 = vst [vmem:[#allocation14_spill] sm:$0xff] %v16383_v0  ;;  %v16447_v45 = vsel %vm15307_vm5, %v4873_v3, %v4874_v61  ;;  %v14240_v61 = vld [vmem:[%s14942_s8 + $0x90] sm:$0xff]   ;;  %v16590_v0 = vld [vmem:[%s14942_s8 + $0xc4] sm:$0xf] }
 0x21f   : > { %13139 = vmatmul.mubr.bf16.gmra.mrb[132].mxu1 %v14233_v37  ;;  %19514 = vst [vmem:[#allocation25_spill] sm:$0xff] %v16447_v45 }
 0x220   : > { %13142 = vmatprep.mubr.bf16.mxu1 %v14234_v19  ;;  %13704 = vmatpush3.bf16.msra.mxu1 %v14645_v30  ;;  %v14237_v30 = vld [vmem:[%s14942_s8 + $0x6c] sm:$0xff]  }
 0x221   : > { %13697 = vmatprep.subr.bf16.mxu1 %v19502_v51  ;;  %v14238_v51 = vld [vmem:[%s14942_s8 + $0x78] sm:$0xff]  }
 0x222   : > { %v16397_v40 = vpop.f32.mrb[28].mxu1 }
 0x223   : > { %19503 = vst [vmem:[#allocation15_spill] sm:$0xff] %v16397_v40  ;;  %v16400_v12 = vpop.f32.mrb[29].mxu1 }
 0x224   : > { %19504 = vst [vmem:[#allocation19_spill] sm:$0xff] %v16400_v12  ;;  %v16403_v58 = vpop.f32.mrb[30].mxu1  ;;  %13705 = vmatpush3.bf16.msra.mxu1 %v14646_v21  ;;  %v11807_v21 = vld [vmem:[%s14942_s8 + $0x78] sm:$0xf] }
 0x225   : > { %19505 = vst [vmem:[#allocation20_spill] sm:$0xff] %v16403_v58  ;;  %v16417_v62 = vpop.f32.mrb[31].mxu1  ;;  %13698 = vmatprep.subr.bf16.mxu1 %v19509_v41 }
 0x226   : > { %19508 = vst [vmem:[#allocation23_spill] sm:$0xff] %v16417_v62 }
 0x227   : > { %13143 = vmatmul.mubr.bf16.gmra.mrb[136].mxu1 %v14235_v2  ;;  %v4212_v2 = vshrl.u32 %v11810_v35, 16  ;;  %v4221_v35 = vshll.u32 %v16486_v44, 16 }
 0x228   : > { %13146 = vmatprep.mubr.bf16.mxu1 %v14236_v25  ;;  %13706 = vmatpush3.bf16.msra.mxu1 %v19509_v41  ;;  %v19518_v25 = vld [vmem:[#allocation10_spill] sm:$0xff] }
 0x229   : > { %13699 = vmatprep.subr.bf16.mxu1 %v19510_v8 }
 0x22a   : > { %v2834_v29 = vpop.f32.mrb[32].mxu1 }
 0x22b   : > { %v16434_v37 = vadd.f32 %v2834_v29, %v16258_v63  ;;  %v16436_v19 = vpop.f32.mrb[33].mxu1  ;;  %v14239_v29 = vld [vmem:[%s14942_s8 + $0x84] sm:$0xff]  }
 0x22c   : > { %19512 = vst [vmem:[#allocation16_spill] sm:$0xff] %v16436_v19  ;;  %v2838_v24 = vpop.f32.mrb[34].mxu1  ;;  %13707 = vmatpush3.bf16.msra.mxu1 %v19510_v8  ;;  %v4217_v19 = vrot.slane %v4215_v50, 5 }
 0x22d   : > { %19511 = vst [vmem:[#allocation13_spill] sm:$0xff] %v16434_v37  ;;  %v16450_v63 = vadd.f32 %v2838_v24, %v16264_v28  ;;  %v16452_v52 = vpop.f32.mrb[35].mxu1  ;;  %13700 = vmatprep.subr.bf16.mxu1 %v19517_v34  ;;  %v16463_v28 = vld [vmem:[%s19321_s1 + $0x200] sm:$0xff]  }
 0x22e   : > { %19516 = vst [vmem:[#allocation27_spill] sm:$0xff] %v16452_v52  ;;  %v4214_v52 = vrot.slane %v4212_v2, 4 }
 0x22f   : > { %19515 = vst [vmem:[#allocation26_spill] sm:$0xff] %v16450_v63  ;;  %13147 = vmatmul.mubr.bf16.gmra.mrb[140].mxu1 %v14237_v30  ;;  %v4188_v30 = vshrl.u32 %v11807_v21, 16  ;;  %v16502_v63 = vld [vmem:[%s14942_s8 + $0x8c] sm:$0x1] }
 0x230   : > { %13150 = vmatprep.mubr.bf16.mxu1 %v14238_v51  ;;  %13708 = vmatpush3.bf16.msra.mxu1 %v19517_v34  ;;  %v4191_v34 = vshll.u32 %v11807_v21, 16 }
 0x231   : > { %13701 = vmatprep.subr.bf16.mxu1 %v19518_v25 }
 0x232   : > { %v2844_v41 = vpop.f32.mrb[36].mxu1  ;;  %v4193_v21 = vrot.slane %v4191_v34, 5  ;;  %v14242_v34 = vld [vmem:[%s14942_s8 + $0xa8] sm:$0xff]  }
 0x233   : > { %v16469_v8 = vadd.f32 %v16255_v53, %v2844_v41  ;;  %v16471_v47 = vpop.f32.mrb[37].mxu1  ;;  %v4197_v53 = vshll.u32 %v16466_v16, 16  ;;  %v4201_v41 = vshrl.u32 %v16466_v16, 16 }
 0x234   : > { %19520 = vst [vmem:[#allocation10_spill] sm:$0xff] %v16471_v47  ;;  %v2848_v3 = vpop.f32.mrb[38].mxu1  ;;  %13709 = vmatpush3.bf16.msra.mxu1 %v19518_v25  ;;  %v4190_v25 = vrot.slane %v4188_v30, 4 }
 0x235   : > { %19519 = vst [vmem:[#allocation17_spill] sm:$0xff] %v16469_v8  ;;  %v16478_v24 = vadd.f32 %v16260_v38, %v2848_v3  ;;  %v16480_v51 = vpop.f32.mrb[39].mxu1  ;;  %13214 = vmatprep.subr.bf16.mxu1 %v16463_v28  ;;  %v16489_v38 = vld [vmem:[%s14942_s8 + $0x80] sm:$0x1]  ;;  %v16491_v3 = vrot.slane %v4197_v53, 5  ;;  %v4231_v8 = vshll.u32 %v16502_v63, 16 }
 0x236   : > { %19522 = vst [vmem:[#allocation29_spill] sm:$0xff] %v16480_v51  ;;  %v4203_v51 = vrot.slane %v4201_v41, 4  ;;  %v11813_v53 = vld [vmem:[%s14942_s8 + $0x90] sm:$0xf]  ;;  %v4194_v2 = vor.u32 %v4193_v21, %v4190_v25  ;;  %v11816_v21 = vld [vmem:[%s14942_s8 + $0x9c] sm:$0xf] }
 0x237   : > { %19521 = vst [vmem:[#allocation28_spill] sm:$0xff] %v16478_v24  ;;  %13151 = vmatmul.mubr.bf16.gmra.mrb[144].mxu1 %v14239_v29  ;;  %v4225_v29 = vshrl.u32 %v16486_v44, 16  ;;  %v4233_v18 = vrot.slane %v4231_v8, 5 }
 0x238   : > { %13154 = vmatprep.mubr.bf16.mxu1 %v14240_v61  ;;  %v4204_v24 = vor.u32 %v4203_v51, %v16491_v3 }
 0x239   : > { %v4227_v37 = vrot.slane %v4225_v29, 4 }
 0x23a   : > { %v2854_v47 = vpop.f32.mrb[40].mxu1  ;;  %v4205_v48 = vrot.slane %v4204_v24, 4  ;;  %v11819_v24 = vld [vmem:[%s14942_s8 + $0xa8] sm:$0xf] }
 0x23b   : > { %v16496_v45 = vadd.f32 %v2854_v47, %v16286_v7  ;;  %v16498_v61 = vpop.f32.mrb[41].mxu1  ;;  %v4207_v7 = vshll.u32 %v16489_v38, 16  ;;  %v16514_v47 = vld [vmem:[%s14942_s8 + $0x94] sm:$0xf] }
 0x23c   : > { %19524 = vst [vmem:[#allocation31_spill] sm:$0xff] %v16498_v61  ;;  %v2858_v30 = vpop.f32.mrb[42].mxu1  ;;  %v4218_v61 = vor.u32 %v4217_v19, %v4214_v52  ;;  %v4245_v25 = vshll.u32 %v16514_v47, 16  ;;  %v4249_v51 = vshrl.u32 %v16514_v47, 16  ;;  %v14244_v52 = vld [vmem:[%s14942_s8 + $0xc0] sm:$0xff]  }
 0x23d   : > { %19523 = vst [vmem:[#allocation30_spill] sm:$0xff] %v16496_v45  ;;  %v16507_v41 = vadd.f32 %v2858_v30, %v16299_v6  ;;  %v16509_v50 = vpop.f32.mrb[43].mxu1  ;;  %v16516_v45 = vrot.slane %v4221_v35, 5  ;;  %v4236_v6 = vshrl.u32 %v11813_v53, 16  ;;  %v4239_v30 = vshll.u32 %v11813_v53, 16 }
 0x23e   : > { %19526 = vst [vmem:[#allocation33_spill] sm:$0xff] %v16509_v50  ;;  %v14243_v50 = vld [vmem:[%s14942_s8 + $0xb4] sm:$0xff]   ;;  %v4209_v35 = vrot.slane %v4207_v7, 5  ;;  %v4219_v29 = vrot.slane %v4218_v61, 4  ;;  %v16526_v53 = vld [vmem:[%s14942_s8 + $0xa0] sm:$0xf] }
 0x23f   : > { %19525 = vst [vmem:[#allocation32_spill] sm:$0xff] %v16507_v41  ;;  %13155 = vmatmul.mubr.bf16.gmra.mrb[148].mxu1 %v14241_v43  ;;  %v4195_v41 = vrot.slane %v4194_v2, 4  ;;  %v4228_v43 = vor.u32 %v4227_v37, %v16516_v45  ;;  %19527 = vst [vmem:[#allocation34_spill] sm:$0xff] %v16526_v53  ;;  %v4238_v40 = vrot.slane %v4236_v6, 4  ;;  %v4241_v62 = vrot.slane %v4239_v30, 5 }
 0x240   : > { %13158 = vmatprep.mubr.bf16.mxu1 %v14242_v34  ;;  %v4260_v2 = vshrl.u32 %v11816_v21, 16  ;;  %v16534_v60 = vrot.slane %v4245_v25, 5  ;;  %v4251_v7 = vrot.slane %v4249_v51, 4  ;;  %v4263_v61 = vshll.u32 %v11816_v21, 16  ;;  %v16548_v6 = vld [vmem:[%s14942_s8 + $0x98] sm:$0x1] }
 0x241   : > { %19533 = vst [vmem:[#allocation40_spill] sm:$0xff] %v16548_v6  ;;  %v4269_v30 = vshll.u32 %v16526_v53, 16  ;;  %v4273_v25 = vshrl.u32 %v16526_v53, 16  ;;  %v4210_v51 = vsel %vm14977_vm2, %v4205_v48, %v4209_v35  ;;  %v4229_v21 = vrot.slane %v4228_v43, 4  ;;  %v16559_v35 = vld [vmem:[%s14942_s8 + $0xa4] sm:$0x1] }
 0x242   : > { %v2864_v19 = vpop.f32.mrb[44].mxu1 }
 0x243   : > { %v16529_v34 = vadd.f32 %v16283_v5, %v2864_v19  ;;  %v16531_v58 = vpop.f32.mrb[45].mxu1  ;;  %v4200_v5 = vsel %vm14977_vm2, %v4195_v41, %v16491_v3  ;;  %v4284_v19 = vshrl.u32 %v11819_v24, 16  ;;  %v4297_v3 = vshrl.u32 %v16537_v54, 16 }
 0x244   : > { %19529 = vst [vmem:[#allocation36_spill] sm:$0xff] %v16531_v58  ;;  %v2868_v12 = vpop.f32.mrb[46].mxu1  ;;  %v4252_v41 = vor.u32 %v4251_v7, %v16534_v60  ;;  %v4255_v58 = vshll.u32 %v16548_v6, 16  ;;  %v11839_v48 = vcombine.low %v4200_v5, %v4210_v51  ;;  %v16561_v43 = vrot.slane %v4269_v30, 5 }
 0x245   : > { %19528 = vst [vmem:[#allocation35_spill] sm:$0xff] %v16529_v34  ;;  %v16540_v37 = vadd.f32 %v16288_v1, %v2868_v12  ;;  %v16542_v8 = vpop.f32.mrb[47].mxu1  ;;  %v4287_v1 = vshll.u32 %v11819_v24, 16  ;;  %v4242_v12 = vor.u32 %v4241_v62, %v4238_v40  ;;  %v4265_v34 = vrot.slane %v4263_v61, 5  ;;  %v14245_v62 = vld [vmem:[%s14942_s8 + $0xcc] sm:$0xff]  }
 0x246   : > { %19532 = vst [vmem:[#allocation39_spill] sm:$0xff] %v16542_v8  ;;  %v4293_v8 = vshll.u32 %v16537_v54, 16  ;;  %v4224_v24 = vsel %vm14977_vm2, %v4219_v29, %v16516_v45  ;;  %v4286_v7 = vrot.slane %v4284_v19, 4  ;;  %v4299_v53 = vrot.slane %v4297_v3, 4 }
 0x247   : > { %19531 = vst [vmem:[#allocation38_spill] sm:$0xff] %v16540_v37  ;;  %13159 = vmatmul.mubr.bf16.gmra.mrb[152].mxu1 %v14243_v50  ;;  %v4262_v37 = vrot.slane %v4260_v2, 4  ;;  %v4275_v50 = vrot.slane %v4273_v25, 4  ;;  %v4289_v54 = vrot.slane %v4287_v1, 5  ;;  %v11822_v2 = vld [vmem:[%s14942_s8 + $0xb4] sm:$0xf] }
 0x248   : > { %13162 = vmatprep.mubr.bf16.mxu1 %v14244_v52  ;;  %v4234_v52 = vsel %vm14977_vm2, %v4229_v21, %v4233_v18  ;;  %v4243_v30 = vrot.slane %v4242_v12, 4  ;;  %v16576_v25 = vld [vmem:[%s14942_s8 + $0xb0] sm:$0x1]  ;;  %v16578_v51 = vrot.slane %v4293_v8, 5  ;;  %v4253_v29 = vrot.slane %v4252_v41, 4 }
 0x249   : > { %v4257_v6 = vrot.slane %v4255_v58, 5  ;;  %v4266_v18 = vor.u32 %v4265_v34, %v4262_v37  ;;  %v4279_v21 = vshll.u32 %v16559_v35, 16  ;;  %v11840_v1 = vcombine.low %v4224_v24, %v4234_v52 }
 0x24a   : > { %v2874_v40 = vpop.f32.mrb[48].mxu1  ;;  %v4276_v12 = vor.u32 %v4275_v50, %v16561_v43  ;;  %v4303_v8 = vshll.u32 %v16576_v25, 16  ;;  %v4311_v3 = vshll.u32 %v11822_v2, 16  ;;  %v4248_v58 = vsel %vm14977_vm2, %v4243_v30, %v16534_v60 }
 0x24b   : > { %v16571_v61 = vadd.f32 %v2874_v40, %v16319_v14  ;;  %v16573_v5 = vpop.f32.mrb[49].mxu1  ;;  %v11825_v40 = vld [vmem:[%s14942_s8 + $0xc0] sm:$0xf]  ;;  %v4317_v34 = vshll.u32 %v16389_v55, 16  ;;  %v4321_v37 = vshrl.u32 %v16389_v55, 16  ;;  %v4267_v41 = vrot.slane %v4266_v18, 4 }
 0x24c   : > { %19535 = vst [vmem:[#allocation42_spill] sm:$0xff] %v16573_v5  ;;  %v2878_v45 = vpop.f32.mrb[50].mxu1  ;;  %v4290_v5 = vor.u32 %v4289_v54, %v4286_v7  ;;  %v4258_v54 = vsel %vm14977_vm2, %v4253_v29, %v4257_v6  ;;  %v4281_v50 = vrot.slane %v4279_v21, 5  ;;  %v4332_v24 = vshrl.u32 %v11825_v40, 16 }
 0x24d   : > { %19534 = vst [vmem:[#allocation41_spill] sm:$0xff] %v16571_v61  ;;  %v16582_v19 = vadd.f32 %v2878_v45, %v16324_v26  ;;  %v16584_v14 = vpop.f32.mrb[51].mxu1  ;;  %v4308_v61 = vshrl.u32 %v11822_v2, 16  ;;  %v4300_v26 = vor.u32 %v4299_v53, %v16578_v51  ;;  %v4277_v52 = vrot.slane %v4276_v12, 4  ;;  %v14247_v12 = vld [vmem:[%s19321_s1 + $0x208] sm:$0xff]  }
 0x24e   : > { %19536 = vst [vmem:[#allocation43_spill] sm:$0xff] %v16584_v14  ;;  %v4335_v7 = vshll.u32 %v11825_v40, 16  ;;  %v4345_v2 = vshrl.u32 %v16590_v0, 16  ;;  %v4291_v30 = vrot.slane %v4290_v5, 4  ;;  %v4305_v53 = vrot.slane %v4303_v8, 5 }
 0x24f   : > { %13163 = vmatmul.mubr.bf16.gmra.mrb[156].mxu1 %v14245_v62  ;;  %v4341_v62 = vshll.u32 %v16590_v0, 16  ;;  %v4310_v45 = vrot.slane %v4308_v61, 4  ;;  %v4313_v14 = vrot.slane %v4311_v3, 5  ;;  %v4301_v6 = vrot.slane %v4300_v26, 4 }
 0x250   : > { %13198 = vmatprep.mubr.bf16.mxu1 %v11839_v48  ;;  %v16607_v29 = vrot.slane %v4317_v34, 5  ;;  %v4323_v18 = vrot.slane %v4321_v37, 4  ;;  %v11841_v5 = vcombine.low %v4248_v58, %v4258_v54  ;;  %v4334_v40 = vrot.slane %v4332_v24, 4  ;;  %v16627_v54 = vld [vmem:[%s14942_s8 + $0xc8] sm:$0x1] }
 0x251   : > { %v16617_v3 = vrot.slane %v4341_v62, 5  ;;  %v4347_v26 = vrot.slane %v4345_v2, 4  ;;  %v4272_v34 = vsel %vm14977_vm2, %v4267_v41, %v16561_v43  ;;  %v4282_v37 = vsel %vm14977_vm2, %v4277_v52, %v4281_v50 }
 0x252   : > { %v2884_v60 = vpop.f32.mrb[52].mxu1  ;;  %v4327_v58 = vshll.u32 %v16394_v31, 16  ;;  %v4306_v24 = vsel %vm14977_vm2, %v4301_v6, %v4305_v53  ;;  %v4324_v62 = vor.u32 %v4323_v18, %v16607_v29  ;;  %v4365_v31 = vshll.u32 %v16423_v49, 16 }
 0x253   : > { %v16603_v55 = vadd.f32 %v16316_v15, %v2884_v60  ;;  %v16605_v48 = vpop.f32.mrb[53].mxu1  ;;  %v4337_v15 = vrot.slane %v4335_v7, 5  ;;  %v11828_v60 = vld [vmem:[%s14942_s8 + $0xcc] sm:$0xf]  ;;  %v4314_v7 = vor.u32 %v4313_v14, %v4310_v45  ;;  %v4369_v50 = vshrl.u32 %v16423_v49, 16 }
 0x254   : > { %19537 = vst [vmem:[#allocation44_spill] sm:$0xff] %v16605_v48  ;;  %v2888_v21 = vpop.f32.mrb[54].mxu1  ;;  %v4356_v43 = vshrl.u32 %v11828_v60, 16  ;;  %v4359_v41 = vshll.u32 %v11828_v60, 16  ;;  %v4348_v52 = vor.u32 %v4347_v26, %v16617_v3  ;;  %v4351_v14 = vshll.u32 %v16627_v54, 16 }
 0x255   : > { %v16613_v61 = vadd.f32 %v16321_v39, %v2888_v21  ;;  %v16615_v8 = vpop.f32.mrb[55].mxu1  ;;  %v4296_v39 = vsel %vm14977_vm2, %v4291_v30, %v16578_v51  ;;  %v14248_v51 = vld [vmem:[%s19321_s1 + $0x210] sm:$0xff]   ;;  %v11842_v30 = vcombine.low %v4272_v34, %v4282_v37  ;;  %v4315_v49 = vrot.slane %v4314_v7, 4 }
 0x256   : > { %19538 = vst [vmem:[#allocation45_spill] sm:$0xff] %v16615_v8  ;;  %v11843_v6 = vcombine.low %v4296_v39, %v4306_v24  ;;  %v4325_v18 = vrot.slane %v4324_v62, 4  ;;  %v4361_v60 = vrot.slane %v4359_v41, 5  ;;  %v4349_v37 = vrot.slane %v4348_v52, 4  ;;  %v14250_v62 = vld [vmem:[%s19321_s1 + $0x220] sm:$0xff]  }
 0x257   : > { %13199 = vmatmul.mubr.bf16.vlgmr.msra.gmra.mrb[160].mxu1 %v11840_v1  ;;  %v4338_v1 = vor.u32 %v4337_v15, %v4334_v40  ;;  %v4367_v40 = vrot.slane %v4365_v31, 5  ;;  %v4371_v15 = vrot.slane %v4369_v50, 4  ;;  %v4375_v7 = vshll.u32 %v16429_v17, 16  ;;  %v14647_v41 = vld [vmem:[%s14942_s8 + $0x1c] sm:$0xf] }
 0x258   : > { %13215 = vmatpush3.bf16.msra.mxu1 %v16463_v28  ;;  %13202 = vmatprep.mubr.bf16.mxu1 %v11841_v5  ;;  %v4329_v28 = vrot.slane %v4327_v58, 5  ;;  %v4358_v5 = vrot.slane %v4356_v43, 4  ;;  %v4353_v58 = vrot.slane %v4351_v14, 5  ;;  %v4766_v31 = vrot.slane %v14647_v41, 5 }
 0x259   : > { %13216 = vmatprep.subr.bf16.mxu1 %v14247_v12  ;;  %v4339_v34 = vrot.slane %v4338_v1, 4  ;;  %v4372_v24 = vor.u32 %v4371_v15, %v4367_v40 }
 0x25a   : > { %v2894_v2 = vpop.f32.mrb[56].mxu1  ;;  %v4362_v39 = vor.u32 %v4361_v60, %v4358_v5  ;;  %v4768_v60 = vrot.slane %v4766_v31, 4 }
 0x25b   : > { %v16644_v53 = vadd.f32 %v2894_v2, %v16339_v32  ;;  %v16646_v45 = vpop.f32.mrb[57].mxu1  ;;  %v14249_v32 = vld [vmem:[%s19321_s1 + $0x218] sm:$0xff]   ;;  %v4344_v43 = vsel %vm14977_vm2, %v4339_v34, %v16617_v3  ;;  %v14648_v3 = vld [vmem:[%s14942_s8 + $0x20] sm:$0x1] }
 0x25c   : > { %19539 = vst [vmem:[#allocation46_spill] sm:$0xff] %v16646_v45  ;;  %v2898_v21 = vpop.f32.mrb[58].mxu1  ;;  %13217 = vmatpush3.bf16.msra.mxu1 %v14247_v12  ;;  %v4320_v12 = vsel %vm14977_vm2, %v4315_v49, %v16607_v29  ;;  %v4354_v29 = vsel %vm14977_vm2, %v4349_v37, %v4353_v58  ;;  %v4769_v49 = vrot.slane %v14648_v3, 5  ;;  %v14649_v58 = vld [vmem:[%s14942_s8 + $0x34] sm:$0xf] }
 0x25d   : > { %v16649_v26 = vadd.f32 %v2898_v21, %v16344_v22  ;;  %v16651_v8 = vpop.f32.mrb[59].mxu1  ;;  %13218 = vmatprep.subr.bf16.mxu1 %v14248_v51  ;;  %v4330_v22 = vsel %vm14977_vm2, %v4325_v18, %v4329_v28  ;;  %v11845_v2 = vcombine.low %v4344_v43, %v4354_v29  ;;  %v4373_v28 = vrot.slane %v4372_v24, 4  ;;  %v5521_v45 = vld [vmem:[#allocation2 + $0x14] sm:$0x1] }
 0x25e   : > { %19540 = vst [vmem:[#allocation47_spill] sm:$0xff] %v16651_v8  ;;  %v11844_v52 = vcombine.low %v4320_v12, %v4330_v22  ;;  %v4770_v37 = vsel %vm15307_vm5, %v4768_v60, %v4769_v49  ;;  %v4780_v12 = vrot.slane %v14649_v58, 5  ;;  %v11858_v49 = vld [vmem:[%s14942_s8 + $0x3c] sm:$0xe] }
 0x25f   : > { %13203 = vmatmul.mubr.bf16.gmra.mrb[164].mxu1 %v11842_v30  ;;  %v4363_v30 = vrot.slane %v4362_v39, 4  ;;  %v11857_v39 = vld [vmem:[%s14942_s8 + $0x30] sm:$0xe] }
 0x260   : > { %13219 = vmatpush3.bf16.msra.mxu1 %v14248_v51  ;;  %13206 = vmatprep.mubr.bf16.mxu1 %v11843_v6  ;;  %v11855_v51 = vld [vmem:[%s14942_s8 + $0x18] sm:$0xe]  ;;  %v4377_v6 = vrot.slane %v4375_v7, 5 }
 0x261   : > { %13220 = vmatprep.subr.bf16.mxu1 %v14249_v32  ;;  %v11871_v5 = vrot.slane %v11855_v51, 9  ;;  %v4368_v15 = vsel %vm14977_vm2, %v4363_v30, %v4367_v40  ;;  %v14650_v51 = vld [vmem:[%s14942_s8 + $0x38] sm:$0x1] }
 0x262   : > { %v2904_v50 = vpop.f32.mrb[60].mxu1 }
 0x263   : > { %v16673_v1 = vadd.f32 %v16337_v36, %v2904_v50  ;;  %v16675_v17 = vpop.f32.mrb[61].mxu1  ;;  %v14251_v36 = vld [vmem:[%s19321_s1 + $0x228] sm:$0xff]   ;;  %v4767_v34 = vsel %vm15307_vm5, %v11871_v5, %v4766_v31  ;;  %v14253_v31 = vld [vmem:[%s19321_s1 + $0x238] sm:$0xff]   ;;  %v4782_v50 = vrot.slane %v4780_v12, 4 }
 0x264   : > { %19541 = vst [vmem:[#allocation48_spill] sm:$0xff] %v16675_v17  ;;  %v2908_v14 = vpop.f32.mrb[62].mxu1  ;;  %13221 = vmatpush3.bf16.msra.mxu1 %v14249_v32  ;;  %v14252_v32 = vld [vmem:[%s19321_s1 + $0x230] sm:$0xff]   ;;  %v11887_v43 = vcombine.low %v4767_v34, %v4770_v37 }
 0x265   : > { %v16679_v18 = vadd.f32 %v16341_v23, %v2908_v14  ;;  %v16681_v21 = vpop.f32.mrb[63].mxu1  ;;  %13222 = vmatprep.subr.bf16.mxu1 %v14250_v62  ;;  %v4378_v23 = vsel %vm14977_vm2, %v4373_v28, %v4377_v6 }
 0x266   : > { %19542 = vst [vmem:[#allocation49_spill] sm:$0xff] %v16681_v21  ;;  %v11846_v7 = vcombine.low %v4368_v15, %v4378_v23  ;;  %v11859_v23 = vld [vmem:[%s14942_s8 + $0x48] sm:$0xe] }
 0x267   : > { %13207 = vmatmul.mubr.bf16.gmra.mrb[168].mxu1 %v11844_v52  ;;  %v4783_v52 = vrot.slane %v14650_v51, 5  ;;  %v16713_v14 = vpop.f32.mrb[0].mxu0 }
 0x268   : > { %13223 = vmatpush3.bf16.msra.mxu1 %v14250_v62  ;;  %13210 = vmatprep.mubr.bf16.mxu1 %v11845_v2  ;;  %v16715_v2 = vpop.f32.mrb[1].mxu0 }
 0x269   : > { %13224 = vmatprep.subr.bf16.mxu1 %v14251_v36  ;;  %v16718_v28 = vpop.f32.mrb[2].mxu0  ;;  %v4784_v3 = vsel %vm15307_vm5, %v4782_v50, %v4783_v52  ;;  %v14654_v50 = vld [vmem:[%s14942_s8 + $0x50] sm:$0x1] }
 0x26a   : > { %v2914_v22 = vpop.f32.mrb[64].mxu1  ;;  %v16726_v60 = vpop.f32.mrb[3].mxu0  ;;  %v4797_v51 = vrot.slane %v14654_v50, 5  ;;  %v14657_v50 = vld [vmem:[%s14942_s8 + $0x5c] sm:$0x1] }
 0x26b   : > { %v16700_v40 = vadd.f32 %v2914_v22, %v16352_v10  ;;  %v16702_v24 = vpop.f32.mrb[65].mxu1  ;;  %v11873_v10 = vrot.slane %v11857_v39, 9  ;;  %v14653_v39 = vld [vmem:[%s14942_s8 + $0x44] sm:$0x1] }
 0x26c   : > { %19543 = vst [vmem:[#allocation50_spill] sm:$0xff] %v16702_v24  ;;  %v2918_v62 = vpop.f32.mrb[66].mxu1  ;;  %13225 = vmatpush3.bf16.msra.mxu1 %v14251_v36  ;;  %v14652_v36 = vld [vmem:[%s14942_s8 + $0x4c] sm:$0xf] }
 0x26d   : > { %v16705_v29 = vadd.f32 %v2918_v62, %v16357_v9  ;;  %v16707_v41 = vpop.f32.mrb[67].mxu1  ;;  %13226 = vmatprep.subr.bf16.mxu1 %v14252_v32  ;;  %v14651_v9 = vld [vmem:[%s14942_s8 + $0x40] sm:$0xf]  ;;  %v4781_v6 = vsel %vm15307_vm5, %v11873_v10, %v4780_v12  ;;  %v4794_v5 = vrot.slane %v14652_v36, 5  ;;  %v11874_v12 = vrot.slane %v11858_v49, 9 }
 0x26e   : > { %19544 = vst [vmem:[#allocation51_spill] sm:$0xff] %v16707_v41  ;;  %v4787_v30 = vrot.slane %v14651_v9, 5  ;;  %v11889_v58 = vcombine.low %v4781_v6, %v4784_v3  ;;  %v11875_v10 = vrot.slane %v11859_v23, 9  ;;  %v11860_v36 = vld [vmem:[%s14942_s8 + $0x54] sm:$0xe] }
 0x26f   : > { %13211 = vmatmul.mubr.bf16.gmra.mrb[172].mxu1 %v11846_v7  ;;  %v4790_v7 = vrot.slane %v14653_v39, 5 }
 0x270   : > { %13227 = vmatpush3.bf16.msra.mxu1 %v14252_v32  ;;  %13230 = vmatprep.mubr.bf16.mxu1 %v11887_v43  ;;  %v4789_v22 = vrot.slane %v4787_v30, 4  ;;  %v4788_v52 = vsel %vm15307_vm5, %v11874_v12, %v4787_v30  ;;  %v4795_v3 = vsel %vm15307_vm5, %v11875_v10, %v4794_v5  ;;  %v11876_v10 = vrot.slane %v11860_v36, 9  ;;  %v14659_v36 = vld [vmem:[%s14942_s8 + $0x70] sm:$0xf] }
 0x271   : > { %13228 = vmatprep.subr.bf16.mxu1 %v14253_v31 }
 0x272   : > { %v2924_v15 = vpop.f32.mrb[68].mxu1  ;;  %v4791_v9 = vsel %vm15307_vm5, %v4789_v22, %v4790_v7 }
 0x273   : > { %v16730_v32 = vadd.f32 %v16350_v13, %v2924_v15  ;;  %v16732_v34 = vpop.f32.mrb[69].mxu1  ;;  %v4796_v13 = vrot.slane %v4794_v5, 4  ;;  %v14656_v15 = vld [vmem:[%s14942_s8 + $0x64] sm:$0xf]  ;;  %v11890_v5 = vcombine.low %v4788_v52, %v4791_v9  ;;  %v14658_v9 = vld [vmem:[%s14942_s8 + $0x68] sm:$0x1] }
 0x274   : > { %19545 = vst [vmem:[#allocation52_spill] sm:$0xff] %v16732_v34  ;;  %v2928_v37 = vpop.f32.mrb[70].mxu1  ;;  %13229 = vmatpush3.bf16.msra.mxu1 %v14253_v31  ;;  %v19547_v31 = vcombine.low %v16293_v57, %v16297_v11  ;;  %v4808_v57 = vrot.slane %v14656_v15, 5  ;;  %v16755_v11 = vpop.f32.mrb[4].mxu0 }
 0x275   : > { %v16736_v62 = vadd.f32 %v16354_v20, %v2928_v37  ;;  %v16738_v43 = vpop.f32.mrb[71].mxu1  ;;  %v14655_v20 = vld [vmem:[%s14942_s8 + $0x58] sm:$0xf]  ;;  %v4798_v49 = vsel %vm15307_vm5, %v4796_v13, %v4797_v51  ;;  %v11861_v37 = vld [vmem:[%s14942_s8 + $0x60] sm:$0xe]  ;;  %v16758_v30 = vpop.f32.mrb[5].mxu0 }
 0x276   : > { %19546 = vst [vmem:[#allocation53_spill] sm:$0xff] %v16738_v43  ;;  %v4801_v6 = vrot.slane %v14655_v20, 5  ;;  %v16765_v22 = vpop.f32.mrb[6].mxu0  ;;  %v11891_v7 = vcombine.low %v4795_v3, %v4798_v49  ;;  %v4804_v51 = vrot.slane %v14657_v50, 5  ;;  %v11877_v15 = vrot.slane %v11861_v37, 9 }
 0x277   : > { %13231 = vmatmul.mubr.bf16.vlgmr.msra.gmra.mrb[176].mxu1 %v19547_v31  ;;  %v16768_v31 = vpop.f32.mrb[7].mxu0  ;;  %v4810_v52 = vrot.slane %v4808_v57, 4  ;;  %v4815_v50 = vrot.slane %v14659_v36, 5 }
 0x278   : > { %13234 = vmatprep.mubr.bf16.mxu1 %v11889_v58  ;;  %v4803_v13 = vrot.slane %v4801_v6, 4  ;;  %v4802_v3 = vsel %vm15307_vm5, %v11876_v10, %v4801_v6 }
 0x27a   : > { %v2934_v23 = vpop.f32.mrb[72].mxu1  ;;  %v4805_v49 = vsel %vm15307_vm5, %v4803_v13, %v4804_v51 }
 0x27b   : > { %v16761_v58 = vadd.f32 %v2934_v23, %v16361_v4  ;;  %v16763_v12 = vpop.f32.mrb[73].mxu1  ;;  %v4811_v23 = vrot.slane %v14658_v9, 5  ;;  %v4822_v9 = vrot.slane %v16466_v16, 5  ;;  %v11892_v10 = vcombine.low %v4802_v3, %v4805_v49 }
 0x27c   : > { %19548 = vst [vmem:[#allocation54_spill] sm:$0xff] %v16763_v12  ;;  %v2938_v39 = vpop.f32.mrb[74].mxu1  ;;  %v16793_v13 = vpop.f32.mrb[8].mxu0  ;;  %v4825_v3 = vrot.slane %v16489_v38, 5 }
 0x27d   : > { %v16771_v20 = vadd.f32 %v2938_v39, %v16367_v33  ;;  %v16773_v4 = vpop.f32.mrb[75].mxu1  ;;  %v4809_v33 = vsel %vm15307_vm5, %v11877_v15, %v4808_v57  ;;  %v4812_v37 = vsel %vm15307_vm5, %v4810_v52, %v4811_v23  ;;  %v11862_v39 = vld [vmem:[%s14942_s8 + $0x6c] sm:$0xe]  ;;  %v4817_v57 = vrot.slane %v4815_v50, 4  ;;  %v14660_v15 = vld [vmem:[%s14942_s8 + $0x74] sm:$0x1] }
 0x27e   : > { %19549 = vst [vmem:[#allocation55_spill] sm:$0xff] %v16773_v4  ;;  %v11893_v36 = vcombine.low %v4809_v33, %v4812_v37  ;;  %v11878_v12 = vrot.slane %v11862_v39, 9  ;;  %v4818_v41 = vrot.slane %v14660_v15, 5  ;;  %v16796_v52 = vpop.f32.mrb[9].mxu0  ;;  %v4829_v39 = vrot.slane %v16486_v44, 5 }
 0x27f   : > { %13235 = vmatmul.mubr.bf16.gmra.mrb[180].mxu1 %v11890_v5  ;;  %v16804_v49 = vpop.f32.mrb[10].mxu0  ;;  %v4836_v15 = vrot.slane %v16514_v47, 5  ;;  %v19553_v47 = vld [vmem:[#allocation14_spill] sm:$0xff] }
 0x280   : > { %13238 = vmatprep.mubr.bf16.mxu1 %v11891_v7  ;;  %v11863_v7 = vld [vmem:[%s14942_s8 + $0x78] sm:$0xe]  ;;  %v16806_v33 = vpop.f32.mrb[11].mxu0  ;;  %v4816_v37 = vsel %vm15307_vm5, %v11878_v12, %v4815_v50 }
 0x282   : > { %v2944_v5 = vpop.f32.mrb[76].mxu1 }
 0x283   : > { %v16789_v4 = vadd.f32 %v16359_v56, %v2944_v5  ;;  %v16791_v6 = vpop.f32.mrb[77].mxu1  ;;  %v11879_v56 = vrot.slane %v11863_v7, 9  ;;  %v4824_v5 = vrot.slane %v4822_v9, 4 }
 0x284   : > { %19550 = vst [vmem:[#allocation56_spill] sm:$0xff] %v16791_v6  ;;  %v2948_v51 = vpop.f32.mrb[78].mxu1 }
 0x285   : > { %v16799_v16 = vadd.f32 %v16364_v27, %v2948_v51  ;;  %v16801_v23 = vpop.f32.mrb[79].mxu1  ;;  %v4819_v27 = vsel %vm15307_vm5, %v4817_v57, %v4818_v41  ;;  %v4823_v7 = vsel %vm15307_vm5, %v11879_v56, %v4822_v9  ;;  %v4826_v38 = vsel %vm15307_vm5, %v4824_v5, %v4825_v3  ;;  %v11864_v51 = vld [vmem:[%s14942_s8 + $0x84] sm:$0xe]  ;;  %v16825_v41 = vpop.f32.mrb[12].mxu0 }
 0x286   : > { %19551 = vst [vmem:[#allocation57_spill] sm:$0xff] %v16801_v23  ;;  %v11894_v50 = vcombine.low %v4816_v37, %v4819_v27  ;;  %v11895_v57 = vcombine.low %v4823_v7, %v4826_v38  ;;  %v11880_v6 = vrot.slane %v11864_v51, 9  ;;  %v4831_v9 = vrot.slane %v4829_v39, 4  ;;  %v16828_v5 = vpop.f32.mrb[13].mxu0  ;;  %v19555_v37 = vld [vmem:[#allocation40_spill] sm:$0xff]  ;;  %v19556_v51 = vld [vmem:[#allocation34_spill] sm:$0xff] }
 0x287   : > { %13239 = vmatmul.mubr.bf16.gmra.mrb[184].mxu1 %v11892_v10  ;;  %v11865_v10 = vld [vmem:[%s14942_s8 + $0x90] sm:$0xe]  ;;  %v4832_v56 = vrot.slane %v16502_v63, 5  ;;  %v4839_v27 = vrot.slane %v19555_v37, 5  ;;  %v11866_v37 = vld [vmem:[%s14942_s8 + $0x9c] sm:$0xe] }
 0x288   : > { %13242 = vmatprep.mubr.bf16.mxu1 %v11893_v36  ;;  %v4830_v63 = vsel %vm15307_vm5, %v11880_v6, %v4829_v39 }
 0x289   : > { %v4833_v38 = vsel %vm15307_vm5, %v4831_v9, %v4832_v56 }
 0x28a   : > { %v2954_v23 = vpop.f32.mrb[80].mxu1  ;;  %v11896_v39 = vcombine.low %v4830_v63, %v4833_v38 }
 0x28b   : > { %v16821_v36 = vadd.f32 %v2954_v23, %v16377_v59  ;;  %v16823_v12 = vpop.f32.mrb[81].mxu1  ;;  %v11881_v59 = vrot.slane %v11865_v10, 9  ;;  %v4838_v23 = vrot.slane %v4836_v15, 4 }
 0x28c   : > { %19552 = vst [vmem:[#allocation58_spill] sm:$0xff] %v16823_v12  ;;  %v2958_v44 = vpop.f32.mrb[82].mxu1  ;;  %v16836_v12 = vpop.f32.mrb[14].mxu0 }
 0x28d   : > { %v16831_v3 = vadd.f32 %v2958_v44, %v19553_v47  ;;  %v16833_v43 = vpop.f32.mrb[83].mxu1  ;;  %v16838_v7 = vpop.f32.mrb[15].mxu0  ;;  %v4843_v44 = vrot.slane %v19556_v51, 5  ;;  %v4837_v10 = vsel %vm15307_vm5, %v11881_v59, %v4836_v15  ;;  %v4840_v47 = vsel %vm15307_vm5, %v4838_v23, %v4839_v27  ;;  %v19560_v59 = vld [vmem:[#allocation12_spill] sm:$0xff] }
 0x28e   : > { %19554 = vst [vmem:[#allocation14_spill] sm:$0xff] %v16833_v43  ;;  %v19557_v43 = vld [vmem:[#allocation37_spill] sm:$0xff]  ;;  %v11897_v56 = vcombine.low %v4837_v10, %v4840_v47  ;;  %v11882_v51 = vrot.slane %v11866_v37, 9  ;;  %v4846_v15 = vrot.slane %v16559_v35, 5  ;;  %v4864_v47 = vrot.slane %v16590_v0, 5 }
 0x28f   : > { %13243 = vmatmul.mubr.bf16.gmra.mrb[188].mxu1 %v11894_v50  ;;  %v4850_v24 = vrot.slane %v19557_v43, 5  ;;  %v11867_v50 = vld [vmem:[%s14942_s8 + $0xa8] sm:$0xe]  ;;  %v4845_v8 = vrot.slane %v4843_v44, 4 }
 0x290   : > { %13246 = vmatprep.mubr.bf16.mxu1 %v11895_v57  ;;  %v19558_v57 = vld [vmem:[#allocation11_spill] sm:$0xff]  ;;  %v11883_v43 = vrot.slane %v11867_v50, 9  ;;  %v4844_v63 = vsel %vm15307_vm5, %v11882_v51, %v4843_v44  ;;  %v11869_v50 = vld [vmem:[%s14942_s8 + $0xc0] sm:$0xe] }
 0x291   : > { %v4852_v17 = vrot.slane %v4850_v24, 4  ;;  %v4847_v38 = vsel %vm15307_vm5, %v4845_v8, %v4846_v15  ;;  %v19564_v51 = vld [vmem:[#allocation23_spill] sm:$0xff] }
 0x292   : > { %v2964_v34 = vpop.f32.mrb[84].mxu1  ;;  %v4851_v35 = vsel %vm15307_vm5, %v11883_v43, %v4850_v24  ;;  %v11885_v24 = vrot.slane %v11869_v50, 9  ;;  %v19568_v50 = vld [vmem:[#allocation20_spill] sm:$0xff] }
 0x293   : > { %v16853_v21 = vadd.f32 %v19558_v57, %v2964_v34  ;;  %v16855_v6 = vpop.f32.mrb[85].mxu1  ;;  %v4853_v34 = vrot.slane %v16576_v25, 5  ;;  %v19562_v57 = vld [vmem:[#allocation19_spill] sm:$0xff] }
 0x294   : > { %19559 = vst [vmem:[#allocation40_spill] sm:$0xff] %v16855_v6  ;;  %v2968_v9 = vpop.f32.mrb[86].mxu1  ;;  %v4865_v0 = vsel %vm15307_vm5, %v11885_v24, %v4864_v47 }
 0x295   : > { %v16859_v23 = vadd.f32 %v19560_v59, %v2968_v9  ;;  %v16861_v27 = vpop.f32.mrb[87].mxu1  ;;  %v4854_v10 = vsel %vm15307_vm5, %v4852_v17, %v4853_v34  ;;  %v11898_v9 = vcombine.low %v4844_v63, %v4847_v38  ;;  %v4866_v59 = vrot.slane %v4864_v47, 4  ;;  %v19566_v63 = vld [vmem:[#allocation15_spill] sm:$0xff] }
 0x296   : > { %19561 = vst [vmem:[#allocation34_spill] sm:$0xff] %v16861_v27  ;;  %v4867_v17 = vrot.slane %v16627_v54, 5  ;;  %v19583_v27 = vld [vmem:[#allocation32_spill] sm:$0xff] }
 0x297   : > { %13247 = vmatmul.mubr.bf16.gmra.mrb[192].mxu1 %v11896_v39 }
 0x298   : > { %13250 = vmatprep.mubr.bf16.mxu1 %v11897_v56  ;;  %v11899_v56 = vcombine.low %v4851_v35, %v4854_v10  ;;  %v4868_v43 = vsel %vm15307_vm5, %v4866_v59, %v4867_v17  ;;  %v19574_v17 = vld [vmem:[#allocation13_spill] sm:$0xff] }
 0x29a   : > { %v2974_v37 = vpop.f32.mrb[88].mxu1 }
 0x29b   : > { %v16875_v25 = vadd.f32 %v2974_v37, %v19562_v57  ;;  %v16877_v39 = vpop.f32.mrb[89].mxu1  ;;  %v11901_v37 = vcombine.low %v4865_v0, %v4868_v43  ;;  %v19575_v0 = vld [vmem:[#allocation28_spill] sm:$0xff] }
 0x29c   : > { %19563 = vst [vmem:[#allocation37_spill] sm:$0xff] %v16877_v39  ;;  %v2978_v44 = vpop.f32.mrb[90].mxu1  ;;  %v19581_v39 = vld [vmem:[#allocation30_spill] sm:$0xff] }
 0x29d   : > { %v16880_v8 = vadd.f32 %v2978_v44, %v19564_v51  ;;  %v16882_v15 = vpop.f32.mrb[91].mxu1  ;;  %v19571_v44 = vld [vmem:[#allocation22_spill] sm:$0xff]  ;;  %v19573_v51 = vld [vmem:[#allocation17_spill] sm:$0xff] }
 0x29e   : > { %19565 = vst [vmem:[#allocation11_spill] sm:$0xff] %v16882_v15 }
 0x29f   : > { %13251 = vmatmul.mubr.bf16.gmra.mrb[196].mxu1 %v11898_v9  ;;  %v19570_v9 = vld [vmem:[#allocation21_spill] sm:$0xff] }
 0x2a0   : > { %13254 = vmatprep.mubr.bf16.mxu1 %v11899_v56  ;;  %v19572_v56 = vcombine.low %v19570_v9, %v19571_v44  ;;  %v19578_v9 = vld [vmem:[#allocation25_spill] sm:$0xff] }
 0x2a2   : > { %v2984_v34 = vpop.f32.mrb[92].mxu1 }
 0x2a3   : > { %v16890_v38 = vadd.f32 %v19566_v63, %v2984_v34  ;;  %v16892_v35 = vpop.f32.mrb[93].mxu1 }
 0x2a4   : > { %19567 = vst [vmem:[#allocation12_spill] sm:$0xff] %v16892_v35  ;;  %v2988_v10 = vpop.f32.mrb[94].mxu1  ;;  %v19582_v35 = vld [vmem:[#allocation38_spill] sm:$0xff] }
 0x2a5   : > { %v16895_v57 = vadd.f32 %v19568_v50, %v2988_v10  ;;  %v16897_v54 = vpop.f32.mrb[95].mxu1  ;;  %v19576_v50 = vld [vmem:[#allocation26_spill] sm:$0xff] }
 0x2a6   : > { %19569 = vst [vmem:[#allocation19_spill] sm:$0xff] %v16897_v54  ;;  %v19577_v54 = vld [vmem:[#allocation24_spill] sm:$0xff] }
 0x2a7   : > { %13255 = vmatmul.mubr.bf16.gmra.mrb[200].mxu1 %v19572_v56  ;;  %v19579_v44 = vcombine.low %v19577_v54, %v19578_v9  ;;  %v19580_v56 = vld [vmem:[#allocation35_spill] sm:$0xff] }
 0x2a8   : > { %13258 = vmatprep.mubr.bf16.mxu1 %v11901_v37 }
 0x2aa   : > { %v13088_v47 = vpop.f32.mrb[96].mxu1 }
 0x2ab   : > { %v16903_v24 = vadd.f32 %v13088_v47, %v19573_v51  ;;  %v3402_v59 = vpop.f32.mrb[97].mxu1 }
 0x2ac   : > { %v16906_v34 = vadd.f32 %v3402_v59, %v19574_v17  ;;  %v13089_v63 = vpop.f32.mrb[98].mxu1 }
 0x2ad   : > { %v16909_v43 = vadd.f32 %v13089_v63, %v19575_v0  ;;  %v3405_v10 = vpop.f32.mrb[99].mxu1 }
 0x2ae   : > { %v16912_v15 = vadd.f32 %v3405_v10, %v19576_v50 }
 0x2af   : > { %13259 = vmatmul.mubr.bf16.gmra.mrb[204].mxu1 %v19579_v44  ;;  %v19584_v44 = vld [vmem:[#allocation41_spill] sm:$0xff] }
 0x2b2   : > { %v13092_v37 = vpop.f32.mrb[100].mxu1 }
 0x2b3   : > { %v16918_v47 = vadd.f32 %v13092_v37, %v19580_v56  ;;  %v3418_v51 = vpop.f32.mrb[101].mxu1 }
 0x2b4   : > { %v16921_v59 = vadd.f32 %v3418_v51, %v19581_v39  ;;  %v13093_v17 = vpop.f32.mrb[102].mxu1 }
 0x2b5   : > { %v16924_v63 = vadd.f32 %v13093_v17, %v19582_v35  ;;  %v3421_v0 = vpop.f32.mrb[103].mxu1 }
 0x2b6   : > { %v16927_v10 = vadd.f32 %v3421_v0, %v19583_v27 }
 0x2ba   : > { %v13096_v50 = vpop.f32.mrb[104].mxu1 }
 0x2bb   : > { %v16930_v54 = vadd.f32 %v13096_v50, %v16603_v55  ;;  %v3434_v9 = vpop.f32.mrb[105].mxu1 }
 0x2bc   : > { %v16933_v37 = vadd.f32 %v3434_v9, %v19584_v44  ;;  %v13097_v56 = vpop.f32.mrb[106].mxu1 }
 0x2bd   : > { %v16936_v39 = vadd.f32 %v13097_v56, %v16613_v61  ;;  %v3437_v51 = vpop.f32.mrb[107].mxu1 }
 0x2be   : > { %v16939_v35 = vadd.f32 %v3437_v51, %v16582_v19 }
 0x2c2   : > { %v13100_v17 = vpop.f32.mrb[108].mxu1 }
 0x2c3   : > { %v16942_v27 = vadd.f32 %v13100_v17, %v16673_v1  ;;  %v3450_v0 = vpop.f32.mrb[109].mxu1 }
 0x2c4   : > { %v16945_v55 = vadd.f32 %v3450_v0, %v16644_v53  ;;  %v13101_v50 = vpop.f32.mrb[110].mxu1 }
 0x2c5   : > { %v16948_v9 = vadd.f32 %v13101_v50, %v16679_v18  ;;  %v3453_v44 = vpop.f32.mrb[111].mxu1 }
 0x2c6   : > { %v16951_v61 = vadd.f32 %v3453_v44, %v16649_v26 }
 0x2ca   : > { %v13104_v56 = vpop.f32.mrb[112].mxu1 }
 0x2cb   : > { %v16954_v19 = vadd.f32 %v13104_v56, %v16730_v32  ;;  %v3466_v51 = vpop.f32.mrb[113].mxu1 }
 0x2cc   : > { %v16957_v1 = vadd.f32 %v3466_v51, %v16700_v40  ;;  %v13105_v17 = vpop.f32.mrb[114].mxu1 }
 0x2cd   : > { %v16960_v53 = vadd.f32 %v13105_v17, %v16736_v62  ;;  %v3469_v0 = vpop.f32.mrb[115].mxu1 }
 0x2ce   : > { %v16963_v18 = vadd.f32 %v3469_v0, %v16705_v29 }
 0x2d2   : > { %v13108_v50 = vpop.f32.mrb[116].mxu1 }
 0x2d3   : > { %v16966_v26 = vadd.f32 %v13108_v50, %v16789_v4  ;;  %v3482_v44 = vpop.f32.mrb[117].mxu1 }
 0x2d4   : > { %v16969_v32 = vadd.f32 %v3482_v44, %v16761_v58  ;;  %v13109_v56 = vpop.f32.mrb[118].mxu1 }
 0x2d5   : > { %v16972_v40 = vadd.f32 %v13109_v56, %v16799_v16  ;;  %v3485_v51 = vpop.f32.mrb[119].mxu1 }
 0x2d6   : > { %v16975_v62 = vadd.f32 %v3485_v51, %v16771_v20 }
 0x2da   : > { %v13112_v17 = vpop.f32.mrb[120].mxu1 }
 0x2db   : > { %v16978_v29 = vadd.f32 %v13112_v17, %v16853_v21  ;;  %v3498_v0 = vpop.f32.mrb[121].mxu1 }
 0x2dc   : > { %v16981_v4 = vadd.f32 %v3498_v0, %v16821_v36  ;;  %v13113_v50 = vpop.f32.mrb[122].mxu1 }
 0x2dd   : > { %v16984_v58 = vadd.f32 %v13113_v50, %v16859_v23  ;;  %v3501_v44 = vpop.f32.mrb[123].mxu1 }
 0x2de   : > { %v16987_v16 = vadd.f32 %v3501_v44, %v16831_v3 }
 0x2e2   : > { %v13116_v56 = vpop.f32.mrb[124].mxu1 }
 0x2e3   : > { %v16990_v20 = vadd.f32 %v13116_v56, %v16890_v38  ;;  %v3514_v51 = vpop.f32.mrb[125].mxu1  ;;  %v5474_v38 = vld [vmem:[#allocation2 + $0x18] sm:$0x1] }
 0x2e4   : > { %v16993_v21 = vadd.f32 %v3514_v51, %v16875_v25  ;;  %v13117_v17 = vpop.f32.mrb[126].mxu1  ;;  %v5475_v25 = vsel %vm17002_vm8, 0, %v5474_v38 }
 0x2e5   : > { %v16996_v36 = vadd.f32 %v13117_v17, %v16895_v57  ;;  %v3517_v0 = vpop.f32.mrb[127].mxu1  ;;  %5476 = vst [vmem:[#allocation2 + $0x18] sm:$0x1] %v5475_v25  ;;  %v5524_v17 = vld [vmem:[#allocation2 + $0x20] sm:$0x1] }
 0x2e6   : > { %v16999_v23 = vadd.f32 %v3517_v0, %v16880_v8  ;;  %v5471_v8 = vld [vmem:[#allocation2 + $0xc] sm:$0x1]  ;;  %v5525_v38 = vsel %vm17009_vm10, 0, %v5524_v17 }
 0x2e7   : > { %v5472_v51 = vsel %vm17002_vm8, 0, %v5471_v8  ;;  %5526 = vst [vmem:[#allocation2 + $0x20] sm:$0x1] %v5525_v38 }
 0x2e8   : > { %5473 = vst [vmem:[#allocation2 + $0xc] sm:$0x1] %v5472_v51 }
 0x2ea   : > { %v13136_v50 = vpop.f32.mrb[128].mxu1 }
 0x2eb   : > { %v3917_v44 = vadd.f32 %v13136_v50, %v16903_v24  ;;  %v3788_v56 = vpop.f32.mrb[129].mxu1  ;;  %v5522_v50 = vsel %vm17009_vm10, 0, %v5521_v45 }
 0x2ec   : > { %v3915_v0 = vadd.f32 %v3788_v56, %v16906_v34  ;;  %v13137_v6 = vpop.f32.mrb[130].mxu1  ;;  %5523 = vst [vmem:[#allocation2 + $0x14] sm:$0x1] %v5522_v50 }
 0x2ed   : > { %v3918_v48 = vadd.f32 %v13137_v6, %v16909_v43  ;;  %v17021_v46 = vadd.f32 %v16713_v14, %v3917_v44  ;;  %v3791_v24 = vpop.f32.mrb[131].mxu1  ;;  %v5480_v6 = vld [vmem:[#allocation2 + $0x30] sm:$0x1]  ;;  %v5477_v44 = vld [vmem:[#allocation2 + $0x24] sm:$0x1] }
 0x2ee   : > { %v3916_v25 = vadd.f32 %v3791_v24, %v16912_v15  ;;  %v17027_v34 = vadd.f32 %v16715_v2, %v3915_v0  ;;  %v5481_v43 = vsel %vm17002_vm8, 0, %v5480_v6  ;;  %v5478_v2 = vsel %vm17002_vm8, 0, %v5477_v44  ;;  %v5530_v24 = vld [vmem:[#allocation2 + $0x38] sm:$0x1]  ;;  %v5486_v44 = vld [vmem:[#allocation2 + $0x48] sm:$0x1] }
 0x2ef   : > { %v17030_v8 = vadd.f32 %v16718_v28, %v3918_v48  ;;  %5482 = vst [vmem:[#allocation2 + $0x30] sm:$0x1] %v5481_v43  ;;  %5479 = vst [vmem:[#allocation2 + $0x24] sm:$0x1] %v5478_v2  ;;  %v5487_v2 = vsel %vm17002_vm8, 0, %v5486_v44 }
 0x2f0   : > { %v17033_v56 = vadd.f32 %v16726_v60, %v3916_v25  ;;  %5488 = vst [vmem:[#allocation2 + $0x48] sm:$0x1] %v5487_v2  ;;  %v5542_v2 = vld [vmem:[#allocation2 + $0x68] sm:$0x1] }
 0x2f2   : > { %v13140_v14 = vpop.f32.mrb[132].mxu1 }
 0x2f3   : > { %v3921_v45 = vadd.f32 %v13140_v14, %v16918_v47  ;;  %v3804_v51 = vpop.f32.mrb[133].mxu1 }
 0x2f4   : > { %v3919_v15 = vadd.f32 %v3804_v51, %v16921_v59  ;;  %v13141_v48 = vpop.f32.mrb[134].mxu1  ;;  %v5531_v59 = vsel %vm17009_vm10, 0, %v5530_v24 }
 0x2f5   : > { %v3922_v28 = vadd.f32 %v13141_v48, %v16924_v63  ;;  %v17043_v60 = vadd.f32 %v16755_v11, %v3921_v45  ;;  %v3807_v17 = vpop.f32.mrb[135].mxu1  ;;  %v5527_v63 = vld [vmem:[#allocation2 + $0x2c] sm:$0x1]  ;;  %5532 = vst [vmem:[#allocation2 + $0x38] sm:$0x1] %v5531_v59 }
 0x2f6   : > { %v3920_v0 = vadd.f32 %v3807_v17, %v16927_v10  ;;  %v17047_v38 = vadd.f32 %v16758_v30, %v3919_v15  ;;  %v5528_v11 = vsel %vm17009_vm10, 0, %v5527_v63 }
 0x2f7   : > { %v17050_v47 = vadd.f32 %v16765_v22, %v3922_v28  ;;  %5529 = vst [vmem:[#allocation2 + $0x2c] sm:$0x1] %v5528_v11 }
 0x2f8   : > { %v17053_v50 = vadd.f32 %v16768_v31, %v3920_v0 }
 0x2fa   : > { %v13144_v25 = vpop.f32.mrb[136].mxu1 }
 0x2fb   : > { %v3925_v30 = vadd.f32 %v13144_v25, %v16930_v54  ;;  %v3820_v10 = vpop.f32.mrb[137].mxu1  ;;  %v5483_v54 = vld [vmem:[#allocation2 + $0x3c] sm:$0x1]  ;;  %v14256_v25 = vld [vmem:[#allocation3 + $0x50] sm:$0xff]  }
 0x2fc   : > { %v3923_v22 = vadd.f32 %v3820_v10, %v16933_v37  ;;  %v13145_v6 = vpop.f32.mrb[138].mxu1  ;;  %v5484_v37 = vsel %vm17002_vm8, 0, %v5483_v54 }
 0x2fd   : > { %v3926_v14 = vadd.f32 %v13145_v6, %v16936_v39  ;;  %v17063_v31 = vadd.f32 %v16793_v13, %v3925_v30  ;;  %v3823_v43 = vpop.f32.mrb[139].mxu1  ;;  %5485 = vst [vmem:[#allocation2 + $0x3c] sm:$0x1] %v5484_v37  ;;  %v14254_v39 = vld [vmem:[#allocation3 + $0x40] sm:$0xff]  }
 0x2fe   : > { %v3924_v45 = vadd.f32 %v3823_v43, %v16939_v35  ;;  %v17067_v51 = vadd.f32 %v16796_v52, %v3923_v22  ;;  %13262 = vmatprep.subr.bf16.mxu0 %v14254_v39 }
 0x2ff   : > { %v17072_v15 = vadd.f32 %v16804_v49, %v3926_v14  ;;  %13263 = vmatpush3.bf16.msra.mxu0 %v14254_v39  ;;  %v14255_v49 = vld [vmem:[#allocation3 + $0x48] sm:$0xff]  }
 0x300   : > { %v17077_v13 = vadd.f32 %v16806_v33, %v3924_v45  ;;  %v5536_v33 = vld [vmem:[#allocation2 + $0x50] sm:$0x1]  ;;  %13264 = vmatprep.subr.bf16.mxu0 %v14255_v49  ;;  %v5492_v14 = vld [vmem:[#allocation2 + $0x60] sm:$0x1]  ;;  %v5489_v45 = vld [vmem:[#allocation2 + $0x54] sm:$0x1] }
 0x301   : > { %v5493_v44 = vsel %vm17002_vm8, 0, %v5492_v14 }
 0x302   : > { %v13148_v35 = vpop.f32.mrb[140].mxu1  ;;  %5494 = vst [vmem:[#allocation2 + $0x60] sm:$0x1] %v5493_v44  ;;  %v5545_v44 = vld [vmem:[#allocation2 + $0x74] sm:$0x1] }
 0x303   : > { %v3929_v52 = vadd.f32 %v13148_v35, %v16942_v27  ;;  %v3836_v48 = vpop.f32.mrb[141].mxu1  ;;  %v5537_v27 = vsel %vm17009_vm10, 0, %v5536_v33  ;;  %13265 = vmatpush3.bf16.msra.mxu0 %v14255_v49 }
 0x304   : > { %v3927_v28 = vadd.f32 %v3836_v48, %v16945_v55  ;;  %v13149_v17 = vpop.f32.mrb[142].mxu1  ;;  %5538 = vst [vmem:[#allocation2 + $0x50] sm:$0x1] %v5537_v27  ;;  %13266 = vmatprep.subr.bf16.mxu0 %v14256_v25  ;;  %v5498_v27 = vld [vmem:[#allocation2 + $0x78] sm:$0x1] }
 0x305   : > { %v3930_v0 = vadd.f32 %v13149_v17, %v16948_v9  ;;  %v17083_v24 = vadd.f32 %v16825_v41, %v3929_v52  ;;  %v3839_v59 = vpop.f32.mrb[143].mxu1  ;;  %v5533_v41 = vld [vmem:[#allocation2 + $0x44] sm:$0x1]  ;;  %v14257_v17 = vld [vmem:[#allocation3 + $0x58] sm:$0xff]  }
 0x306   : > { %v3928_v63 = vadd.f32 %v3839_v59, %v16951_v61  ;;  %v17087_v11 = vadd.f32 %v16828_v5, %v3927_v28  ;;  %v5534_v61 = vsel %vm17009_vm10, 0, %v5533_v41  ;;  %v5499_v41 = vsel %vm17002_vm8, 0, %v5498_v27 }
 0x307   : > { %v17092_v55 = vadd.f32 %v16836_v12, %v3930_v0  ;;  %5535 = vst [vmem:[#allocation2 + $0x44] sm:$0x1] %v5534_v61  ;;  %13267 = vmatpush3.bf16.msra.mxu0 %v14256_v25  ;;  %v5495_v25 = vld [vmem:[#allocation2 + $0x6c] sm:$0x1]  ;;  %5500 = vst [vmem:[#allocation2 + $0x78] sm:$0x1] %v5499_v41 }
 0x308   : > { %v17095_v9 = vadd.f32 %v16838_v7, %v3928_v63  ;;  %13268 = vmatprep.subr.bf16.mxu0 %v14257_v17 }
 0x30a   : > { %v13152_v30 = vpop.f32.mrb[144].mxu1 }
 0x30b   : > { %v17100_v5 = vadd.f32 %v13152_v30, %v16954_v19  ;;  %v3852_v10 = vpop.f32.mrb[145].mxu1  ;;  %v5490_v19 = vsel %vm17002_vm8, 0, %v5489_v45  ;;  %13269 = vmatpush3.bf16.msra.mxu0 %v14257_v17 }
 0x30c   : > { %v17103_v12 = vadd.f32 %v3852_v10, %v16957_v1  ;;  %v13153_v22 = vpop.f32.mrb[146].mxu1  ;;  %5491 = vst [vmem:[#allocation2 + $0x54] sm:$0x1] %v5490_v19  ;;  %v5543_v1 = vsel %vm17009_vm10, 0, %v5542_v2  ;;  %v5548_v10 = vld [vmem:[#allocation2 + $0x80] sm:$0x1] }
 0x30d   : > { %v17106_v7 = vadd.f32 %v13153_v22, %v16960_v53  ;;  %v3855_v6 = vpop.f32.mrb[147].mxu1  ;;  %5544 = vst [vmem:[#allocation2 + $0x68] sm:$0x1] %v5543_v1  ;;  %v5549_v14 = vsel %vm17009_vm10, 0, %v5548_v10  ;;  %v5546_v19 = vsel %vm17009_vm10, 0, %v5545_v44 }
 0x30e   : > { %v17109_v43 = vadd.f32 %v3855_v6, %v16963_v18  ;;  %5550 = vst [vmem:[#allocation2 + $0x80] sm:$0x1] %v5549_v14  ;;  %5547 = vst [vmem:[#allocation2 + $0x74] sm:$0x1] %v5546_v19  ;;  %v5504_v1 = vld [vmem:[#allocation2 + $0x90] sm:$0x1] }
 0x312   : > { %v13156_v53 = vpop.f32.mrb[148].mxu1 }
 0x313   : > { %v17118_v54 = vadd.f32 %v13156_v53, %v16966_v26  ;;  %v3868_v18 = vpop.f32.mrb[149].mxu1 }
 0x314   : > { %v17121_v37 = vadd.f32 %v3868_v18, %v16969_v32  ;;  %v13157_v39 = vpop.f32.mrb[150].mxu1  ;;  %v5539_v32 = vld [vmem:[#allocation2 + $0x5c] sm:$0x1]  ;;  %v5505_v18 = vsel %vm17002_vm8, 0, %v5504_v1 }
 0x315   : > { %v17124_v35 = vadd.f32 %v13157_v39, %v16972_v40  ;;  %v3871_v52 = vpop.f32.mrb[151].mxu1  ;;  %5506 = vst [vmem:[#allocation2 + $0x90] sm:$0x1] %v5505_v18 }
 0x316   : > { %v17127_v48 = vadd.f32 %v3871_v52, %v16975_v62  ;;  %v5540_v62 = vsel %vm17009_vm10, 0, %v5539_v32 }
 0x317   : > { %5541 = vst [vmem:[#allocation2 + $0x5c] sm:$0x1] %v5540_v62 }
 0x31a   : > { %v13160_v28 = vpop.f32.mrb[152].mxu1 }
 0x31b   : > { %v17130_v49 = vadd.f32 %v13160_v28, %v16978_v29  ;;  %v3884_v0 = vpop.f32.mrb[153].mxu1  ;;  %v14258_v29 = vld [vmem:[#allocation3 + $0x60] sm:$0xff]  }
 0x31c   : > { %v17133_v26 = vadd.f32 %v3884_v0, %v16981_v4  ;;  %v13161_v59 = vpop.f32.mrb[154].mxu1  ;;  %13270 = vmatprep.subr.bf16.mxu0 %v14258_v29 }
 0x31d   : > { %v17136_v33 = vadd.f32 %v13161_v59, %v16984_v58  ;;  %v3887_v40 = vpop.f32.mrb[155].mxu1  ;;  %13271 = vmatpush3.bf16.msra.mxu0 %v14258_v29  ;;  %v14259_v58 = vld [vmem:[#allocation3 + $0x68] sm:$0xff]  }
 0x31e   : > { %v17141_v63 = vadd.f32 %v3887_v40, %v16987_v16  ;;  %v5496_v16 = vsel %vm17002_vm8, 0, %v5495_v25  ;;  %13272 = vmatprep.subr.bf16.mxu0 %v14259_v58  ;;  %v6101_v40 = vld [vmem:[#allocation2] sm:$0xf] }
 0x31f   : > { %5497 = vst [vmem:[#allocation2 + $0x6c] sm:$0x1] %v5496_v16  ;;  %v6166_v62 = vshrl.u32 %v6101_v40, 16  ;;  %v6169_v29 = vshll.u32 %v6101_v40, 16 }
 0x321   : > { %13273 = vmatpush3.bf16.msra.mxu0 %v14259_v58  ;;  %v6168_v25 = vrot.slane %v6166_v62, 4  ;;  %v6171_v58 = vrot.slane %v6169_v29, 5 }
 0x322   : > { %v13164_v4 = vpop.f32.mrb[156].mxu1 }
 0x323   : > { %v17146_v61 = vadd.f32 %v13164_v4, %v16990_v20  ;;  %v3900_v30 = vpop.f32.mrb[157].mxu1  ;;  %v6172_v14 = vor.u32 %v6171_v58, %v6168_v25  ;;  %v5510_v58 = vld [vmem:[#allocation2 + $0xa8] sm:$0x1] }
 0x324   : > { %v17151_v22 = vadd.f32 %v3900_v30, %v16993_v21  ;;  %v13165_v6 = vpop.f32.mrb[158].mxu1  ;;  %v14260_v21 = vld [vmem:[#allocation3 + $0x70] sm:$0xff]  }
 0x325   : > { %v17156_v45 = vadd.f32 %v13165_v6, %v16996_v36  ;;  %v3903_v20 = vpop.f32.mrb[159].mxu1  ;;  %13274 = vmatprep.subr.bf16.mxu0 %v14260_v21  ;;  %v5501_v36 = vld [vmem:[#allocation2 + $0x84] sm:$0x1] }
 0x326   : > { %v17161_v2 = vadd.f32 %v3903_v20, %v16999_v23  ;;  %13275 = vmatpush3.bf16.msra.mxu0 %v14260_v21  ;;  %v5502_v28 = vsel %vm17002_vm8, 0, %v5501_v36  ;;  %v5554_v36 = vld [vmem:[#allocation2 + $0x98] sm:$0x1] }
 0x327   : > { %5503 = vst [vmem:[#allocation2 + $0x84] sm:$0x1] %v5502_v28 }
 0x32a   : > { %v13200_v53 = vpop.f32.mrb[160].mxu1 }
 0x32b   : > { %v17166_v39 = vadd.f32 %v13200_v53, %v17100_v5  ;;  %v4605_v52 = vpop.f32.mrb[161].mxu1  ;;  %v6102_v5 = vld [vmem:[#allocation2 + $0x4] sm:$0xf]  ;;  %v14261_v53 = vld [vmem:[#allocation3 + $0x78] sm:$0xff]  }
 0x32c   : > { %v17171_v23 = vadd.f32 %v4605_v52, %v17103_v12  ;;  %v13201_v17 = vpop.f32.mrb[162].mxu1  ;;  %v6175_v27 = vshll.u32 %v6102_v5, 16  ;;  %v6179_v4 = vshrl.u32 %v6102_v5, 16  ;;  %13276 = vmatprep.subr.bf16.mxu0 %v14261_v53 }
 0x32d   : > { %v17174_v0 = vadd.f32 %v13201_v17, %v17106_v7  ;;  %v4608_v59 = vpop.f32.mrb[163].mxu1  ;;  %v6149_v7 = vld [vmem:[#allocation2 + $0x8] sm:$0x1]  ;;  %13277 = vmatpush3.bf16.msra.mxu0 %v14261_v53 }
 0x32e   : > { %v17177_v32 = vadd.f32 %v4608_v59, %v17109_v43  ;;  %v6177_v12 = vrot.slane %v6175_v27, 5  ;;  %v6181_v10 = vrot.slane %v6179_v4, 4  ;;  %v6185_v44 = vshll.u32 %v6149_v7, 16 }
 0x330   : > { %v6182_v21 = vor.u32 %v6181_v10, %v6177_v12  ;;  %v6187_v18 = vrot.slane %v6185_v44, 5  ;;  %v5557_v10 = vld [vmem:[#allocation2 + $0xa4] sm:$0x1] }
 0x332   : > { %v13204_v41 = vpop.f32.mrb[164].mxu1  ;;  %v6183_v52 = vrot.slane %v6182_v21, 4 }
 0x333   : > { %v17180_v30 = vadd.f32 %v13204_v41, %v17118_v54  ;;  %v4621_v16 = vpop.f32.mrb[165].mxu1  ;;  %v6173_v54 = vrot.slane %v6172_v14, 4  ;;  %v5558_v14 = vsel %vm17009_vm10, 0, %v5557_v10 }
 0x334   : > { %v17183_v6 = vadd.f32 %v4621_v16, %v17121_v37  ;;  %v13205_v43 = vpop.f32.mrb[166].mxu1  ;;  %v5555_v37 = vsel %vm17009_vm10, 0, %v5554_v36  ;;  %v5560_v16 = vld [vmem:[#allocation2 + $0xb0] sm:$0x1]  ;;  %5559 = vst [vmem:[#allocation2 + $0xa4] sm:$0x1] %v5558_v14 }
 0x335   : > { %v17186_v20 = vadd.f32 %v13205_v43, %v17124_v35  ;;  %v4624_v19 = vpop.f32.mrb[167].mxu1  ;;  %v6178_v28 = vsel %vm14977_vm2, %v6173_v54, %v6177_v12  ;;  %5556 = vst [vmem:[#allocation2 + $0x98] sm:$0x1] %v5555_v37  ;;  %v6188_v35 = vsel %vm14977_vm2, %v6183_v52, %v6187_v18  ;;  %v5507_v12 = vld [vmem:[#allocation2 + $0x9c] sm:$0x1] }
 0x336   : > { %v17189_v1 = vadd.f32 %v4624_v19, %v17127_v48  ;;  %v5551_v48 = vld [vmem:[#allocation2 + $0x8c] sm:$0x1]  ;;  %v11976_v59 = vcombine.low %v6178_v28, %v6188_v35  ;;  %v5516_v18 = vld [vmem:[#allocation2 + $0xc0] sm:$0x1] }
 0x337   : > { %v5552_v62 = vsel %vm17009_vm10, 0, %v5551_v48 }
 0x338   : > { %5553 = vst [vmem:[#allocation2 + $0x8c] sm:$0x1] %v5552_v62  ;;  %13278 = vmatprep.mubr.bf16.mxu0 %v11976_v59 }
 0x33a   : > { %v13208_v17 = vpop.f32.mrb[168].mxu1 }
 0x33b   : > { %v17198_v40 = vadd.f32 %v13208_v17, %v17130_v49  ;;  %v4637_v5 = vpop.f32.mrb[169].mxu1  ;;  %v5511_v49 = vsel %vm17002_vm8, 0, %v5510_v58 }
 0x33c   : > { %v17203_v29 = vadd.f32 %v4637_v5, %v17133_v26  ;;  %v13209_v27 = vpop.f32.mrb[170].mxu1  ;;  %5512 = vst [vmem:[#allocation2 + $0xa8] sm:$0x1] %v5511_v49  ;;  %v5508_v26 = vsel %vm17002_vm8, 0, %v5507_v12  ;;  %v5513_v49 = vld [vmem:[#allocation2 + $0xb4] sm:$0x1] }
 0x33d   : > { %v17206_v4 = vadd.f32 %v13209_v27, %v17136_v33  ;;  %v4640_v41 = vpop.f32.mrb[171].mxu1  ;;  %5509 = vst [vmem:[#allocation2 + $0x9c] sm:$0x1] %v5508_v26  ;;  %v5561_v33 = vsel %vm17009_vm10, 0, %v5560_v16  ;;  %v5514_v16 = vsel %vm17002_vm8, 0, %v5513_v49 }
 0x33e   : > { %v17209_v25 = vadd.f32 %v4640_v41, %v17141_v63  ;;  %5562 = vst [vmem:[#allocation2 + $0xb0] sm:$0x1] %v5561_v33  ;;  %5515 = vst [vmem:[#allocation2 + $0xb4] sm:$0x1] %v5514_v16 }
 0x342   : > { %v13212_v7 = vpop.f32.mrb[172].mxu1 }
 0x343   : > { %v17218_v43 = vadd.f32 %v13212_v7, %v17146_v61  ;;  %v4653_v63 = vpop.f32.mrb[173].mxu1  ;;  %v5517_v61 = vsel %vm17002_vm8, 0, %v5516_v18 }
 0x344   : > { %v17223_v44 = vadd.f32 %v4653_v63, %v17151_v22  ;;  %v13213_v19 = vpop.f32.mrb[174].mxu1  ;;  %5518 = vst [vmem:[#allocation2 + $0xc0] sm:$0x1] %v5517_v61  ;;  %v17236_v22 = vld [vmem:[%s19323_s3] ss:$0 sm:$0xff] }
 0x345   : > { %v17226_v21 = vadd.f32 %v13213_v19, %v17156_v45  ;;  %v4656_v53 = vpop.f32.mrb[175].mxu1  ;;  %v5566_v63 = vld [vmem:[#allocation2 + $0xc8] sm:$0x1]  ;;  %v5563_v19 = vld [vmem:[#allocation2 + $0xbc] sm:$0x1] }
 0x346   : > { %v17229_v54 = vadd.f32 %v4656_v53, %v17161_v2 }
 0x348   : > { %19589 = vst [vmem:[#allocation23_spill] sm:$0xff] %v17229_v54 }
 0x34a   : > { %v13232_v36 = vpop.f32.mrb[176].mxu1 }
 0x34b   : > { %v5167_v52 = vadd.f32 %v13232_v36, %v17021_v46  ;;  %v5038_v37 = vpop.f32.mrb[177].mxu1 }
 0x34c   : > { %v5165_v45 = vadd.f32 %v5038_v37, %v17027_v34  ;;  %v13233_v28 = vpop.f32.mrb[178].mxu1 }
 0x34d   : > { %v17241_v2 = vadd.f32 %v17236_v22, %v5167_v52  ;;  %v5168_v35 = vadd.f32 %v13233_v28, %v17030_v8  ;;  %v5041_v17 = vpop.f32.mrb[179].mxu1 }
 0x34e   : > { %v17245_v48 = vadd.f32 %v17236_v22, %v5165_v45  ;;  %v5166_v59 = vadd.f32 %v5041_v17, %v17033_v56 }
 0x34f   : > { %v11914_v5 = vmul.f32 -1.442695, %v17241_v2  ;;  %v17250_v62 = vadd.f32 %v17236_v22, %v5168_v35 }
 0x350   : > { %v11912_v46 = vmul.f32 -1.442695, %v17245_v48  ;;  %v17254_v34 = vadd.f32 %v17236_v22, %v5166_v59 }
 0x351   : > { %14374 = vpow2.f32 %v11914_v5  ;;  %v11915_v27 = vmul.f32 -1.442695, %v17250_v62 }
 0x352   : > { %14376 = vpow2.f32 %v11912_v46  ;;  %v11913_v8 = vmul.f32 -1.442695, %v17254_v34  ;;  %v13236_v41 = vpop.f32.mrb[180].mxu1 }
 0x353   : > { %14378 = vpow2.f32 %v11915_v27  ;;  %v5171_v56 = vadd.f32 %v13236_v41, %v17043_v60  ;;  %v5054_v58 = vpop.f32.mrb[181].mxu1 }
 0x354   : > { %14380 = vpow2.f32 %v11913_v8  ;;  %v5169_v12 = vadd.f32 %v5054_v58, %v17047_v38  ;;  %v13237_v26 = vpop.f32.mrb[182].mxu1  ;;  %v5567_v38 = vsel %vm17009_vm10, 0, %v5566_v63 }
 0x355   : > { %v17263_v7 = vadd.f32 %v17236_v22, %v5171_v56  ;;  %v5172_v33 = vadd.f32 %v13237_v26, %v17050_v47  ;;  %v5057_v10 = vpop.f32.mrb[183].mxu1  ;;  %5568 = vst [vmem:[#allocation2 + $0xc8] sm:$0x1] %v5567_v38  ;;  %v5564_v47 = vsel %vm17009_vm10, 0, %v5563_v19  ;;  %v14262_v26 = vld [vmem:[#allocation3] sm:$0xff]  }
 0x356   : > { %v17267_v14 = vadd.f32 %v17236_v22, %v5169_v12  ;;  %v5170_v60 = vadd.f32 %v5057_v10, %v17053_v50  ;;  %5565 = vst [vmem:[#allocation2 + $0xbc] sm:$0x1] %v5564_v47  ;;  %13310 = vmatprep.subr.bf16.mxu0 %v14262_v26 }
 0x357   : > { %v11918_v53 = vmul.f32 -1.442695, %v17263_v7  ;;  %v17274_v18 = vadd.f32 %v17236_v22, %v5172_v33 }
 0x358   : > { %v11916_v61 = vmul.f32 -1.442695, %v17267_v14  ;;  %v17280_v36 = vadd.f32 %v17236_v22, %v5170_v60 }
 0x359   : > { %14382 = vpow2.f32 %v11918_v53  ;;  %v11919_v50 = vmul.f32 -1.442695, %v17274_v18 }
 0x35a   : > { %14384 = vpow2.f32 %v11916_v61  ;;  %v11917_v52 = vmul.f32 -1.442695, %v17280_v36  ;;  %v13240_v37 = vpop.f32.mrb[184].mxu1 }
 0x35b   : > { %v14375_v45 = vpop.eup %14374  ;;  %14386 = vpow2.f32 %v11919_v50  ;;  %v5175_v28 = vadd.f32 %v13240_v37, %v17063_v31  ;;  %v5070_v35 = vpop.f32.mrb[185].mxu1 }
 0x35c   : > { %v14377_v57 = vpop.eup %14376  ;;  %v5334_v17 = vadd.f32 1.0, %v14375_v45  ;;  %14388 = vpow2.f32 %v11917_v52  ;;  %v5173_v59 = vadd.f32 %v5070_v35, %v17067_v51  ;;  %v13241_v5 = vpop.f32.mrb[186].mxu1 }
 0x35d   : > { %v14379_v46 = vpop.eup %14378  ;;  %v5332_v27 = vadd.f32 1.0, %v14377_v57  ;;  %v17287_v8 = vadd.f32 %v17236_v22, %v5175_v28  ;;  %v5176_v41 = vadd.f32 %v13241_v5, %v17072_v15  ;;  %v5073_v56 = vpop.f32.mrb[187].mxu1 }
 0x35e   : > { %v14381_v58 = vpop.eup %14380  ;;  %14390 = vrcp.f32 %v5334_v17  ;;  %v5335_v49 = vadd.f32 1.0, %v14379_v46  ;;  %v17291_v31 = vadd.f32 %v17236_v22, %v5173_v59  ;;  %v5174_v12 = vadd.f32 %v5073_v56, %v17077_v13 }
 0x35f   : > { %14392 = vrcp.f32 %v5332_v27  ;;  %v5333_v51 = vadd.f32 1.0, %v14381_v58  ;;  %v11922_v16 = vmul.f32 -1.442695, %v17287_v8  ;;  %v17296_v33 = vadd.f32 %v17236_v22, %v5176_v41 }
 0x360   : > { %14394 = vrcp.f32 %v5335_v49  ;;  %v11920_v15 = vmul.f32 -1.442695, %v17291_v31  ;;  %v17300_v10 = vadd.f32 %v17236_v22, %v5174_v12 }
 0x361   : > { %14396 = vrcp.f32 %v5333_v51  ;;  %v11923_v63 = vmul.f32 -1.442695, %v17296_v33 }
 0x362   : > { %14398 = vpow2.f32 %v11922_v16  ;;  %v11921_v13 = vmul.f32 -1.442695, %v17300_v10  ;;  %v13244_v60 = vpop.f32.mrb[188].mxu1 }
 0x363   : > { %v14383_v38 = vpop.eup %14382  ;;  %14400 = vpow2.f32 %v11920_v15  ;;  %v5179_v19 = vadd.f32 %v13244_v60, %v17083_v24  ;;  %v5086_v53 = vpop.f32.mrb[189].mxu1 }
 0x364   : > { %v14385_v47 = vpop.eup %14384  ;;  %v5338_v61 = vadd.f32 1.0, %v14383_v38  ;;  %14402 = vpow2.f32 %v11923_v63  ;;  %v5177_v50 = vadd.f32 %v5086_v53, %v17087_v11  ;;  %v13245_v52 = vpop.f32.mrb[190].mxu1 }
 0x365   : > { %v14387_v37 = vpop.eup %14386  ;;  %v5336_v45 = vadd.f32 1.0, %v14385_v47  ;;  %14404 = vpow2.f32 %v11921_v13  ;;  %v17307_v28 = vadd.f32 %v17236_v22, %v5179_v19  ;;  %v5180_v35 = vadd.f32 %v13245_v52, %v17092_v55  ;;  %v5089_v57 = vpop.f32.mrb[191].mxu1 }
 0x366   : > { %v14389_v17 = vpop.eup %14388  ;;  %14406 = vrcp.f32 %v5338_v61  ;;  %v5339_v59 = vadd.f32 1.0, %v14387_v37  ;;  %v17311_v24 = vadd.f32 %v17236_v22, %v5177_v50  ;;  %v5178_v5 = vadd.f32 %v5089_v57, %v17095_v9 }
 0x367   : > { %14408 = vrcp.f32 %v5336_v45  ;;  %v5337_v11 = vadd.f32 1.0, %v14389_v17  ;;  %v11926_v46 = vmul.f32 -1.442695, %v17307_v28  ;;  %v17316_v27 = vadd.f32 %v17236_v22, %v5180_v35 }
 0x368   : > { %v14391_v41 = vpop.eup %14390  ;;  %14410 = vrcp.f32 %v5339_v59  ;;  %v11924_v55 = vmul.f32 -1.442695, %v17311_v24  ;;  %v17320_v56 = vadd.f32 %v17236_v22, %v5178_v5 }
 0x369   : > { %v14393_v58 = vpop.eup %14392  ;;  %v5430_v49 = vmul.f32 %v14391_v41, %v17241_v2  ;;  %14412 = vrcp.f32 %v5337_v11  ;;  %v11927_v9 = vmul.f32 -1.442695, %v17316_v27 }
 0x36a   : > { %v14395_v12 = vpop.eup %14394  ;;  %v5428_v26 = vmul.f32 %v14393_v58, %v17245_v48  ;;  %14414 = vpow2.f32 %v11926_v46  ;;  %v17326_v51 = vmul.f32 -1.442695, %v17320_v56  ;;  %v13248_v16 = vpop.f32.mrb[192].mxu1 }
 0x36b   : > { %v14397_v15 = vpop.eup %14396  ;;  %v12312_v63 = vpack.c.bf16 %v5430_v49, %v5430_v49  ;;  %v5431_v13 = vmul.f32 %v14395_v12, %v17250_v62  ;;  %14416 = vpow2.f32 %v11924_v55  ;;  %v17330_v2 = vadd.f32 %v13248_v16, %v17166_v39  ;;  %v5102_v60 = vpop.f32.mrb[193].mxu1  ;;  %v5996_v55 = vld [vmem:[#allocation2 + $0x18] sm:$0xf] }
 0x36c   : > { %v14399_v38 = vpop.eup %14398  ;;  %v12310_v19 = vpack.c.bf16 %v5428_v26, %v5428_v26  ;;  %v5429_v53 = vmul.f32 %v14397_v15, %v17254_v34  ;;  %14418 = vpow2.f32 %v11927_v9  ;;  %v17334_v48 = vadd.f32 %v5102_v60, %v17171_v23  ;;  %v17336_v47 = vpop.f32.mrb[194].mxu1  ;;  %v5989_v15 = vld [vmem:[#allocation2 + $0xc] sm:$0xf] }
 0x36d   : > { %v14401_v61 = vpop.eup %14400  ;;  %v5685_v50 = vshrl.u32 %v12312_v63, 16  ;;  %v5688_v52 = vshll.u32 %v12312_v63, 16  ;;  %v12313_v37 = vpack.c.bf16 %v5431_v13, %v5431_v13  ;;  %v5342_v62 = vadd.f32 1.0, %v14399_v38  ;;  %v17338_v45 = vpop.f32.mrb[195].mxu1 }
 0x36e   : > { %v17340_v39 = vpop.eup %14402  ;;  %v5668_v35 = vshrl.u32 %v12310_v19, 16  ;;  %v5671_v57 = vshll.u32 %v12310_v19, 16  ;;  %v12311_v17 = vpack.c.bf16 %v5429_v53, %v5429_v53  ;;  %v5340_v59 = vadd.f32 1.0, %v14401_v61  ;;  %v6000_v61 = vld [vmem:[#allocation2 + $0x20] sm:$0x1] }
 0x36f   : > { %v14405_v34 = vpop.eup %14404  ;;  %v5687_v5 = vrot.slane %v5685_v50, 7  ;;  %v5693_v11 = vshrl.u32 %v12313_v37, 16  ;;  %v5696_v23 = vshll.u32 %v12313_v37, 16  ;;  %14420 = vrcp.f32 %v5342_v62 }
 0x370   : > { %v14407_v46 = vpop.eup %14406  ;;  %v5670_v58 = vrot.slane %v5668_v35, 7  ;;  %v5676_v49 = vshrl.u32 %v12311_v17, 16  ;;  %v5679_v9 = vshll.u32 %v12311_v17, 16  ;;  %14422 = vrcp.f32 %v5340_v59 }
 0x371   : > { %v14409_v12 = vpop.eup %14408  ;;  %v5690_v26 = vor.u32 %v5688_v52, %v5687_v5  ;;  %v5691_v16 = vrot.slane %v5687_v5, 4  ;;  %v5695_v63 = vrot.slane %v5693_v11, 7  ;;  %v5434_v13 = vmul.f32 %v14407_v46, %v17263_v7 }
 0x372   : > { %v14411_v60 = vpop.eup %14410  ;;  %v5673_v38 = vor.u32 %v5671_v57, %v5670_v58  ;;  %v5674_v19 = vrot.slane %v5670_v58, 4  ;;  %v5678_v50 = vrot.slane %v5676_v49, 7  ;;  %v5432_v37 = vmul.f32 %v14409_v12, %v17267_v14  ;;  %v17356_v62 = vpop.f32.mrb[196].mxu1  ;;  %v5993_v57 = vld [vmem:[#allocation2 + $0x14] sm:$0x1] }
 0x373   : > { %v14413_v52 = vpop.eup %14412  ;;  %v5997_v35 = vsel %vm17344_vm13, %v5690_v26, %v5996_v55  ;;  %v5698_v7 = vor.u32 %v5696_v23, %v5695_v63  ;;  %v5700_v17 = vrot.slane %v5695_v63, 4  ;;  %v12316_v59 = vpack.c.bf16 %v5434_v13, %v5434_v13  ;;  %v17360_v5 = vpop.f32.mrb[197].mxu1 }
 0x374   : > { %v14415_v11 = vpop.eup %14414  ;;  %5998 = vst [vmem:[#allocation2 + $0x18] sm:$0xf] %v5997_v35  ;;  %v5990_v46 = vsel %vm17344_vm13, %v5673_v38, %v5989_v15  ;;  %v5681_v58 = vor.u32 %v5679_v9, %v5678_v50  ;;  %v5683_v49 = vrot.slane %v5678_v50, 4  ;;  %v12314_v14 = vpack.c.bf16 %v5432_v37, %v5432_v37  ;;  %v17364_v12 = vpop.f32.mrb[198].mxu1 }
 0x375   : > { %v14417_v42 = vpop.eup %14416  ;;  %5991 = vst [vmem:[#allocation2 + $0xc] sm:$0xf] %v5990_v46  ;;  %v5699_v23 = vsel %vm17351_vm14, %v5691_v16, %v5698_v7  ;;  %v6001_v55 = vsel %vm17002_vm8, %v5700_v17, %v6000_v61  ;;  %v5719_v26 = vshrl.u32 %v12316_v59, 16  ;;  %v5722_v63 = vshll.u32 %v12316_v59, 16  ;;  %v17370_v13 = vpop.f32.mrb[199].mxu1 }
 0x376   : > { %v14419_v35 = vpop.eup %14418  ;;  %5999 = vst [vmem:[#allocation2 + $0x1c] sm:$0xf] %v5699_v23  ;;  %6002 = vst [vmem:[#allocation2 + $0x20] sm:$0x1] %v6001_v55  ;;  %v5682_v9 = vsel %vm17351_vm14, %v5674_v19, %v5681_v58  ;;  %v5994_v15 = vsel %vm17002_vm8, %v5683_v49, %v5993_v57  ;;  %v5702_v38 = vshrl.u32 %v12314_v14, 16  ;;  %v5705_v50 = vshll.u32 %v12314_v14, 16 }
 0x377   : > { %5992 = vst [vmem:[#allocation2 + $0x10] sm:$0xf] %v5682_v9  ;;  %5995 = vst [vmem:[#allocation2 + $0x14] sm:$0x1] %v5994_v15  ;;  %v5721_v16 = vrot.slane %v5719_v26, 7  ;;  %v5435_v61 = vmul.f32 %v14411_v60, %v17274_v18  ;;  %v5433_v37 = vmul.f32 %v14413_v52, %v17280_v36  ;;  %v5343_v7 = vadd.f32 1.0, %v17340_v39 }
 0x378   : > { %v6010_v17 = vld [vmem:[#allocation2 + $0x30] sm:$0xf]  ;;  %v5704_v59 = vrot.slane %v5702_v38, 7  ;;  %v5341_v46 = vadd.f32 1.0, %v14405_v34  ;;  %v5346_v23 = vadd.f32 1.0, %v14415_v11  ;;  %v5344_v55 = vadd.f32 1.0, %v14417_v42 }
 0x379   : > { %v14421_v19 = vpop.eup %14420  ;;  %v5724_v58 = vor.u32 %v5722_v63, %v5721_v16  ;;  %v5725_v54 = vrot.slane %v5721_v16, 4  ;;  %v6003_v57 = vld [vmem:[#allocation2 + $0x24] sm:$0xf]  ;;  %v12317_v49 = vpack.c.bf16 %v5435_v61, %v5435_v61  ;;  %v12315_v14 = vpack.c.bf16 %v5433_v37, %v5433_v37 }
 0x37a   : > { %v14423_v9 = vpop.eup %14422  ;;  %v5707_v15 = vor.u32 %v5705_v50, %v5704_v59  ;;  %v5708_v26 = vrot.slane %v5704_v59, 4  ;;  %v5438_v18 = vmul.f32 %v14421_v19, %v17287_v8  ;;  %14424 = vrcp.f32 %v5343_v7  ;;  %v17380_v36 = vpop.f32.mrb[200].mxu1  ;;  %v6007_v59 = vld [vmem:[#allocation2 + $0x2c] sm:$0x1] }
 0x37b   : > { %v6011_v39 = vsel %vm17344_vm13, %v5724_v58, %v6010_v17  ;;  %v5727_v34 = vshrl.u32 %v12317_v49, 16  ;;  %v5730_v60 = vshll.u32 %v12317_v49, 16  ;;  %v5710_v42 = vshrl.u32 %v12315_v14, 16  ;;  %v17384_v52 = vpop.f32.mrb[201].mxu1  ;;  %v6014_v17 = vld [vmem:[#allocation2 + $0x38] sm:$0x1] }
 0x37c   : > { %6012 = vst [vmem:[#allocation2 + $0x30] sm:$0xf] %v6011_v39  ;;  %v6004_v11 = vsel %vm17344_vm13, %v5707_v15, %v6003_v57  ;;  %v5713_v63 = vshll.u32 %v12315_v14, 16  ;;  %v12320_v38 = vpack.c.bf16 %v5438_v18, %v5438_v18  ;;  %v5436_v50 = vmul.f32 %v14423_v9, %v17291_v31  ;;  %v17389_v8 = vpop.f32.mrb[202].mxu1  ;;  %v6024_v31 = vld [vmem:[#allocation2 + $0x48] sm:$0xf] }
 0x37d   : > { %6005 = vst [vmem:[#allocation2 + $0x24] sm:$0xf] %v6004_v11  ;;  %v5729_v16 = vrot.slane %v5727_v34, 7  ;;  %v5712_v61 = vrot.slane %v5710_v42, 7  ;;  %14426 = vrcp.f32 %v5341_v46  ;;  %v5347_v37 = vadd.f32 1.0, %v14419_v35  ;;  %v17391_v7 = vpop.f32.mrb[203].mxu1 }
 0x37e   : > { %v5753_v19 = vshrl.u32 %v12320_v38, 16  ;;  %v5756_v58 = vshll.u32 %v12320_v38, 16  ;;  %v12318_v49 = vpack.c.bf16 %v5436_v50, %v5436_v50  ;;  %14428 = vrcp.f32 %v5346_v23 }
 0x37f   : > { %v5732_v57 = vor.u32 %v5730_v60, %v5729_v16  ;;  %v5734_v14 = vrot.slane %v5729_v16, 4  ;;  %v5715_v15 = vor.u32 %v5713_v63, %v5712_v61  ;;  %v5717_v18 = vrot.slane %v5712_v61, 4  ;;  %v6017_v63 = vld [vmem:[#allocation2 + $0x3c] sm:$0xf] }
 0x380   : > { %v17393_v9 = vrot.slane %v5753_v19, 7  ;;  %v5736_v39 = vshrl.u32 %v12318_v49, 16  ;;  %v5739_v34 = vshll.u32 %v12318_v49, 16  ;;  %14430 = vrcp.f32 %v5344_v55 }
 0x381   : > { %v5733_v35 = vsel %vm17351_vm14, %v5725_v54, %v5732_v57  ;;  %v6015_v46 = vsel %vm17002_vm8, %v5734_v14, %v6014_v17  ;;  %v5716_v42 = vsel %vm17351_vm14, %v5708_v26, %v5715_v15  ;;  %v6008_v23 = vsel %vm17002_vm8, %v5717_v18, %v6007_v59 }
 0x382   : > { %6013 = vst [vmem:[#allocation2 + $0x34] sm:$0xf] %v5733_v35  ;;  %6016 = vst [vmem:[#allocation2 + $0x38] sm:$0x1] %v6015_v46  ;;  %v5758_v60 = vor.u32 %v5756_v58, %v17393_v9  ;;  %v5759_v55 = vrot.slane %v17393_v9, 4  ;;  %v17405_v11 = vrot.slane %v5736_v39, 7  ;;  %14432 = vrcp.f32 %v5347_v37 }
 0x383   : > { %6006 = vst [vmem:[#allocation2 + $0x28] sm:$0xf] %v5716_v42  ;;  %6009 = vst [vmem:[#allocation2 + $0x2c] sm:$0x1] %v6008_v23  ;;  %v17407_v54 = vpop.f32.mrb[204].mxu1  ;;  %14434 = vpow2.f32 %v17326_v51  ;;  %v17412_v26 = vadd.f32 %v17236_v22, %v17330_v2  ;;  %v17416_v38 = vadd.f32 %v17236_v22, %v17334_v48  ;;  %v5184_v50 = vadd.f32 %v17336_v47, %v17174_v0 }
 0x384   : > { %v17420_v16 = vpop.f32.mrb[205].mxu1  ;;  %v14425_v61 = vpop.eup %14424  ;;  %v6025_v37 = vsel %vm17344_vm13, %v5758_v60, %v6024_v31  ;;  %v5741_v17 = vor.u32 %v5739_v34, %v17405_v11  ;;  %v5742_v51 = vrot.slane %v17405_v11, 4  ;;  %v5182_v2 = vadd.f32 %v17338_v45, %v17177_v32 }
 0x385   : > { %v17428_v59 = vpop.f32.mrb[206].mxu1  ;;  %6026 = vst [vmem:[#allocation2 + $0x48] sm:$0xf] %v6025_v37  ;;  %v5439_v48 = vmul.f32 %v14425_v61, %v17296_v33  ;;  %v11930_v0 = vmul.f32 -1.442695, %v17412_v26  ;;  %v17434_v19 = vadd.f32 %v17236_v22, %v5184_v50  ;;  %v5187_v32 = vadd.f32 %v17356_v62, %v17180_v30 }
 0x386   : > { %v11928_v47 = vmul.f32 -1.442695, %v17416_v38  ;;  %v17436_v58 = vpop.f32.mrb[207].mxu1  ;;  %v6018_v49 = vsel %vm17344_vm13, %v5741_v17, %v6017_v63  ;;  %v17441_v57 = vadd.f32 %v17236_v22, %v5182_v2  ;;  %v5185_v33 = vadd.f32 %v17360_v5, %v17183_v6  ;;  %v6028_v50 = vld [vmem:[#allocation2 + $0x50] sm:$0x1] }
 0x387   : > { %v14427_v45 = vpop.eup %14426  ;;  %6019 = vst [vmem:[#allocation2 + $0x3c] sm:$0xf] %v6018_v49  ;;  %v12321_v14 = vpack.c.bf16 %v5439_v48, %v5439_v48  ;;  %14436 = vpow2.f32 %v11930_v0  ;;  %v11931_v15 = vmul.f32 -1.442695, %v17434_v19  ;;  %v5188_v18 = vadd.f32 %v17364_v12, %v17186_v20 }
 0x388   : > { %v14429_v31 = vpop.eup %14428  ;;  %v5437_v39 = vmul.f32 %v14427_v45, %v17300_v10  ;;  %14438 = vpow2.f32 %v11928_v47  ;;  %v11929_v34 = vmul.f32 -1.442695, %v17441_v57  ;;  %v17453_v30 = vadd.f32 %v17236_v22, %v5187_v32  ;;  %v6021_v32 = vld [vmem:[#allocation2 + $0x44] sm:$0x1] }
 0x389   : > { %v5761_v62 = vshrl.u32 %v12321_v14, 16  ;;  %v5764_v6 = vshll.u32 %v12321_v14, 16  ;;  %v5442_v5 = vmul.f32 %v14429_v31, %v17307_v28  ;;  %14440 = vpow2.f32 %v11931_v15 }
 0x38a   : > { %v14431_v35 = vpop.eup %14430  ;;  %v12319_v46 = vpack.c.bf16 %v5437_v39, %v5437_v39  ;;  %14442 = vpow2.f32 %v11929_v34  ;;  %v11934_v42 = vmul.f32 -1.442695, %v17453_v30  ;;  %v17458_v20 = vadd.f32 %v17236_v22, %v5185_v33  ;;  %v6038_v34 = vld [vmem:[#allocation2 + $0x60] sm:$0xf] }
 0x38b   : > { %v5763_v10 = vrot.slane %v5761_v62, 7  ;;  %v12324_v12 = vpack.c.bf16 %v5442_v5, %v5442_v5  ;;  %v5440_v23 = vmul.f32 %v14431_v35, %v17311_v24  ;;  %v17462_v60 = vadd.f32 %v17236_v22, %v5188_v18 }
 0x38c   : > { %v14433_v63 = vpop.eup %14432  ;;  %v5744_v61 = vshrl.u32 %v12319_v46, 16  ;;  %v5747_v28 = vshll.u32 %v12319_v46, 16  ;;  %14444 = vpow2.f32 %v11934_v42  ;;  %v11932_v37 = vmul.f32 -1.442695, %v17458_v20 }
 0x38d   : > { %v14435_v17 = vpop.eup %14434  ;;  %v5766_v2 = vor.u32 %v5764_v6, %v5763_v10  ;;  %v5768_v48 = vrot.slane %v5763_v10, 4  ;;  %v5787_v0 = vshrl.u32 %v12324_v12, 16  ;;  %v5790_v47 = vshll.u32 %v12324_v12, 16 }
 0x38e   : > { %v5746_v49 = vrot.slane %v5744_v61, 7  ;;  %v12322_v33 = vpack.c.bf16 %v5440_v23, %v5440_v23  ;;  %v5443_v24 = vmul.f32 %v14433_v63, %v17316_v27  ;;  %v5345_v45 = vadd.f32 1.0, %v14435_v17 }
 0x38f   : > { %v5767_v14 = vsel %vm17351_vm14, %v5759_v55, %v5766_v2  ;;  %v6029_v15 = vsel %vm17002_vm8, %v5768_v48, %v6028_v50  ;;  %v5789_v18 = vrot.slane %v5787_v0, 7  ;;  %14446 = vpow2.f32 %v11932_v37  ;;  %v6031_v50 = vld [vmem:[#allocation2 + $0x54] sm:$0xf] }
 0x390   : > { %6027 = vst [vmem:[#allocation2 + $0x4c] sm:$0xf] %v5767_v14  ;;  %6030 = vst [vmem:[#allocation2 + $0x50] sm:$0x1] %v6029_v15  ;;  %v5749_v31 = vor.u32 %v5747_v28, %v5746_v49  ;;  %v5751_v39 = vrot.slane %v5746_v49, 4  ;;  %v5770_v62 = vshrl.u32 %v12322_v33, 16  ;;  %v12325_v46 = vpack.c.bf16 %v5443_v24, %v5443_v24 }
 0x391   : > { %v5773_v6 = vshll.u32 %v12322_v33, 16  ;;  %v14437_v5 = vpop.eup %14436  ;;  %v5792_v27 = vor.u32 %v5790_v47, %v5789_v18  ;;  %v5793_v35 = vrot.slane %v5789_v18, 4  ;;  %14448 = vrcp.f32 %v5345_v45  ;;  %v6042_v33 = vld [vmem:[#allocation2 + $0x68] sm:$0x1] }
 0x392   : > { %v14439_v9 = vpop.eup %14438  ;;  %v5750_v55 = vsel %vm17351_vm14, %v5742_v51, %v5749_v31  ;;  %v6022_v42 = vsel %vm17002_vm8, %v5751_v39, %v6021_v32  ;;  %v17478_v10 = vrot.slane %v5770_v62, 7  ;;  %v5350_v12 = vadd.f32 1.0, %v14437_v5 }
 0x393   : > { %v14441_v23 = vpop.eup %14440  ;;  %6020 = vst [vmem:[#allocation2 + $0x40] sm:$0xf] %v5750_v55  ;;  %6023 = vst [vmem:[#allocation2 + $0x44] sm:$0x1] %v6022_v42  ;;  %v6039_v63 = vsel %vm17344_vm13, %v5792_v27, %v6038_v34  ;;  %v5795_v61 = vshrl.u32 %v12325_v46, 16  ;;  %v5798_v28 = vshll.u32 %v12325_v46, 16  ;;  %v5186_v24 = vadd.f32 %v17370_v13, %v17189_v1 }
 0x394   : > { %v5348_v37 = vadd.f32 1.0, %v14439_v9  ;;  %v14443_v11 = vpop.eup %14442  ;;  %6040 = vst [vmem:[#allocation2 + $0x60] sm:$0xf] %v6039_v63  ;;  %v5775_v51 = vor.u32 %v5773_v6, %v17478_v10  ;;  %v5776_v17 = vrot.slane %v17478_v10, 4  ;;  %14450 = vrcp.f32 %v5350_v12 }
 0x395   : > { %v5351_v2 = vadd.f32 1.0, %v14441_v23  ;;  %v5797_v48 = vrot.slane %v5795_v61, 7  ;;  %v5349_v0 = vadd.f32 1.0, %v14443_v11  ;;  %v11935_v47 = vmul.f32 -1.442695, %v17462_v60 }
 0x396   : > { %14452 = vrcp.f32 %v5348_v37  ;;  %v14445_v49 = vpop.eup %14444  ;;  %v6032_v32 = vsel %vm17344_vm13, %v5775_v51, %v6031_v50  ;;  %v5191_v45 = vadd.f32 %v17380_v36, %v17198_v40  ;;  %v17492_v31 = vadd.f32 %v17236_v22, %v5186_v24 }
 0x397   : > { %14454 = vrcp.f32 %v5351_v2  ;;  %6033 = vst [vmem:[#allocation2 + $0x54] sm:$0xf] %v6032_v32  ;;  %v5800_v14 = vor.u32 %v5798_v28, %v5797_v48  ;;  %v5802_v15 = vrot.slane %v5797_v48, 4  ;;  %v5354_v18 = vadd.f32 1.0, %v14445_v49  ;;  %v6035_v2 = vld [vmem:[#allocation2 + $0x5c] sm:$0x1] }
 0x398   : > { %14456 = vrcp.f32 %v5349_v0  ;;  %v17495_v39 = vadd.f32 %v17236_v22, %v5191_v45  ;;  %v5189_v34 = vadd.f32 %v17384_v52, %v17203_v29  ;;  %v5192_v13 = vadd.f32 %v17389_v8, %v17206_v4 }
 0x399   : > { %14458 = vpow2.f32 %v11935_v47  ;;  %v14447_v62 = vpop.eup %14446  ;;  %v5801_v1 = vsel %vm17351_vm14, %v5793_v35, %v5800_v14  ;;  %v6043_v40 = vsel %vm17002_vm8, %v5802_v15, %v6042_v33  ;;  %v11933_v6 = vmul.f32 -1.442695, %v17492_v31 }
 0x39a   : > { %14460 = vrcp.f32 %v5354_v18  ;;  %6041 = vst [vmem:[#allocation2 + $0x64] sm:$0xf] %v5801_v1  ;;  %6044 = vst [vmem:[#allocation2 + $0x68] sm:$0x1] %v6043_v40  ;;  %v5352_v36 = vadd.f32 1.0, %v14447_v62  ;;  %v17508_v29 = vadd.f32 %v17236_v22, %v5189_v34  ;;  %v17511_v27 = vadd.f32 %v17236_v22, %v5192_v13 }
 0x39b   : > { %v11938_v5 = vmul.f32 -1.442695, %v17495_v39  ;;  %v14449_v52 = vpop.eup %14448  ;;  %v5190_v35 = vadd.f32 %v17391_v7, %v17209_v25  ;;  %v5195_v4 = vadd.f32 %v17407_v54, %v17218_v43  ;;  %v5193_v8 = vadd.f32 %v17420_v16, %v17223_v44  ;;  %v6052_v13 = vld [vmem:[#allocation2 + $0x78] sm:$0xf] }
 0x39c   : > { %v5441_v46 = vmul.f32 %v14449_v52, %v17320_v56  ;;  %14462 = vrcp.f32 %v5352_v36  ;;  %v11936_v9 = vmul.f32 -1.442695, %v17508_v29  ;;  %v5196_v55 = vadd.f32 %v17428_v59, %v17226_v21 }
 0x39d   : > { %14464 = vpow2.f32 %v11933_v6  ;;  %v11939_v42 = vmul.f32 -1.442695, %v17511_v27  ;;  %v17525_v12 = vadd.f32 %v17236_v22, %v5190_v35  ;;  %v17528_v25 = vadd.f32 %v17236_v22, %v5195_v4  ;;  %v6045_v4 = vld [vmem:[#allocation2 + $0x6c] sm:$0xf] }
 0x39e   : > { %v14451_v43 = vpop.eup %14450  ;;  %v12323_v7 = vpack.c.bf16 %v5441_v46, %v5441_v46  ;;  %14466 = vpow2.f32 %v11938_v5  ;;  %v17531_v44 = vadd.f32 %v17236_v22, %v5193_v8  ;;  %v17534_v56 = vadd.f32 %v17236_v22, %v5196_v55 }
 0x39f   : > { %v5446_v21 = vmul.f32 %v14451_v43, %v17412_v26  ;;  %14468 = vpow2.f32 %v11936_v9  ;;  %v11937_v16 = vmul.f32 -1.442695, %v17525_v12  ;;  %v11942_v59 = vmul.f32 -1.442695, %v17528_v25 }
 0x3a0   : > { %v14453_v54 = vpop.eup %14452  ;;  %v5778_v63 = vshrl.u32 %v12323_v7, 16  ;;  %v5781_v50 = vshll.u32 %v12323_v7, 16  ;;  %14470 = vpow2.f32 %v11939_v42  ;;  %v17542_v22 = vmul.f32 -1.442695, %v17531_v44  ;;  %v6056_v42 = vld [vmem:[#allocation2 + $0x80] sm:$0x1] }
 0x3a1   : > { %v14455_v23 = vpop.eup %14454  ;;  %v5444_v61 = vmul.f32 %v14453_v54, %v17416_v38  ;;  %v12328_v37 = vpack.c.bf16 %v5446_v21, %v5446_v21  ;;  %14472 = vpow2.f32 %v11937_v16 }
 0x3a2   : > { %v14457_v28 = vpop.eup %14456  ;;  %v5447_v11 = vmul.f32 %v14455_v23, %v17434_v19  ;;  %v5780_v51 = vrot.slane %v5778_v63, 7  ;;  %14474 = vpow2.f32 %v11942_v59  ;;  %v6049_v63 = vld [vmem:[#allocation2 + $0x74] sm:$0x1] }
 0x3a3   : > { %v14459_v26 = vpop.eup %14458  ;;  %v12326_v48 = vpack.c.bf16 %v5444_v61, %v5444_v61  ;;  %v5445_v0 = vmul.f32 %v14457_v28, %v17441_v57  ;;  %v5821_v49 = vshrl.u32 %v12328_v37, 16  ;;  %v5824_v32 = vshll.u32 %v12328_v37, 16 }
 0x3a4   : > { %v14461_v47 = vpop.eup %14460  ;;  %v12329_v38 = vpack.c.bf16 %v5447_v11, %v5447_v11  ;;  %v5355_v33 = vadd.f32 1.0, %v14459_v26  ;;  %v5783_v24 = vor.u32 %v5781_v50, %v5780_v51  ;;  %v5785_v45 = vrot.slane %v5780_v51, 4 }
 0x3a5   : > { %v5804_v14 = vshrl.u32 %v12326_v48, 16  ;;  %v5807_v19 = vshll.u32 %v12326_v48, 16  ;;  %v5823_v15 = vrot.slane %v5821_v49, 7  ;;  %v12327_v62 = vpack.c.bf16 %v5445_v0, %v5445_v0 }
 0x3a6   : > { %v5829_v18 = vshrl.u32 %v12329_v38, 16  ;;  %v5832_v34 = vshll.u32 %v12329_v38, 16  ;;  %v14463_v1 = vpop.eup %14462  ;;  %v5784_v57 = vsel %vm17351_vm14, %v5776_v17, %v5783_v24  ;;  %v6036_v40 = vsel %vm17002_vm8, %v5785_v45, %v6035_v2  ;;  %v6066_v38 = vld [vmem:[#allocation2 + $0x90] sm:$0xf] }
 0x3a7   : > { %v5806_v36 = vrot.slane %v5804_v14, 7  ;;  %v5450_v6 = vmul.f32 %v14461_v47, %v17453_v30  ;;  %v14465_v5 = vpop.eup %14464  ;;  %6034 = vst [vmem:[#allocation2 + $0x58] sm:$0xf] %v5784_v57  ;;  %6037 = vst [vmem:[#allocation2 + $0x5c] sm:$0x1] %v6036_v40  ;;  %v5826_v52 = vor.u32 %v5824_v32, %v5823_v15  ;;  %v5827_v35 = vrot.slane %v5823_v15, 4 }
 0x3a8   : > { %v5831_v8 = vrot.slane %v5829_v18, 7  ;;  %v5812_v46 = vshrl.u32 %v12327_v62, 16  ;;  %v14467_v9 = vpop.eup %14466  ;;  %v5815_v17 = vshll.u32 %v12327_v62, 16  ;;  %v5448_v28 = vmul.f32 %v14463_v1, %v17458_v20  ;;  %v6104_v57 = vld [vmem:[#allocation2 + $0x10] sm:$0xf] }
 0x3a9   : > { %v5809_v10 = vor.u32 %v5807_v19, %v5806_v36  ;;  %v5810_v55 = vrot.slane %v5806_v36, 4  ;;  %v12332_v43 = vpack.c.bf16 %v5450_v6, %v5450_v6  ;;  %v14469_v7 = vpop.eup %14468  ;;  %v6053_v54 = vsel %vm17344_vm13, %v5826_v52, %v6052_v13  ;;  %v6059_v6 = vld [vmem:[#allocation2 + $0x84] sm:$0xf] }
 0x3aa   : > { %v5834_v21 = vor.u32 %v5832_v34, %v5831_v8  ;;  %v5836_v30 = vrot.slane %v5831_v8, 4  ;;  %v5814_v16 = vrot.slane %v5812_v46, 7  ;;  %v14471_v59 = vpop.eup %14470  ;;  %6054 = vst [vmem:[#allocation2 + $0x78] sm:$0xf] %v6053_v54  ;;  %v12330_v47 = vpack.c.bf16 %v5448_v28, %v5448_v28  ;;  %v6103_v34 = vld [vmem:[#allocation2 + $0xc] sm:$0xf] }
 0x3ab   : > { %v6046_v23 = vsel %vm17344_vm13, %v5809_v10, %v6045_v4  ;;  %v5855_v50 = vshrl.u32 %v12332_v43, 16  ;;  %v5858_v61 = vshll.u32 %v12332_v43, 16  ;;  %v14473_v37 = vpop.eup %14472  ;;  %14476 = vrcp.f32 %v5355_v33 }
 0x3ac   : > { %6047 = vst [vmem:[#allocation2 + $0x6c] sm:$0xf] %v6046_v23  ;;  %v5835_v11 = vsel %vm17351_vm14, %v5827_v35, %v5834_v21  ;;  %v6057_v26 = vsel %vm17002_vm8, %v5836_v30, %v6056_v42  ;;  %v5817_v51 = vor.u32 %v5815_v17, %v5814_v16  ;;  %v5819_v2 = vrot.slane %v5814_v16, 4  ;;  %v14475_v48 = vpop.eup %14474  ;;  %v17587_v23 = vld [vmem:[#allocation2 + $0x1c] sm:$0xf] }
 0x3ad   : > { %6055 = vst [vmem:[#allocation2 + $0x7c] sm:$0xf] %v5835_v11  ;;  %6058 = vst [vmem:[#allocation2 + $0x80] sm:$0x1] %v6057_v26  ;;  %v17561_v0 = vrot.slane %v5855_v50, 7  ;;  %v5353_v49 = vadd.f32 1.0, %v14465_v5 }
 0x3ae   : > { %v5818_v20 = vsel %vm17351_vm14, %v5810_v55, %v5817_v51  ;;  %v6050_v32 = vsel %vm17002_vm8, %v5819_v2, %v6049_v63  ;;  %v5358_v24 = vadd.f32 1.0, %v14467_v9  ;;  %v5356_v45 = vadd.f32 1.0, %v14469_v7  ;;  %v19594_v5 = vld [vmem:[#allocation23_spill] sm:$0xff]  ;;  %v6150_v9 = vld [vmem:[#allocation2 + $0x14] sm:$0x1] }
 0x3af   : > { %6048 = vst [vmem:[#allocation2 + $0x70] sm:$0xf] %v5818_v20  ;;  %6051 = vst [vmem:[#allocation2 + $0x74] sm:$0x1] %v6050_v32  ;;  %v5860_v14 = vor.u32 %v5858_v61, %v17561_v0  ;;  %v5861_v19 = vrot.slane %v17561_v0, 4  ;;  %v5838_v15 = vshrl.u32 %v12330_v47, 16  ;;  %14478 = vrcp.f32 %v5353_v49 }
 0x3b0   : > { %v5841_v18 = vshll.u32 %v12330_v47, 16  ;;  %v5359_v33 = vadd.f32 1.0, %v14471_v59  ;;  %v5357_v62 = vadd.f32 1.0, %v14473_v37  ;;  %v5362_v1 = vadd.f32 1.0, %v14475_v48  ;;  %v14661_v55 = vld [vmem:[%s19323_s3] ss:$0 sm:$0xff] }
 0x3b1   : > { %v6067_v40 = vsel %vm17344_vm13, %v5860_v14, %v6066_v38  ;;  %v17571_v13 = vrot.slane %v5838_v15, 7  ;;  %14480 = vrcp.f32 %v5358_v24  ;;  %v11943_v36 = vmul.f32 -1.442695, %v17534_v56  ;;  %v6105_v7 = vld [vmem:[#allocation2 + $0x18] sm:$0xf] }
 0x3b2   : > { %6068 = vst [vmem:[#allocation2 + $0x90] sm:$0xf] %v6067_v40  ;;  %14482 = vrcp.f32 %v5356_v45  ;;  %v5194_v52 = vadd.f32 %v17436_v58, %v19594_v5  ;;  %v6190_v35 = vshrl.u32 %v6103_v34, 16  ;;  %v6193_v4 = vshll.u32 %v6103_v34, 16  ;;  %v17589_v61 = vld [vmem:[#allocation2 + $0x20] sm:$0x1] }
 0x3b3   : > { %v5843_v8 = vor.u32 %v5841_v18, %v17571_v13  ;;  %v5844_v46 = vrot.slane %v17571_v13, 4  ;;  %14484 = vrcp.f32 %v5359_v33  ;;  %v6199_v10 = vshll.u32 %v6104_v57, 16  ;;  %v14265_v13 = vld [vmem:[#allocation3 + $0x18] sm:$0xff]  }
 0x3b4   : > { %14486 = vrcp.f32 %v5357_v62  ;;  %v17581_v42 = vadd.f32 %v14661_v55, %v5194_v52  ;;  %v6192_v17 = vrot.slane %v6190_v35, 4  ;;  %v6195_v43 = vrot.slane %v6193_v4, 5  ;;  %v14263_v55 = vld [vmem:[#allocation3 + $0x8] sm:$0xff]  }
 0x3b5   : > { %v6060_v58 = vsel %vm17344_vm13, %v5843_v8, %v6059_v6  ;;  %14488 = vrcp.f32 %v5362_v1  ;;  %v6201_v54 = vrot.slane %v6199_v10, 5  ;;  %v6203_v21 = vshrl.u32 %v6104_v57, 16  ;;  %v14477_v63 = vpop.eup %14476 }
 0x3b6   : > { %6061 = vst [vmem:[#allocation2 + $0x84] sm:$0xf] %v6060_v58  ;;  %14490 = vpow2.f32 %v17542_v22  ;;  %v11941_v30 = vmul.f32 -1.442695, %v17581_v42  ;;  %v6196_v16 = vor.u32 %v6195_v43, %v6192_v17  ;;  %v6209_v59 = vshll.u32 %v6150_v9, 16 }
 0x3b7   : > { %14492 = vpow2.f32 %v11943_v36  ;;  %v6205_v50 = vrot.slane %v6203_v21, 4  ;;  %v6214_v28 = vshrl.u32 %v6105_v7, 16  ;;  %v6217_v37 = vshll.u32 %v6105_v7, 16 }
 0x3b8   : > { %v5451_v11 = vmul.f32 %v14477_v63, %v17462_v60  ;;  %14494 = vpow2.f32 %v11941_v30  ;;  %v6197_v26 = vrot.slane %v6196_v16, 4  ;;  %v6211_v51 = vrot.slane %v6209_v59, 5 }
 0x3b9   : > { %v6206_v2 = vor.u32 %v6205_v50, %v6201_v54  ;;  %v6216_v22 = vrot.slane %v6214_v28, 4  ;;  %v6219_v48 = vrot.slane %v6217_v37, 5  ;;  %v6223_v47 = vshll.u32 %v17587_v23, 16  ;;  %v14479_v49 = vpop.eup %14478 }
 0x3ba   : > { %v12333_v20 = vpack.c.bf16 %v5451_v11, %v5451_v11  ;;  %v6202_v38 = vsel %vm14977_vm2, %v6197_v26, %v6201_v54  ;;  %v6227_v24 = vshrl.u32 %v17587_v23, 16  ;;  %v6233_v45 = vshll.u32 %v17589_v61, 16  ;;  %v14662_v11 = vld [vmem:[#allocation3] sm:$0xff]  }
 0x3bb   : > { %v14481_v14 = vpop.eup %14480  ;;  %v5449_v60 = vmul.f32 %v14479_v49, %v17492_v31  ;;  %v6207_v15 = vrot.slane %v6206_v2, 4  ;;  %v6220_v18 = vor.u32 %v6219_v48, %v6216_v22  ;;  %v17598_v34 = vrot.slane %v6223_v47, 5  ;;  %v6063_v2 = vld [vmem:[#allocation2 + $0x8c] sm:$0x1] }
 0x3bc   : > { %v14483_v33 = vpop.eup %14482  ;;  %v5863_v62 = vshrl.u32 %v12333_v20, 16  ;;  %v5866_v1 = vshll.u32 %v12333_v20, 16  ;;  %v5454_v57 = vmul.f32 %v14481_v14, %v17495_v39  ;;  %v17601_v40 = vrot.slane %v6227_v24, 4  ;;  %v6070_v39 = vld [vmem:[#allocation2 + $0x98] sm:$0x1]  ;;  %v14264_v47 = vld [vmem:[#allocation3 + $0x10] sm:$0xff]  }
 0x3bd   : > { %v14485_v36 = vpop.eup %14484  ;;  %v12331_v6 = vpack.c.bf16 %v5449_v60, %v5449_v60  ;;  %v5452_v5 = vmul.f32 %v14483_v33, %v17508_v29  ;;  %v6212_v52 = vsel %vm14977_vm2, %v6207_v15, %v6211_v51  ;;  %v17606_v35 = vrot.slane %v6220_v18, 4  ;;  %v6073_v15 = vld [vmem:[#allocation2 + $0x9c] sm:$0xf] }
 0x3be   : > { %v14487_v31 = vpop.eup %14486  ;;  %v5865_v4 = vrot.slane %v5863_v62, 7  ;;  %v12336_v8 = vpack.c.bf16 %v5454_v57, %v5454_v57  ;;  %v5455_v9 = vmul.f32 %v14485_v36, %v17511_v27  ;;  %v11977_v10 = vcombine.low %v6202_v38, %v6212_v52  ;;  %v6080_v38 = vld [vmem:[#allocation2 + $0xa8] sm:$0xf] }
 0x3bf   : > { %v14489_v17 = vpop.eup %14488  ;;  %v5846_v43 = vshrl.u32 %v12331_v6, 16  ;;  %v5849_v7 = vshll.u32 %v12331_v6, 16  ;;  %v12334_v58 = vpack.c.bf16 %v5452_v5, %v5452_v5  ;;  %v5453_v54 = vmul.f32 %v14487_v31, %v17525_v12  ;;  %v6084_v5 = vld [vmem:[#allocation2 + $0xb0] sm:$0x1] }
 0x3c0   : > { %v14491_v29 = vpop.eup %14490  ;;  %v5868_v21 = vor.u32 %v5866_v1, %v5865_v4  ;;  %v5870_v30 = vrot.slane %v5865_v4, 4  ;;  %v5889_v16 = vshrl.u32 %v12336_v8, 16  ;;  %v5892_v59 = vshll.u32 %v12336_v8, 16  ;;  %13279 = vmatmul.mubr.bf16.vlgmr.msra.gmra.mrb[16].mxu0 %v11977_v10  ;;  %v6077_v4 = vld [vmem:[#allocation2 + $0xa4] sm:$0x1] }
 0x3c1   : > { %v14493_v63 = vpop.eup %14492  ;;  %v5848_v50 = vrot.slane %v5846_v43, 7  ;;  %v5872_v28 = vshrl.u32 %v12334_v58, 16  ;;  %v5875_v37 = vshll.u32 %v12334_v58, 16  ;;  %v12337_v27 = vpack.c.bf16 %v5455_v9, %v5455_v9  ;;  %13311 = vmatpush3.bf16.msra.mxu0 %v14662_v11  ;;  %v6094_v11 = vld [vmem:[#allocation2 + $0xc0] sm:$0xf] }
 0x3c2   : > { %v14495_v26 = vpop.eup %14494  ;;  %v5869_v51 = vsel %vm17351_vm14, %v5861_v19, %v5868_v21  ;;  %v6071_v12 = vsel %vm17002_vm8, %v5870_v30, %v6070_v39  ;;  %v5891_v22 = vrot.slane %v5889_v16, 7  ;;  %v12335_v48 = vpack.c.bf16 %v5453_v54, %v5453_v54  ;;  %13312 = vmatprep.subr.bf16.mxu0 %v14263_v55  ;;  %v17631_v30 = vld [vmem:[#allocation2 + $0x24] sm:$0xf] }
 0x3c3   : > { %6069 = vst [vmem:[#allocation2 + $0x94] sm:$0xf] %v5869_v51  ;;  %6072 = vst [vmem:[#allocation2 + $0x98] sm:$0x1] %v6071_v12  ;;  %v5851_v49 = vor.u32 %v5849_v7, %v5848_v50  ;;  %v5853_v20 = vrot.slane %v5848_v50, 4  ;;  %v5874_v24 = vrot.slane %v5872_v28, 7  ;;  %v5458_v8 = vmul.f32 %v14489_v17, %v17528_v25 }
 0x3c4   : > { %v5897_v14 = vshrl.u32 %v12337_v27, 16  ;;  %v5894_v60 = vor.u32 %v5892_v59, %v5891_v22  ;;  %v5895_v0 = vrot.slane %v5891_v22, 4  ;;  %v5900_v18 = vshll.u32 %v12337_v27, 16  ;;  %v17641_v59 = vld [vmem:[#allocation2 + $0x28] sm:$0xf] }
 0x3c5   : > { %v5880_v19 = vshrl.u32 %v12335_v48, 16  ;;  %v5852_v33 = vsel %vm17351_vm14, %v5844_v46, %v5851_v49  ;;  %v6064_v62 = vsel %vm17002_vm8, %v5853_v20, %v6063_v2  ;;  %v5877_v1 = vor.u32 %v5875_v37, %v5874_v24  ;;  %13313 = vmatpush3.bf16.msra.mxu0 %v14263_v55  ;;  %v6152_v27 = vld [vmem:[#allocation2 + $0x2c] sm:$0x1]  ;;  %v14267_v49 = vld [vmem:[#allocation3 + $0x28] sm:$0xff]  }
 0x3c6   : > { %v5878_v57 = vrot.slane %v5874_v24, 4  ;;  %6062 = vst [vmem:[#allocation2 + $0x88] sm:$0xf] %v5852_v33  ;;  %6065 = vst [vmem:[#allocation2 + $0x8c] sm:$0x1] %v6064_v62  ;;  %v6081_v36 = vsel %vm17344_vm13, %v5894_v60, %v6080_v38  ;;  %v5899_v6 = vrot.slane %v5897_v14, 7  ;;  %13314 = vmatprep.subr.bf16.mxu0 %v14264_v47  ;;  %v12340_v58 = vpack.c.bf16 %v5458_v8, %v5458_v8 }
 0x3c7   : > { %v5882_v52 = vrot.slane %v5880_v19, 7  ;;  %v5883_v31 = vshll.u32 %v12335_v48, 16  ;;  %6082 = vst [vmem:[#allocation2 + $0xa8] sm:$0xf] %v6081_v36  ;;  %v6074_v46 = vsel %vm17344_vm13, %v5877_v1, %v6073_v15  ;;  %v5360_v9 = vadd.f32 1.0, %v14491_v29 }
 0x3c8   : > { %v5363_v10 = vadd.f32 1.0, %v14493_v63  ;;  %6075 = vst [vmem:[#allocation2 + $0x9c] sm:$0xf] %v6074_v46  ;;  %v5902_v55 = vor.u32 %v5900_v18, %v5899_v6  ;;  %v5904_v39 = vrot.slane %v5899_v6, 4  ;;  %v5361_v54 = vadd.f32 1.0, %v14495_v26  ;;  %v14268_v46 = vld [vmem:[#allocation3 + $0x30] sm:$0xff]  }
 0x3c9   : > { %v5885_v43 = vor.u32 %v5883_v31, %v5882_v52  ;;  %v5887_v7 = vrot.slane %v5882_v52, 4  ;;  %14496 = vrcp.f32 %v5360_v9  ;;  %v6226_v21 = vsel %vm14977_vm2, %v17606_v35, %v17598_v34  ;;  %13315 = vmatpush3.bf16.msra.mxu0 %v14264_v47  ;;  %v17643_v63 = vld [vmem:[#allocation2 + $0x30] sm:$0xf]  ;;  %v14266_v35 = vld [vmem:[#allocation3 + $0x20] sm:$0xff]   ;;  %v17655_v38 = vld [vmem:[#allocation2 + $0x34] sm:$0xf] }
 0x3ca   : > { %v5903_v25 = vsel %vm17351_vm14, %v5895_v0, %v5902_v55  ;;  %v6085_v17 = vsel %vm17002_vm8, %v5904_v39, %v6084_v5  ;;  %13316 = vmatprep.subr.bf16.mxu0 %v14265_v13  ;;  %v5923_v50 = vshrl.u32 %v12340_v58, 16  ;;  %v5926_v28 = vshll.u32 %v12340_v58, 16  ;;  %v6153_v0 = vld [vmem:[#allocation2 + $0x38] sm:$0x1]  ;;  %v17662_v62 = vld [vmem:[#allocation2 + $0x3c] sm:$0xf] }
 0x3cb   : > { %v5886_v29 = vsel %vm17351_vm14, %v5878_v57, %v5885_v43  ;;  %v6078_v16 = vsel %vm17002_vm8, %v5887_v7, %v6077_v4  ;;  %6083 = vst [vmem:[#allocation2 + $0xac] sm:$0xf] %v5903_v25  ;;  %6086 = vst [vmem:[#allocation2 + $0xb0] sm:$0x1] %v6085_v17  ;;  %14498 = vrcp.f32 %v5363_v10  ;;  %v6230_v37 = vor.u32 %v17601_v40, %v17598_v34  ;;  %v17674_v17 = vld [vmem:[#allocation2 + $0x40] sm:$0xf] }
 0x3cc   : > { %6076 = vst [vmem:[#allocation2 + $0xa0] sm:$0xf] %v5886_v29  ;;  %6079 = vst [vmem:[#allocation2 + $0xa4] sm:$0x1] %v6078_v16  ;;  %14500 = vrcp.f32 %v5361_v54  ;;  %v6235_v26 = vrot.slane %v6233_v45, 5  ;;  %v6238_v51 = vshrl.u32 %v17631_v30, 16 }
 0x3cd   : > { %v6241_v12 = vshll.u32 %v17631_v30, 16  ;;  %v17651_v2 = vrot.slane %v5923_v50, 7  ;;  %v6231_v22 = vrot.slane %v6230_v37, 4  ;;  %v6247_v48 = vshll.u32 %v17641_v59, 16  ;;  %13317 = vmatpush3.bf16.msra.mxu0 %v14265_v13 }
 0x3ce   : > { %v6251_v47 = vshrl.u32 %v17641_v59, 16  ;;  %v6240_v34 = vrot.slane %v6238_v51, 4  ;;  %v6257_v20 = vshll.u32 %v6152_v27, 16  ;;  %v6262_v61 = vshrl.u32 %v17643_v63, 16  ;;  %13318 = vmatprep.subr.bf16.mxu0 %v14266_v35 }
 0x3cf   : > { %v6243_v40 = vrot.slane %v6241_v12, 5  ;;  %v5928_v45 = vor.u32 %v5926_v28, %v17651_v2  ;;  %v5929_v24 = vrot.slane %v17651_v2, 4  ;;  %v6236_v14 = vsel %vm14977_vm2, %v6231_v22, %v6235_v26  ;;  %v14269_v12 = vld [vmem:[#allocation3 + $0x38] sm:$0xff]  }
 0x3d0   : > { %v6249_v60 = vrot.slane %v6247_v48, 5  ;;  %v11978_v15 = vcombine.low %v6226_v21, %v6236_v14  ;;  %v6253_v19 = vrot.slane %v6251_v47, 4  ;;  %v6259_v33 = vrot.slane %v6257_v20, 5 }
 0x3d1   : > { %v6244_v18 = vor.u32 %v6243_v40, %v6240_v34  ;;  %v6095_v1 = vsel %vm17344_vm13, %v5928_v45, %v6094_v11  ;;  %v6264_v57 = vrot.slane %v6262_v61, 4  ;;  %v6265_v36 = vshll.u32 %v17643_v63, 16  ;;  %13319 = vmatpush3.bf16.msra.mxu0 %v14266_v35  ;;  %v17685_v61 = vld [vmem:[#allocation2 + $0x48] sm:$0xf] }
 0x3d2   : > { %v6271_v6 = vshll.u32 %v17655_v38, 16  ;;  %6096 = vst [vmem:[#allocation2 + $0xc0] sm:$0xf] %v6095_v1  ;;  %13282 = vmatprep.mubr.bf16.mxu0 %v11978_v15  ;;  %v6254_v52 = vor.u32 %v6253_v19, %v6249_v60  ;;  %v6275_v31 = vshrl.u32 %v17655_v38, 16  ;;  %v6281_v13 = vshll.u32 %v6153_v0, 16  ;;  %13320 = vmatprep.subr.bf16.mxu0 %v14267_v49 }
 0x3d3   : > { %v6245_v5 = vrot.slane %v6244_v18, 4  ;;  %v14497_v4 = vpop.eup %14496  ;;  %v6267_v8 = vrot.slane %v6265_v36, 5  ;;  %v6286_v10 = vshrl.u32 %v17662_v62, 16  ;;  %v6289_v55 = vshll.u32 %v17662_v62, 16  ;;  %v17689_v0 = vld [vmem:[#allocation2 + $0x44] sm:$0x1] }
 0x3d4   : > { %v6273_v9 = vrot.slane %v6271_v6, 5  ;;  %v5456_v39 = vmul.f32 %v14497_v4, %v17531_v44  ;;  %v6255_v7 = vrot.slane %v6254_v52, 4  ;;  %v6277_v58 = vrot.slane %v6275_v31, 4  ;;  %v6087_v15 = vld [vmem:[#allocation2 + $0xb4] sm:$0xf] }
 0x3d5   : > { %v6250_v43 = vsel %vm14977_vm2, %v6245_v5, %v6249_v60  ;;  %v14499_v54 = vpop.eup %14498  ;;  %v6268_v21 = vor.u32 %v6267_v8, %v6264_v57  ;;  %v6283_v25 = vrot.slane %v6281_v13, 5  ;;  %v6288_v29 = vrot.slane %v6286_v10, 4  ;;  %13321 = vmatpush3.bf16.msra.mxu0 %v14267_v49  ;;  %v17691_v57 = vld [vmem:[#allocation3 + $0x80] sm:$0xff]   ;;  %v6098_v52 = vld [vmem:[#allocation2 + $0xc8] sm:$0x1] }
 0x3d6   : > { %v6291_v16 = vrot.slane %v6289_v55, 5  ;;  %v14501_v35 = vpop.eup %14500  ;;  %v12338_v50 = vpack.c.bf16 %v5456_v39, %v5456_v39  ;;  %v5459_v28 = vmul.f32 %v14499_v54, %v17534_v56  ;;  %v6260_v44 = vsel %vm14977_vm2, %v6255_v7, %v6259_v33  ;;  %13322 = vmatprep.subr.bf16.mxu0 %v14268_v46  ;;  %v6091_v4 = vld [vmem:[#allocation2 + $0xbc] sm:$0x1]  ;;  %v17701_v7 = vld [vmem:[#allocation2 + $0x4c] sm:$0xf] }
 0x3d7   : > { %v6278_v37 = vor.u32 %v6277_v58, %v6273_v9  ;;  %v5457_v27 = vmul.f32 %v14501_v35, %v17581_v42  ;;  %v11979_v11 = vcombine.low %v6250_v43, %v6260_v44  ;;  %v6269_v26 = vrot.slane %v6268_v21, 4  ;;  %v17703_v58 = vld [vmem:[#allocation2 + $0x50] sm:$0x1]  ;;  %v17715_v44 = vld [vmem:[#allocation2 + $0x58] sm:$0xf] }
 0x3d8   : > { %v6292_v51 = vor.u32 %v6291_v16, %v6288_v29  ;;  %v5906_v22 = vshrl.u32 %v12338_v50, 16  ;;  %v5909_v48 = vshll.u32 %v12338_v50, 16  ;;  %v12341_v47 = vpack.c.bf16 %v5459_v28, %v5459_v28  ;;  %v17705_v16 = vld [vmem:[#allocation2 + $0x54] sm:$0xf] }
 0x3d9   : > { %v6279_v34 = vrot.slane %v6278_v37, 4  ;;  %v12339_v49 = vpack.c.bf16 %v5457_v27, %v5457_v27  ;;  %13283 = vmatmul.mubr.bf16.gmra.mrb[20].mxu0 %v11979_v11  ;;  %v6274_v56 = vsel %vm14977_vm2, %v6269_v26, %v6273_v9  ;;  %v6295_v20 = vshll.u32 %v17674_v17, 16 }
 0x3da   : > { %v17682_v40 = vrot.slane %v6292_v51, 4  ;;  %v5908_v42 = vrot.slane %v5906_v22, 7  ;;  %v5931_v45 = vshrl.u32 %v12341_v47, 16  ;;  %v5934_v14 = vshll.u32 %v12341_v47, 16  ;;  %13323 = vmatpush3.bf16.msra.mxu0 %v14268_v46  ;;  %v17725_v22 = vld [vmem:[#allocation2 + $0x60] sm:$0xf] }
 0x3db   : > { %v6284_v60 = vsel %vm14977_vm2, %v6279_v34, %v6283_v25  ;;  %v5914_v18 = vshrl.u32 %v12339_v49, 16  ;;  %v5917_v19 = vshll.u32 %v12339_v49, 16  ;;  %v6297_v1 = vrot.slane %v6295_v20, 5  ;;  %13324 = vmatprep.subr.bf16.mxu0 %v14269_v12  ;;  %v17727_v47 = vld [vmem:[#allocation2 + $0x5c] sm:$0x1] }
 0x3dc   : > { %v11980_v33 = vcombine.low %v6274_v56, %v6284_v60  ;;  %v5911_v36 = vor.u32 %v5909_v48, %v5908_v42  ;;  %v5912_v6 = vrot.slane %v5908_v42, 4  ;;  %v5933_v5 = vrot.slane %v5931_v45, 7  ;;  %v17733_v42 = vld [vmem:[#allocation2 + $0x64] sm:$0xf] }
 0x3dd   : > { %v6299_v31 = vshrl.u32 %v17674_v17, 16  ;;  %v5916_v13 = vrot.slane %v5914_v18, 7  ;;  %v6298_v46 = vsel %vm14977_vm2, %v17682_v40, %v6297_v1  ;;  %v6305_v8 = vshll.u32 %v17689_v0, 16 }
 0x3de   : > { %13286 = vmatprep.mubr.bf16.mxu0 %v11980_v33  ;;  %v6310_v9 = vshrl.u32 %v17685_v61, 16  ;;  %v6088_v10 = vsel %vm17344_vm13, %v5911_v36, %v6087_v15  ;;  %v5936_v55 = vor.u32 %v5934_v14, %v5933_v5  ;;  %v5938_v39 = vrot.slane %v5933_v5, 4  ;;  %13325 = vmatpush3.bf16.msra.mxu0 %v14269_v12 }
 0x3df   : > { %v6301_v43 = vrot.slane %v6299_v31, 4  ;;  %6089 = vst [vmem:[#allocation2 + $0xb4] sm:$0xf] %v6088_v10  ;;  %v5919_v54 = vor.u32 %v5917_v19, %v5916_v13  ;;  %v5921_v21 = vrot.slane %v5916_v13, 4  ;;  %v6307_v25 = vrot.slane %v6305_v8, 5  ;;  %13358 = vmatprep.subr.bf16.mxu0 %v17691_v57 }
 0x3e0   : > { %v6312_v29 = vrot.slane %v6310_v9, 4  ;;  %v5937_v41 = vsel %vm17351_vm14, %v5929_v24, %v5936_v55  ;;  %v6099_v35 = vsel %vm17002_vm8, %v5938_v39, %v6098_v52  ;;  %v6313_v28 = vshll.u32 %v17685_v61, 16  ;;  %v17742_v13 = vld [vmem:[#allocation2 + $0x6c] sm:$0xf] }
 0x3e1   : > { %v6302_v50 = vor.u32 %v6301_v43, %v6297_v1  ;;  %6097 = vst [vmem:[#allocation2 + $0xc4] sm:$0xf] %v5937_v41  ;;  %6100 = vst [vmem:[#allocation2 + $0xc8] sm:$0x1] %v6099_v35  ;;  %v5920_v37 = vsel %vm17351_vm14, %v5912_v6, %v5919_v54  ;;  %v6092_v27 = vsel %vm17002_vm8, %v5921_v21, %v6091_v4  ;;  %v6319_v2 = vshll.u32 %v17701_v7, 16 }
 0x3e2   : > { %v6323_v24 = vshrl.u32 %v17701_v7, 16  ;;  %6090 = vst [vmem:[#allocation2 + $0xb8] sm:$0xf] %v5920_v37  ;;  %6093 = vst [vmem:[#allocation2 + $0xbc] sm:$0x1] %v6092_v27  ;;  %v6315_v26 = vrot.slane %v6313_v28, 5 }
 0x3e3   : > { %v6303_v11 = vrot.slane %v6302_v50, 4  ;;  %v6329_v51 = vshll.u32 %v17703_v58, 16  ;;  %v6334_v12 = vshrl.u32 %v17705_v16, 16  ;;  %v6321_v48 = vrot.slane %v6319_v2, 5  ;;  %v17737_v1 = vld [vmem:[#allocation2 + $0x68] sm:$0x1] }
 0x3e4   : > { %v6325_v53 = vrot.slane %v6323_v24, 4  ;;  %v6337_v3 = vshll.u32 %v17705_v16, 16  ;;  %v6343_v34 = vshll.u32 %v17715_v44, 16  ;;  %v6316_v56 = vor.u32 %v6315_v26, %v6312_v29  ;;  %v17748_v54 = vld [vmem:[#allocation2 + $0x70] sm:$0xf] }
 0x3e5   : > { %v6308_v49 = vsel %vm14977_vm2, %v6303_v11, %v6307_v25  ;;  %v6331_v40 = vrot.slane %v6329_v51, 5  ;;  %v6336_v20 = vrot.slane %v6334_v12, 4  ;;  %v6347_v19 = vshrl.u32 %v17715_v44, 16  ;;  %v17752_v35 = vld [vmem:[#allocation2 + $0x74] sm:$0x1] }
 0x3e6   : > { %v11981_v45 = vcombine.low %v6298_v46, %v6308_v49  ;;  %v6326_v14 = vor.u32 %v6325_v53, %v6321_v48  ;;  %v6339_v60 = vrot.slane %v6337_v3, 5  ;;  %v6345_v15 = vrot.slane %v6343_v34, 5  ;;  %v17760_v3 = vld [vmem:[#allocation2 + $0x78] sm:$0xf] }
 0x3e7   : > { %v6317_v18 = vrot.slane %v6316_v56, 4  ;;  %v6353_v33 = vshll.u32 %v17727_v47, 16  ;;  %v6358_v36 = vshrl.u32 %v17725_v22, 16  ;;  %v6361_v52 = vshll.u32 %v17725_v22, 16 }
 0x3e8   : > { %13287 = vmatmul.mubr.bf16.gmra.mrb[24].mxu0 %v11981_v45  ;;  %v6327_v6 = vrot.slane %v6326_v14, 4  ;;  %v6340_v5 = vor.u32 %v6339_v60, %v6336_v20  ;;  %v6367_v31 = vshll.u32 %v17733_v42, 16  ;;  %v6349_v46 = vrot.slane %v6347_v19, 4  ;;  %v17765_v20 = vld [vmem:[#allocation2 + $0x7c] sm:$0xf] }
 0x3e9   : > { %v6322_v4 = vsel %vm14977_vm2, %v6317_v18, %v6321_v48  ;;  %v6355_v8 = vrot.slane %v6353_v33, 5  ;;  %v6360_v9 = vrot.slane %v6358_v36, 4  ;;  %v6363_v39 = vrot.slane %v6361_v52, 5  ;;  %v17769_v18 = vld [vmem:[#allocation2 + $0x80] sm:$0x1] }
 0x3ea   : > { %v6332_v10 = vsel %vm14977_vm2, %v6327_v6, %v6331_v40  ;;  %v6341_v55 = vrot.slane %v6340_v5, 4  ;;  %v6369_v43 = vrot.slane %v6367_v31, 5  ;;  %v6350_v25 = vor.u32 %v6349_v46, %v6345_v15  ;;  %v17771_v19 = vld [vmem:[#allocation2 + $0x84] sm:$0xf]  ;;  %v17775_v52 = vld [vmem:[#allocation2 + $0x88] sm:$0xf] }
 0x3eb   : > { %v11982_v21 = vcombine.low %v6322_v4, %v6332_v10  ;;  %v6371_v29 = vshrl.u32 %v17733_v42, 16  ;;  %v6377_v41 = vshll.u32 %v17737_v1, 16  ;;  %v6364_v28 = vor.u32 %v6363_v39, %v6360_v9 }
 0x3ec   : > { %v6346_v50 = vsel %vm14977_vm2, %v6341_v55, %v6345_v15  ;;  %v6382_v37 = vshrl.u32 %v17742_v13, 16  ;;  %v6385_v27 = vshll.u32 %v17742_v13, 16  ;;  %v6351_v2 = vrot.slane %v6350_v25, 4 }
 0x3ed   : > { %13290 = vmatprep.mubr.bf16.mxu0 %v11982_v21  ;;  %v6373_v24 = vrot.slane %v6371_v29, 4  ;;  %v6379_v11 = vrot.slane %v6377_v41, 5  ;;  %v6391_v26 = vshll.u32 %v17748_v54, 16  ;;  %v6365_v51 = vrot.slane %v6364_v28, 4 }
 0x3ee   : > { %v6384_v12 = vrot.slane %v6382_v37, 4  ;;  %v6387_v48 = vrot.slane %v6385_v27, 5  ;;  %v6395_v53 = vshrl.u32 %v17748_v54, 16  ;;  %v6356_v34 = vsel %vm14977_vm2, %v6351_v2, %v6355_v8 }
 0x3ef   : > { %v6374_v49 = vor.u32 %v6373_v24, %v6369_v43  ;;  %v6393_v56 = vrot.slane %v6391_v26, 5  ;;  %v6401_v40 = vshll.u32 %v17752_v35, 16  ;;  %v11983_v45 = vcombine.low %v6346_v50, %v6356_v34  ;;  %v17786_v50 = vld [vmem:[#allocation2 + $0x90] sm:$0xf] }
 0x3f0   : > { %v6370_v14 = vsel %vm14977_vm2, %v6365_v51, %v6369_v43  ;;  %v6388_v60 = vor.u32 %v6387_v48, %v6384_v12  ;;  %v6397_v15 = vrot.slane %v6395_v53, 4  ;;  %v6406_v6 = vshrl.u32 %v17760_v3, 16  ;;  %v17782_v43 = vld [vmem:[#allocation2 + $0x8c] sm:$0x1] }
 0x3f1   : > { %v6375_v33 = vrot.slane %v6374_v49, 4  ;;  %v6403_v36 = vrot.slane %v6401_v40, 5  ;;  %v6409_v5 = vshll.u32 %v17760_v3, 16  ;;  %13291 = vmatmul.mubr.bf16.gmra.mrb[28].mxu0 %v11983_v45  ;;  %v6415_v46 = vshll.u32 %v17765_v20, 16  ;;  %v17794_v49 = vld [vmem:[#allocation2 + $0x94] sm:$0xf] }
 0x3f2   : > { %v6389_v31 = vrot.slane %v6388_v60, 4  ;;  %v6398_v4 = vor.u32 %v6397_v15, %v6393_v56  ;;  %v6419_v8 = vshrl.u32 %v17765_v20, 16  ;;  %v6408_v10 = vrot.slane %v6406_v6, 4  ;;  %v17797_v60 = vld [vmem:[#allocation2 + $0x98] sm:$0x1] }
 0x3f3   : > { %v6380_v9 = vsel %vm14977_vm2, %v6375_v33, %v6379_v11  ;;  %v6411_v55 = vrot.slane %v6409_v5, 5  ;;  %v6425_v39 = vshll.u32 %v17769_v18, 16  ;;  %v6417_v41 = vrot.slane %v6415_v46, 5  ;;  %v17799_v15 = vld [vmem:[#allocation2 + $0x9c] sm:$0xf] }
 0x3f4   : > { %v11984_v21 = vcombine.low %v6370_v14, %v6380_v9  ;;  %v6394_v25 = vsel %vm14977_vm2, %v6389_v31, %v6393_v56  ;;  %v6399_v29 = vrot.slane %v6398_v4, 4  ;;  %v6421_v37 = vrot.slane %v6419_v8, 4  ;;  %v17806_v9 = vld [vmem:[#allocation2 + $0xa0] sm:$0xf] }
 0x3f5   : > { %v6412_v28 = vor.u32 %v6411_v55, %v6408_v10  ;;  %v6427_v27 = vrot.slane %v6425_v39, 5  ;;  %v6430_v2 = vshrl.u32 %v17771_v19, 16  ;;  %v6433_v11 = vshll.u32 %v17771_v19, 16 }
 0x3f6   : > { %13294 = vmatprep.mubr.bf16.mxu0 %v11984_v21  ;;  %v6404_v24 = vsel %vm14977_vm2, %v6399_v29, %v6403_v36  ;;  %v6439_v26 = vshll.u32 %v17775_v52, 16  ;;  %v6443_v51 = vshrl.u32 %v17775_v52, 16  ;;  %v6422_v53 = vor.u32 %v6421_v37, %v6417_v41  ;;  %v17811_v37 = vld [vmem:[#allocation2 + $0xa4] sm:$0x1] }
 0x3f7   : > { %v11985_v12 = vcombine.low %v6394_v25, %v6404_v24  ;;  %v6413_v48 = vrot.slane %v6412_v28, 4  ;;  %v6432_v34 = vrot.slane %v6430_v2, 4  ;;  %v6435_v56 = vrot.slane %v6433_v11, 5  ;;  %v17813_v2 = vld [vmem:[#allocation2 + $0xa8] sm:$0xf] }
 0x3f8   : > { %v6441_v40 = vrot.slane %v6439_v26, 5  ;;  %v6445_v45 = vrot.slane %v6443_v51, 4  ;;  %v6449_v14 = vshll.u32 %v17782_v43, 16  ;;  %v6423_v36 = vrot.slane %v6422_v53, 4 }
 0x3f9   : > { %v6418_v33 = vsel %vm14977_vm2, %v6413_v48, %v6417_v41  ;;  %v6454_v6 = vshrl.u32 %v17786_v50, 16  ;;  %v6457_v5 = vshll.u32 %v17786_v50, 16  ;;  %13295 = vmatmul.mubr.bf16.gmra.mrb[32].mxu0 %v11985_v12  ;;  %v6436_v31 = vor.u32 %v6435_v56, %v6432_v34 }
 0x3fa   : > { %v6446_v4 = vor.u32 %v6445_v45, %v6441_v40  ;;  %v6451_v46 = vrot.slane %v6449_v14, 5  ;;  %v6463_v8 = vshll.u32 %v17794_v49, 16  ;;  %v6428_v10 = vsel %vm14977_vm2, %v6423_v36, %v6427_v27  ;;  %v17823_v14 = vld [vmem:[#allocation2 + $0xac] sm:$0xf] }
 0x3fb   : > { %v6456_v55 = vrot.slane %v6454_v6, 4  ;;  %v6459_v39 = vrot.slane %v6457_v5, 5  ;;  %v6467_v21 = vshrl.u32 %v17794_v49, 16  ;;  %v11986_v25 = vcombine.low %v6418_v33, %v6428_v10 }
 0x3fc   : > { %v6437_v29 = vrot.slane %v6436_v31, 4  ;;  %v6447_v41 = vrot.slane %v6446_v4, 4  ;;  %v6465_v28 = vrot.slane %v6463_v8, 5  ;;  %v6473_v26 = vshll.u32 %v17797_v60, 16  ;;  %v17827_v8 = vld [vmem:[#allocation2 + $0xb0] sm:$0x1] }
 0x3fd   : > { %v6460_v24 = vor.u32 %v6459_v39, %v6456_v55  ;;  %v6469_v11 = vrot.slane %v6467_v21, 4  ;;  %v6478_v51 = vshrl.u32 %v17799_v15, 16  ;;  %13298 = vmatprep.mubr.bf16.mxu0 %v11986_v25  ;;  %v6481_v48 = vshll.u32 %v17799_v15, 16  ;;  %v17832_v25 = vld [vmem:[#allocation2 + $0xb4] sm:$0xf] }
 0x3fe   : > { %v6442_v27 = vsel %vm14977_vm2, %v6437_v29, %v6441_v40  ;;  %v6452_v12 = vsel %vm14977_vm2, %v6447_v41, %v6451_v46  ;;  %v6487_v53 = vshll.u32 %v17806_v9, 16  ;;  %v6491_v5 = vshrl.u32 %v17806_v9, 16 }
 0x3ff   : > { %v11987_v34 = vcombine.low %v6442_v27, %v6452_v12  ;;  %v6461_v56 = vrot.slane %v6460_v24, 4  ;;  %v6470_v45 = vor.u32 %v6469_v11, %v6465_v28  ;;  %v6480_v33 = vrot.slane %v6478_v51, 4 }
 0x400   : > { %v6483_v36 = vrot.slane %v6481_v48, 5  ;;  %v6489_v6 = vrot.slane %v6487_v53, 5  ;;  %v6475_v4 = vrot.slane %v6473_v26, 5  ;;  %v6497_v40 = vshll.u32 %v17811_v37, 16  ;;  %v17839_v48 = vld [vmem:[#allocation2 + $0xb8] sm:$0xf] }
 0x401   : > { %v6471_v31 = vrot.slane %v6470_v45, 4  ;;  %v6502_v46 = vshrl.u32 %v17813_v2, 16  ;;  %13299 = vmatmul.mubr.bf16.gmra.mrb[36].mxu0 %v11987_v34  ;;  %v6493_v55 = vrot.slane %v6491_v5, 4  ;;  %v6505_v39 = vshll.u32 %v17813_v2, 16 }
 0x402   : > { %v6484_v10 = vor.u32 %v6483_v36, %v6480_v33  ;;  %v6511_v21 = vshll.u32 %v17823_v14, 16  ;;  %v6466_v29 = vsel %vm14977_vm2, %v6461_v56, %v6465_v28  ;;  %v6515_v11 = vshrl.u32 %v17823_v14, 16 }
 0x403   : > { %v6476_v41 = vsel %vm14977_vm2, %v6471_v31, %v6475_v4  ;;  %v6504_v24 = vrot.slane %v6502_v46, 4  ;;  %v6494_v27 = vor.u32 %v6493_v55, %v6489_v6  ;;  %v6507_v12 = vrot.slane %v6505_v39, 5  ;;  %v17846_v46 = vld [vmem:[#allocation2 + $0xbc] sm:$0x1] }
 0x404   : > { %v11988_v26 = vcombine.low %v6466_v29, %v6476_v41  ;;  %v6485_v51 = vrot.slane %v6484_v10, 4  ;;  %v6513_v53 = vrot.slane %v6511_v21, 5  ;;  %v6517_v34 = vrot.slane %v6515_v11, 4 }
 0x405   : > { %v6521_v45 = vshll.u32 %v17827_v8, 16  ;;  %v6526_v33 = vshrl.u32 %v17832_v25, 16  ;;  %v6495_v28 = vrot.slane %v6494_v27, 4  ;;  %v6499_v56 = vrot.slane %v6497_v40, 5 }
 0x406   : > { %13302 = vmatprep.mubr.bf16.mxu0 %v11988_v26  ;;  %v6508_v36 = vor.u32 %v6507_v12, %v6504_v24  ;;  %v6529_v5 = vshll.u32 %v17832_v25, 16  ;;  %v6490_v31 = vsel %vm14977_vm2, %v6485_v51, %v6489_v6  ;;  %v6518_v4 = vor.u32 %v6517_v34, %v6513_v53 }
 0x407   : > { %v6528_v10 = vrot.slane %v6526_v33, 4  ;;  %v6535_v55 = vshll.u32 %v17839_v48, 16  ;;  %v6500_v39 = vsel %vm14977_vm2, %v6495_v28, %v6499_v56  ;;  %v6539_v41 = vshrl.u32 %v17839_v48, 16 }
 0x408   : > { %v6509_v21 = vrot.slane %v6508_v36, 4  ;;  %v6531_v29 = vrot.slane %v6529_v5, 5  ;;  %v11989_v40 = vcombine.low %v6490_v31, %v6500_v39  ;;  %v6519_v24 = vrot.slane %v6518_v4, 4  ;;  %v14663_v36 = vld [vmem:[#allocation2] sm:$0xf] }
 0x409   : > { %v6523_v11 = vrot.slane %v6521_v45, 5  ;;  %v6537_v26 = vrot.slane %v6535_v55, 5  ;;  %v6541_v12 = vrot.slane %v6539_v41, 4  ;;  %v6545_v6 = vshll.u32 %v17846_v46, 16  ;;  %v17857_v5 = vld [vmem:[#allocation2 + $0x4] sm:$0xf] }
 0x40a   : > { %v6532_v27 = vor.u32 %v6531_v29, %v6528_v10  ;;  %13303 = vmatmul.mubr.bf16.gmra.mrb[40].mxu0 %v11989_v40  ;;  %v6514_v51 = vsel %vm14977_vm2, %v6509_v21, %v6513_v53  ;;  %v12000_v45 = vcombine.low %v14663_v36, %v17857_v5  ;;  %v12005_v31 = vcombine.low %v17662_v62, %v17674_v17  ;;  %v17886_v36 = vld [vmem:[#allocation2 + $0x10] sm:$0xf] }
 0x40b   : > { %v6524_v34 = vsel %vm14977_vm2, %v6519_v24, %v6523_v11  ;;  %v6542_v56 = vor.u32 %v6541_v12, %v6537_v26  ;;  %v6547_v55 = vrot.slane %v6545_v6, 5  ;;  %v7150_v12 = vld [vmem:[#allocation2 + $0x54] sm:$0xe]  ;;  %v12003_v6 = vcombine.low %v17631_v30, %v17641_v59  ;;  %v7155_v21 = vld [vmem:[#allocation2 + $0x90] sm:$0xe] }
 0x40c   : > { %v11990_v33 = vcombine.low %v6514_v51, %v6524_v34  ;;  %v6533_v28 = vrot.slane %v6532_v27, 4  ;;  %v7148_v34 = vld [vmem:[#allocation2 + $0x3c] sm:$0xe]  ;;  %v7298_v4 = vrot.slane %v17839_v48, 5 }
 0x40d   : > { %v6543_v10 = vrot.slane %v6542_v56, 4  ;;  %v14665_v56 = vld [vmem:[#allocation2 + $0xc] sm:$0xf] }
 0x40e   : > { %13306 = vmatprep.mubr.bf16.mxu0 %v11990_v33  ;;  %v6538_v11 = vsel %vm14977_vm2, %v6533_v28, %v6537_v26  ;;  %v7149_v33 = vld [vmem:[#allocation2 + $0x48] sm:$0xe]  ;;  %v12001_v24 = vcombine.low %v14665_v56, %v17886_v36  ;;  %v14667_v26 = vld [vmem:[#allocation2 + $0x18] sm:$0xf]  ;;  %v7231_v56 = vrot.slane %v17689_v0, 5 }
 0x40f   : > { %v6548_v27 = vsel %vm14977_vm2, %v6543_v10, %v6547_v55  ;;  %v12002_v28 = vcombine.low %v14667_v26, %v17587_v23  ;;  %v14275_v10 = vld [vmem:[#allocation3 + $0x88] sm:$0xff]   ;;  %v7228_v55 = vrot.slane %v17674_v17, 5  ;;  %v12030_v40 = vrot.slane %v7149_v33, 9 }
 0x410   : > { %v11991_v51 = vcombine.low %v6538_v11, %v6548_v27  ;;  %v12029_v11 = vrot.slane %v7148_v34, 9  ;;  %v7235_v27 = vrot.slane %v17701_v7, 5  ;;  %v7238_v23 = vrot.slane %v17703_v58, 5  ;;  %v7151_v26 = vld [vmem:[#allocation2 + $0x60] sm:$0xe] }
 0x411   : > { %v7242_v34 = vrot.slane %v17715_v44, 5  ;;  %v7249_v33 = vrot.slane %v17733_v42, 5  ;;  %v12032_v29 = vrot.slane %v7151_v26, 9 }
 0x412   : > { %13307 = vmatmul.mubr.bf16.gmra.mrb[44].mxu0 %v11991_v51  ;;  %v7230_v51 = vrot.slane %v7228_v55, 4  ;;  %v17901_v30 = vsel %vm15307_vm5, %v12029_v11, %v7228_v55  ;;  %v7237_v59 = vrot.slane %v7235_v27, 4  ;;  %v17910_v58 = vsel %vm15307_vm5, %v12030_v40, %v7235_v27 }
 0x413   : > { %13326 = vmatprep.mubr.bf16.mxu0 %v12000_v45  ;;  %v12004_v45 = vcombine.low %v17643_v63, %v17655_v38  ;;  %v12031_v63 = vrot.slane %v7150_v12, 9  ;;  %v7244_v11 = vrot.slane %v7242_v34, 4  ;;  %v7252_v27 = vrot.slane %v17737_v1, 5 }
 0x414   : > { %v17906_v0 = vsel %vm15307_vm5, %v7230_v51, %v7231_v56  ;;  %v17918_v55 = vsel %vm15307_vm5, %v7237_v59, %v7238_v23  ;;  %v7153_v56 = vld [vmem:[#allocation2 + $0x78] sm:$0xe]  ;;  %v17933_v23 = vsel %vm15307_vm5, %v12032_v29, %v7249_v33  ;;  %v7256_v59 = vrot.slane %v17748_v54, 5  ;;  %v7154_v51 = vld [vmem:[#allocation2 + $0x84] sm:$0xe] }
 0x415   : > { %v17924_v40 = vsel %vm15307_vm5, %v12031_v63, %v7242_v34  ;;  %v14281_v63 = vld [vmem:[#allocation3 + $0x98] sm:$0xff]  }
 0x41a   : > { %13327 = vmatmul.mubr.bf16.vlgmr.msra.gmra.mrb[16].mxu0 %v12001_v24  ;;  %v14278_v24 = vld [vmem:[#allocation3 + $0x90] sm:$0xff]  }
 0x41b   : > { %13330 = vmatprep.mubr.bf16.mxu0 %v12002_v28  ;;  %13359 = vmatpush3.bf16.msra.mxu0 %v17691_v57  ;;  %v7245_v57 = vrot.slane %v17727_v47, 5  ;;  %v7152_v28 = vld [vmem:[#allocation2 + $0x6c] sm:$0xe]  ;;  %v7251_v47 = vrot.slane %v7249_v33, 4  ;;  %v7258_v33 = vrot.slane %v7256_v59, 4 }
 0x41c   : > { %13360 = vmatprep.subr.bf16.mxu0 %v14275_v10  ;;  %v12033_v26 = vrot.slane %v7152_v28, 9  ;;  %v12034_v28 = vrot.slane %v7153_v56, 9 }
 0x41d   : > { %v17929_v12 = vsel %vm15307_vm5, %v7244_v11, %v7245_v57  ;;  %v17940_v1 = vsel %vm15307_vm5, %v7251_v47, %v7252_v27  ;;  %v7263_v57 = vrot.slane %v17765_v20, 5  ;;  %v7266_v11 = vrot.slane %v17769_v18, 5 }
 0x41e   : > { %v17949_v34 = vsel %vm15307_vm5, %v12033_v26, %v7256_v59  ;;  %v12035_v47 = vrot.slane %v7154_v51, 9  ;;  %v7270_v27 = vrot.slane %v17775_v52, 5  ;;  %v7273_v18 = vrot.slane %v17782_v43, 5  ;;  %v14284_v26 = vld [vmem:[#allocation3 + $0xa0] sm:$0xff]  }
 0x41f   : > { %13361 = vmatpush3.bf16.msra.mxu0 %v14275_v10  ;;  %v7259_v10 = vrot.slane %v17752_v35, 5  ;;  %v7265_v39 = vrot.slane %v7263_v57, 4  ;;  %v17958_v56 = vsel %vm15307_vm5, %v12034_v28, %v7263_v57  ;;  %v12036_v59 = vrot.slane %v7155_v21, 9  ;;  %v7157_v28 = vld [vmem:[#allocation2 + $0xa8] sm:$0xe] }
 0x420   : > { %13362 = vmatprep.subr.bf16.mxu0 %v14278_v24  ;;  %v7280_v43 = vrot.slane %v17797_v60, 5  ;;  %v17973_v29 = vsel %vm15307_vm5, %v12035_v47, %v7270_v27  ;;  %v7284_v21 = vrot.slane %v17806_v9, 5  ;;  %v7158_v57 = vld [vmem:[#allocation2 + $0xb4] sm:$0xe] }
 0x421   : > { %v17954_v35 = vsel %vm15307_vm5, %v7258_v33, %v7259_v10  ;;  %v7156_v10 = vld [vmem:[#allocation2 + $0x9c] sm:$0xe] }
 0x422   : > { %13331 = vmatmul.mubr.bf16.gmra.mrb[20].mxu0 %v12003_v6  ;;  %v7277_v6 = vrot.slane %v17794_v49, 5  ;;  %v12037_v47 = vrot.slane %v7156_v10, 9 }
 0x423   : > { %13334 = vmatprep.mubr.bf16.mxu0 %v12004_v45  ;;  %13363 = vmatpush3.bf16.msra.mxu0 %v14278_v24  ;;  %v17966_v45 = vsel %vm15307_vm5, %v7265_v39, %v7266_v11  ;;  %v7272_v24 = vrot.slane %v7270_v27, 4  ;;  %v7291_v27 = vrot.slane %v17823_v14, 5  ;;  %v7294_v11 = vrot.slane %v17827_v8, 5 }
 0x424   : > { %13364 = vmatprep.subr.bf16.mxu0 %v14281_v63  ;;  %v7279_v33 = vrot.slane %v7277_v6, 4  ;;  %v17981_v39 = vsel %vm15307_vm5, %v12036_v59, %v7277_v6  ;;  %v7287_v59 = vrot.slane %v17811_v37, 5  ;;  %v18001_v10 = vsel %vm15307_vm5, %v12037_v47, %v7284_v21 }
 0x425   : > { %v17977_v51 = vsel %vm15307_vm5, %v7272_v24, %v7273_v18  ;;  %v14287_v18 = vld [vmem:[#allocation3 + $0xa8] sm:$0xff]   ;;  %v7286_v24 = vrot.slane %v7284_v21, 4  ;;  %v7293_v53 = vrot.slane %v7291_v27, 4  ;;  %v19597_v8 = vcombine.low %v17685_v61, %v17701_v7  ;;  %v14290_v21 = vld [vmem:[#allocation3 + $0xb0] sm:$0xff]  }
 0x426   : > { %v17988_v60 = vsel %vm15307_vm5, %v7279_v33, %v7280_v43  ;;  %v12039_v43 = vrot.slane %v7158_v57, 9  ;;  %v19600_v47 = vcombine.low %v17742_v13, %v17748_v54  ;;  %v19604_v54 = vcombine.low %v17799_v15, %v17806_v9  ;;  %v7144_v9 = vld [vmem:[#allocation2 + $0xc] sm:$0xe] }
 0x427   : > { %13365 = vmatpush3.bf16.msra.mxu0 %v14281_v63  ;;  %v12038_v63 = vrot.slane %v7157_v28, 9  ;;  %v18005_v33 = vsel %vm15307_vm5, %v7286_v24, %v7287_v59  ;;  %v18018_v17 = vsel %vm15307_vm5, %v7293_v53, %v7294_v11  ;;  %v7301_v28 = vrot.slane %v17846_v46, 5  ;;  %v14668_v59 = vld [vmem:[#allocation2 + $0x8] sm:$0x1] }
 0x428   : > { %13366 = vmatprep.subr.bf16.mxu0 %v14284_v26  ;;  %v18025_v61 = vsel %vm15307_vm5, %v12039_v43, %v7298_v4  ;;  %v19598_v46 = vcombine.low %v17705_v16, %v17715_v44  ;;  %v19599_v11 = vcombine.low %v17725_v22, %v17733_v42  ;;  %v19602_v16 = vcombine.low %v17771_v19, %v17775_v52  ;;  %v7143_v42 = vld [vmem:[#allocation2] sm:$0xe] }
 0x429   : > { %v18009_v37 = vsel %vm15307_vm5, %v12038_v63, %v7291_v27  ;;  %v19601_v27 = vcombine.low %v17760_v3, %v17765_v20  ;;  %v19603_v44 = vcombine.low %v17786_v50, %v17794_v49  ;;  %v7193_v22 = vrot.slane %v17857_v5, 5  ;;  %v14669_v50 = vld [vmem:[#allocation2 + $0x1c] sm:$0xf] }
 0x42a   : > { %13335 = vmatmul.mubr.bf16.gmra.mrb[24].mxu0 %v12005_v31  ;;  %v7300_v31 = vrot.slane %v7298_v4, 4  ;;  %v14294_v4 = vld [vmem:[#allocation3 + $0xc0] sm:$0xff]   ;;  %v7196_v13 = vrot.slane %v14668_v59, 5  ;;  %v19605_v3 = vcombine.low %v17813_v2, %v17823_v14  ;;  %v7200_v52 = vrot.slane %v17886_v36, 5  ;;  %v14670_v2 = vld [vmem:[#allocation2 + $0x14] sm:$0x1] }
 0x42b   : > { %13338 = vmatprep.mubr.bf16.mxu0 %v19597_v8  ;;  %13367 = vmatpush3.bf16.msra.mxu0 %v14284_v26  ;;  %v14293_v26 = vld [vmem:[#allocation3 + $0xb8] sm:$0xff]   ;;  %v7195_v24 = vrot.slane %v7193_v22, 4  ;;  %v7207_v49 = vrot.slane %v14669_v50, 5  ;;  %v19606_v15 = vcombine.low %v17832_v25, %v17839_v48  ;;  %v7203_v14 = vrot.slane %v14670_v2, 5  ;;  %v7145_v8 = vld [vmem:[#allocation2 + $0x18] sm:$0xe] }
 0x42c   : > { %13368 = vmatprep.subr.bf16.mxu0 %v14287_v18  ;;  %v18029_v7 = vsel %vm15307_vm5, %v7300_v31, %v7301_v28  ;;  %v7202_v63 = vrot.slane %v7200_v52, 4  ;;  %v14671_v31 = vld [vmem:[#allocation2 + $0x20] sm:$0x1]  ;;  %v7221_v25 = vrot.slane %v17655_v38, 5  ;;  %v14673_v59 = vld [vmem:[#allocation2 + $0x2c] sm:$0x1]  ;;  %v19622_v62 = vcombine.low %v17973_v29, %v17977_v51 }
 0x42d   : > { %v7197_v19 = vsel %vm15307_vm5, %v7195_v24, %v7196_v13  ;;  %v7209_v43 = vrot.slane %v7207_v49, 4  ;;  %v7210_v28 = vrot.slane %v14671_v31, 5  ;;  %v7217_v13 = vrot.slane %v14673_v59, 5  ;;  %v14674_v38 = vld [vmem:[#allocation2 + $0x38] sm:$0x1]  ;;  %v14299_v2 = vld [vmem:[#allocation3 + $0xe8] sm:$0xff]  }
 0x42e   : > { %v7204_v36 = vsel %vm15307_vm5, %v7202_v63, %v7203_v14  ;;  %v7223_v24 = vrot.slane %v7221_v25, 4  ;;  %v19607_v14 = vcombine.low %v17901_v30, %v17906_v0  ;;  %v14300_v31 = vld [vmem:[#allocation3 + $0xf0] sm:$0xff]   ;;  %v18097_v30 = vld [vmem:[#allocation2 + $0x40] sm:$0xf]  ;;  %v18118_v59 = vld [vmem:[#allocation2 + $0x64] sm:$0xf] }
 0x42f   : > { %13369 = vmatpush3.bf16.msra.mxu0 %v14287_v18  ;;  %v12024_v18 = vrot.slane %v7143_v42, 9  ;;  %v8776_v29 = vld [vmem:[#allocation2 + $0xb4] sm:$0xe] }
 0x430   : > { %13370 = vmatprep.subr.bf16.mxu0 %v14290_v21 }
 0x431   : > { %v7194_v20 = vsel %vm15307_vm5, %v12024_v18, %v7193_v22  ;;  %v7146_v18 = vld [vmem:[#allocation2 + $0x24] sm:$0xe] }
 0x432   : > { %13339 = vmatmul.mubr.bf16.gmra.mrb[28].mxu0 %v19598_v46  ;;  %v12040_v5 = vcombine.low %v7194_v20, %v7197_v19  ;;  %v14296_v20 = vld [vmem:[#allocation3 + $0xd0] sm:$0xff]   ;;  %v12027_v19 = vrot.slane %v7146_v18, 9 }
 0x433   : > { %13342 = vmatprep.mubr.bf16.mxu0 %v19599_v11  ;;  %13371 = vmatpush3.bf16.msra.mxu0 %v14290_v21  ;;  %v12025_v21 = vrot.slane %v7144_v9, 9  ;;  %v12026_v11 = vrot.slane %v7145_v8, 9  ;;  %v19608_v8 = vcombine.low %v17910_v58, %v17918_v55  ;;  %v19609_v58 = vcombine.low %v17924_v40, %v17929_v12  ;;  %v18103_v55 = vld [vmem:[#allocation2 + $0x44] sm:$0x1]  ;;  %v18113_v12 = vld [vmem:[#allocation2 + $0x50] sm:$0x1] }
 0x434   : > { %13372 = vmatprep.subr.bf16.mxu0 %v14293_v26  ;;  %v8767_v18 = vld [vmem:[#allocation2 + $0x48] sm:$0xe] }
 0x435   : > { %v7201_v48 = vsel %vm15307_vm5, %v12025_v21, %v7200_v52  ;;  %v18091_v21 = vld [vmem:[#allocation2 + $0x2c] sm:$0x1] }
 0x437   : > { %13373 = vmatpush3.bf16.msra.mxu0 %v14293_v26  ;;  %v14672_v26 = vld [vmem:[#allocation2 + $0x28] sm:$0xf] }
 0x438   : > { %13406 = vmatprep.subr.bf16.mxu0 %v14294_v4  ;;  %v7214_v46 = vrot.slane %v14672_v26, 5  ;;  %v18093_v26 = vld [vmem:[#allocation2 + $0x34] sm:$0xf] }
 0x439   : > { %v8849_v40 = vrot.slane %v18093_v26, 5 }
 0x43a   : > { %13343 = vmatmul.mubr.bf16.gmra.mrb[32].mxu0 %v19600_v47  ;;  %v7211_v47 = vsel %vm15307_vm5, %v7209_v43, %v7210_v28  ;;  %v7216_v42 = vrot.slane %v7214_v46, 4  ;;  %v14298_v43 = vld [vmem:[#allocation3 + $0xe0] sm:$0xff]   ;;  %v18089_v28 = vld [vmem:[#allocation2 + $0x28] sm:$0xf] }
 0x43b   : > { %13346 = vmatprep.mubr.bf16.mxu0 %v19601_v27  ;;  %v12041_v27 = vcombine.low %v7201_v48, %v7204_v36  ;;  %v14301_v36 = vld [vmem:[#allocation3 + $0xf8] sm:$0xff]   ;;  %v8842_v0 = vrot.slane %v18089_v28, 5  ;;  %v19610_v48 = vcombine.low %v17933_v23, %v17940_v1 }
 0x43c   : > { %v7218_v52 = vsel %vm15307_vm5, %v7216_v42, %v7217_v13  ;;  %v18111_v42 = vld [vmem:[#allocation3 + $0x100] sm:$0xff]  }
 0x442   : > { %13347 = vmatmul.mubr.bf16.gmra.mrb[36].mxu0 %v19602_v16  ;;  %v7208_v16 = vsel %vm15307_vm5, %v12026_v11, %v7207_v49  ;;  %v18095_v11 = vld [vmem:[#allocation2 + $0x38] sm:$0x1] }
 0x443   : > { %13350 = vmatprep.mubr.bf16.mxu0 %v19603_v44  ;;  %v14295_v44 = vld [vmem:[#allocation3 + $0xc8] sm:$0xff]   ;;  %v12042_v22 = vcombine.low %v7208_v16, %v7211_v47  ;;  %v18105_v47 = vld [vmem:[#allocation2 + $0x4c] sm:$0xf]  ;;  %v8844_v16 = vrot.slane %v8842_v0, 4 }
 0x44a   : > { %13351 = vmatmul.mubr.bf16.gmra.mrb[40].mxu0 %v19604_v54  ;;  %v7147_v54 = vld [vmem:[#allocation2 + $0x30] sm:$0xe] }
 0x44b   : > { %13354 = vmatprep.mubr.bf16.mxu0 %v19605_v3  ;;  %v7224_v3 = vrot.slane %v14674_v38, 5  ;;  %v12028_v50 = vrot.slane %v7147_v54, 9  ;;  %v8852_v54 = vrot.slane %v18095_v11, 5 }
 0x44d   : > { %v7225_v49 = vsel %vm15307_vm5, %v7223_v24, %v7224_v3  ;;  %v7222_v63 = vsel %vm15307_vm5, %v12028_v50, %v7221_v25  ;;  %v8765_v25 = vld [vmem:[#allocation2 + $0x30] sm:$0xe]  ;;  %v18116_v24 = vld [vmem:[#allocation2 + $0x58] sm:$0xf]  ;;  %v8851_v3 = vrot.slane %v8849_v40, 4 }
 0x44e   : > { %v12044_v9 = vcombine.low %v7222_v63, %v7225_v49  ;;  %v12115_v13 = vrot.slane %v8765_v25, 9  ;;  %v18132_v50 = vld [vmem:[#allocation2 + $0x5c] sm:$0x1]  ;;  %v8863_v63 = vrot.slane %v18105_v47, 5  ;;  %v18158_v25 = vld [vmem:[#allocation2 + $0x70] sm:$0xf] }
 0x450   : > { %v18136_v49 = vsel %vm15307_vm5, %v12115_v13, %v8849_v40  ;;  %v19613_v40 = vcombine.low %v17958_v56, %v17966_v45  ;;  %v8044_v56 = vld [vmem:[#allocation2 + $0x98] sm:$0x1] }
 0x452   : > { %13355 = vmatmul.mubr.bf16.gmra.mrb[44].mxu0 %v19606_v15  ;;  %v14297_v15 = vld [vmem:[#allocation3 + $0xd8] sm:$0xff]  }
 0x453   : > { %13374 = vmatprep.mubr.bf16.mxu0 %v12040_v5  ;;  %v7215_v5 = vsel %vm15307_vm5, %v12027_v19, %v7214_v46  ;;  %v8764_v46 = vld [vmem:[#allocation2 + $0x24] sm:$0xe]  ;;  %v8856_v19 = vrot.slane %v18097_v30, 5 }
 0x45a   : > { %13375 = vmatmul.mubr.bf16.vlgmr.msra.gmra.mrb[16].mxu0 %v12041_v27  ;;  %v12114_v27 = vrot.slane %v8764_v46, 9 }
 0x45b   : > { %13378 = vmatprep.mubr.bf16.mxu0 %v12042_v22  ;;  %13407 = vmatpush3.bf16.msra.mxu0 %v14294_v4  ;;  %v12043_v4 = vcombine.low %v7215_v5, %v7218_v52  ;;  %v8766_v22 = vld [vmem:[#allocation2 + $0x3c] sm:$0xe]  ;;  %v8768_v52 = vld [vmem:[#allocation2 + $0x54] sm:$0xe]  ;;  %v8859_v5 = vrot.slane %v18103_v55, 5 }
 0x45c   : > { %13408 = vmatprep.subr.bf16.mxu0 %v14295_v44  ;;  %v18122_v23 = vsel %vm15307_vm5, %v12114_v27, %v8842_v0  ;;  %v12118_v46 = vrot.slane %v8768_v52, 9  ;;  %v8870_v0 = vrot.slane %v18116_v24, 5 }
 0x45e   : > { %v8872_v13 = vrot.slane %v8870_v0, 4  ;;  %v18189_v45 = vsel %vm15307_vm5, %v12118_v46, %v8870_v0  ;;  %v8773_v46 = vld [vmem:[#allocation2 + $0x90] sm:$0xe] }
 0x45f   : > { %13409 = vmatpush3.bf16.msra.mxu0 %v14295_v44  ;;  %v8845_v44 = vrot.slane %v18091_v21, 5  ;;  %19615 = vst [vmem:[#allocation21_spill] sm:$0xff] %v18189_v45  ;;  %v8033_v45 = vld [vmem:[#allocation2 + $0x6c] sm:$0xf] }
 0x460   : > { %13410 = vmatprep.subr.bf16.mxu0 %v14296_v20 }
 0x461   : > { %v18126_v1 = vsel %vm15307_vm5, %v8844_v16, %v8845_v44  ;;  %v8873_v16 = vrot.slane %v18132_v50, 5  ;;  %v8877_v44 = vrot.slane %v18118_v59, 5 }
 0x462   : > { %13379 = vmatmul.mubr.bf16.gmra.mrb[20].mxu0 %v12043_v4  ;;  %v12117_v4 = vrot.slane %v8767_v18, 9 }
 0x463   : > { %13382 = vmatprep.mubr.bf16.mxu0 %v12044_v9  ;;  %13411 = vmatpush3.bf16.msra.mxu0 %v14296_v20  ;;  %v12116_v20 = vrot.slane %v8766_v22, 9  ;;  %v8770_v22 = vld [vmem:[#allocation2 + $0x6c] sm:$0xe]  ;;  %v8879_v52 = vrot.slane %v8877_v44, 4 }
 0x464   : > { %13412 = vmatprep.subr.bf16.mxu0 %v14297_v15  ;;  %v18166_v27 = vsel %vm15307_vm5, %v12117_v4, %v8863_v63  ;;  %v18192_v4 = vld [vmem:[#allocation2 + $0x88] sm:$0xf] }
 0x465   : > { %v18147_v9 = vsel %vm15307_vm5, %v12116_v20, %v8856_v19  ;;  %19612 = vst [vmem:[#allocation15_spill] sm:$0xff] %v18166_v27  ;;  %v18181_v20 = vld [vmem:[#allocation2 + $0x74] sm:$0x1]  ;;  %v8898_v38 = vrot.slane %v18192_v4, 5 }
 0x467   : > { %13413 = vmatpush3.bf16.msra.mxu0 %v14297_v15  ;;  %v18143_v15 = vsel %vm15307_vm5, %v8851_v3, %v8852_v54  ;;  %v8771_v3 = vld [vmem:[#allocation2 + $0x78] sm:$0xe] }
 0x468   : > { %13414 = vmatprep.subr.bf16.mxu0 %v14298_v43 }
 0x46a   : > { %13383 = vmatmul.mubr.bf16.gmra.mrb[24].mxu0 %v19607_v14  ;;  %v8769_v14 = vld [vmem:[#allocation2 + $0x60] sm:$0xe] }
 0x46b   : > { %13386 = vmatprep.mubr.bf16.mxu0 %v19608_v8  ;;  %13415 = vmatpush3.bf16.msra.mxu0 %v14298_v43  ;;  %v8858_v43 = vrot.slane %v8856_v19, 4  ;;  %v18150_v8 = vld [vmem:[#allocation2 + $0x68] sm:$0x1]  ;;  %v12119_v54 = vrot.slane %v8769_v14, 9  ;;  %v18183_v19 = vld [vmem:[#allocation2 + $0x80] sm:$0x1] }
 0x46c   : > { %13416 = vmatprep.subr.bf16.mxu0 %v14299_v2  ;;  %v12120_v14 = vrot.slane %v8770_v22, 9 }
 0x46f   : > { %13417 = vmatpush3.bf16.msra.mxu0 %v14299_v2  ;;  %v8866_v2 = vrot.slane %v18113_v12, 5 }
 0x470   : > { %13418 = vmatprep.subr.bf16.mxu0 %v14300_v31 }
 0x472   : > { %13387 = vmatmul.mubr.bf16.gmra.mrb[28].mxu0 %v19609_v58  ;;  %v19611_v58 = vcombine.low %v17949_v34, %v17954_v35  ;;  %v18173_v34 = vld [vmem:[#allocation2 + $0x7c] sm:$0xf]  ;;  %v8887_v35 = vrot.slane %v18181_v20, 5 }
 0x473   : > { %13390 = vmatprep.mubr.bf16.mxu0 %v19610_v48  ;;  %13419 = vmatpush3.bf16.msra.mxu0 %v14300_v31  ;;  %v18162_v48 = vsel %vm15307_vm5, %v8858_v43, %v8859_v5  ;;  %v8880_v5 = vrot.slane %v18150_v8, 5  ;;  %v18196_v43 = vsel %vm15307_vm5, %v8872_v13, %v8873_v16  ;;  %v8891_v16 = vrot.slane %v18173_v34, 5  ;;  %v8772_v13 = vld [vmem:[#allocation2 + $0x84] sm:$0xe]  ;;  %v18219_v31 = vld [vmem:[#allocation2 + $0xa0] sm:$0xf] }
 0x474   : > { %13420 = vmatprep.subr.bf16.mxu0 %v14301_v36  ;;  %19616 = vst [vmem:[#allocation22_spill] sm:$0xff] %v18196_v43  ;;  %v18246_v43 = vld [vmem:[#allocation2 + $0xb8] sm:$0xf] }
 0x475   : > { %v18209_v0 = vsel %vm15307_vm5, %v8879_v52, %v8880_v5  ;;  %v8893_v52 = vrot.slane %v8891_v16, 4  ;;  %v8894_v5 = vrot.slane %v18183_v19, 5 }
 0x476   : > { %19618 = vst [vmem:[#allocation13_spill] sm:$0xff] %v18209_v0  ;;  %v8900_v0 = vrot.slane %v8898_v38, 4 }
 0x477   : > { %13421 = vmatpush3.bf16.msra.mxu0 %v14301_v36  ;;  %v8865_v36 = vrot.slane %v8863_v63, 4  ;;  %v8041_v63 = vld [vmem:[#allocation2 + $0x8c] sm:$0x1]  ;;  %v18239_v6 = vsel %vm15307_vm5, %v8893_v52, %v8894_v5  ;;  %v8055_v5 = vld [vmem:[#allocation2 + $0xc4] sm:$0xf] }
 0x478   : > { %13454 = vmatprep.subr.bf16.mxu0 %v18111_v42  ;;  %v8901_v53 = vrot.slane %v8041_v63, 5  ;;  %19623 = vst [vmem:[#allocation25_spill] sm:$0xff] %v18239_v6  ;;  %v19624_v63 = vcombine.low %v17981_v39, %v17988_v60  ;;  %v8912_v60 = vrot.slane %v18219_v31, 5  ;;  %v8056_v6 = vld [vmem:[#allocation2 + $0xc8] sm:$0x1] }
 0x479   : > { %v18179_v18 = vsel %vm15307_vm5, %v8865_v36, %v8866_v2  ;;  %v18200_v2 = vsel %vm15307_vm5, %v12119_v54, %v8877_v44  ;;  %v8884_v36 = vrot.slane %v18158_v25, 5  ;;  %v8047_v44 = vld [vmem:[#allocation2 + $0xa4] sm:$0x1] }
 0x47a   : > { %13391 = vmatmul.mubr.bf16.gmra.mrb[32].mxu0 %v19611_v58  ;;  %19614 = vst [vmem:[#allocation20_spill] sm:$0xff] %v18179_v18  ;;  %19617 = vst [vmem:[#allocation17_spill] sm:$0xff] %v18200_v2  ;;  %v18203_v58 = vld [vmem:[#allocation2 + $0x94] sm:$0xf]  ;;  %v12123_v2 = vrot.slane %v8773_v46, 9  ;;  %v18254_v46 = vsel %vm15307_vm5, %v8900_v0, %v8901_v53  ;;  %v8914_v0 = vrot.slane %v8912_v60, 4  ;;  %v19633_v53 = vcombine.low %v18001_v10, %v18005_v33 }
 0x47b   : > { %13394 = vmatprep.mubr.bf16.mxu0 %v19613_v40  ;;  %v12121_v40 = vrot.slane %v8771_v3, 9  ;;  %v18216_v22 = vsel %vm15307_vm5, %v12120_v14, %v8884_v36  ;;  %v8886_v54 = vrot.slane %v8884_v36, 4  ;;  %v12122_v36 = vrot.slane %v8772_v13, 9  ;;  %v8050_v13 = vld [vmem:[#allocation2 + $0xb0] sm:$0x1]  ;;  %19626 = vst [vmem:[#allocation30_spill] sm:$0xff] %v18254_v46 }
 0x47c   : > { %19619 = vst [vmem:[#allocation28_spill] sm:$0xff] %v18216_v22  ;;  %v8905_v57 = vrot.slane %v18203_v58, 5  ;;  %v8926_v46 = vrot.slane %v18246_v43, 5 }
 0x47d   : > { %v18223_v3 = vsel %vm15307_vm5, %v12121_v40, %v8891_v16  ;;  %v18229_v14 = vsel %vm15307_vm5, %v8886_v54, %v8887_v35  ;;  %v8049_v40 = vld [vmem:[#allocation2 + $0xac] sm:$0xf]  ;;  %v8774_v35 = vld [vmem:[#allocation2 + $0x9c] sm:$0xe]  ;;  %v8775_v54 = vld [vmem:[#allocation2 + $0xa8] sm:$0xe]  ;;  %v18250_v52 = vsel %vm15307_vm5, %v12122_v36, %v8898_v38 }
 0x47e   : > { %19620 = vst [vmem:[#allocation26_spill] sm:$0xff] %v18223_v3  ;;  %19621 = vst [vmem:[#allocation24_spill] sm:$0xff] %v18229_v14  ;;  %v8907_v51 = vrot.slane %v8905_v57, 4  ;;  %v8053_v16 = vld [vmem:[#allocation2 + $0xbc] sm:$0x1]  ;;  %v18258_v39 = vsel %vm15307_vm5, %v12123_v2, %v8905_v57  ;;  %v12124_v38 = vrot.slane %v8774_v35, 9 }
 0x47f   : > { %19625 = vst [vmem:[#allocation35_spill] sm:$0xff] %v18250_v52  ;;  %19627 = vst [vmem:[#allocation38_spill] sm:$0xff] %v18258_v39  ;;  %v8919_v36 = vrot.slane %v8049_v40, 5  ;;  %v8915_v57 = vrot.slane %v8047_v44, 5  ;;  %v12125_v2 = vrot.slane %v8775_v54, 9  ;;  %v8933_v44 = vrot.slane %v8055_v5, 5 }
 0x480   : > { %v18271_v3 = vsel %vm15307_vm5, %v12124_v38, %v8912_v60  ;;  %v8929_v38 = vrot.slane %v8053_v16, 5  ;;  %v19634_v5 = vcombine.low %v18009_v37, %v18018_v17  ;;  %v14302_v17 = vld [vmem:[#allocation2 + $0xc] sm:$0xff]   ;;  %v14315_v52 = vld [vmem:[#allocation2 + $0x78] sm:$0xff]  }
 0x481   : > { %19629 = vst [vmem:[#allocation41_spill] sm:$0xff] %v18271_v3  ;;  %v8921_v14 = vrot.slane %v8919_v36, 4  ;;  %v18276_v40 = vsel %vm15307_vm5, %v8914_v0, %v8915_v57  ;;  %v18280_v35 = vsel %vm15307_vm5, %v12125_v2, %v8919_v36  ;;  %v8935_v57 = vrot.slane %v8933_v44, 4  ;;  %v14305_v2 = vld [vmem:[#allocation2 + $0x24] sm:$0xff]  }
 0x482   : > { %13395 = vmatmul.mubr.bf16.gmra.mrb[36].mxu0 %v19622_v62  ;;  %v8908_v62 = vrot.slane %v8044_v56, 5  ;;  %v8922_v56 = vrot.slane %v8050_v13, 5  ;;  %19630 = vst [vmem:[#allocation23_spill] sm:$0xff] %v18276_v40  ;;  %19631 = vst [vmem:[#allocation9_spill] sm:$0xff] %v18280_v35  ;;  %v8928_v13 = vrot.slane %v8926_v46, 4  ;;  %v8119_v40 = vshrl.u32 %v18089_v28, 16 }
 0x483   : > { %13398 = vmatprep.mubr.bf16.mxu0 %v19624_v63 }
 0x484   : > { %v18265_v63 = vsel %vm15307_vm5, %v8907_v51, %v8908_v62  ;;  %v8777_v51 = vld [vmem:[#allocation2 + $0xc0] sm:$0xe]  ;;  %v12126_v62 = vrot.slane %v8776_v29, 9  ;;  %v18286_v60 = vsel %vm15307_vm5, %v8921_v14, %v8922_v56  ;;  %v8936_v29 = vrot.slane %v8056_v6, 5  ;;  %v14303_v56 = vld [vmem:[#allocation2 + $0x18] sm:$0xff]  }
 0x485   : > { %19628 = vst [vmem:[#allocation32_spill] sm:$0xff] %v18265_v63  ;;  %19632 = vst [vmem:[#allocation18_spill] sm:$0xff] %v18286_v60  ;;  %v12127_v36 = vrot.slane %v8777_v51, 9  ;;  %v18302_v16 = vsel %vm15307_vm5, %v8928_v13, %v8929_v38  ;;  %v14310_v51 = vld [vmem:[#allocation3 + $0x110] sm:$0xff]  }
 0x486   : > { %v18298_v14 = vsel %vm15307_vm5, %v12126_v62, %v8926_v46  ;;  %19636 = vst [vmem:[#allocation60_spill] sm:$0xff] %v18302_v16  ;;  %v18312_v6 = vsel %vm15307_vm5, %v8935_v57, %v8936_v29  ;;  %v19639_v46 = vcombine.low %v18025_v61, %v18029_v7  ;;  %v8009_v62 = vld [vmem:[#allocation2 + $0xc] sm:$0xf]  ;;  %v8012_v29 = vld [vmem:[#allocation2 + $0x18] sm:$0xf]  ;;  %v14306_v61 = vld [vmem:[#allocation2 + $0x30] sm:$0xff]  }
 0x487   : > { %19635 = vst [vmem:[#allocation59_spill] sm:$0xff] %v18298_v14  ;;  %v18308_v33 = vsel %vm15307_vm5, %v12127_v36, %v8933_v44  ;;  %19638 = vst [vmem:[#allocation62_spill] sm:$0xff] %v18312_v6  ;;  %v8010_v44 = vld [vmem:[#allocation2 + $0x10] sm:$0xf]  ;;  %v8058_v13 = vshrl.u32 %v8009_v62, 16  ;;  %v8061_v38 = vshll.u32 %v8009_v62, 16 }
 0x488   : > { %19637 = vst [vmem:[#allocation61_spill] sm:$0xff] %v18308_v33  ;;  %v8067_v36 = vshll.u32 %v8010_v44, 16  ;;  %v8071_v57 = vshrl.u32 %v8010_v44, 16  ;;  %v14313_v7 = vld [vmem:[#allocation3 + $0x118] sm:$0xff]   ;;  %v8015_v33 = vld [vmem:[#allocation2 + $0x24] sm:$0xf] }
 0x489   : > { %v18320_v44 = vld [vmem:[#allocation2 + $0x14] sm:$0x1]  ;;  %v14309_v14 = vld [vmem:[#allocation2 + $0x48] sm:$0xff]  }
 0x48a   : > { %13399 = vmatmul.mubr.bf16.gmra.mrb[40].mxu0 %v19633_v53  ;;  %v14307_v53 = vld [vmem:[#allocation3 + $0x108] sm:$0xff]   ;;  %v8069_v37 = vrot.slane %v8067_v36, 5  ;;  %v8073_v10 = vrot.slane %v8071_v57, 4  ;;  %v8077_v36 = vshll.u32 %v18320_v44, 16 }
 0x48b   : > { %13402 = vmatprep.mubr.bf16.mxu0 %v19634_v5  ;;  %v14308_v5 = vld [vmem:[#allocation2 + $0x3c] sm:$0xff]  }
 0x48c   : > { %v18325_v57 = vld [vmem:[#allocation2 + $0x20] sm:$0x1] }
 0x492   : > { %13403 = vmatmul.mubr.bf16.gmra.mrb[44].mxu0 %v19639_v46  ;;  %v8082_v46 = vshrl.u32 %v8012_v29, 16 }
 0x493   : > { %13422 = vmatprep.mubr.bf16.mxu0 %v14302_v17  ;;  %v8013_v17 = vld [vmem:[#allocation2 + $0x1c] sm:$0xf] }
 0x494   : > { %v8091_v62 = vshll.u32 %v8013_v17, 16  ;;  %v8095_v0 = vshrl.u32 %v8013_v17, 16  ;;  %v8084_v54 = vrot.slane %v8082_v46, 4  ;;  %v8109_v17 = vshll.u32 %v8015_v33, 16 }
 0x496   : > { %v8111_v35 = vrot.slane %v8109_v17, 5 }
 0x49a   : > { %13423 = vmatmul.mubr.bf16.vlgmr.msra.gmra.mrb[16].mxu0 %v14303_v56  ;;  %v8085_v56 = vshll.u32 %v8012_v29, 16  ;;  %v14319_v29 = vld [vmem:[#allocation3 + $0x128] sm:$0xff]  }
 0x49b   : > { %13426 = vmatprep.mubr.bf16.mxu0 %v14305_v2  ;;  %13455 = vmatpush3.bf16.msra.mxu0 %v18111_v42  ;;  %v8060_v42 = vrot.slane %v8058_v13, 4  ;;  %v8063_v2 = vrot.slane %v8061_v38, 5  ;;  %v8097_v13 = vrot.slane %v8095_v0, 4  ;;  %v14311_v38 = vld [vmem:[#allocation2 + $0x54] sm:$0xff]   ;;  %v8115_v0 = vshll.u32 %v18089_v28, 16  ;;  %v14314_v28 = vld [vmem:[#allocation2 + $0x6c] sm:$0xff]  }
 0x49c   : > { %13456 = vmatprep.subr.bf16.mxu0 %v14307_v53  ;;  %v8087_v6 = vrot.slane %v8085_v56, 5 }
 0x49d   : > { %v8064_v16 = vor.u32 %v8063_v2, %v8060_v42  ;;  %v8101_v2 = vshll.u32 %v18325_v57, 16 }
 0x49e   : > { %v8088_v46 = vor.u32 %v8087_v6, %v8084_v54  ;;  %v8021_v6 = vld [vmem:[#allocation2 + $0x3c] sm:$0xf] }
 0x49f   : > { %13457 = vmatpush3.bf16.msra.mxu0 %v14307_v53  ;;  %v14316_v53 = vld [vmem:[#allocation3 + $0x120] sm:$0xff]  }
 0x4a0   : > { %13458 = vmatprep.subr.bf16.mxu0 %v14310_v51 }
 0x4a2   : > { %13427 = vmatmul.mubr.bf16.gmra.mrb[20].mxu0 %v14306_v61  ;;  %v8074_v61 = vor.u32 %v8073_v10, %v8069_v37  ;;  %v14322_v10 = vld [vmem:[#allocation3 + $0x130] sm:$0xff]  }
 0x4a3   : > { %13430 = vmatprep.mubr.bf16.mxu0 %v14308_v5  ;;  %13459 = vmatpush3.bf16.msra.mxu0 %v14310_v51  ;;  %v18322_v51 = vrot.slane %v8091_v62, 5  ;;  %v8106_v5 = vshrl.u32 %v8015_v33, 16  ;;  %v8079_v62 = vrot.slane %v8077_v36, 5  ;;  %v8089_v33 = vrot.slane %v8088_v46, 4 }
 0x4a4   : > { %13460 = vmatprep.subr.bf16.mxu0 %v14313_v7  ;;  %v8075_v56 = vrot.slane %v8074_v61, 4  ;;  %v14325_v61 = vld [vmem:[#allocation3 + $0x138] sm:$0xff]   ;;  %v18335_v36 = vrot.slane %v8115_v0, 5  ;;  %v8121_v46 = vrot.slane %v8119_v40, 4  ;;  %v8167_v40 = vshrl.u32 %v18097_v30, 16 }
 0x4a5   : > { %v8098_v42 = vor.u32 %v8097_v13, %v18322_v51  ;;  %v8108_v60 = vrot.slane %v8106_v5, 4  ;;  %v8125_v5 = vshll.u32 %v18091_v21, 16  ;;  %v8157_v21 = vshll.u32 %v8021_v6, 16 }
 0x4a6   : > { %v8169_v39 = vrot.slane %v8167_v40, 4 }
 0x4a7   : > { %13461 = vmatpush3.bf16.msra.mxu0 %v14313_v7  ;;  %v8065_v7 = vrot.slane %v8064_v16, 4  ;;  %v8080_v16 = vsel %vm14977_vm2, %v8075_v56, %v8079_v62  ;;  %v8099_v13 = vrot.slane %v8098_v42, 4  ;;  %v8112_v17 = vor.u32 %v8111_v35, %v8108_v60  ;;  %v8024_v60 = vld [vmem:[#allocation2 + $0x48] sm:$0xf]  ;;  %v18349_v62 = vld [vmem:[#allocation3 + $0x140] sm:$0xff]  }
 0x4a8   : > { %13462 = vmatprep.subr.bf16.mxu0 %v14316_v53  ;;  %v8139_v56 = vshll.u32 %v18093_v26, 16  ;;  %v8143_v42 = vshrl.u32 %v18093_v26, 16  ;;  %v8163_v35 = vshll.u32 %v18097_v30, 16  ;;  %v8191_v26 = vshrl.u32 %v18105_v47, 16  ;;  %v8027_v30 = vld [vmem:[#allocation2 + $0x54] sm:$0xf] }
 0x4a9   : > { %v8070_v54 = vsel %vm14977_vm2, %v8065_v7, %v8069_v37  ;;  %v8094_v7 = vsel %vm14977_vm2, %v8089_v33, %v18322_v51  ;;  %v18351_v51 = vrot.slane %v8125_v5, 5  ;;  %v8187_v33 = vshll.u32 %v18105_v47, 16 }
 0x4aa   : > { %13431 = vmatmul.mubr.bf16.gmra.mrb[24].mxu0 %v14309_v14  ;;  %v8018_v14 = vld [vmem:[#allocation2 + $0x30] sm:$0xf]  ;;  %v18338_v37 = vcombine.low %v8070_v54, %v8080_v16  ;;  %v8159_v5 = vrot.slane %v8157_v21, 5  ;;  %v18360_v63 = vrot.slane %v8163_v35, 5  ;;  %v8149_v35 = vshll.u32 %v18095_v11, 16 }
 0x4ab   : > { %13434 = vmatprep.mubr.bf16.mxu0 %v14311_v38  ;;  %13463 = vmatpush3.bf16.msra.mxu0 %v14316_v53  ;;  %v14312_v53 = vld [vmem:[#allocation2 + $0x60] sm:$0xff]   ;;  %v8103_v38 = vrot.slane %v8101_v2, 5  ;;  %v8133_v3 = vshll.u32 %v8018_v14, 16  ;;  %v8154_v2 = vshrl.u32 %v8021_v6, 16  ;;  %v18358_v6 = vrot.slane %v8139_v56, 5 }
 0x4ac   : > { %13464 = vmatprep.subr.bf16.mxu0 %v14319_v29  ;;  %v18363_v47 = vrot.slane %v8187_v33, 5  ;;  %v8030_v33 = vld [vmem:[#allocation2 + $0x60] sm:$0xf] }
 0x4ad   : > { %v8104_v0 = vsel %vm14977_vm2, %v8099_v13, %v8103_v38  ;;  %v8135_v16 = vrot.slane %v8133_v3, 5  ;;  %v8181_v13 = vshll.u32 %v8024_v60, 16  ;;  %v8156_v38 = vrot.slane %v8154_v2, 4 }
 0x4ae   : > { %v8205_v3 = vshll.u32 %v8027_v30, 16  ;;  %v18365_v56 = vcombine.low %v8094_v7, %v8104_v0  ;;  %v8215_v2 = vshrl.u32 %v18116_v24, 16  ;;  %v8170_v0 = vor.u32 %v8169_v39, %v18360_v63 }
 0x4af   : > { %13465 = vmatpush3.bf16.msra.mxu0 %v14319_v29  ;;  %v8130_v29 = vshrl.u32 %v8018_v14, 16  ;;  %v8122_v14 = vor.u32 %v8121_v46, %v18335_v36  ;;  %v8202_v46 = vshrl.u32 %v8027_v30, 16  ;;  %v8173_v30 = vshll.u32 %v18103_v55, 16 }
 0x4b0   : > { %13466 = vmatprep.subr.bf16.mxu0 %v14322_v10  ;;  %v8226_v11 = vshrl.u32 %v8030_v33, 16 }
 0x4b1   : > { %v8132_v54 = vrot.slane %v8130_v29, 4  ;;  %v14317_v29 = vld [vmem:[#allocation2 + $0x84] sm:$0xff]   ;;  %v8123_v21 = vrot.slane %v8122_v14, 4  ;;  %v8204_v22 = vrot.slane %v8202_v46, 4  ;;  %v8217_v14 = vrot.slane %v8215_v2, 4  ;;  %v14320_v2 = vld [vmem:[#allocation2 + $0x9c] sm:$0xff]  }
 0x4b2   : > { %13435 = vmatmul.mubr.bf16.gmra.mrb[28].mxu0 %v14312_v53  ;;  %v8145_v53 = vrot.slane %v8143_v42, 4  ;;  %v8211_v42 = vshll.u32 %v18116_v24, 16  ;;  %v8207_v24 = vrot.slane %v8205_v3, 5  ;;  %v8175_v46 = vrot.slane %v8173_v30, 5 }
 0x4b3   : > { %13438 = vmatprep.mubr.bf16.mxu0 %v14314_v28  ;;  %13467 = vmatpush3.bf16.msra.mxu0 %v14322_v10  ;;  %v18355_v10 = vrot.slane %v8112_v17, 4  ;;  %v8178_v28 = vshrl.u32 %v8024_v60, 16  ;;  %v8193_v17 = vrot.slane %v8191_v26, 4  ;;  %v8183_v60 = vrot.slane %v8181_v13, 5 }
 0x4b4   : > { %13468 = vmatprep.subr.bf16.mxu0 %v14325_v61  ;;  %v8136_v26 = vor.u32 %v8135_v16, %v8132_v54  ;;  %v8146_v7 = vor.u32 %v8145_v53, %v18358_v6  ;;  %v8235_v54 = vshll.u32 %v18118_v59, 16  ;;  %v8239_v16 = vshrl.u32 %v18118_v59, 16 }
 0x4b5   : > { %v8180_v40 = vrot.slane %v8178_v28, 4  ;;  %v8229_v28 = vshll.u32 %v8030_v33, 16  ;;  %v8128_v55 = vsel %vm14977_vm2, %v8123_v21, %v18351_v51  ;;  %v8151_v53 = vrot.slane %v8149_v35, 5 }
 0x4b6   : > { %v8147_v39 = vrot.slane %v8146_v7, 4  ;;  %v18387_v27 = vrot.slane %v8235_v54, 5  ;;  %v8241_v51 = vrot.slane %v8239_v16, 4  ;;  %v8250_v30 = vshrl.u32 %v8033_v45, 16 }
 0x4b7   : > { %13469 = vmatpush3.bf16.msra.mxu0 %v14325_v61  ;;  %v8118_v61 = vsel %vm14977_vm2, %v18355_v10, %v18335_v36  ;;  %v8160_v36 = vor.u32 %v8159_v5, %v8156_v38  ;;  %v8194_v10 = vor.u32 %v8193_v17, %v18363_v47  ;;  %v8184_v13 = vor.u32 %v8183_v60, %v8180_v40  ;;  %v14318_v5 = vld [vmem:[#allocation2 + $0x90] sm:$0xff]  }
 0x4b8   : > { %13502 = vmatprep.subr.bf16.mxu0 %v18349_v62  ;;  %v8171_v38 = vrot.slane %v8170_v0, 4  ;;  %v8137_v17 = vrot.slane %v8136_v26, 4  ;;  %v8228_v60 = vrot.slane %v8226_v11, 4  ;;  %v8231_v33 = vrot.slane %v8229_v28, 5  ;;  %v18415_v28 = vld [vmem:[#allocation2 + $0x78] sm:$0xf] }
 0x4b9   : > { %v8195_v3 = vrot.slane %v8194_v10, 4  ;;  %v8161_v40 = vrot.slane %v8160_v36, 4  ;;  %v8185_v59 = vrot.slane %v8184_v13, 4  ;;  %v18389_v21 = vcombine.low %v8118_v61, %v8128_v55  ;;  %v18426_v55 = vld [vmem:[#allocation2 + $0x20] sm:$0x1] }
 0x4ba   : > { %13439 = vmatmul.mubr.bf16.gmra.mrb[32].mxu0 %v14315_v52  ;;  %v18378_v52 = vrot.slane %v8211_v42, 5  ;;  %v8208_v42 = vor.u32 %v8207_v24, %v8204_v22  ;;  %v8152_v35 = vsel %vm14977_vm2, %v8147_v39, %v8151_v53  ;;  %v8176_v22 = vsel %vm14977_vm2, %v8171_v38, %v8175_v46  ;;  %19641 = vst [vmem:[#allocation64_spill] sm:$0xff] %v18426_v55  ;;  %v14321_v39 = vld [vmem:[#allocation2 + $0xa8] sm:$0xff]   ;;  %v14323_v46 = vld [vmem:[#allocation2 + $0xb4] sm:$0xff]  }
 0x4bb   : > { %13442 = vmatprep.mubr.bf16.mxu0 %v14317_v29  ;;  %v8197_v29 = vshll.u32 %v18113_v12, 16  ;;  %v8221_v26 = vshll.u32 %v18132_v50, 16  ;;  %v8253_v36 = vshll.u32 %v8033_v45, 16  ;;  %v8142_v61 = vsel %vm14977_vm2, %v8137_v17, %v18358_v6  ;;  %v18417_v6 = vld [vmem:[#allocation2 + $0x1c] sm:$0xf] }
 0x4bc   : > { %v8218_v12 = vor.u32 %v8217_v14, %v18378_v52  ;;  %v18398_v0 = vrot.slane %v8208_v42, 4  ;;  %v8232_v24 = vor.u32 %v8231_v33, %v8228_v60  ;;  %v8259_v14 = vshll.u32 %v18158_v25, 16  ;;  %19640 = vst [vmem:[#allocation63_spill] sm:$0xff] %v18417_v6  ;;  %v18437_v17 = vld [vmem:[#allocation2 + $0x28] sm:$0xf] }
 0x4bd   : > { %v8199_v18 = vrot.slane %v8197_v29, 5  ;;  %v18406_v11 = vcombine.low %v8142_v61, %v8152_v35  ;;  %v8166_v50 = vsel %vm14977_vm2, %v8161_v40, %v18360_v63  ;;  %v8242_v45 = vor.u32 %v8241_v51, %v18387_v27  ;;  %v10398_v63 = vld [vmem:[#allocation2 + $0x18] sm:$0xe]  ;;  %19642 = vst [vmem:[#allocation65_spill] sm:$0xff] %v18437_v17  ;;  %v18447_v40 = vld [vmem:[#allocation2 + $0x34] sm:$0xf] }
 0x4be   : > { %v18403_v10 = vrot.slane %v8218_v12, 4  ;;  %v18419_v13 = vcombine.low %v8166_v50, %v8176_v22  ;;  %v18423_v54 = vrot.slane %v8221_v26, 5  ;;  %v18432_v53 = vrot.slane %v8250_v30, 4  ;;  %19643 = vst [vmem:[#allocation66_spill] sm:$0xff] %v18447_v40  ;;  %v10399_v60 = vld [vmem:[#allocation2 + $0x24] sm:$0xe] }
 0x4bf   : > { %v8200_v7 = vsel %vm14977_vm2, %v8195_v3, %v8199_v18  ;;  %v8190_v18 = vsel %vm14977_vm2, %v8185_v59, %v18363_v47  ;;  %v18434_v38 = vrot.slane %v8253_v36, 5  ;;  %v18443_v42 = vrot.slane %v8232_v24, 4  ;;  %v18455_v35 = vld [vmem:[#allocation2 + $0x2c] sm:$0x1]  ;;  %v18457_v22 = vld [vmem:[#allocation2 + $0x38] sm:$0x1] }
 0x4c0   : > { %v18421_v29 = vcombine.low %v8190_v18, %v8200_v7  ;;  %v10464_v12 = vrot.slane %v18417_v6, 5  ;;  %v18450_v33 = vrot.slane %v8242_v45, 4  ;;  %v8274_v59 = vshrl.u32 %v18415_v28, 16  ;;  %19644 = vst [vmem:[#allocation67_spill] sm:$0xff] %v18455_v35  ;;  %19645 = vst [vmem:[#allocation68_spill] sm:$0xff] %v18457_v22  ;;  %v14324_v50 = vld [vmem:[#allocation2 + $0xc0] sm:$0xff]  }
 0x4c1   : > { %v18459_v26 = vld [vmem:[#allocation2 + $0x40] sm:$0xf]  ;;  %v12200_v7 = vrot.slane %v10398_v63, 9  ;;  %v10467_v36 = vrot.slane %v18426_v55, 5  ;;  %v10471_v61 = vrot.slane %v18437_v17, 5  ;;  %v12201_v18 = vrot.slane %v10399_v60, 9 }
 0x4c2   : > { %13443 = vmatmul.mubr.bf16.gmra.mrb[36].mxu0 %v14318_v5  ;;  %v8263_v5 = vshrl.u32 %v18158_v25, 16  ;;  %19646 = vst [vmem:[#allocation69_spill] sm:$0xff] %v18459_v26  ;;  %v10466_v30 = vrot.slane %v10464_v12, 4  ;;  %v10400_v45 = vld [vmem:[#allocation2 + $0x30] sm:$0xe]  ;;  %v10474_v16 = vrot.slane %v18455_v35, 5 }
 0x4c3   : > { %13446 = vmatprep.mubr.bf16.mxu0 %v14320_v2  ;;  %v18445_v2 = vrot.slane %v8259_v14, 5  ;;  %v10473_v25 = vrot.slane %v10471_v61, 4  ;;  %v10401_v47 = vld [vmem:[#allocation2 + $0x3c] sm:$0xe]  ;;  %v18482_v60 = vld [vmem:[#allocation2 + $0x44] sm:$0x1] }
 0x4c4   : > { %v18465_v14 = vrot.slane %v8263_v5, 4  ;;  %v18476_v63 = vsel %vm15307_vm5, %v10466_v30, %v10467_v36  ;;  %v18479_v5 = vrot.slane %v8274_v59, 4  ;;  %19650 = vst [vmem:[#allocation73_spill] sm:$0xff] %v18482_v60  ;;  %v18489_v30 = vsel %vm15307_vm5, %v12201_v18, %v10471_v61  ;;  %v10402_v3 = vld [vmem:[#allocation2 + $0x48] sm:$0xe] }
 0x4c5   : > { %19649 = vst [vmem:[#allocation72_spill] sm:$0xff] %v18476_v63  ;;  %19651 = vst [vmem:[#allocation74_spill] sm:$0xff] %v18489_v30  ;;  %v18493_v36 = vsel %vm15307_vm5, %v10473_v25, %v10474_v16  ;;  %v12202_v59 = vrot.slane %v10400_v45, 9  ;;  %v10485_v51 = vrot.slane %v18459_v26, 5  ;;  %v18496_v35 = vld [vmem:[#allocation2 + $0x58] sm:$0xf] }
 0x4c6   : > { %19652 = vst [vmem:[#allocation75_spill] sm:$0xff] %v18493_v36  ;;  %19653 = vst [vmem:[#allocation76_spill] sm:$0xff] %v18496_v35  ;;  %v18503_v18 = vld [vmem:[#allocation2 + $0x5c] sm:$0x1]  ;;  %v10488_v45 = vrot.slane %v18482_v60, 5  ;;  %v12204_v61 = vrot.slane %v10402_v3, 9 }
 0x4c7   : > { %19654 = vst [vmem:[#allocation77_spill] sm:$0xff] %v18503_v18  ;;  %v10487_v25 = vrot.slane %v10485_v51, 4  ;;  %v10403_v26 = vld [vmem:[#allocation2 + $0x54] sm:$0xe]  ;;  %v18510_v55 = vld [vmem:[#allocation2 + $0x64] sm:$0xf] }
 0x4c8   : > { %19656 = vst [vmem:[#allocation79_spill] sm:$0xff] %v18510_v55  ;;  %v18522_v30 = vld [vmem:[#allocation2 + $0x70] sm:$0xf]  ;;  %v9668_v17 = vld [vmem:[#allocation2 + $0x74] sm:$0x1] }
 0x4c9   : > { %19659 = vst [vmem:[#allocation82_spill] sm:$0xff] %v18522_v30  ;;  %v9676_v6 = vld [vmem:[#allocation2 + $0x94] sm:$0xf] }
 0x4ca   : > { %13447 = vmatmul.mubr.bf16.gmra.mrb[40].mxu0 %v14321_v39  ;;  %v18468_v39 = vld [vmem:[#allocation2 + $0x4c] sm:$0xf] }
 0x4cb   : > { %13450 = vmatprep.mubr.bf16.mxu0 %v14323_v46  ;;  %19647 = vst [vmem:[#allocation70_spill] sm:$0xff] %v18468_v39  ;;  %v18472_v46 = vsel %vm15307_vm5, %v12200_v7, %v10464_v12  ;;  %v10478_v12 = vrot.slane %v18447_v40, 5  ;;  %v9659_v7 = vld [vmem:[#allocation2 + $0x50] sm:$0x1]  ;;  %v12203_v40 = vrot.slane %v10401_v47, 9  ;;  %v10492_v36 = vrot.slane %v18468_v39, 5 }
 0x4cc   : > { %19648 = vst [vmem:[#allocation71_spill] sm:$0xff] %v18472_v46  ;;  %v10481_v46 = vrot.slane %v18457_v22, 5  ;;  %v12205_v39 = vrot.slane %v10403_v26, 9  ;;  %v10405_v22 = vld [vmem:[#allocation2 + $0x6c] sm:$0xe] }
 0x4cd   : > { %v10480_v63 = vrot.slane %v10478_v12, 4  ;;  %v18507_v16 = vsel %vm15307_vm5, %v12202_v59, %v10478_v12  ;;  %v18518_v47 = vsel %vm15307_vm5, %v12203_v40, %v10485_v51  ;;  %v10404_v12 = vld [vmem:[#allocation2 + $0x60] sm:$0xe]  ;;  %v9665_v59 = vld [vmem:[#allocation2 + $0x68] sm:$0x1]  ;;  %v10499_v40 = vrot.slane %v18496_v35, 5 }
 0x4ce   : > { %19655 = vst [vmem:[#allocation78_spill] sm:$0xff] %v18507_v16  ;;  %19658 = vst [vmem:[#allocation81_spill] sm:$0xff] %v18518_v47  ;;  %v9670_v51 = vld [vmem:[#allocation2 + $0x7c] sm:$0xf]  ;;  %v10494_v60 = vrot.slane %v10492_v36, 4  ;;  %v10509_v3 = vrot.slane %v9665_v59, 5 }
 0x4cf   : > { %v18514_v24 = vsel %vm15307_vm5, %v10480_v63, %v10481_v46  ;;  %v18528_v46 = vsel %vm15307_vm5, %v10487_v25, %v10488_v45  ;;  %v10495_v63 = vrot.slane %v9659_v7, 5  ;;  %v12206_v25 = vrot.slane %v10404_v12, 9  ;;  %v9671_v45 = vld [vmem:[#allocation2 + $0x80] sm:$0x1]  ;;  %v10406_v47 = vld [vmem:[#allocation2 + $0x78] sm:$0xe] }
 0x4d0   : > { %19657 = vst [vmem:[#allocation80_spill] sm:$0xff] %v18514_v24  ;;  %19660 = vst [vmem:[#allocation83_spill] sm:$0xff] %v18528_v46  ;;  %v10501_v24 = vrot.slane %v10499_v40, 4  ;;  %v10506_v7 = vrot.slane %v18510_v55, 5  ;;  %v18545_v26 = vsel %vm15307_vm5, %v12205_v39, %v10499_v40  ;;  %v10513_v46 = vrot.slane %v18522_v30, 5 }
 0x4d1   : > { %v18541_v16 = vsel %vm15307_vm5, %v10494_v60, %v10495_v63  ;;  %v12207_v60 = vrot.slane %v10405_v22, 9  ;;  %v14327_v63 = vld [vmem:[#allocation3 + $0x148] sm:$0xff]   ;;  %v10516_v30 = vrot.slane %v9668_v17, 5  ;;  %v12208_v22 = vrot.slane %v10406_v47, 9  ;;  %v9677_v39 = vld [vmem:[#allocation2 + $0x98] sm:$0x1] }
 0x4d2   : > { %13451 = vmatmul.mubr.bf16.gmra.mrb[44].mxu0 %v14324_v50  ;;  %v18536_v50 = vsel %vm15307_vm5, %v12204_v61, %v10492_v36  ;;  %19661 = vst [vmem:[#allocation84_spill] sm:$0xff] %v18541_v16  ;;  %v9674_v36 = vld [vmem:[#allocation2 + $0x8c] sm:$0x1]  ;;  %v10508_v55 = vrot.slane %v10506_v7, 4  ;;  %v18558_v59 = vsel %vm15307_vm5, %v12206_v25, %v10506_v7  ;;  %v10515_v40 = vrot.slane %v10513_v46, 4 }
 0x4d3   : > { %13470 = vmatprep.mubr.bf16.mxu0 %v18338_v37  ;;  %v10502_v37 = vrot.slane %v18503_v18, 5  ;;  %v9673_v18 = vld [vmem:[#allocation2 + $0x88] sm:$0xf]  ;;  %v10407_v35 = vld [vmem:[#allocation2 + $0x84] sm:$0xe] }
 0x4d4   : > { %v18562_v61 = vsel %vm15307_vm5, %v10508_v55, %v10509_v3  ;;  %v10408_v16 = vld [vmem:[#allocation2 + $0x90] sm:$0xe]  ;;  %v9679_v25 = vld [vmem:[#allocation2 + $0xa0] sm:$0xf]  ;;  %v18573_v7 = vsel %vm15307_vm5, %v10515_v40, %v10516_v30  ;;  %v10523_v55 = vrot.slane %v9671_v45, 5  ;;  %v10527_v3 = vrot.slane %v9673_v18, 5 }
 0x4d5   : > { %v18552_v12 = vsel %vm15307_vm5, %v10501_v24, %v10502_v37  ;;  %19663 = vst [vmem:[#allocation86_spill] sm:$0xff] %v18562_v61  ;;  %v18566_v24 = vsel %vm15307_vm5, %v12207_v60, %v10513_v46  ;;  %v10520_v37 = vrot.slane %v9670_v51, 5  ;;  %19665 = vst [vmem:[#allocation88_spill] sm:$0xff] %v18573_v7  ;;  %v10530_v51 = vrot.slane %v9674_v36, 5  ;;  %v10409_v60 = vld [vmem:[#allocation2 + $0x9c] sm:$0xe] }
 0x4d6   : > { %19662 = vst [vmem:[#allocation85_spill] sm:$0xff] %v18552_v12  ;;  %19664 = vst [vmem:[#allocation87_spill] sm:$0xff] %v18566_v24  ;;  %v14328_v12 = vld [vmem:[#allocation3 + $0x150] sm:$0xff]   ;;  %v9680_v17 = vld [vmem:[#allocation2 + $0xa4] sm:$0x1]  ;;  %v10529_v45 = vrot.slane %v10527_v3, 4 }
 0x4d7   : > { %v10522_v46 = vrot.slane %v10520_v37, 4  ;;  %v18581_v30 = vsel %vm15307_vm5, %v12208_v22, %v10520_v37  ;;  %v12210_v18 = vrot.slane %v10408_v16, 9  ;;  %v10534_v40 = vrot.slane %v9676_v6, 5  ;;  %v9683_v61 = vld [vmem:[#allocation2 + $0xb0] sm:$0x1] }
 0x4d8   : > { %19666 = vst [vmem:[#allocation89_spill] sm:$0xff] %v18581_v30  ;;  %v10537_v36 = vrot.slane %v9677_v39, 5  ;;  %v10541_v47 = vrot.slane %v9679_v25, 5  ;;  %v9685_v7 = vld [vmem:[#allocation2 + $0xb8] sm:$0xf]  ;;  %v18595_v16 = vsel %vm15307_vm5, %v10529_v45, %v10530_v51  ;;  %v12211_v37 = vrot.slane %v10409_v60, 9 }
 0x4d9   : > { %19668 = vst [vmem:[#allocation91_spill] sm:$0xff] %v18595_v16  ;;  %v10536_v6 = vrot.slane %v10534_v40, 4  ;;  %v10410_v24 = vld [vmem:[#allocation2 + $0xa8] sm:$0xe]  ;;  %v14329_v22 = vld [vmem:[#allocation3 + $0x158] sm:$0xff]   ;;  %v18605_v51 = vsel %vm15307_vm5, %v12210_v18, %v10534_v40  ;;  %v10555_v16 = vrot.slane %v9685_v7, 5 }
 0x4da   : > { %13471 = vmatmul.mubr.bf16.vlgmr.msra.gmra.mrb[16].mxu0 %v18365_v56  ;;  %v12209_v56 = vrot.slane %v10407_v35, 9  ;;  %v10543_v25 = vrot.slane %v10541_v47, 4  ;;  %v9688_v30 = vld [vmem:[#allocation2 + $0xc4] sm:$0xf]  ;;  %v18613_v60 = vsel %vm15307_vm5, %v12211_v37, %v10541_v47  ;;  %v12212_v39 = vrot.slane %v10410_v24, 9  ;;  %v14330_v7 = vld [vmem:[#allocation3 + $0x160] sm:$0xff]  }
 0x4db   : > { %13474 = vmatprep.mubr.bf16.mxu0 %v18389_v21  ;;  %13503 = vmatpush3.bf16.msra.mxu0 %v18349_v62  ;;  %v9682_v21 = vld [vmem:[#allocation2 + $0xac] sm:$0xf]  ;;  %v18585_v62 = vsel %vm15307_vm5, %v10522_v46, %v10523_v55  ;;  %v19669_v55 = vshll.u32 %v18173_v34, 16  ;;  %v10412_v18 = vld [vmem:[#allocation2 + $0xc0] sm:$0xe]  ;;  %v10551_v47 = vrot.slane %v9683_v61, 5 }
 0x4dc   : > { %13504 = vmatprep.subr.bf16.mxu0 %v14327_v63  ;;  %19667 = vst [vmem:[#allocation90_spill] sm:$0xff] %v18585_v62  ;;  %v18589_v35 = vsel %vm15307_vm5, %v12209_v56, %v10527_v3  ;;  %v10544_v3 = vrot.slane %v9680_v17, 5  ;;  %v10411_v56 = vld [vmem:[#allocation2 + $0xb4] sm:$0xe]  ;;  %v9686_v62 = vld [vmem:[#allocation2 + $0xbc] sm:$0x1] }
 0x4dd   : > { %v18599_v46 = vrot.slane %v19669_v55, 5  ;;  %v10548_v45 = vrot.slane %v9682_v21, 5  ;;  %v9689_v40 = vld [vmem:[#allocation2 + $0xc8] sm:$0x1]  ;;  %v12213_v37 = vrot.slane %v10411_v56, 9  ;;  %v19671_v21 = vshrl.u32 %v18173_v34, 16 }
 0x4de   : > { %v18619_v55 = vsel %vm15307_vm5, %v10543_v25, %v10544_v3  ;;  %v10557_v25 = vrot.slane %v10555_v16, 4  ;;  %v10558_v3 = vrot.slane %v9686_v62, 5  ;;  %v10562_v24 = vrot.slane %v9688_v30, 5  ;;  %v19740_v32 = vld [vmem:[#allocation84_spill] sm:$0xff] }
 0x4df   : > { %13505 = vmatpush3.bf16.msra.mxu0 %v14327_v63  ;;  %v18609_v63 = vsel %vm15307_vm5, %v10536_v6, %v10537_v36  ;;  %v12227_v36 = vcombine.low %v18613_v60, %v18619_v55  ;;  %v10550_v6 = vrot.slane %v10548_v45, 4  ;;  %v8289_v17 = vrot.slane %v19671_v21, 4 }
 0x4e0   : > { %13506 = vmatprep.subr.bf16.mxu0 %v14328_v12  ;;  %19670 = vst [vmem:[#allocation92_spill] sm:$0xff] %v18609_v63  ;;  %v8039_v63 = vld [vmem:[#allocation2 + $0x84] sm:$0xf]  ;;  %v12214_v34 = vrot.slane %v10412_v18, 9  ;;  %v18643_v30 = vsel %vm15307_vm5, %v10557_v25, %v10558_v3  ;;  %v10564_v62 = vrot.slane %v10562_v24, 4  ;;  %v10565_v56 = vrot.slane %v9689_v40, 5 }
 0x4e1   : > { %v18633_v61 = vsel %vm15307_vm5, %v10550_v6, %v10551_v47  ;;  %v8307_v6 = vshll.u32 %v18192_v4, 16  ;;  %v8311_v47 = vshrl.u32 %v18192_v4, 16  ;;  %v8298_v18 = vshrl.u32 %v8039_v63, 16 }
 0x4e2   : > { %13475 = vmatmul.mubr.bf16.gmra.mrb[20].mxu0 %v18406_v11  ;;  %v18629_v11 = vsel %vm15307_vm5, %v12212_v39, %v10548_v45  ;;  %v19672_v39 = vshll.u32 %v18415_v28, 16  ;;  %v18653_v21 = vsel %vm15307_vm5, %v12214_v34, %v10562_v24  ;;  %v18657_v40 = vsel %vm15307_vm5, %v10564_v62, %v10565_v56 }
 0x4e3   : > { %13478 = vmatprep.mubr.bf16.mxu0 %v18419_v13  ;;  %13507 = vmatpush3.bf16.msra.mxu0 %v14328_v12  ;;  %v18637_v13 = vsel %vm15307_vm5, %v12213_v37, %v10555_v16  ;;  %v12228_v12 = vcombine.low %v18629_v11, %v18633_v61  ;;  %v8301_v37 = vshll.u32 %v8039_v63, 16  ;;  %v19673_v28 = vor.u32 %v18434_v38, %v18432_v53  ;;  %v14331_v63 = vld [vmem:[#allocation3 + $0x168] sm:$0xff]  }
 0x4e4   : > { %13508 = vmatprep.subr.bf16.mxu0 %v14329_v22  ;;  %v8279_v45 = vrot.slane %v19672_v39, 5  ;;  %v12229_v16 = vcombine.low %v18637_v13, %v18643_v30  ;;  %v19674_v4 = vor.u32 %v18465_v14, %v18445_v2  ;;  %v12230_v24 = vcombine.low %v18653_v21, %v18657_v40 }
 0x4e5   : > { %v8257_v25 = vrot.slane %v19673_v28, 4  ;;  %v19675_v34 = vsel %vm14977_vm2, %v18403_v10, %v18423_v54  ;;  %v19676_v53 = vsel %vm14977_vm2, %v18398_v0, %v18378_v52  ;;  %v19677_v14 = vshll.u32 %v18150_v8, 16  ;;  %v8042_v10 = vld [vmem:[#allocation2 + $0x90] sm:$0xf] }
 0x4e6   : > { %v8267_v3 = vrot.slane %v19674_v4, 4  ;;  %v12094_v38 = vcombine.low %v19676_v53, %v19675_v34  ;;  %v8293_v39 = vshll.u32 %v18183_v19, 16  ;;  %v18684_v28 = vrot.slane %v8307_v6, 5 }
 0x4e7   : > { %13509 = vmatpush3.bf16.msra.mxu0 %v14329_v22  ;;  %v8290_v22 = vor.u32 %v8289_v17, %v18599_v46  ;;  %v8247_v62 = vrot.slane %v19677_v14, 5  ;;  %v19678_v17 = vshll.u32 %v18181_v20, 16  ;;  %v8313_v4 = vrot.slane %v8311_v47, 4  ;;  %v14332_v47 = vld [vmem:[#allocation3 + $0x170] sm:$0xff]  }
 0x4e8   : > { %13510 = vmatprep.subr.bf16.mxu0 %v14330_v7  ;;  %v8238_v52 = vsel %vm14977_vm2, %v18443_v42, %v18387_v27  ;;  %v8280_v8 = vor.u32 %v8279_v45, %v18479_v5  ;;  %v8300_v0 = vrot.slane %v8298_v18, 4  ;;  %v8303_v54 = vrot.slane %v8301_v37, 5  ;;  %v8045_v45 = vld [vmem:[#allocation2 + $0x9c] sm:$0xf] }
 0x4e9   : > { %v8271_v56 = vrot.slane %v19678_v17, 5  ;;  %v8248_v20 = vsel %vm14977_vm2, %v18450_v33, %v8247_v62  ;;  %v8262_v19 = vsel %vm14977_vm2, %v8257_v25, %v18445_v2  ;;  %v8291_v6 = vrot.slane %v8290_v22, 4  ;;  %v14333_v17 = vld [vmem:[#allocation3 + $0x178] sm:$0xff]  }
 0x4ea   : > { %13479 = vmatmul.mubr.bf16.gmra.mrb[24].mxu0 %v18421_v29  ;;  %v8322_v27 = vshrl.u32 %v8042_v10, 16  ;;  %v8325_v42 = vshll.u32 %v8042_v10, 16  ;;  %v8331_v5 = vshll.u32 %v18203_v58, 16  ;;  %v8295_v18 = vrot.slane %v8293_v39, 5 }
 0x4eb   : > { %13482 = vmatprep.mubr.bf16.mxu0 %v12094_v38  ;;  %13511 = vmatpush3.bf16.msra.mxu0 %v14330_v7  ;;  %v8272_v29 = vsel %vm14977_vm2, %v8267_v3, %v8271_v56  ;;  %v8335_v7 = vshrl.u32 %v18203_v58, 16  ;;  %v8314_v33 = vor.u32 %v8313_v4, %v18684_v28  ;;  %v8355_v37 = vshll.u32 %v18219_v31, 16  ;;  %v14675_v38 = vld [vmem:[#allocation2 + $0x8c] sm:$0x1] }
 0x4ec   : > { %13512 = vmatprep.subr.bf16.mxu0 %v14331_v63  ;;  %v8359_v2 = vshrl.u32 %v18219_v31, 16  ;;  %v12095_v25 = vcombine.low %v8238_v52, %v8248_v20  ;;  %v12096_v34 = vcombine.low %v8262_v19, %v8272_v29  ;;  %v8281_v3 = vrot.slane %v8280_v8, 4 }
 0x4ed   : > { %v8304_v22 = vor.u32 %v8303_v54, %v8300_v0  ;;  %v8296_v53 = vsel %vm14977_vm2, %v8291_v6, %v8295_v18  ;;  %v8317_v14 = vshll.u32 %v14675_v38, 16  ;;  %v8346_v62 = vshrl.u32 %v8045_v45, 16  ;;  %v8048_v6 = vld [vmem:[#allocation2 + $0xa8] sm:$0xf] }
 0x4ee   : > { %v8349_v58 = vshll.u32 %v8045_v45, 16  ;;  %v8324_v56 = vrot.slane %v8322_v27, 4  ;;  %v8327_v39 = vrot.slane %v8325_v42, 5  ;;  %v18706_v4 = vrot.slane %v8331_v5, 5  ;;  %v18713_v27 = vld [vmem:[#allocation3 + $0x180] sm:$0xff]  }
 0x4ef   : > { %13513 = vmatpush3.bf16.msra.mxu0 %v14331_v63  ;;  %v8337_v10 = vrot.slane %v8335_v7, 4  ;;  %v8315_v31 = vrot.slane %v8314_v33, 4  ;;  %v18708_v52 = vrot.slane %v8355_v37, 5  ;;  %v8361_v8 = vrot.slane %v8359_v2, 4  ;;  %v14676_v7 = vld [vmem:[#allocation2 + $0xac] sm:$0xf] }
 0x4f0   : > { %13514 = vmatprep.subr.bf16.mxu0 %v14332_v47  ;;  %v8286_v63 = vsel %vm14977_vm2, %v8281_v3, %v18599_v46  ;;  %v8305_v0 = vrot.slane %v8304_v22, 4  ;;  %v8319_v20 = vrot.slane %v8317_v14, 5  ;;  %v8348_v19 = vrot.slane %v8346_v62, 4  ;;  %v8051_v33 = vld [vmem:[#allocation2 + $0xb4] sm:$0xf] }
 0x4f1   : > { %v12097_v54 = vcombine.low %v8286_v63, %v8296_v53  ;;  %v8351_v29 = vrot.slane %v8349_v58, 5  ;;  %v8328_v42 = vor.u32 %v8327_v39, %v8324_v56  ;;  %v8338_v5 = vor.u32 %v8337_v10, %v18706_v4  ;;  %v14678_v14 = vld [vmem:[#allocation2 + $0xa4] sm:$0x1] }
 0x4f2   : > { %13483 = vmatmul.mubr.bf16.gmra.mrb[28].mxu0 %v12095_v25  ;;  %v8379_v45 = vshll.u32 %v14676_v7, 16  ;;  %v8383_v18 = vshrl.u32 %v14676_v7, 16  ;;  %v8320_v46 = vsel %vm14977_vm2, %v8315_v31, %v8319_v20  ;;  %v8403_v37 = vshll.u32 %v18246_v43, 16 }
 0x4f3   : > { %13486 = vmatprep.mubr.bf16.mxu0 %v12096_v34  ;;  %13515 = vmatpush3.bf16.msra.mxu0 %v14332_v47  ;;  %v8362_v47 = vor.u32 %v8361_v8, %v18708_v52  ;;  %v8407_v2 = vshrl.u32 %v18246_v43, 16  ;;  %v8310_v25 = vsel %vm14977_vm2, %v8305_v0, %v18684_v28  ;;  %v14677_v34 = vld [vmem:[#allocation2 + $0x98] sm:$0x1]  ;;  %v8370_v22 = vshrl.u32 %v8048_v6, 16 }
 0x4f4   : > { %13516 = vmatprep.subr.bf16.mxu0 %v14333_v17  ;;  %v8341_v3 = vshll.u32 %v14677_v34, 16  ;;  %v8373_v53 = vshll.u32 %v8048_v6, 16  ;;  %v8352_v38 = vor.u32 %v8351_v29, %v8348_v19  ;;  %v8365_v62 = vshll.u32 %v14678_v14, 16 }
 0x4f5   : > { %v8394_v58 = vshrl.u32 %v8051_v33, 16  ;;  %v8397_v56 = vshll.u32 %v8051_v33, 16  ;;  %v12098_v39 = vcombine.low %v8310_v25, %v8320_v46  ;;  %v8339_v10 = vrot.slane %v8338_v5, 4  ;;  %v8054_v33 = vld [vmem:[#allocation2 + $0xc0] sm:$0xf] }
 0x4f6   : > { %v8381_v31 = vrot.slane %v8379_v45, 5  ;;  %v8385_v43 = vrot.slane %v8383_v18, 4  ;;  %v8329_v8 = vrot.slane %v8328_v42, 4  ;;  %v8363_v63 = vrot.slane %v8362_v47, 4  ;;  %v14679_v45 = vld [vmem:[#allocation2 + $0xc4] sm:$0xf] }
 0x4f7   : > { %13517 = vmatpush3.bf16.msra.mxu0 %v14333_v17  ;;  %v8405_v28 = vrot.slane %v8403_v37, 5  ;;  %v8409_v0 = vrot.slane %v8407_v2, 4  ;;  %v8343_v20 = vrot.slane %v8341_v3, 5  ;;  %v8372_v6 = vrot.slane %v8370_v22, 4  ;;  %v14680_v25 = vld [vmem:[#allocation2 + $0xb0] sm:$0x1] }
 0x4f8   : > { %13550 = vmatprep.subr.bf16.mxu0 %v18713_v27  ;;  %v8375_v17 = vrot.slane %v8373_v53, 5  ;;  %v8353_v19 = vrot.slane %v8352_v38, 4  ;;  %v8367_v29 = vrot.slane %v8365_v62, 5  ;;  %v8396_v7 = vrot.slane %v8394_v58, 4  ;;  %v14681_v58 = vld [vmem:[#allocation2 + $0xbc] sm:$0x1] }
 0x4f9   : > { %v8399_v34 = vrot.slane %v8397_v56, 5  ;;  %v8344_v46 = vsel %vm14977_vm2, %v8339_v10, %v8343_v20  ;;  %v8386_v5 = vor.u32 %v8385_v43, %v8381_v31  ;;  %v8427_v18 = vshll.u32 %v14679_v45, 16 }
 0x4fa   : > { %13487 = vmatmul.mubr.bf16.gmra.mrb[32].mxu0 %v12097_v54  ;;  %v8431_v54 = vshrl.u32 %v14679_v45, 16  ;;  %v8334_v42 = vsel %vm14977_vm2, %v8329_v8, %v18706_v4  ;;  %v8368_v47 = vsel %vm14977_vm2, %v8363_v63, %v8367_v29  ;;  %v8410_v37 = vor.u32 %v8409_v0, %v8405_v28  ;;  %v14683_v45 = vld [vmem:[#allocation2 + $0xc8] sm:$0x1] }
 0x4fb   : > { %13490 = vmatprep.mubr.bf16.mxu0 %v12098_v39  ;;  %v8376_v2 = vor.u32 %v8375_v17, %v8372_v6  ;;  %v8389_v3 = vshll.u32 %v14680_v25, 16  ;;  %v8418_v22 = vshrl.u32 %v8054_v33, 16  ;;  %v8421_v53 = vshll.u32 %v8054_v33, 16 }
 0x4fc   : > { %v12099_v38 = vcombine.low %v8334_v42, %v8344_v46  ;;  %v8358_v14 = vsel %vm14977_vm2, %v8353_v19, %v18708_v52  ;;  %v8400_v62 = vor.u32 %v8399_v34, %v8396_v7  ;;  %v8413_v56 = vshll.u32 %v14681_v58, 16  ;;  %v14682_v7 = vld [vmem:[#allocation2 + $0x10] sm:$0xf] }
 0x4fd   : > { %v12100_v39 = vcombine.low %v8358_v14, %v8368_v47  ;;  %v8387_v10 = vrot.slane %v8386_v5, 4  ;;  %v8429_v4 = vrot.slane %v8427_v18, 5  ;;  %v8433_v43 = vrot.slane %v8431_v54, 4 }
 0x4fe   : > { %v8411_v8 = vrot.slane %v8410_v37, 4  ;;  %v8377_v63 = vrot.slane %v8376_v2, 4  ;;  %v8391_v0 = vrot.slane %v8389_v3, 5  ;;  %v8420_v20 = vrot.slane %v8418_v22, 4  ;;  %v8762_v22 = vld [vmem:[#allocation2 + $0xc] sm:$0xe] }
 0x4ff   : > { %v8423_v6 = vrot.slane %v8421_v53, 5  ;;  %v8401_v17 = vrot.slane %v8400_v62, 4  ;;  %v8415_v29 = vrot.slane %v8413_v56, 5  ;;  %v8434_v52 = vor.u32 %v8433_v43, %v8429_v4 }
 0x500   : > { %v8392_v33 = vsel %vm14977_vm2, %v8387_v10, %v8391_v0  ;;  %v8828_v34 = vrot.slane %v14682_v7, 5  ;;  %v8382_v46 = vsel %vm14977_vm2, %v8377_v63, %v8381_v31  ;;  %v8437_v18 = vshll.u32 %v14683_v45, 16 }
 0x501   : > { %v8416_v19 = vsel %vm14977_vm2, %v8411_v8, %v8415_v29  ;;  %v8424_v5 = vor.u32 %v8423_v6, %v8420_v20  ;;  %v12101_v54 = vcombine.low %v8382_v46, %v8392_v33  ;;  %v8406_v42 = vsel %vm14977_vm2, %v8401_v17, %v8405_v28  ;;  %v14336_v29 = vld [vmem:[#allocation3 + $0x190] sm:$0xff]   ;;  %v19686_v46 = vld [vmem:[#allocation22_spill] sm:$0xff] }
 0x502   : > { %13491 = vmatmul.mubr.bf16.gmra.mrb[36].mxu0 %v12099_v38  ;;  %v12102_v47 = vcombine.low %v8406_v42, %v8416_v19  ;;  %v8435_v37 = vrot.slane %v8434_v52, 4  ;;  %v8830_v2 = vrot.slane %v8828_v34, 4  ;;  %v8439_v3 = vrot.slane %v8437_v18, 5  ;;  %v14684_v38 = vld [vmem:[#allocation2 + $0x1c] sm:$0xf]  ;;  %v19691_v18 = vld [vmem:[#allocation28_spill] sm:$0xff] }
 0x503   : > { %13494 = vmatprep.mubr.bf16.mxu0 %v12100_v39  ;;  %v8425_v25 = vrot.slane %v8424_v5, 4  ;;  %v8831_v53 = vrot.slane %v18320_v44, 5  ;;  %v8835_v14 = vrot.slane %v14684_v38, 5  ;;  %v12112_v62 = vrot.slane %v8762_v22, 9  ;;  %v8763_v44 = vld [vmem:[#allocation2 + $0x18] sm:$0xe] }
 0x504   : > { %v8440_v31 = vsel %vm14977_vm2, %v8435_v37, %v8439_v3  ;;  %v8838_v8 = vrot.slane %v18325_v57, 5  ;;  %v12113_v63 = vrot.slane %v8763_v44, 9  ;;  %v19679_v17 = vcombine.low %v18122_v23, %v18126_v1  ;;  %v14337_v57 = vld [vmem:[#allocation3 + $0x198] sm:$0xff]   ;;  %v14338_v19 = vld [vmem:[#allocation3 + $0x1a0] sm:$0xff]   ;;  %v14339_v23 = vld [vmem:[#allocation3 + $0x1a8] sm:$0xff]  }
 0x505   : > { %v8832_v58 = vsel %vm15307_vm5, %v8830_v2, %v8831_v53  ;;  %v8430_v28 = vsel %vm14977_vm2, %v8425_v25, %v8429_v4  ;;  %v8829_v39 = vsel %vm15307_vm5, %v12112_v62, %v8828_v34  ;;  %v8837_v43 = vrot.slane %v8835_v14, 4  ;;  %v14335_v4 = vld [vmem:[#allocation3 + $0x188] sm:$0xff]   ;;  %v19682_v1 = vld [vmem:[#allocation15_spill] sm:$0xff]  ;;  %v19685_v34 = vld [vmem:[#allocation21_spill] sm:$0xff] }
 0x506   : > { %v12103_v56 = vcombine.low %v8430_v28, %v8440_v31  ;;  %v12128_v10 = vcombine.low %v8829_v39, %v8832_v58  ;;  %v8836_v20 = vsel %vm15307_vm5, %v12113_v63, %v8835_v14  ;;  %v19680_v33 = vcombine.low %v18136_v49, %v18143_v15  ;;  %v14340_v49 = vld [vmem:[#allocation3 + $0x1b0] sm:$0xff]   ;;  %v14341_v15 = vld [vmem:[#allocation3 + $0x1b8] sm:$0xff]   ;;  %v19694_v37 = vld [vmem:[#allocation26_spill] sm:$0xff] }
 0x507   : > { %v8839_v0 = vsel %vm15307_vm5, %v8837_v43, %v8838_v8  ;;  %v19681_v52 = vcombine.low %v18147_v9, %v18162_v48  ;;  %v19687_v5 = vcombine.low %v19685_v34, %v19686_v46  ;;  %v19688_v9 = vld [vmem:[#allocation17_spill] sm:$0xff]  ;;  %v19697_v3 = vld [vmem:[#allocation35_spill] sm:$0xff]  ;;  %v19698_v22 = vld [vmem:[#allocation30_spill] sm:$0xff] }
 0x508   : > { %v12129_v6 = vcombine.low %v8836_v20, %v8839_v0  ;;  %v19689_v48 = vld [vmem:[#allocation13_spill] sm:$0xff]  ;;  %v19699_v53 = vcombine.low %v19697_v3, %v19698_v22  ;;  %v19700_v31 = vld [vmem:[#allocation38_spill] sm:$0xff]  ;;  %v19701_v38 = vld [vmem:[#allocation32_spill] sm:$0xff] }
 0x509   : > { %v19690_v45 = vcombine.low %v19688_v9, %v19689_v48  ;;  %v19695_v2 = vld [vmem:[#allocation25_spill] sm:$0xff]  ;;  %v19702_v14 = vcombine.low %v19700_v31, %v19701_v38  ;;  %v19704_v58 = vld [vmem:[#allocation23_spill] sm:$0xff]  ;;  %v19707_v39 = vld [vmem:[#allocation18_spill] sm:$0xff] }
 0x50a   : > { %13495 = vmatmul.mubr.bf16.gmra.mrb[40].mxu0 %v12101_v54  ;;  %v19692_v54 = vld [vmem:[#allocation24_spill] sm:$0xff]  ;;  %v19696_v25 = vcombine.low %v19694_v37, %v19695_v2  ;;  %v19703_v62 = vld [vmem:[#allocation41_spill] sm:$0xff]  ;;  %v19709_v43 = vld [vmem:[#allocation59_spill] sm:$0xff] }
 0x50b   : > { %13498 = vmatprep.mubr.bf16.mxu0 %v12102_v47  ;;  %v19693_v42 = vcombine.low %v19691_v18, %v19692_v54  ;;  %v14344_v47 = vld [vmem:[#allocation3 + $0x1c0] sm:$0xff]   ;;  %v19705_v28 = vcombine.low %v19703_v62, %v19704_v58  ;;  %v19710_v44 = vld [vmem:[#allocation60_spill] sm:$0xff]  ;;  %v19713_v20 = vld [vmem:[#allocation62_spill] sm:$0xff] }
 0x50c   : > { %v19711_v8 = vcombine.low %v19709_v43, %v19710_v44  ;;  %v14342_v63 = vld [vmem:[#allocation2 + $0x18] sm:$0xff]   ;;  %v14362_v34 = vld [vmem:[#allocation3 + $0x1f0] sm:$0xff]   ;;  %v9648_v54 = vld [vmem:[#allocation2 + $0x24] sm:$0xf] }
 0x50d   : > { %v19712_v0 = vld [vmem:[#allocation61_spill] sm:$0xff]  ;;  %v14352_v46 = vld [vmem:[#allocation2 + $0x6c] sm:$0xff]   ;;  %v9718_v22 = vshrl.u32 %v9648_v54, 16 }
 0x50e   : > { %v9645_v9 = vld [vmem:[#allocation2 + $0x18] sm:$0xf]  ;;  %v19715_v48 = vld [vmem:[#allocation63_spill] sm:$0xff]  ;;  %v14357_v2 = vld [vmem:[#allocation2 + $0x90] sm:$0xff]  }
 0x50f   : > { %v9707_v18 = vshrl.u32 %v19715_v48, 16  ;;  %v9697_v37 = vshll.u32 %v9645_v9, 16  ;;  %v14358_v43 = vld [vmem:[#allocation2 + $0x9c] sm:$0xff]  }
 0x511   : > { %v9709_v3 = vrot.slane %v9707_v18, 4  ;;  %v9699_v38 = vrot.slane %v9697_v37, 5  ;;  %v19720_v37 = vld [vmem:[#allocation68_spill] sm:$0xff] }
 0x512   : > { %13499 = vmatmul.mubr.bf16.gmra.mrb[44].mxu0 %v12103_v56  ;;  %v19706_v56 = vld [vmem:[#allocation9_spill] sm:$0xff] }
 0x513   : > { %13518 = vmatprep.mubr.bf16.mxu0 %v12128_v10  ;;  %v19708_v10 = vcombine.low %v19706_v56, %v19707_v39 }
 0x51a   : > { %13519 = vmatmul.mubr.bf16.vlgmr.msra.gmra.mrb[16].mxu0 %v12129_v6  ;;  %v19714_v6 = vcombine.low %v19712_v0, %v19713_v20  ;;  %v14360_v0 = vld [vmem:[#allocation2 + $0xa8] sm:$0xff]  }
 0x51b   : > { %13522 = vmatprep.mubr.bf16.mxu0 %v19679_v17  ;;  %13551 = vmatpush3.bf16.msra.mxu0 %v18713_v27  ;;  %v19683_v27 = vld [vmem:[#allocation20_spill] sm:$0xff]  ;;  %v14347_v17 = vld [vmem:[#allocation3 + $0x1c8] sm:$0xff]  }
 0x51c   : > { %13552 = vmatprep.subr.bf16.mxu0 %v14335_v4  ;;  %v19684_v7 = vcombine.low %v19682_v1, %v19683_v27  ;;  %v14349_v1 = vld [vmem:[#allocation2 + $0x54] sm:$0xff]   ;;  %v14359_v27 = vld [vmem:[#allocation3 + $0x1e8] sm:$0xff]  }
 0x51f   : > { %13553 = vmatpush3.bf16.msra.mxu0 %v14335_v4  ;;  %v14343_v4 = vld [vmem:[#allocation2 + $0x24] sm:$0xff]  }
 0x520   : > { %13554 = vmatprep.subr.bf16.mxu0 %v14336_v29 }
 0x522   : > { %13523 = vmatmul.mubr.bf16.gmra.mrb[20].mxu0 %v19680_v33  ;;  %v14346_v33 = vld [vmem:[#allocation2 + $0x3c] sm:$0xff]  }
 0x523   : > { %13526 = vmatprep.mubr.bf16.mxu0 %v19681_v52  ;;  %13555 = vmatpush3.bf16.msra.mxu0 %v14336_v29  ;;  %v14345_v29 = vld [vmem:[#allocation2 + $0x30] sm:$0xff]  }
 0x524   : > { %13556 = vmatprep.subr.bf16.mxu0 %v14337_v57  ;;  %v14353_v52 = vld [vmem:[#allocation3 + $0x1d8] sm:$0xff]  }
 0x527   : > { %13557 = vmatpush3.bf16.msra.mxu0 %v14337_v57  ;;  %v14350_v57 = vld [vmem:[#allocation3 + $0x1d0] sm:$0xff]  }
 0x528   : > { %13558 = vmatprep.subr.bf16.mxu0 %v14338_v19 }
 0x52a   : > { %13527 = vmatmul.mubr.bf16.gmra.mrb[24].mxu0 %v19684_v7  ;;  %v14351_v7 = vld [vmem:[#allocation2 + $0x60] sm:$0xff]  }
 0x52b   : > { %13530 = vmatprep.mubr.bf16.mxu0 %v19687_v5  ;;  %13559 = vmatpush3.bf16.msra.mxu0 %v14338_v19  ;;  %v14348_v19 = vld [vmem:[#allocation2 + $0x48] sm:$0xff]   ;;  %v14365_v5 = vld [vmem:[#allocation3 + $0x1f8] sm:$0xff]  }
 0x52c   : > { %13560 = vmatprep.subr.bf16.mxu0 %v14339_v23 }
 0x52f   : > { %13561 = vmatpush3.bf16.msra.mxu0 %v14339_v23  ;;  %v14356_v23 = vld [vmem:[#allocation3 + $0x1e0] sm:$0xff]  }
 0x530   : > { %13562 = vmatprep.subr.bf16.mxu0 %v14340_v49 }
 0x532   : > { %13531 = vmatmul.mubr.bf16.gmra.mrb[28].mxu0 %v19690_v45  ;;  %v9703_v45 = vshll.u32 %v19715_v48, 16 }
 0x533   : > { %13534 = vmatprep.mubr.bf16.mxu0 %v19693_v42  ;;  %13563 = vmatpush3.bf16.msra.mxu0 %v14340_v49  ;;  %v14354_v49 = vld [vmem:[#allocation2 + $0x78] sm:$0xff]   ;;  %v14355_v42 = vld [vmem:[#allocation2 + $0x84] sm:$0xff]  }
 0x534   : > { %13564 = vmatprep.subr.bf16.mxu0 %v14341_v15 }
 0x537   : > { %13565 = vmatpush3.bf16.msra.mxu0 %v14341_v15  ;;  %v18800_v15 = vld [vmem:[#allocation3 + $0x200] sm:$0xff]  }
 0x538   : > { %13598 = vmatprep.subr.bf16.mxu0 %v14344_v47 }
 0x53a   : > { %13535 = vmatmul.mubr.bf16.gmra.mrb[32].mxu0 %v19696_v25  ;;  %v9705_v25 = vrot.slane %v9703_v45, 5 }
 0x53b   : > { %13538 = vmatprep.mubr.bf16.mxu0 %v19699_v53  ;;  %v9721_v53 = vshll.u32 %v9648_v54, 16  ;;  %v14361_v54 = vld [vmem:[#allocation2 + $0xb4] sm:$0xff]  }
 0x53c   : > { %v9710_v58 = vor.u32 %v9709_v3, %v9705_v25 }
 0x53d   : > { %v9723_v56 = vrot.slane %v9721_v53, 5 }
 0x542   : > { %13539 = vmatmul.mubr.bf16.gmra.mrb[36].mxu0 %v19702_v14  ;;  %v19716_v14 = vld [vmem:[#allocation65_spill] sm:$0xff] }
 0x543   : > { %13542 = vmatprep.mubr.bf16.mxu0 %v19705_v28  ;;  %v9727_v62 = vshll.u32 %v19716_v14, 16  ;;  %v9720_v28 = vrot.slane %v9718_v22, 4  ;;  %v9731_v39 = vshrl.u32 %v19716_v14, 16  ;;  %v14363_v22 = vld [vmem:[#allocation2 + $0xc0] sm:$0xff]  }
 0x545   : > { %v18808_v20 = vrot.slane %v9727_v62, 5 }
 0x54a   : > { %13543 = vmatmul.mubr.bf16.gmra.mrb[40].mxu0 %v19708_v10  ;;  %v9651_v10 = vld [vmem:[#allocation2 + $0x30] sm:$0xf] }
 0x54b   : > { %13546 = vmatprep.mubr.bf16.mxu0 %v19711_v8  ;;  %v19717_v8 = vld [vmem:[#allocation64_spill] sm:$0xff] }
 0x552   : > { %13547 = vmatmul.mubr.bf16.gmra.mrb[44].mxu0 %v19714_v6  ;;  %v9742_v6 = vshrl.u32 %v9651_v10, 16 }
 0x553   : > { %13566 = vmatprep.mubr.bf16.mxu0 %v14342_v63  ;;  %v9713_v63 = vshll.u32 %v19717_v8, 16 }
 0x55a   : > { %13567 = vmatmul.mubr.bf16.vlgmr.msra.gmra.mrb[16].mxu0 %v14343_v4  ;;  %v9711_v4 = vrot.slane %v9710_v58, 4  ;;  %v9657_v58 = vld [vmem:[#allocation2 + $0x48] sm:$0xf] }
 0x55b   : > { %13570 = vmatprep.mubr.bf16.mxu0 %v14345_v29  ;;  %13599 = vmatpush3.bf16.msra.mxu0 %v14344_v47  ;;  %v9694_v47 = vshrl.u32 %v9645_v9, 16  ;;  %v9733_v29 = vrot.slane %v9731_v39, 4  ;;  %v19722_v39 = vld [vmem:[#allocation70_spill] sm:$0xff] }
 0x55c   : > { %13600 = vmatprep.subr.bf16.mxu0 %v14347_v17 }
 0x55d   : > { %v9696_v31 = vrot.slane %v9694_v47, 4  ;;  %v9734_v9 = vor.u32 %v9733_v29, %v18808_v20  ;;  %v19723_v29 = vld [vmem:[#allocation76_spill] sm:$0xff] }
 0x55f   : > { %13601 = vmatpush3.bf16.msra.mxu0 %v14347_v17  ;;  %v9700_v44 = vor.u32 %v9699_v38, %v9696_v31  ;;  %v9724_v17 = vor.u32 %v9723_v56, %v9720_v28  ;;  %v19721_v38 = vld [vmem:[#allocation69_spill] sm:$0xff] }
 0x560   : > { %13602 = vmatprep.subr.bf16.mxu0 %v14350_v57  ;;  %v9775_v14 = vshll.u32 %v19721_v38, 16  ;;  %v9779_v62 = vshrl.u32 %v19721_v38, 16 }
 0x562   : > { %13571 = vmatmul.mubr.bf16.gmra.mrb[20].mxu0 %v14346_v33  ;;  %v19718_v33 = vld [vmem:[#allocation66_spill] sm:$0xff] }
 0x563   : > { %13574 = vmatprep.mubr.bf16.mxu0 %v14348_v19  ;;  %13603 = vmatpush3.bf16.msra.mxu0 %v14350_v57  ;;  %v9745_v57 = vshll.u32 %v9651_v10, 16  ;;  %v9755_v19 = vshrl.u32 %v19718_v33, 16  ;;  %v9799_v10 = vshll.u32 %v19722_v39, 16 }
 0x564   : > { %13604 = vmatprep.subr.bf16.mxu0 %v14353_v52 }
 0x565   : > { %v9747_v48 = vrot.slane %v9745_v57, 5  ;;  %v9757_v18 = vrot.slane %v9755_v19, 4  ;;  %v9823_v57 = vshll.u32 %v19723_v29, 16 }
 0x567   : > { %13605 = vmatpush3.bf16.msra.mxu0 %v14353_v52  ;;  %v9751_v52 = vshll.u32 %v19718_v33, 16  ;;  %v9827_v33 = vshrl.u32 %v19723_v29, 16 }
 0x568   : > { %13606 = vmatprep.subr.bf16.mxu0 %v14356_v23 }
 0x569   : > { %v18818_v45 = vrot.slane %v9751_v52, 5 }
 0x56a   : > { %13575 = vmatmul.mubr.bf16.gmra.mrb[24].mxu0 %v14349_v1  ;;  %v9715_v1 = vrot.slane %v9713_v63, 5  ;;  %v9803_v63 = vshrl.u32 %v19722_v39, 16 }
 0x56b   : > { %13578 = vmatprep.mubr.bf16.mxu0 %v14351_v7  ;;  %13607 = vmatpush3.bf16.msra.mxu0 %v14356_v23  ;;  %v9701_v23 = vrot.slane %v9700_v44, 4  ;;  %v18834_v44 = vld [vmem:[#allocation2 + $0xd4] sm:$0x1]  ;;  %v9758_v8 = vor.u32 %v9757_v18, %v18818_v45 }
 0x56c   : > { %13608 = vmatprep.subr.bf16.mxu0 %v14359_v27 }
 0x56f   : > { %13609 = vmatpush3.bf16.msra.mxu0 %v14359_v27  ;;  %v19719_v27 = vld [vmem:[#allocation67_spill] sm:$0xff] }
 0x570   : > { %13610 = vmatprep.subr.bf16.mxu0 %v14362_v34  ;;  %v9737_v7 = vshll.u32 %v19719_v27, 16 }
 0x572   : > { %13579 = vmatmul.mubr.bf16.gmra.mrb[28].mxu0 %v14352_v46  ;;  %v9654_v46 = vld [vmem:[#allocation2 + $0x3c] sm:$0xf]  ;;  %v18822_v47 = vrot.slane %v9737_v7, 5  ;;  %v14364_v7 = vld [vmem:[#allocation2 + $0xcc] sm:$0xff]  }
 0x573   : > { %13582 = vmatprep.mubr.bf16.mxu0 %v14354_v49  ;;  %13611 = vmatpush3.bf16.msra.mxu0 %v14362_v34  ;;  %v9744_v34 = vrot.slane %v9742_v6, 4  ;;  %v18815_v49 = vrot.slane %v9724_v17, 4  ;;  %v9766_v3 = vshrl.u32 %v9654_v46, 16  ;;  %v9769_v31 = vshll.u32 %v9654_v46, 16 }
 0x574   : > { %13612 = vmatprep.subr.bf16.mxu0 %v14365_v5  ;;  %v9793_v46 = vshll.u32 %v9657_v58, 16 }
 0x575   : > { %v9730_v28 = vsel %vm14977_vm2, %v18815_v49, %v18808_v20  ;;  %v9748_v56 = vor.u32 %v9747_v48, %v9744_v34  ;;  %v9768_v17 = vrot.slane %v9766_v3, 4  ;;  %v9660_v20 = vld [vmem:[#allocation2 + $0x54] sm:$0xf]  ;;  %v9771_v19 = vrot.slane %v9769_v31, 5 }
 0x576   : > { %v9790_v34 = vshrl.u32 %v9657_v58, 16  ;;  %v9814_v48 = vshrl.u32 %v9660_v20, 16  ;;  %v9817_v18 = vshll.u32 %v9660_v20, 16  ;;  %v9829_v3 = vrot.slane %v9827_v33, 4  ;;  %v19724_v58 = vld [vmem:[#allocation73_spill] sm:$0xff] }
 0x577   : > { %13613 = vmatpush3.bf16.msra.mxu0 %v14365_v5  ;;  %v9716_v5 = vsel %vm14977_vm2, %v9711_v4, %v9715_v1  ;;  %v10572_v4 = vrot.slane %v18834_v44, 5  ;;  %v9781_v1 = vrot.slane %v9779_v62, 4  ;;  %v9759_v62 = vrot.slane %v9758_v8, 4  ;;  %v14685_v33 = vld [vmem:[#allocation2 + $0x50] sm:$0x1] }
 0x578   : > { %13646 = vmatprep.subr.bf16.mxu0 %v18800_v15  ;;  %v9785_v39 = vshll.u32 %v19724_v58, 16  ;;  %v9772_v41 = vor.u32 %v9771_v19, %v9768_v17 }
 0x57a   : > { %13583 = vmatmul.mubr.bf16.gmra.mrb[32].mxu0 %v14355_v42  ;;  %v9706_v42 = vsel %vm14977_vm2, %v9701_v23, %v9705_v25  ;;  %v9735_v25 = vrot.slane %v9734_v9, 4  ;;  %v18842_v23 = vrot.slane %v9775_v14, 5  ;;  %v9805_v9 = vrot.slane %v9803_v63, 4 }
 0x57b   : > { %13586 = vmatprep.mubr.bf16.mxu0 %v14357_v2  ;;  %v9761_v2 = vshll.u32 %v19720_v37, 16  ;;  %v12176_v53 = vcombine.low %v9706_v42, %v9716_v5  ;;  %v18844_v5 = vrot.slane %v9799_v10, 5  ;;  %v18854_v37 = vrot.slane %v9823_v57, 5 }
 0x57c   : > { %v9740_v38 = vsel %vm14977_vm2, %v9735_v25, %v18822_v47  ;;  %v9749_v14 = vrot.slane %v9748_v56, 4  ;;  %v9782_v10 = vor.u32 %v9781_v1, %v18842_v23  ;;  %v9795_v63 = vrot.slane %v9793_v46, 5  ;;  %v19725_v47 = vld [vmem:[#allocation79_spill] sm:$0xff] }
 0x57d   : > { %v9763_v42 = vrot.slane %v9761_v2, 5  ;;  %v9792_v2 = vrot.slane %v9790_v34, 4  ;;  %v9830_v29 = vor.u32 %v9829_v3, %v18854_v37  ;;  %v9847_v25 = vshll.u32 %v19725_v47, 16  ;;  %v9666_v3 = vld [vmem:[#allocation2 + $0x6c] sm:$0xf] }
 0x57e   : > { %v9851_v56 = vshrl.u32 %v19725_v47, 16  ;;  %v12177_v8 = vcombine.low %v9730_v28, %v9740_v38  ;;  %v9754_v17 = vsel %vm14977_vm2, %v9749_v14, %v18818_v45  ;;  %v9773_v19 = vrot.slane %v9772_v41, 4  ;;  %v14367_v28 = vld [vmem:[#allocation3 + $0x208] sm:$0xff]  }
 0x57f   : > { %v9783_v1 = vrot.slane %v9782_v10, 4  ;;  %v9796_v46 = vor.u32 %v9795_v63, %v9792_v2  ;;  %v18873_v58 = vrot.slane %v9847_v25, 5  ;;  %v9862_v2 = vshrl.u32 %v9666_v3, 16 }
 0x580   : > { %v9853_v45 = vrot.slane %v9851_v56, 4  ;;  %v9865_v63 = vshll.u32 %v9666_v3, 16 }
 0x582   : > { %13587 = vmatmul.mubr.bf16.gmra.mrb[36].mxu0 %v14358_v43  ;;  %v18832_v43 = vld [vmem:[#allocation2 + $0xd0] sm:$0xf]  ;;  %v9854_v56 = vor.u32 %v9853_v45, %v18873_v58 }
 0x583   : > { %13590 = vmatprep.mubr.bf16.mxu0 %v14360_v0  ;;  %v10413_v0 = vld [vmem:[#allocation2 + $0xcc] sm:$0xe]  ;;  %v10569_v6 = vrot.slane %v18832_v43, 5  ;;  %v14369_v45 = vld [vmem:[#allocation3 + $0x218] sm:$0xff]  }
 0x584   : > { %v12215_v52 = vrot.slane %v10413_v0, 9  ;;  %v9806_v0 = vor.u32 %v9805_v9, %v18844_v5 }
 0x585   : > { %v10571_v27 = vrot.slane %v10569_v6, 4 }
 0x586   : > { %v18848_v49 = vsel %vm15307_vm5, %v12215_v52, %v10569_v6  ;;  %v9816_v6 = vrot.slane %v9814_v48, 4  ;;  %v9809_v52 = vshll.u32 %v14685_v33, 16  ;;  %v9807_v9 = vrot.slane %v9806_v0, 4  ;;  %v9669_v0 = vld [vmem:[#allocation2 + $0x78] sm:$0xf] }
 0x587   : > { %v9886_v33 = vshrl.u32 %v9669_v0, 16 }
 0x58a   : > { %13591 = vmatmul.mubr.bf16.gmra.mrb[40].mxu0 %v14361_v54  ;;  %v18852_v54 = vsel %vm15307_vm5, %v10571_v27, %v10572_v4  ;;  %v9819_v4 = vrot.slane %v9817_v18, 5  ;;  %v9787_v27 = vrot.slane %v9785_v39, 5  ;;  %v9778_v39 = vsel %vm14977_vm2, %v9773_v19, %v18842_v23  ;;  %v14368_v23 = vld [vmem:[#allocation3 + $0x210] sm:$0xff]  }
 0x58b   : > { %13594 = vmatprep.mubr.bf16.mxu0 %v14363_v22  ;;  %v9663_v22 = vld [vmem:[#allocation2 + $0x60] sm:$0xf]  ;;  %v12231_v31 = vcombine.low %v18848_v49, %v18852_v54  ;;  %v9864_v19 = vrot.slane %v9862_v2, 4 }
 0x58c   : > { %v9838_v20 = vshrl.u32 %v9663_v22, 16  ;;  %v9841_v57 = vshll.u32 %v9663_v22, 16  ;;  %v9820_v48 = vor.u32 %v9819_v4, %v9816_v6  ;;  %v9831_v22 = vrot.slane %v9830_v29, 4 }
 0x58d   : > { %v9788_v6 = vsel %vm14977_vm2, %v9783_v1, %v9787_v27  ;;  %v9797_v4 = vrot.slane %v9796_v46, 4  ;;  %v9867_v1 = vrot.slane %v9865_v63, 5  ;;  %v14687_v27 = vld [vmem:[#allocation2 + $0x7c] sm:$0xf] }
 0x58e   : > { %v9840_v18 = vrot.slane %v9838_v20, 4  ;;  %v9843_v38 = vrot.slane %v9841_v57, 5  ;;  %v9821_v29 = vrot.slane %v9820_v48, 4  ;;  %v12179_v46 = vcombine.low %v9778_v39, %v9788_v6  ;;  %v9675_v39 = vld [vmem:[#allocation2 + $0x90] sm:$0xf] }
 0x58f   : > { %v14689_v6 = vld [vmem:[#allocation2 + $0x88] sm:$0xf] }
 0x590   : > { %v9844_v25 = vor.u32 %v9843_v38, %v9840_v18  ;;  %v9826_v48 = vsel %vm14977_vm2, %v9821_v29, %v18854_v37  ;;  %v14370_v29 = vld [vmem:[#allocation3 + $0x220] sm:$0xff]  }
 0x592   : > { %13595 = vmatmul.mubr.bf16.gmra.mrb[44].mxu0 %v14364_v7  ;;  %v19726_v7 = vld [vmem:[#allocation77_spill] sm:$0xff] }
 0x593   : > { %13614 = vmatprep.mubr.bf16.mxu0 %v12176_v53  ;;  %v9764_v53 = vsel %vm14977_vm2, %v9759_v62, %v9763_v42  ;;  %v9833_v34 = vshll.u32 %v19726_v7, 16  ;;  %v9811_v42 = vrot.slane %v9809_v52, 5  ;;  %v19727_v62 = vld [vmem:[#allocation82_spill] sm:$0xff]  ;;  %v9889_v52 = vshll.u32 %v9669_v0, 16 }
 0x594   : > { %v12178_v14 = vcombine.low %v9754_v17, %v9764_v53  ;;  %v9871_v47 = vshll.u32 %v19727_v62, 16  ;;  %v9875_v41 = vshrl.u32 %v19727_v62, 16  ;;  %v9895_v7 = vshll.u32 %v14687_v27, 16 }
 0x595   : > { %v9835_v10 = vrot.slane %v9833_v34, 5  ;;  %v9812_v20 = vsel %vm14977_vm2, %v9807_v9, %v9811_v42  ;;  %v9899_v34 = vshrl.u32 %v14687_v27, 16  ;;  %v9802_v9 = vsel %vm14977_vm2, %v9797_v4, %v18844_v5 }
 0x596   : > { %v18888_v53 = vrot.slane %v9871_v47, 5  ;;  %v12180_v18 = vcombine.low %v9802_v9, %v9812_v20  ;;  %v9855_v42 = vrot.slane %v9854_v56, 4  ;;  %v9888_v47 = vrot.slane %v9886_v33, 4  ;;  %v14690_v56 = vld [vmem:[#allocation2 + $0x94] sm:$0xf] }
 0x597   : > { %v9836_v57 = vsel %vm14977_vm2, %v9831_v22, %v9835_v10  ;;  %v9845_v22 = vrot.slane %v9844_v25, 4  ;;  %v9868_v5 = vor.u32 %v9867_v1, %v9864_v19  ;;  %v18897_v2 = vrot.slane %v9895_v7, 5  ;;  %v14691_v7 = vld [vmem:[#allocation2 + $0x80] sm:$0x1] }
 0x598   : > { %v12181_v3 = vcombine.low %v9826_v48, %v9836_v57  ;;  %v9901_v37 = vrot.slane %v9899_v34, 4  ;;  %v9919_v4 = vshll.u32 %v14689_v6, 16  ;;  %v9923_v20 = vshrl.u32 %v14689_v6, 16 }
 0x599   : > { %v9934_v57 = vshrl.u32 %v9675_v39, 16  ;;  %v9937_v25 = vshll.u32 %v9675_v39, 16  ;;  %v9869_v19 = vrot.slane %v9868_v5, 4  ;;  %v9905_v34 = vshll.u32 %v14691_v7, 16 }
 0x59a   : > { %13615 = vmatmul.mubr.bf16.vlgmr.msra.gmra.mrb[16].mxu0 %v12177_v8  ;;  %v14686_v8 = vld [vmem:[#allocation2 + $0x68] sm:$0x1]  ;;  %v9902_v27 = vor.u32 %v9901_v37, %v18897_v2  ;;  %v18905_v48 = vrot.slane %v9919_v4, 5 }
 0x59b   : > { %13618 = vmatprep.mubr.bf16.mxu0 %v12178_v14  ;;  %13647 = vmatpush3.bf16.msra.mxu0 %v18800_v15  ;;  %v9857_v17 = vshll.u32 %v14686_v8, 16  ;;  %v9877_v15 = vrot.slane %v9875_v41, 4  ;;  %v9672_v14 = vld [vmem:[#allocation2 + $0x84] sm:$0xf]  ;;  %v9891_v41 = vrot.slane %v9889_v52, 5  ;;  %v9943_v8 = vshll.u32 %v14690_v56, 16 }
 0x59c   : > { %13648 = vmatprep.subr.bf16.mxu0 %v14367_v28  ;;  %v9910_v63 = vshrl.u32 %v9672_v14, 16  ;;  %v9913_v0 = vshll.u32 %v9672_v14, 16  ;;  %v9678_v14 = vld [vmem:[#allocation2 + $0x9c] sm:$0xf]  ;;  %v9903_v5 = vrot.slane %v9902_v27, 4  ;;  %v9907_v6 = vrot.slane %v9905_v34, 5 }
 0x59d   : > { %v9859_v38 = vrot.slane %v9857_v17, 5  ;;  %v9878_v62 = vor.u32 %v9877_v15, %v18888_v53  ;;  %v9947_v17 = vshrl.u32 %v14690_v56, 16  ;;  %v9850_v15 = vsel %vm14977_vm2, %v9845_v22, %v18873_v58  ;;  %v14693_v56 = vld [vmem:[#allocation2 + $0xa0] sm:$0xf] }
 0x59e   : > { %v9892_v52 = vor.u32 %v9891_v41, %v9888_v47  ;;  %v9915_v9 = vrot.slane %v9913_v0, 5  ;;  %v9936_v58 = vrot.slane %v9934_v57, 4  ;;  %v9939_v22 = vrot.slane %v9937_v25, 5  ;;  %v14372_v57 = vld [vmem:[#allocation3 + $0x230] sm:$0xff]  }
 0x59f   : > { %13649 = vmatpush3.bf16.msra.mxu0 %v14367_v28  ;;  %v14688_v28 = vld [vmem:[#allocation2 + $0x74] sm:$0x1]  ;;  %v9860_v33 = vsel %vm14977_vm2, %v9855_v42, %v9859_v38  ;;  %v18907_v39 = vrot.slane %v9943_v8, 5  ;;  %v9949_v38 = vrot.slane %v9947_v17, 4  ;;  %v14371_v42 = vld [vmem:[#allocation3 + $0x228] sm:$0xff]   ;;  %v9958_v37 = vshrl.u32 %v9678_v14, 16 }
 0x5a0   : > { %13650 = vmatprep.subr.bf16.mxu0 %v14368_v23  ;;  %v9881_v10 = vshll.u32 %v14688_v28, 16  ;;  %v9893_v41 = vrot.slane %v9892_v52, 4  ;;  %v9940_v4 = vor.u32 %v9939_v22, %v9936_v58  ;;  %v9967_v8 = vshll.u32 %v14693_v56, 16  ;;  %v14695_v52 = vld [vmem:[#allocation2 + $0xac] sm:$0xf]  ;;  %v14373_v58 = vld [vmem:[#allocation3 + $0x238] sm:$0xff]  }
 0x5a1   : > { %v9971_v17 = vshrl.u32 %v14693_v56, 16  ;;  %v9960_v34 = vrot.slane %v9958_v37, 4 }
 0x5a2   : > { %13619 = vmatmul.mubr.bf16.gmra.mrb[20].mxu0 %v12179_v46  ;;  %v9883_v1 = vrot.slane %v9881_v10, 5  ;;  %v9912_v46 = vrot.slane %v9910_v63, 4  ;;  %v9961_v63 = vshll.u32 %v9678_v14, 16 }
 0x5a3   : > { %13622 = vmatprep.mubr.bf16.mxu0 %v12180_v18  ;;  %13651 = vmatpush3.bf16.msra.mxu0 %v14368_v23  ;;  %v9879_v23 = vrot.slane %v9878_v62, 4  ;;  %v9925_v18 = vrot.slane %v9923_v20, 4  ;;  %v12182_v62 = vcombine.low %v9850_v15, %v9860_v33  ;;  %v9950_v20 = vor.u32 %v9949_v38, %v18907_v39  ;;  %v9681_v15 = vld [vmem:[#allocation2 + $0xa8] sm:$0xf]  ;;  %v14694_v33 = vld [vmem:[#allocation2 + $0x98] sm:$0x1] }
 0x5a4   : > { %13652 = vmatprep.subr.bf16.mxu0 %v14369_v45  ;;  %v9916_v28 = vor.u32 %v9915_v9, %v9912_v46  ;;  %v9963_v46 = vrot.slane %v9961_v63, 5  ;;  %v9985_v14 = vshll.u32 %v9681_v15, 16  ;;  %v14696_v63 = vld [vmem:[#allocation2 + $0xa4] sm:$0x1] }
 0x5a5   : > { %v9884_v47 = vsel %vm14977_vm2, %v9879_v23, %v9883_v1  ;;  %v9926_v10 = vor.u32 %v9925_v18, %v18905_v48  ;;  %v9953_v23 = vshll.u32 %v14694_v33, 16  ;;  %v9995_v1 = vshrl.u32 %v14695_v52, 16 }
 0x5a6   : > { %v9917_v27 = vrot.slane %v9916_v28, 4  ;;  %v9951_v9 = vrot.slane %v9950_v20, 4  ;;  %v9982_v18 = vshrl.u32 %v9681_v15, 16  ;;  %v9684_v28 = vld [vmem:[#allocation2 + $0xb4] sm:$0xf]  ;;  %v9964_v37 = vor.u32 %v9963_v46, %v9960_v34 }
 0x5a7   : > { %13653 = vmatpush3.bf16.msra.mxu0 %v14369_v45  ;;  %v9874_v45 = vsel %vm14977_vm2, %v9869_v19, %v18888_v53  ;;  %v14692_v53 = vld [vmem:[#allocation2 + $0x8c] sm:$0x1]  ;;  %v9991_v19 = vshll.u32 %v14695_v52, 16  ;;  %v9927_v7 = vrot.slane %v9926_v10, 4 }
 0x5a8   : > { %13654 = vmatprep.subr.bf16.mxu0 %v14370_v29  ;;  %v12183_v0 = vcombine.low %v9874_v45, %v9884_v47  ;;  %v9929_v25 = vshll.u32 %v14692_v53, 16  ;;  %v9973_v47 = vrot.slane %v9971_v17, 4  ;;  %v9984_v20 = vrot.slane %v9982_v18, 4  ;;  %v9687_v17 = vld [vmem:[#allocation2 + $0xc0] sm:$0xf] }
 0x5a9   : > { %v18923_v45 = vrot.slane %v9991_v19, 5  ;;  %v9965_v19 = vrot.slane %v9964_v37, 4  ;;  %v10030_v46 = vshrl.u32 %v9687_v17, 16  ;;  %v10067_v37 = vshrl.u32 %v18832_v43, 16 }
 0x5aa   : > { %13623 = vmatmul.mubr.bf16.gmra.mrb[24].mxu0 %v12181_v3  ;;  %v9898_v3 = vsel %vm14977_vm2, %v9893_v41, %v18897_v2  ;;  %v9941_v2 = vrot.slane %v9940_v4, 4  ;;  %v9931_v38 = vrot.slane %v9929_v25, 5  ;;  %v9955_v41 = vrot.slane %v9953_v23, 5  ;;  %v14697_v25 = vld [vmem:[#allocation2 + $0xb8] sm:$0xf] }
 0x5ab   : > { %13626 = vmatprep.mubr.bf16.mxu0 %v12182_v62  ;;  %13655 = vmatpush3.bf16.msra.mxu0 %v14370_v29  ;;  %v9908_v29 = vsel %vm14977_vm2, %v9903_v5, %v9907_v6  ;;  %v18921_v62 = vrot.slane %v9967_v8, 5  ;;  %v9997_v5 = vrot.slane %v9995_v1, 4  ;;  %v9977_v6 = vshll.u32 %v14696_v63, 16 }
 0x5ac   : > { %13656 = vmatprep.subr.bf16.mxu0 %v14371_v42  ;;  %v12184_v22 = vcombine.low %v9898_v3, %v9908_v29  ;;  %v9932_v10 = vsel %vm14977_vm2, %v9927_v7, %v9931_v38  ;;  %v9956_v4 = vsel %vm14977_vm2, %v9951_v9, %v9955_v41  ;;  %v9987_v3 = vrot.slane %v9985_v14, 5  ;;  %v14698_v29 = vld [vmem:[#allocation2 + $0xc4] sm:$0xf]  ;;  %v14699_v7 = vld [vmem:[#allocation2 + $0xb0] sm:$0x1] }
 0x5ad   : > { %v9974_v53 = vor.u32 %v9973_v47, %v18921_v62  ;;  %v10015_v56 = vshll.u32 %v14697_v25, 16  ;;  %v10019_v8 = vshrl.u32 %v14697_v25, 16  ;;  %v9998_v15 = vor.u32 %v9997_v5, %v18923_v45  ;;  %v9690_v9 = vld [vmem:[#allocation2 + $0xcc] sm:$0xf] }
 0x5ae   : > { %v10039_v33 = vshll.u32 %v14698_v29, 16  ;;  %v10043_v23 = vshrl.u32 %v14698_v29, 16  ;;  %v9979_v1 = vrot.slane %v9977_v6, 5  ;;  %v10001_v34 = vshll.u32 %v14699_v7, 16 }
 0x5af   : > { %13657 = vmatpush3.bf16.msra.mxu0 %v14371_v42  ;;  %v9922_v42 = vsel %vm14977_vm2, %v9917_v27, %v18905_v48  ;;  %v10006_v48 = vshrl.u32 %v9684_v28, 16  ;;  %v9988_v27 = vor.u32 %v9987_v3, %v9984_v20  ;;  %v9975_v18 = vrot.slane %v9974_v53, 4 }
 0x5b0   : > { %13658 = vmatprep.subr.bf16.mxu0 %v14372_v57  ;;  %v10021_v38 = vrot.slane %v10019_v8, 4  ;;  %v9999_v47 = vrot.slane %v9998_v15, 4  ;;  %v10041_v5 = vrot.slane %v10039_v33, 5  ;;  %v10003_v6 = vrot.slane %v10001_v34, 5 }
 0x5b1   : > { %v10008_v14 = vrot.slane %v10006_v48, 4  ;;  %v9989_v63 = vrot.slane %v9988_v27, 4  ;;  %v9970_v20 = vsel %vm14977_vm2, %v9965_v19, %v18921_v62  ;;  %v9980_v3 = vsel %vm14977_vm2, %v9975_v18, %v9979_v1 }
 0x5b2   : > { %13627 = vmatmul.mubr.bf16.gmra.mrb[28].mxu0 %v12183_v0  ;;  %v9946_v0 = vsel %vm14977_vm2, %v9941_v2, %v18907_v39  ;;  %v12185_v39 = vcombine.low %v9922_v42, %v9932_v10  ;;  %v10033_v2 = vshll.u32 %v9687_v17, 16  ;;  %v10054_v42 = vshrl.u32 %v9690_v9, 16 }
 0x5b3   : > { %13630 = vmatprep.mubr.bf16.mxu0 %v12184_v22  ;;  %13659 = vmatpush3.bf16.msra.mxu0 %v14372_v57  ;;  %v10009_v57 = vshll.u32 %v9684_v28, 16  ;;  %v12186_v52 = vcombine.low %v9946_v0, %v9956_v4  ;;  %v10017_v22 = vrot.slane %v10015_v56, 5  ;;  %v10045_v28 = vrot.slane %v10043_v23, 4  ;;  %v14700_v56 = vld [vmem:[#allocation2 + $0xbc] sm:$0x1] }
 0x5b4   : > { %13660 = vmatprep.subr.bf16.mxu0 %v14373_v58  ;;  %v10057_v10 = vshll.u32 %v9690_v9, 16  ;;  %v10032_v0 = vrot.slane %v10030_v46, 4  ;;  %v10035_v4 = vrot.slane %v10033_v2, 5  ;;  %v10004_v48 = vsel %vm14977_vm2, %v9999_v47, %v10003_v6 }
 0x5b5   : > { %v10011_v41 = vrot.slane %v10009_v57, 5  ;;  %v10022_v53 = vor.u32 %v10021_v38, %v10017_v22  ;;  %v10025_v8 = vshll.u32 %v14700_v56, 16  ;;  %v10046_v17 = vor.u32 %v10045_v28, %v10041_v5  ;;  %v19737_v56 = vld [vmem:[#allocation81_spill] sm:$0xff] }
 0x5b6   : > { %v10059_v15 = vrot.slane %v10057_v10, 5  ;;  %v10069_v29 = vrot.slane %v10067_v37, 4  ;;  %v12187_v33 = vcombine.low %v9970_v20, %v9980_v3  ;;  %v9994_v62 = vsel %vm14977_vm2, %v9989_v63, %v18923_v45  ;;  %v19731_v20 = vld [vmem:[#allocation74_spill] sm:$0xff]  ;;  %v19732_v3 = vld [vmem:[#allocation75_spill] sm:$0xff] }
 0x5b7   : > { %13661 = vmatpush3.bf16.msra.mxu0 %v14373_v58  ;;  %v10063_v58 = vshll.u32 %v18832_v43, 16  ;;  %v10012_v25 = vor.u32 %v10011_v41, %v10008_v14  ;;  %v10056_v43 = vrot.slane %v10054_v42, 4  ;;  %v10036_v23 = vor.u32 %v10035_v4, %v10032_v0  ;;  %v19728_v0 = vld [vmem:[#allocation71_spill] sm:$0xff] }
 0x5b8   : > { %v12188_v19 = vcombine.low %v9994_v62, %v10004_v48  ;;  %v10023_v1 = vrot.slane %v10022_v53, 4  ;;  %v10027_v27 = vrot.slane %v10025_v8, 5  ;;  %v10047_v7 = vrot.slane %v10046_v17, 4  ;;  %v19735_v48 = vld [vmem:[#allocation80_spill] sm:$0xff]  ;;  %v19738_v8 = vld [vmem:[#allocation83_spill] sm:$0xff] }
 0x5b9   : > { %v10065_v57 = vrot.slane %v10063_v58, 5  ;;  %v10013_v34 = vrot.slane %v10012_v25, 4  ;;  %v10060_v46 = vor.u32 %v10059_v15, %v10056_v43  ;;  %v10073_v9 = vshll.u32 %v18834_v44, 16  ;;  %v19742_v15 = vld [vmem:[#allocation85_spill] sm:$0xff]  ;;  %v19746_v62 = vld [vmem:[#allocation87_spill] sm:$0xff] }
 0x5ba   : > { %13631 = vmatmul.mubr.bf16.gmra.mrb[32].mxu0 %v12185_v39  ;;  %v14701_v39 = vld [vmem:[#allocation2 + $0xc8] sm:$0x1]  ;;  %v10037_v18 = vrot.slane %v10036_v23, 4  ;;  %v10028_v38 = vsel %vm14977_vm2, %v10023_v1, %v10027_v27  ;;  %v19733_v53 = vcombine.low %v19731_v20, %v19732_v3  ;;  %v19739_v17 = vcombine.low %v19737_v56, %v19738_v8  ;;  %v19747_v23 = vld [vmem:[#allocation88_spill] sm:$0xff]  ;;  %v19066_v8 = vld [vmem:[%s19326_s6] ss:$0 sm:$0xff] }
 0x5bb   : > { %13634 = vmatprep.mubr.bf16.mxu0 %v12186_v52  ;;  %v10049_v52 = vshll.u32 %v14701_v39, 16  ;;  %v10070_v2 = vor.u32 %v10069_v29, %v10065_v57  ;;  %v10018_v47 = vsel %vm14977_vm2, %v10013_v34, %v10017_v22  ;;  %v10061_v41 = vrot.slane %v10060_v46, 4  ;;  %v19729_v22 = vld [vmem:[#allocation72_spill] sm:$0xff]  ;;  %v19744_v29 = vld [vmem:[#allocation86_spill] sm:$0xff]  ;;  %v19752_v27 = vld [vmem:[#allocation91_spill] sm:$0xff] }
 0x5bc   : > { %v10075_v42 = vrot.slane %v10073_v9, 5  ;;  %v12189_v10 = vcombine.low %v10018_v47, %v10028_v38  ;;  %v10042_v58 = vsel %vm14977_vm2, %v10037_v18, %v10041_v5  ;;  %v19730_v4 = vcombine.low %v19728_v0, %v19729_v22  ;;  %v19734_v5 = vld [vmem:[#allocation78_spill] sm:$0xff] }
 0x5bd   : > { %v10051_v14 = vrot.slane %v10049_v52, 5  ;;  %v10071_v28 = vrot.slane %v10070_v2, 4  ;;  %v10066_v44 = vsel %vm14977_vm2, %v10061_v41, %v10065_v57  ;;  %v19736_v25 = vcombine.low %v19734_v5, %v19735_v48  ;;  %v19749_v52 = vld [vmem:[#allocation89_spill] sm:$0xff] }
 0x5be   : > { %v19741_v43 = vcombine.low %v18536_v50, %v19740_v32  ;;  %v19743_v57 = vcombine.low %v18545_v26, %v19742_v15  ;;  %v19748_v39 = vcombine.low %v19746_v62, %v19747_v23  ;;  %v19753_v50 = vcombine.low %v18589_v35, %v19752_v27  ;;  %v19756_v23 = vld [vmem:[#allocation16_spill] sm:$0xff] }
 0x5bf   : > { %v10052_v45 = vsel %vm14977_vm2, %v10047_v7, %v10051_v14  ;;  %v10076_v63 = vsel %vm14977_vm2, %v10071_v28, %v10075_v42  ;;  %v19754_v7 = vld [vmem:[#allocation92_spill] sm:$0xff] }
 0x5c0   : > { %v12190_v37 = vcombine.low %v10042_v58, %v10052_v45  ;;  %v12191_v6 = vcombine.low %v10066_v44, %v10076_v63  ;;  %v19755_v26 = vcombine.low %v18605_v51, %v19754_v7 }
 0x5c2   : > { %13635 = vmatmul.mubr.bf16.gmra.mrb[36].mxu0 %v12187_v33  ;;  %v19745_v33 = vcombine.low %v18558_v59, %v19744_v29  ;;  %v19013_v59 = vld [vmem:[%s19325_s5] ss:$0 sm:$0xff] }
 0x5c3   : > { %13638 = vmatprep.mubr.bf16.mxu0 %v12188_v19  ;;  %v19750_v19 = vld [vmem:[#allocation90_spill] sm:$0xff] }
 0x5c4   : > { %v19751_v1 = vcombine.low %v19749_v52, %v19750_v19 }
 0x5ca   : > { %13639 = vmatmul.mubr.bf16.gmra.mrb[40].mxu0 %v12189_v10 }
 0x5cb   : > { %13642 = vmatprep.mubr.bf16.mxu0 %v12190_v37 }
 0x5d2   : > { %13643 = vmatmul.mubr.bf16.gmra.mrb[44].mxu0 %v12191_v6 }
 0x5d3   : > { %13662 = vmatprep.mubr.bf16.mxu0 %v19730_v4 }
 0x5da   : > { %13663 = vmatmul.mubr.bf16.vlgmr.msra.gmra.mrb[16].mxu0 %v19733_v53 }
 0x5db   : > { %13666 = vmatprep.mubr.bf16.mxu0 %v19736_v25 }
 0x5e2   : > { %13667 = vmatmul.mubr.bf16.gmra.mrb[20].mxu0 %v19739_v17 }
 0x5e3   : > { %13670 = vmatprep.mubr.bf16.mxu0 %v19741_v43 }
 0x5ea   : > { %13671 = vmatmul.mubr.bf16.gmra.mrb[24].mxu0 %v19743_v57 }
 0x5eb   : > { %13674 = vmatprep.mubr.bf16.mxu0 %v19745_v33 }
 0x5f2   : > { %13675 = vmatmul.mubr.bf16.gmra.mrb[28].mxu0 %v19748_v39  ;;  %v3000_v39 = vadd.f32 %v19066_v8, %v19756_v23 }
 0x5f3   : > { %13678 = vmatprep.mubr.bf16.mxu0 %v19751_v1 }
 0x5fa   : > { %13679 = vmatmul.mubr.bf16.gmra.mrb[32].mxu0 %v19753_v50 }
 0x5fb   : > { %13682 = vmatprep.mubr.bf16.mxu0 %v19755_v26 }
 0x602   : > { %13683 = vmatmul.mubr.bf16.gmra.mrb[36].mxu0 %v12227_v36 }
 0x603   : > { %13686 = vmatprep.mubr.bf16.mxu0 %v12228_v12 }
 0x60a   : > { %13687 = vmatmul.mubr.bf16.gmra.mrb[40].mxu0 %v12229_v16 }
 0x60b   : > { %13690 = vmatprep.mubr.bf16.mxu0 %v12230_v24 }
 0x612   : > { %13691 = vmatmul.mubr.bf16.gmra.mrb[44].mxu0 %v12231_v31 }
 0x6ad   : > { %v13664_v35 = vpop.f32.mrb[16].mxu0 }
 0x6ae   : > { %v19016_v51 = vadd.f32 %v13664_v35, %v19013_v59  ;;  %v10736_v60 = vpop.f32.mrb[17].mxu0 }
 0x6af   : > { %v19019_v55 = vadd.f32 %v19013_v59, %v10736_v60  ;;  %v13665_v36 = vpop.f32.mrb[18].mxu0  ;;  %v19757_v60 = vld [vmem:[#allocation27_spill] sm:$0xff] }
 0x6b0   : > { %v12243_v11 = vmul.f32 -1.442695, %v19016_v51  ;;  %v19023_v61 = vadd.f32 %v13665_v36, %v19013_v59  ;;  %v10739_v13 = vpop.f32.mrb[19].mxu0  ;;  %v3001_v36 = vadd.f32 %v19066_v8, %v19757_v60  ;;  %v19763_v60 = vld [vmem:[#allocation39_spill] sm:$0xff] }
 0x6b1   : > { %v12241_v12 = vmul.f32 -1.442695, %v19019_v55  ;;  %v19027_v30 = vadd.f32 %v19013_v59, %v10739_v13 }
 0x6b2   : > { %14502 = vpow2.f32 %v12243_v11  ;;  %v12244_v16 = vmul.f32 -1.442695, %v19023_v61 }
 0x6b3   : > { %14504 = vpow2.f32 %v12241_v12  ;;  %v12242_v21 = vmul.f32 -1.442695, %v19027_v30 }
 0x6b4   : > { %14506 = vpow2.f32 %v12244_v16  ;;  %v19758_v16 = vld [vmem:[#allocation10_spill] sm:$0xff] }
 0x6b5   : > { %14508 = vpow2.f32 %v12242_v21  ;;  %v13668_v40 = vpop.f32.mrb[20].mxu0  ;;  %v3002_v21 = vadd.f32 %v19066_v8, %v19758_v16 }
 0x6b6   : > { %v19032_v24 = vadd.f32 %v13668_v40, %v19013_v59  ;;  %v10752_v49 = vpop.f32.mrb[21].mxu0 }
 0x6b7   : > { %v19035_v54 = vadd.f32 %v19013_v59, %v10752_v49  ;;  %v13669_v31 = vpop.f32.mrb[22].mxu0 }
 0x6b8   : > { %v12247_v34 = vmul.f32 -1.442695, %v19032_v24  ;;  %v19039_v46 = vadd.f32 %v13669_v31, %v19013_v59  ;;  %v10755_v2 = vpop.f32.mrb[23].mxu0 }
 0x6b9   : > { %v12245_v9 = vmul.f32 -1.442695, %v19035_v54  ;;  %v19043_v18 = vadd.f32 %v19013_v59, %v10755_v2 }
 0x6ba   : > { %14510 = vpow2.f32 %v12247_v34  ;;  %v12248_v14 = vmul.f32 -1.442695, %v19039_v46  ;;  %v19759_v34 = vld [vmem:[#allocation29_spill] sm:$0xff] }
 0x6bb   : > { %14512 = vpow2.f32 %v12245_v9  ;;  %v12246_v38 = vmul.f32 -1.442695, %v19043_v18  ;;  %v3003_v2 = vadd.f32 %v19066_v8, %v19759_v34 }
 0x6bc   : > { %v14503_v45 = vpop.eup %14502  ;;  %14514 = vpow2.f32 %v12248_v14 }
 0x6bd   : > { %v14505_v47 = vpop.eup %14504  ;;  %v11032_v41 = vadd.f32 1.0, %v14503_v45  ;;  %14516 = vpow2.f32 %v12246_v38  ;;  %v13672_v28 = vpop.f32.mrb[24].mxu0  ;;  %v19760_v45 = vld [vmem:[#allocation31_spill] sm:$0xff] }
 0x6be   : > { %v14507_v42 = vpop.eup %14506  ;;  %v11030_v10 = vadd.f32 1.0, %v14505_v47  ;;  %v19048_v58 = vadd.f32 %v13672_v28, %v19013_v59  ;;  %v10768_v37 = vpop.f32.mrb[25].mxu0  ;;  %v3004_v47 = vadd.f32 %v19066_v8, %v19760_v45 }
 0x6bf   : > { %v14509_v44 = vpop.eup %14508  ;;  %14518 = vrcp.f32 %v11032_v41  ;;  %v11033_v63 = vadd.f32 1.0, %v14507_v42  ;;  %v19051_v6 = vadd.f32 %v19013_v59, %v10768_v37  ;;  %v13673_v0 = vpop.f32.mrb[26].mxu0  ;;  %v19761_v42 = vld [vmem:[#allocation33_spill] sm:$0xff] }
 0x6c0   : > { %14520 = vrcp.f32 %v11030_v10  ;;  %v11031_v22 = vadd.f32 1.0, %v14509_v44  ;;  %v12251_v4 = vmul.f32 -1.442695, %v19048_v58  ;;  %v19055_v20 = vadd.f32 %v13673_v0, %v19013_v59  ;;  %v10771_v3 = vpop.f32.mrb[27].mxu0 }
 0x6c1   : > { %14522 = vrcp.f32 %v11033_v63  ;;  %v12249_v53 = vmul.f32 -1.442695, %v19051_v6  ;;  %v19059_v5 = vadd.f32 %v19013_v59, %v10771_v3  ;;  %v3005_v10 = vadd.f32 %v19066_v8, %v19761_v42 }
 0x6c2   : > { %14524 = vrcp.f32 %v11031_v22  ;;  %v12252_v48 = vmul.f32 -1.442695, %v19055_v20 }
 0x6c3   : > { %14526 = vpow2.f32 %v12251_v4  ;;  %v12250_v25 = vmul.f32 -1.442695, %v19059_v5 }
 0x6c4   : > { %v14511_v56 = vpop.eup %14510  ;;  %14528 = vpow2.f32 %v12249_v53 }
 0x6c5   : > { %v14513_v17 = vpop.eup %14512  ;;  %v11036_v32 = vadd.f32 1.0, %v14511_v56  ;;  %14530 = vpow2.f32 %v12252_v48  ;;  %v13676_v43 = vpop.f32.mrb[28].mxu0 }
 0x6c6   : > { %v14515_v15 = vpop.eup %14514  ;;  %v11034_v57 = vadd.f32 1.0, %v14513_v17  ;;  %14532 = vpow2.f32 %v12250_v25  ;;  %v19069_v29 = vadd.f32 %v13676_v43, %v19013_v59  ;;  %v10784_v33 = vpop.f32.mrb[29].mxu0 }
 0x6c7   : > { %v14517_v62 = vpop.eup %14516  ;;  %14534 = vrcp.f32 %v11036_v32  ;;  %v11037_v52 = vadd.f32 1.0, %v14515_v15  ;;  %v19074_v19 = vadd.f32 %v19013_v59, %v10784_v33  ;;  %v13677_v1 = vpop.f32.mrb[30].mxu0 }
 0x6c8   : > { %14536 = vrcp.f32 %v11034_v57  ;;  %v11035_v27 = vadd.f32 1.0, %v14517_v62  ;;  %v12255_v50 = vmul.f32 -1.442695, %v19069_v29  ;;  %v19078_v7 = vadd.f32 %v13677_v1, %v19013_v59  ;;  %v10787_v26 = vpop.f32.mrb[31].mxu0 }
 0x6c9   : > { %v14519_v35 = vpop.eup %14518  ;;  %14538 = vrcp.f32 %v11037_v52  ;;  %v12253_v11 = vmul.f32 -1.442695, %v19074_v19  ;;  %v19085_v13 = vadd.f32 %v19013_v59, %v10787_v26 }
 0x6ca   : > { %v14521_v12 = vpop.eup %14520  ;;  %v11128_v40 = vmul.f32 %v14519_v35, %v19016_v51  ;;  %14540 = vrcp.f32 %v11035_v27  ;;  %v12256_v49 = vmul.f32 -1.442695, %v19078_v7 }
 0x6cb   : > { %v14523_v31 = vpop.eup %14522  ;;  %v11126_v9 = vmul.f32 %v14521_v12, %v19019_v55  ;;  %14542 = vpow2.f32 %v12255_v50  ;;  %v12254_v14 = vmul.f32 -1.442695, %v19085_v13 }
 0x6cc   : > { %v14525_v38 = vpop.eup %14524  ;;  %v11160_v41 = vadd.f32 %v11128_v40, %v3002_v21  ;;  %v11129_v51 = vmul.f32 %v14523_v31, %v19023_v61  ;;  %14544 = vpow2.f32 %v12253_v11  ;;  %v19762_v61 = vld [vmem:[#allocation36_spill] sm:$0xff]  ;;  %v19764_v11 = vld [vmem:[#allocation42_spill] sm:$0xff] }
 0x6cd   : > { %v14527_v28 = vpop.eup %14526  ;;  %v11158_v37 = vadd.f32 %v11126_v9, %v3000_v39  ;;  %v11127_v55 = vmul.f32 %v14525_v38, %v19027_v30  ;;  %14546 = vpow2.f32 %v12256_v49  ;;  %v13680_v44 = vpop.f32.mrb[32].mxu0  ;;  %v3006_v48 = vadd.f32 %v19066_v8, %v19762_v61  ;;  %v19765_v61 = vld [vmem:[#allocation43_spill] sm:$0xff] }
 0x6ce   : > { %v14529_v63 = vpop.eup %14528  ;;  %v11161_v0 = vadd.f32 %v11129_v51, %v3003_v2  ;;  %v11040_v22 = vadd.f32 1.0, %v14527_v28  ;;  %14548 = vpow2.f32 %v12254_v14  ;;  %v19106_v4 = vadd.f32 %v13680_v44, %v19013_v59  ;;  %v10800_v3 = vpop.f32.mrb[33].mxu0 }
 0x6cf   : > { %v14531_v53 = vpop.eup %14530  ;;  %v11159_v25 = vadd.f32 %v11127_v55, %v3001_v36  ;;  %v11038_v56 = vadd.f32 1.0, %v14529_v63  ;;  %v19111_v17 = vadd.f32 %v19013_v59, %v10800_v3  ;;  %v13681_v30 = vpop.f32.mrb[34].mxu0  ;;  %v3007_v36 = vadd.f32 %v19066_v8, %v19763_v60 }
 0x6d0   : > { %v14533_v32 = vpop.eup %14532  ;;  %v12383_v43 = vpack.c.bf16 %v11161_v0, %v11160_v41  ;;  %14550 = vrcp.f32 %v11040_v22  ;;  %v11041_v15 = vadd.f32 1.0, %v14531_v53  ;;  %v12259_v57 = vmul.f32 -1.442695, %v19106_v4  ;;  %v10803_v33 = vpop.f32.mrb[35].mxu0 }
 0x6d1   : > { %v14535_v62 = vpop.eup %14534  ;;  %v12378_v23 = vpack.c.bf16 %v11159_v25, %v11158_v37  ;;  %14552 = vrcp.f32 %v11038_v56  ;;  %v11039_v39 = vadd.f32 1.0, %v14533_v32  ;;  %v12257_v52 = vmul.f32 -1.442695, %v19111_v17  ;;  %v19766_v32 = vld [vmem:[#allocation44_spill] sm:$0xff] }
 0x6d2   : > { %v14537_v1 = vpop.eup %14536  ;;  %12455 = vst [vmem:[%s19116_s17 + $0x8] sm:$0xff] %v12383_v43   ;;  %v11132_v27 = vmul.f32 %v14535_v62, %v19032_v24  ;;  %14554 = vrcp.f32 %v11041_v15  ;;  %v19121_v50 = vadd.f32 %v13681_v30, %v19013_v59  ;;  %v19124_v26 = vadd.f32 %v19013_v59, %v10803_v33  ;;  %v19767_v15 = vld [vmem:[#allocation45_spill] sm:$0xff] }
 0x6d3   : > { %v14539_v35 = vpop.eup %14538  ;;  %v3008_v12 = vadd.f32 %v19066_v8, %v19764_v11  ;;  %12379 = vst [vmem:[%s19116_s17] sm:$0xff] %v12378_v23   ;;  %v11130_v16 = vmul.f32 %v14537_v1, %v19035_v54  ;;  %14556 = vrcp.f32 %v11039_v39  ;;  %v3010_v43 = vadd.f32 %v19066_v8, %v19766_v32 }
 0x6d4   : > { %v14541_v21 = vpop.eup %14540  ;;  %v11164_v24 = vadd.f32 %v11132_v27, %v3006_v48  ;;  %v11133_v40 = vmul.f32 %v14539_v35, %v19039_v46  ;;  %14558 = vpow2.f32 %v12259_v57  ;;  %v12260_v49 = vmul.f32 -1.442695, %v19121_v50  ;;  %v19768_v27 = vld [vmem:[#allocation46_spill] sm:$0xff] }
 0x6d5   : > { %v14543_v31 = vpop.eup %14542  ;;  %v11162_v34 = vadd.f32 %v11130_v16, %v3004_v47  ;;  %v11131_v2 = vmul.f32 %v14541_v21, %v19043_v18  ;;  %14560 = vpow2.f32 %v12257_v52  ;;  %v12258_v9 = vmul.f32 -1.442695, %v19124_v26  ;;  %v13684_v14 = vpop.f32.mrb[36].mxu0 }
 0x6d6   : > { %v14545_v38 = vpop.eup %14544  ;;  %v11165_v45 = vadd.f32 %v11133_v40, %v3007_v36  ;;  %v11044_v41 = vadd.f32 1.0, %v14543_v31  ;;  %14562 = vpow2.f32 %v12260_v49  ;;  %v19137_v54 = vadd.f32 %v13684_v14, %v19013_v59  ;;  %v10816_v51 = vpop.f32.mrb[37].mxu0 }
 0x6d7   : > { %v14547_v46 = vpop.eup %14546  ;;  %v11163_v28 = vadd.f32 %v11131_v2, %v3005_v10  ;;  %v11042_v42 = vadd.f32 1.0, %v14545_v38  ;;  %14564 = vpow2.f32 %v12258_v9  ;;  %v19140_v47 = vadd.f32 %v19013_v59, %v10816_v51  ;;  %v13685_v18 = vpop.f32.mrb[38].mxu0  ;;  %v19769_v9 = vld [vmem:[#allocation48_spill] sm:$0xff] }
 0x6d8   : > { %v14549_v37 = vpop.eup %14548  ;;  %v12393_v55 = vpack.c.bf16 %v11165_v45, %v11164_v24  ;;  %14566 = vrcp.f32 %v11044_v41  ;;  %v11045_v44 = vadd.f32 1.0, %v14547_v46  ;;  %v12263_v63 = vmul.f32 -1.442695, %v19137_v54  ;;  %v10819_v0 = vpop.f32.mrb[39].mxu0 }
 0x6d9   : > { %v12388_v22 = vpack.c.bf16 %v11163_v28, %v11162_v34  ;;  %14568 = vrcp.f32 %v11042_v42  ;;  %v11043_v3 = vadd.f32 1.0, %v14549_v37  ;;  %v12261_v10 = vmul.f32 -1.442695, %v19140_v47 }
 0x6da   : > { %v14551_v53 = vpop.eup %14550  ;;  %v3009_v48 = vadd.f32 %v19066_v8, %v19765_v61  ;;  %12457 = vst [vmem:[%s19116_s17 + $0x18] sm:$0xff] %v12393_v55   ;;  %14570 = vrcp.f32 %v11045_v44  ;;  %v19148_v25 = vadd.f32 %v13685_v18, %v19013_v59  ;;  %v19151_v56 = vadd.f32 %v19013_v59, %v10819_v0  ;;  %v19771_v61 = vld [vmem:[#allocation49_spill] sm:$0xff] }
 0x6db   : > { %v14553_v30 = vpop.eup %14552  ;;  %v3011_v57 = vadd.f32 %v19066_v8, %v19767_v15  ;;  %12456 = vst [vmem:[%s19116_s17 + $0x10] sm:$0xff] %v12388_v22   ;;  %v11136_v33 = vmul.f32 %v14551_v53, %v19048_v58  ;;  %14572 = vrcp.f32 %v11043_v3  ;;  %v3012_v35 = vadd.f32 %v19066_v8, %v19768_v27 }
 0x6dc   : > { %v14555_v62 = vpop.eup %14554  ;;  %v11134_v23 = vmul.f32 %v14553_v30, %v19051_v6  ;;  %14574 = vpow2.f32 %v12263_v63  ;;  %v12264_v39 = vmul.f32 -1.442695, %v19148_v25  ;;  %v12262_v52 = vmul.f32 -1.442695, %v19151_v56 }
 0x6dd   : > { %v14557_v1 = vpop.eup %14556  ;;  %v11168_v60 = vadd.f32 %v11136_v33, %v3010_v43  ;;  %v11137_v36 = vmul.f32 %v14555_v62, %v19055_v20  ;;  %14576 = vpow2.f32 %v12261_v10  ;;  %v13688_v11 = vpop.f32.mrb[40].mxu0  ;;  %v3014_v14 = vadd.f32 %v19066_v8, %v19769_v9  ;;  %v19770_v10 = vld [vmem:[#allocation47_spill] sm:$0xff] }
 0x6de   : > { %v14559_v16 = vpop.eup %14558  ;;  %v11166_v58 = vadd.f32 %v11134_v23, %v3008_v12  ;;  %v11135_v21 = vmul.f32 %v14557_v1, %v19059_v5  ;;  %14578 = vpow2.f32 %v12264_v39  ;;  %v19167_v6 = vadd.f32 %v13688_v11, %v19013_v59  ;;  %v10832_v24 = vpop.f32.mrb[41].mxu0 }
 0x6df   : > { %v14561_v40 = vpop.eup %14560  ;;  %v11169_v49 = vadd.f32 %v11137_v36, %v3011_v57  ;;  %v11048_v31 = vadd.f32 1.0, %v14559_v16  ;;  %14580 = vpow2.f32 %v12262_v52  ;;  %v19170_v34 = vadd.f32 %v19013_v59, %v10832_v24  ;;  %v13689_v2 = vpop.f32.mrb[42].mxu0 }
 0x6e0   : > { %v14563_v20 = vpop.eup %14562  ;;  %v11167_v12 = vadd.f32 %v11135_v21, %v3009_v48  ;;  %v11046_v5 = vadd.f32 1.0, %v14561_v40  ;;  %v19175_v38 = vadd.f32 %v13689_v2, %v19013_v59  ;;  %v10835_v45 = vpop.f32.mrb[43].mxu0  ;;  %v12267_v28 = vmul.f32 -1.442695, %v19167_v6 }
 0x6e1   : > { %v14565_v41 = vpop.eup %14564  ;;  %v12403_v51 = vpack.c.bf16 %v11169_v49, %v11168_v60  ;;  %14582 = vrcp.f32 %v11048_v31  ;;  %v11049_v46 = vadd.f32 1.0, %v14563_v20  ;;  %v12265_v55 = vmul.f32 -1.442695, %v19170_v34 }
 0x6e2   : > { %v14567_v42 = vpop.eup %14566  ;;  %v12398_v18 = vpack.c.bf16 %v11167_v12, %v11166_v58  ;;  %14584 = vrcp.f32 %v11046_v5  ;;  %v11047_v37 = vadd.f32 1.0, %v14565_v41  ;;  %v12268_v0 = vmul.f32 -1.442695, %v19175_v38  ;;  %v19772_v12 = vld [vmem:[#allocation52_spill] sm:$0xff] }
 0x6e3   : > { %v14569_v44 = vpop.eup %14568  ;;  %12459 = vst [vmem:[%s19116_s17 + $0x28] sm:$0xff] %v12403_v51   ;;  %v11140_v63 = vmul.f32 %v14567_v42, %v19069_v29  ;;  %14586 = vrcp.f32 %v11049_v46  ;;  %v19183_v22 = vadd.f32 %v19013_v59, %v10835_v45  ;;  %v3013_v53 = vadd.f32 %v19066_v8, %v19770_v10  ;;  %v19773_v46 = vld [vmem:[#allocation50_spill] sm:$0xff] }
 0x6e4   : > { %v14571_v3 = vpop.eup %14570  ;;  %v3015_v48 = vadd.f32 %v19066_v8, %v19771_v61  ;;  %12458 = vst [vmem:[%s19116_s17 + $0x20] sm:$0xff] %v12398_v18   ;;  %v11138_v30 = vmul.f32 %v14569_v44, %v19074_v19  ;;  %14588 = vrcp.f32 %v11047_v37  ;;  %v3018_v5 = vadd.f32 %v19066_v8, %v19772_v12  ;;  %v19774_v37 = vld [vmem:[#allocation53_spill] sm:$0xff] }
 0x6e5   : > { %v14573_v32 = vpop.eup %14572  ;;  %v11172_v43 = vadd.f32 %v11140_v63, %v3014_v14  ;;  %v11141_v29 = vmul.f32 %v14571_v3, %v19078_v7  ;;  %14590 = vpow2.f32 %v12267_v28  ;;  %v12266_v15 = vmul.f32 -1.442695, %v19183_v22  ;;  %v13692_v57 = vpop.f32.mrb[44].mxu0 }
 0x6e6   : > { %v14575_v33 = vpop.eup %14574  ;;  %v11170_v62 = vadd.f32 %v11138_v30, %v3012_v35  ;;  %v11139_v23 = vmul.f32 %v14573_v32, %v19085_v13  ;;  %14592 = vpow2.f32 %v12265_v55  ;;  %v19195_v39 = vadd.f32 %v13692_v57, %v19013_v59  ;;  %v10848_v52 = vpop.f32.mrb[45].mxu0 }
 0x6e7   : > { %v14577_v1 = vpop.eup %14576  ;;  %v11173_v19 = vadd.f32 %v11141_v29, %v3015_v48  ;;  %v11052_v27 = vadd.f32 1.0, %v14575_v33  ;;  %14594 = vpow2.f32 %v12268_v0  ;;  %v19198_v60 = vadd.f32 %v19013_v59, %v10848_v52  ;;  %v13693_v7 = vpop.f32.mrb[46].mxu0  ;;  %v19775_v0 = vld [vmem:[#allocation51_spill] sm:$0xff] }
 0x6e8   : > { %v14579_v36 = vpop.eup %14578  ;;  %v11171_v11 = vadd.f32 %v11139_v23, %v3013_v53  ;;  %v11050_v16 = vadd.f32 1.0, %v14577_v1  ;;  %14596 = vpow2.f32 %v12266_v15  ;;  %v12271_v13 = vmul.f32 -1.442695, %v19195_v39  ;;  %v10851_v35 = vpop.f32.mrb[47].mxu0 }
 0x6e9   : > { %v14581_v58 = vpop.eup %14580  ;;  %v12413_v21 = vpack.c.bf16 %v11173_v19, %v11172_v43  ;;  %14598 = vrcp.f32 %v11052_v27  ;;  %v11053_v24 = vadd.f32 1.0, %v14579_v36  ;;  %v12269_v40 = vmul.f32 -1.442695, %v19198_v60  ;;  %v19777_v27 = vld [vmem:[#allocation54_spill] sm:$0xff] }
 0x6ea   : > { %v12408_v49 = vpack.c.bf16 %v11171_v11, %v11170_v62  ;;  %14600 = vrcp.f32 %v11050_v16  ;;  %v11051_v31 = vadd.f32 1.0, %v14581_v58  ;;  %v19203_v2 = vadd.f32 %v13693_v7, %v19013_v59  ;;  %v19778_v16 = vld [vmem:[#allocation57_spill] sm:$0xff] }
 0x6eb   : > { %v14583_v20 = vpop.eup %14582  ;;  %12461 = vst [vmem:[%s19116_s17 + $0x38] sm:$0xff] %v12413_v21   ;;  %14602 = vrcp.f32 %v11053_v24  ;;  %v19207_v9 = vadd.f32 %v19013_v59, %v10851_v35  ;;  %v3016_v28 = vadd.f32 %v19066_v8, %v19773_v46  ;;  %v3019_v55 = vadd.f32 %v19066_v8, %v19774_v37  ;;  %v19779_v24 = vld [vmem:[#allocation55_spill] sm:$0xff] }
 0x6ec   : > { %v14585_v14 = vpop.eup %14584  ;;  %12460 = vst [vmem:[%s19116_s17 + $0x30] sm:$0xff] %v12408_v49   ;;  %v11144_v45 = vmul.f32 %v14583_v20, %v19106_v4  ;;  %14604 = vrcp.f32 %v11051_v31  ;;  %v12272_v41 = vmul.f32 -1.442695, %v19203_v2  ;;  %v3017_v3 = vadd.f32 %v19066_v8, %v19775_v0  ;;  %v19782_v0 = vld [vmem:[#allocation34_spill] sm:$0xff] }
 0x6ed   : > { %v14587_v51 = vpop.eup %14586  ;;  %v11142_v42 = vmul.f32 %v14585_v14, %v19111_v17  ;;  %14606 = vpow2.f32 %v12271_v13  ;;  %v12270_v59 = vmul.f32 -1.442695, %v19207_v9  ;;  %v3020_v7 = vadd.f32 %v19066_v8, %v19777_v27 }
 0x6ee   : > { %v14589_v18 = vpop.eup %14588  ;;  %v11176_v44 = vadd.f32 %v11144_v45, %v3018_v5  ;;  %v11145_v63 = vmul.f32 %v14587_v51, %v19121_v50  ;;  %14608 = vpow2.f32 %v12269_v40  ;;  %v3023_v13 = vadd.f32 %v19066_v8, %v19778_v16 }
 0x6ef   : > { %v14591_v4 = vpop.eup %14590  ;;  %v11174_v10 = vadd.f32 %v11142_v42, %v3016_v28  ;;  %v11143_v53 = vmul.f32 %v14589_v18, %v19124_v26  ;;  %14610 = vpow2.f32 %v12272_v41  ;;  %v19776_v26 = vld [vmem:[#allocation56_spill] sm:$0xff] }
 0x6f0   : > { %v14593_v17 = vpop.eup %14592  ;;  %v11177_v61 = vadd.f32 %v11145_v63, %v3019_v55  ;;  %v11056_v48 = vadd.f32 1.0, %v14591_v4  ;;  %14612 = vpow2.f32 %v12270_v59  ;;  %v3022_v52 = vadd.f32 %v19066_v8, %v19776_v26  ;;  %v19780_v59 = vld [vmem:[#allocation40_spill] sm:$0xff]  ;;  %v19781_v55 = vld [vmem:[#allocation58_spill] sm:$0xff] }
 0x6f1   : > { %v14595_v30 = vpop.eup %14594  ;;  %v11175_v32 = vadd.f32 %v11143_v53, %v3017_v3  ;;  %v11054_v43 = vadd.f32 1.0, %v14593_v17  ;;  %v3027_v3 = vadd.f32 %v19066_v8, %v19782_v0  ;;  %v19783_v17 = vld [vmem:[#allocation14_spill] sm:$0xff] }
 0x6f2   : > { %v14597_v29 = vpop.eup %14596  ;;  %v12423_v50 = vpack.c.bf16 %v11177_v61, %v11176_v44  ;;  %14614 = vrcp.f32 %v11056_v48  ;;  %v11057_v15 = vadd.f32 1.0, %v14595_v30  ;;  %v3024_v44 = vadd.f32 %v19066_v8, %v19781_v55 }
 0x6f3   : > { %v14599_v57 = vpop.eup %14598  ;;  %v12418_v33 = vpack.c.bf16 %v11175_v32, %v11174_v10  ;;  %14616 = vrcp.f32 %v11054_v43  ;;  %v11055_v62 = vadd.f32 1.0, %v14597_v29  ;;  %v3025_v61 = vadd.f32 %v19066_v8, %v19783_v17 }
 0x6f4   : > { %v14601_v23 = vpop.eup %14600  ;;  %12463 = vst [vmem:[%s19116_s17 + $0x48] sm:$0xff] %v12423_v50   ;;  %v11148_v1 = vmul.f32 %v14599_v57, %v19137_v54  ;;  %14618 = vrcp.f32 %v11057_v15  ;;  %v3021_v54 = vadd.f32 %v19066_v8, %v19779_v24  ;;  %v19784_v15 = vld [vmem:[#allocation12_spill] sm:$0xff] }
 0x6f5   : > { %v14603_v19 = vpop.eup %14602  ;;  %12462 = vst [vmem:[%s19116_s17 + $0x40] sm:$0xff] %v12418_v33   ;;  %v11146_v36 = vmul.f32 %v14601_v23, %v19140_v47  ;;  %14620 = vrcp.f32 %v11055_v62  ;;  %v3030_v57 = vadd.f32 %v19066_v8, %v19784_v15  ;;  %v19785_v62 = vld [vmem:[#allocation37_spill] sm:$0xff] }
 0x6f6   : > { %v14605_v11 = vpop.eup %14604  ;;  %v11180_v35 = vadd.f32 %v11148_v1, %v3022_v52  ;;  %v11149_v58 = vmul.f32 %v14603_v19, %v19148_v25  ;;  %v3028_v23 = vadd.f32 %v19066_v8, %v19785_v62  ;;  %v19786_v52 = vld [vmem:[#allocation19_spill] sm:$0xff] }
 0x6f7   : > { %v14607_v21 = vpop.eup %14606  ;;  %v11178_v40 = vadd.f32 %v11146_v36, %v3020_v7  ;;  %v11147_v49 = vmul.f32 %v14605_v11, %v19151_v56  ;;  %v3026_v56 = vadd.f32 %v19066_v8, %v19780_v59  ;;  %v3031_v1 = vadd.f32 %v19066_v8, %v19786_v52  ;;  %v19787_v7 = vld [vmem:[#allocation11_spill] sm:$0xff] }
 0x6f8   : > { %v14609_v31 = vpop.eup %14608  ;;  %v11181_v20 = vadd.f32 %v11149_v58, %v3023_v13  ;;  %v11060_v14 = vadd.f32 1.0, %v14607_v21 }
 0x6f9   : > { %v14611_v47 = vpop.eup %14610  ;;  %v11179_v12 = vadd.f32 %v11147_v49, %v3021_v54  ;;  %v11058_v5 = vadd.f32 1.0, %v14609_v31 }
 0x6fa   : > { %v14613_v45 = vpop.eup %14612  ;;  %v12433_v41 = vpack.c.bf16 %v11181_v20, %v11180_v35  ;;  %14622 = vrcp.f32 %v11060_v14  ;;  %v11061_v51 = vadd.f32 1.0, %v14611_v47 }
 0x6fb   : > { %v12428_v25 = vpack.c.bf16 %v11179_v12, %v11178_v40  ;;  %14624 = vrcp.f32 %v11058_v5  ;;  %v11059_v46 = vadd.f32 1.0, %v14613_v45 }
 0x6fc   : > { %v14615_v28 = vpop.eup %14614  ;;  %12465 = vst [vmem:[%s19116_s17 + $0x58] sm:$0xff] %v12433_v41   ;;  %14626 = vrcp.f32 %v11061_v51 }
 0x6fd   : > { %v14617_v42 = vpop.eup %14616  ;;  %12464 = vst [vmem:[%s19116_s17 + $0x50] sm:$0xff] %v12428_v25   ;;  %v11152_v18 = vmul.f32 %v14615_v28, %v19167_v6  ;;  %14628 = vrcp.f32 %v11059_v46 }
 0x6fe   : > { %v14619_v37 = vpop.eup %14618  ;;  %v11150_v63 = vmul.f32 %v14617_v42, %v19170_v34 }
 0x6ff   : > { %v14621_v4 = vpop.eup %14620  ;;  %v11184_v10 = vadd.f32 %v11152_v18, %v3026_v56  ;;  %v11153_v53 = vmul.f32 %v14619_v37, %v19175_v38 }
 0x700   : > { %v11182_v6 = vadd.f32 %v11150_v63, %v3024_v44  ;;  %v11151_v48 = vmul.f32 %v14621_v4, %v19183_v22 }
 0x701   : > { %v11185_v30 = vadd.f32 %v11153_v53, %v3027_v3 }
 0x702   : > { %v11183_v32 = vadd.f32 %v11151_v48, %v3025_v61 }
 0x703   : > { %v12443_v43 = vpack.c.bf16 %v11185_v30, %v11184_v10 }
 0x704   : > { %v14623_v29 = vpop.eup %14622  ;;  %v12438_v50 = vpack.c.bf16 %v11183_v32, %v11182_v6 }
 0x705   : > { %v14625_v34 = vpop.eup %14624  ;;  %12467 = vst [vmem:[%s19116_s17 + $0x68] sm:$0xff] %v12443_v43   ;;  %v11156_v38 = vmul.f32 %v14623_v29, %v19195_v39  ;;  %v3029_v39 = vadd.f32 %v19066_v8, %v19787_v7 }
 0x706   : > { %v14627_v33 = vpop.eup %14626  ;;  %12466 = vst [vmem:[%s19116_s17 + $0x60] sm:$0xff] %v12438_v50   ;;  %v11154_v22 = vmul.f32 %v14625_v34, %v19198_v60 }
 0x707   : > { %v14629_v26 = vpop.eup %14628  ;;  %v11188_v19 = vadd.f32 %v11156_v38, %v3030_v57  ;;  %v11157_v27 = vmul.f32 %v14627_v33, %v19203_v2 }
 0x708   : > { %v11186_v36 = vadd.f32 %v11154_v22, %v3028_v23  ;;  %v11155_v11 = vmul.f32 %v14629_v26, %v19207_v9 }
 0x709   : > { %v11189_v60 = vadd.f32 %v11157_v27, %v3031_v1 }
 0x70a   : > { %v11187_v16 = vadd.f32 %v11155_v11, %v3029_v39 }
 0x70b   : > { %v12453_v13 = vpack.c.bf16 %v11189_v60, %v11188_v19 }
 0x70c   : > { %v12448_v8 = vpack.c.bf16 %v11187_v16, %v11186_v36 }
 0x70d   : > { %12469 = vst [vmem:[%s19116_s17 + $0x78] sm:$0xff] %v12453_v13  }
 0x70e   : > { %12468 = vst [vmem:[%s19116_s17 + $0x70] sm:$0xff] %v12448_v8  }
 0x70f   : > { %14743 = shalt.err (!%p14740_p7)
}
 0x710   : > { %s14744_s23 = scalar_lea.hbm %s19271_s16, 2048  ;;  %s14748_s14 = scalar_lea.hbm %s19327_s7, 4096 }
 0x711   : > { %p14745_p8 = scmp.ne.s32.totalorder %s19271_s16, %s14744_s23  ;;  %p14749_p1 = scmp.lt.u32.totalorder %s19271_s16, %s19327_s7 }
 0x712   : > { %p14750_p0 = scmp.lt.u32.totalorder %s14748_s14, %s14744_s23  ;;  %p14752_p6 = scmp.lt.u32.totalorder %s14744_s23, %s19271_s16 }
 0x713   : > { %p14746_p11 = pnand %p14745_p8, %p19788_p9 }
 0x714   : > { %p14751_p5 = por %p14750_p0, %p14749_p1 }
 0x715   : > { %p14747_p13 = pneg %p14746_p11 }
 0x716   : > { %p14753_p10 = por %p14752_p6, %p14751_p5 }
 0x718   : > { %p14754_p12 = pnand %p14753_p10, %p14747_p13 }
 0x71a   : > { %14757 = shalt.err (!%p14754_p12)
}
 0x71b   : > { %s14803_s20 = smov 64   ;;  %s14804_s8 = smov 4  }
 0x71c   : > { %14067 = dma.vmem_to_hbm [thread:$0]  (%p19788_p9), %s19273_s19, 2048, %s19271_s16, %s19279_s21, %s14803_s20, %s14803_s20, %s14804_s8  }
 0x71d PF: > { %p14079_p2 = scmp.ge.s32.totalorder %s14796_s27, 2  ;;  %s11379_s28 = sand.u32 1, %s14784_s24  }
 0x71e   : > { %p19789_p3 = scmp.ne.s32.totalorder %s19427_s12, 0  ;;  %s11380_s13 = scalar_lea.sflag [#allocation5], %s11379_s28 }
 0x720   : > { %p14074_p4 = pnand %p14079_p2, %p19789_p3 }
 0x722   : > { %14779 = dma.done.wait (!%p14074_p4), %s11380_s13, 2048  }
 0x723   : > { %14781 = vsyncadd (!%p14074_p4), %s11380_s13, 4294965248  ;;  %p18_p7 = scmp.ge.s32.totalorder %s14870_s30, 4   ;;  %s19790_s24 = smov %s14788_s25 }
 0x724   : > { %s19791_s25 = smov %s14792_s26  ;;  %s19792_s26 = smov %s14881_s10 }
 0x725   : > { %s19793_s27 = smov %s14870_s30  ;;  %20 = sbr.rel (!%p18_p7) target bundleno = 4 (0x4), region = 93 }
 0x72c   :  { %11385 = vsyncpa [#allocation4], 1 }
 0x72d   :  { %11387 = vsyncpa [#allocation4 + $0x1], 1 }
 0x72e   :  { %11388 = vsyncpa [#allocation5], 1 }
 0x72f   :  { %11390 = vsyncpa [#allocation5 + $0x1], 1 }

</bundles_post_ra>
